<compile_context>
chip_gen: v5e
topology: v5e:2x2
jax: 0.10.0
libtpu: 0.0.40
codegen_flags: <defaults>
</compile_context>

<pallas_src>
import math

import numpy as np
import jax
import jax.numpy as jnp
from jax.experimental import pallas as pl
from jax.experimental.pallas import tpu as pltpu

# ----------------------------- hyperparameters ------------------------------
BATCH = 4
NSTYLE = 5                       # FCDecoder latent size
HIDDEN = 32                      # FCDecoder hidden size
DIM_IN = 32                      # FCDecoder dim_out == ExLayers dim_in (n_grid)
DIM_OUT = 40                     # ExDecoder dim_out
GATE_WINDOW = 13
N_POLY_ORDER = 3
N_POLY_POINTS = 10
D_MODEL = 2                      # transformer_d_model
FF_DIM = 16                      # transformer_hidden_size (small)
N_ENC_LAYERS = 2                 # transformer_layers (small)
SEQ = DIM_IN
PRE_DIM = DIM_OUT + GATE_WINDOW - 1          # 'stretch' padding mode
FLAT = GATE_WINDOW * DIM_OUT                 # 520: flattened (window, out-pos) axis
BN_INV = 1.0 / math.sqrt(1.0 + 1e-5)         # eval BatchNorm1d, running stats (0, 1)
LN_EPS = 1e-5
INV_SQRT_D = 1.0 / math.sqrt(D_MODEL)

# ------------- scalar-parameter packing layout (SMEM vector) ----------------
EMB_SCALARS = 4                                   # emb_w0, emb_w1, emb_b0, emb_b1
OFF_WQ, OFF_WK, OFF_WV, OFF_WO = 0, 6, 12, 18     # each block: 2x2 weight then 2 biases
OFF_G1 = 24                                       # g1_0, g1_1, be1_0, be1_1
OFF_WF1 = 28                                      # wf1[0,:] then wf1[1,:]
OFF_BF1 = OFF_WF1 + 2 * FF_DIM                    # bf1[:]
OFF_WF2 = OFF_BF1 + FF_DIM                        # wf2[:,0] then wf2[:,1]
OFF_BF2 = OFF_WF2 + 2 * FF_DIM                    # bf2_0, bf2_1
OFF_G2 = OFF_BF2 + 2                              # g2_0, g2_1, be2_0, be2_1
LAYER_SCALARS = OFF_G2 + 4                        # 114
TOTAL_SCALARS = EMB_SCALARS + N_ENC_LAYERS * LAYER_SCALARS


# --------------------- bicubic interpolation as a matrix --------------------
def _cubic1(x, a):  # |x| <= 1
    return ((a + 2.0) * x - (a + 3.0)) * x * x + 1.0


def _cubic2(x, a):  # 1 < |x| < 2
    return ((a * x - 5.0 * a) * x + 8.0 * a) * x - 4.0 * a


def bicubic_interp_matrix(n_in, n_out, a=-0.75):
    """M such that M @ v == F.interpolate(..., mode='bicubic', align_corners=True)
    along one axis (the other spatial axis has size 1 -> identity), with PyTorch's
    clamped-border taps."""
    m = np.zeros((n_out, n_in), dtype=np.float64)
    scale = (n_in - 1) / (n_out - 1) if n_out > 1 else 0.0
    for j in range(n_out):
        x = j * scale
        i = int(np.floor(x))
        t = x - i
        coeffs = (_cubic2(t + 1.0, a), _cubic1(t, a),
                  _cubic1(1.0 - t, a), _cubic2(2.0 - t, a))
        for k, c in enumerate(coeffs):
            idx = min(max(i - 1 + k, 0), n_in - 1)
            m[j, idx] += c
    return m.astype(np.float32)


_M_STRETCH = bicubic_interp_matrix(DIM_IN, PRE_DIM)            # [52, 32]
# Fold stretch + conv1d(eye(GW)) unfold into one matrix:
#   windows_flat[b, g*40 + j] = padded[b, g + j] = sum_i spec[b, i] * M_STRETCH[g+j, i]
_gj = (np.arange(GATE_WINDOW)[:, None] + np.arange(DIM_OUT)[None, :]).reshape(-1)
W_UNFOLD = jnp.asarray(_M_STRETCH[_gj, :].T)                   # [32, 520]
# Window-sum reduction as a matmul: R[g*40 + j, j] = 1
R_REDUCE = jnp.asarray(np.tile(np.eye(DIM_OUT, dtype=np.float32), (GATE_WINDOW, 1)))
M_POLY_T = jnp.asarray(bicubic_interp_matrix(N_POLY_POINTS, DIM_OUT).T)   # [10, 40]


# ------------------------------ encoder layer --------------------------------
def _encoder_layer(x0, x1, x0t, x1t, s, base, need_cols):
    """One post-norm transformer encoder layer (nhead=1, relu FFN, dropout=identity).

    Row rail:    x0, x1   are [B, SEQ]  (SEQ on lanes).
    Column rail: x0t, x1t are [SEQ, B]  (same values, transposed layout) -- kept so the
    SxS attention can be formed without any in-kernel transpose/reshape.
    All per-layer parameters are scalars read from the packed SMEM vector `s`.
    The 1/sqrt(d_model) score scale is pre-folded into Wq/bq at packing time.
    """
    cache = {}

    def sc(i):
        j = base + i
        if j not in cache:
            cache[j] = s[j]
        return cache[j]

    def proj(a0, a1, o):                 # 2->2 linear with per-channel scalars
        return (a0 * sc(o + 0) + a1 * sc(o + 2) + sc(o + 4),
                a0 * sc(o + 1) + a1 * sc(o + 3) + sc(o + 5))

    def ln(a0, a1, o):                   # LayerNorm over the 2 channels
        mu = (a0 + a1) * 0.5
        d0 = a0 - mu
        d1 = a1 - mu
        inv = jax.lax.rsqrt((d0 * d0 + d1 * d1) * 0.5 + LN_EPS)
        return d0 * inv * sc(o + 0) + sc(o + 2), d1 * inv * sc(o + 1) + sc(o + 3)

    def tail(u0, u1, r0, r1):            # residual + LN1 + FFN + residual + LN2
        h0, h1 = ln(u0 + r0, u1 + r1, OFF_G1)
        f0 = jnp.zeros_like(h0)
        f1 = jnp.zeros_like(h1)
        for m in range(FF_DIM):          # FFN unrolled over hidden units (dense VPU work)
            fm = jnp.maximum(
                h0 * sc(OFF_WF1 + m) + h1 * sc(OFF_WF1 + FF_DIM + m) + sc(OFF_BF1 + m),
                0.0)
            f0 = f0 + fm * sc(OFF_WF2 + m)
            f1 = f1 + fm * sc(OFF_WF2 + FF_DIM + m)
        return ln(h0 + f0 + sc(OFF_BF2 + 0), h1 + f1 + sc(OFF_BF2 + 1), OFF_G2)

    # q / k / v in both rails (k, v columns feed the attention; q columns only if the
    # next layer still needs the transposed rail).
    q0, q1 = proj(x0, x1, OFF_WQ)
    k0, k1 = proj(x0, x1, OFF_WK)
    v0, v1 = proj(x0, x1, OFF_WV)
    k0t, k1t = proj(x0t, x1t, OFF_WK)
    v0t, v1t = proj(x0t, x1t, OFF_WV)
    if need_cols:
        q0t, q1t = proj(x0t, x1t, OFF_WQ)

    a0_rows, a1_rows, a0_cols, a1_cols = [], [], [], []
    for b in range(BATCH):
        # Orientation B: scores laid out [k on sublanes, q on lanes] -> row outputs.
        sB = (k0t[:, b:b + 1] * q0[b:b + 1, :]
              + k1t[:, b:b + 1] * q1[b:b + 1, :])
        eB = jnp.exp(sB - jnp.max(sB, axis=0, keepdims=True))
        pB = eB * pl.reciprocal(jnp.sum(eB, axis=0, keepdims=True), approx=True)
        a0_rows.append(jnp.sum(pB * v0t[:, b:b + 1], axis=0, keepdims=True))
        a1_rows.append(jnp.sum(pB * v1t[:, b:b + 1], axis=0, keepdims=True))
        if need_cols:
            # Orientation A: [q on sublanes, k on lanes] -> column outputs.
            sA = (q0t[:, b:b + 1] * k0[b:b + 1, :]
                  + q1t[:, b:b + 1] * k1[b:b + 1, :])
            eA = jnp.exp(sA - jnp.max(sA, axis=-1, keepdims=True))
            pA = eA * pl.reciprocal(jnp.sum(eA, axis=-1, keepdims=True), approx=True)
            a0_cols.append(jnp.sum(pA * v0[b:b + 1, :], axis=-1, keepdims=True))
            a1_cols.append(jnp.sum(pA * v1[b:b + 1, :], axis=-1, keepdims=True))

    a0 = jnp.concatenate(a0_rows, axis=0)          # [B, SEQ]
    a1 = jnp.concatenate(a1_rows, axis=0)
    y0, y1 = tail(x0, x1, *proj(a0, a1, OFF_WO))
    if need_cols:
        a0t = jnp.concatenate(a0_cols, axis=1)     # [SEQ, B]
        a1t = jnp.concatenate(a1_cols, axis=1)
        y0t, y1t = tail(x0t, x1t, *proj(a0t, a1t, OFF_WO))
    else:
        y0t = y1t = None
    return y0, y1, y0t, y1t


# --------------------------------- kernel ------------------------------------
def ex_decoder_kernel(z_ref, zt_ref, sc_ref,
                      w1_ref, w2_ref, w3_ref, w1t_ref, w2t_ref, w3t_ref,
                      fcv_ref, fcvt_ref, head_wt_ref, aux_ref,
                      wunf_ref, rred_ref, pw_ref, o_ref):
    f32 = jnp.float32

    # ---------------- FCDecoder: Linear -> [Swish -> BN -> Linear] x2 -> ReLU ---------
    # Eval BatchNorm (affine=False, running stats 0/1) is a pure scale and was folded
    # into w2/w3 at packing time, so only Swish sits between the matmuls here.
    fb1 = fcv_ref[0:1, :]
    fbe1 = fcv_ref[1:2, :]
    fb2 = fcv_ref[2:3, :]
    fbe2 = fcv_ref[3:4, :]
    fb3 = fcv_ref[4:5, :]
    h = jnp.dot(z_ref[...], w1_ref[...], preferred_element_type=f32) + fb1
    h = h * jax.nn.sigmoid((1.0 + fbe1) * h)                   # Swish (per-feature beta)
    h = jnp.dot(h, w2_ref[...], preferred_element_type=f32) + fb2
    h = h * jax.nn.sigmoid((1.0 + fbe2) * h)
    spec = jnp.maximum(
        jnp.dot(h, w3_ref[...], preferred_element_type=f32) + fb3, 0.0)      # [B, 32]

    # Transposed (column-rail) copy of the same pipeline: spec_t == spec.T, built from
    # pre-transposed weights so no in-kernel transpose is needed.
    cb1 = fcvt_ref[:, 0:1]
    cbe1 = fcvt_ref[:, 1:2]
    cb2 = fcvt_ref[:, 2:3]
    cbe2 = fcvt_ref[:, 3:4]
    cb3 = fcvt_ref[:, 4:5]
    ht = jnp.dot(w1t_ref[...], zt_ref[...], preferred_element_type=f32) + cb1
    ht = ht * jax.nn.sigmoid((1.0 + cbe1) * ht)
    ht = jnp.dot(w2t_ref[...], ht, preferred_element_type=f32) + cb2
    ht = ht * jax.nn.sigmoid((1.0 + cbe2) * ht)
    spec_t = jnp.maximum(
        jnp.dot(w3t_ref[...], ht, preferred_element_type=f32) + cb3, 0.0)    # [32, B]

    # ---------------- transformer proxy: embedding + N post-norm encoder layers ------
    ew0 = sc_ref[0]
    ew1 = sc_ref[1]
    pos0 = fcv_ref[5:6, :]          # positional table with embedding bias pre-folded
    pos1 = fcv_ref[6:7, :]
    pos0c = fcvt_ref[:, 5:6]
    pos1c = fcvt_ref[:, 6:7]
    x0 = spec * ew0 + pos0          # channel-split rows, SEQ on lanes
    x1 = spec * ew1 + pos1
    x0t = spec_t * ew0 + pos0c      # column rail
    x1t = spec_t * ew1 + pos1c

    for l in range(N_ENC_LAYERS):
        need_cols = (l + 1) < N_ENC_LAYERS
        x0, x1, x0t, x1t = _encoder_layer(
            x0, x1, x0t, x1t, sc_ref, EMB_SCALARS + l * LAYER_SCALARS, need_cols)

    # ---------------- ExLayers: energy-position head + two-hot gating ----------------
    # Head weights are pre-tiled to width GW*DIM_OUT so ep / lower / frac are computed
    # directly on the flat (window, out-pos) axis; one fused [B,64]x[64,520] matmul.
    x01 = jnp.concatenate([x0, x1], axis=1)                   # [B, 2*SEQ], lane concat
    ep = jnp.tanh(
        jnp.dot(x01, head_wt_ref[...], preferred_element_type=f32)
        + aux_ref[0:1, :])                                    # [B, 520]
    ep = ep * (GATE_WINDOW / 2.0) + (GATE_WINDOW / 2.0)
    ep = jnp.clip(ep, 0.0, GATE_WINDOW - 1.0 - 1e-6)          # TwoHotGenerator clamp
    lower = jnp.floor(ep)
    frac = ep - lower
    gidx = aux_ref[1:2, :]                                    # column g*40+j holds g
    twohot = (jnp.where(lower == gidx, 1.0 - frac, 0.0)
              + jnp.where(lower + 1.0 == gidx, frac, 0.0))    # [B, 520]

    # stretch + unfold (one constant matmul), gate, window-sum (one constant matmul)
    windows = jnp.dot(spec, wunf_ref[...], preferred_element_type=f32)        # [B, 520]
    gated = jnp.dot(windows * twohot, rred_ref[...], preferred_element_type=f32)  # [B, 40]

    # polynomial correction: d = sum_k gated**k * pw[k]  (Horner)
    d_spec = pw_ref[N_POLY_ORDER:N_POLY_ORDER + 1, :]
    for kk in range(N_POLY_ORDER - 1, -1, -1):
        d_spec = d_spec * gated + pw_ref[kk:kk + 1, :]
    o_ref[...] = gated + d_spec


# ------------------------------- parameters ----------------------------------
def init_params(key):
    keys = iter(jax.random.split(key, 64))

    def nrm(shape, scale):
        return (scale * jax.random.normal(next(keys), shape)).astype(jnp.float32)

    p = {
        # FCDecoder (activation='Swish' init=1.0 -> beta=3.0, last layer ReLU, n_layers=3)
        "fc_w1": nrm((NSTYLE, HIDDEN), 1.0 / math.sqrt(NSTYLE)),
        "fc_b1": nrm((HIDDEN,), 0.02),
        "fc_beta1": jnp.full((HIDDEN,), 3.0, jnp.float32),
        "fc_w2": nrm((HIDDEN, HIDDEN), 1.0 / math.sqrt(HIDDEN)),
        "fc_b2": nrm((HIDDEN,), 0.02),
        "fc_beta2": jnp.full((HIDDEN,), 3.0, jnp.float32),
        "fc_w3": nrm((HIDDEN, DIM_IN), 1.0 / math.sqrt(HIDDEN)),
        "fc_b3": nrm((DIM_IN,), 0.02),
        # transformer proxy (TODO(synk): stand-in for undefined TransformerEnergyPositionPredictor)
        "emb_w": nrm((D_MODEL,), 1.0),
        "emb_b": nrm((D_MODEL,), 0.02),
        "pos": nrm((SEQ, D_MODEL), 0.1),
        "head_w": nrm((SEQ * D_MODEL, DIM_OUT), 1.0 / math.sqrt(SEQ * D_MODEL)),
        "head_b": nrm((DIM_OUT,), 0.02),
        # ExLayers.polynomial_weights is zero-initialized in the module; small random
        # values here so the polynomial branch is exercised.
        "poly": nrm((N_POLY_ORDER + 1, N_POLY_POINTS), 0.01),
        "enc": [],
    }
    for _ in range(N_ENC_LAYERS):
        p["enc"].append({
            "wq": nrm((D_MODEL, D_MODEL), INV_SQRT_D), "bq": nrm((D_MODEL,), 0.02),
            "wk": nrm((D_MODEL, D_MODEL), INV_SQRT_D), "bk": nrm((D_MODEL,), 0.02),
            "wv": nrm((D_MODEL, D_MODEL), INV_SQRT_D), "bv": nrm((D_MODEL,), 0.02),
            "wo": nrm((D_MODEL, D_MODEL), INV_SQRT_D), "bo": nrm((D_MODEL,), 0.02),
            "g1": jnp.ones((D_MODEL,), jnp.float32), "be1": jnp.zeros((D_MODEL,), jnp.float32),
            "wf1": nrm((D_MODEL, FF_DIM), INV_SQRT_D), "bf1": nrm((FF_DIM,), 0.02),
            "wf2": nrm((FF_DIM, D_MODEL), 1.0 / math.sqrt(FF_DIM)), "bf2": nrm((D_MODEL,), 0.02),
            "g2": jnp.ones((D_MODEL,), jnp.float32), "be2": jnp.zeros((D_MODEL,), jnp.float32),
        })
    return p


def pack_params(p):
    """Pack logical params into the kernel operand set (done ONCE, outside the fwd path).

    Packing-time hoists (all exact algebraic folds):
      * eval BatchNorm scale BN_INV folded into fc_w2 / fc_w3 (and transposes);
      * embedding bias folded into the positional table;
      * attention 1/sqrt(d_model) folded into Wq / bq;
      * polynomial-weight bicubic interpolation applied once;
      * head weights tiled to the flat (window, out-pos) axis.
    """
    w2 = p["fc_w2"] * BN_INV
    w3 = p["fc_w3"] * BN_INV

    # FCDecoder vector params + (positional + embedding-bias) rows, row + column layout.
    pos0 = p["pos"][:, 0] + p["emb_b"][0]
    pos1 = p["pos"][:, 1] + p["emb_b"][1]
    fcv = jnp.stack([p["fc_b1"], p["fc_beta1"], p["fc_b2"], p["fc_beta2"], p["fc_b3"],
                     pos0, pos1,
                     jnp.zeros((HIDDEN,), jnp.float32)], axis=0)            # [8, 32]
    fcvt = fcv.T                                                            # [32, 8]

    # All tiny encoder scalars -> one SMEM vector.
    blocks = [jnp.concatenate([p["emb_w"], p["emb_b"]]).astype(jnp.float32)]
    for lyr in p["enc"]:
        blk = jnp.concatenate([
            (lyr["wq"] * INV_SQRT_D).reshape(-1), lyr["bq"] * INV_SQRT_D,
            lyr["wk"].reshape(-1), lyr["bk"],
            lyr["wv"].reshape(-1), lyr["bv"],
            lyr["wo"].reshape(-1), lyr["bo"],
            lyr["g1"], lyr["be1"],
            lyr["wf1"].reshape(-1), lyr["bf1"],
            lyr["wf2"].T.reshape(-1), lyr["bf2"],
            lyr["g2"], lyr["be2"],
        ]).astype(jnp.float32)
        assert blk.shape[0] == LAYER_SCALARS, blk.shape
        blocks.append(blk)
    scal = jnp.concatenate(blocks)
    assert scal.shape[0] == TOTAL_SCALARS, scal.shape

    # Head weights tiled to the flat (window, out-pos) axis; bias + window index row.
    head_wt = jnp.tile(p["head_w"], (1, GATE_WINDOW))                       # [64, 520]
    gidx = np.repeat(np.arange(GATE_WINDOW, dtype=np.float32), DIM_OUT)     # [520]
    aux = jnp.stack([jnp.tile(p["head_b"], GATE_WINDOW),
                     jnp.asarray(gidx)], axis=0)                            # [2, 520]

    # Polynomial-weight bicubic interpolation hoisted out of the forward path.
    pw = (p["poly"] @ M_POLY_T).astype(jnp.float32)                         # [4, 40]

    return (scal,
            p["fc_w1"], w2, w3,
            p["fc_w1"].T, w2.T, w3.T,
            fcv, fcvt, head_wt, aux, W_UNFOLD, R_REDUCE, pw)


# -------------------------------- forward ------------------------------------
@jax.jit
def ex_decoder_forward(packed, z_gauss):
    assert z_gauss.shape == (BATCH, NSTYLE), z_gauss.shape
    zt = z_gauss.T                               # tiny XLA transpose feeding the column rail
    vmem = pl.BlockSpec(memory_space=pltpu.MemorySpace.VMEM)
    smem = pl.BlockSpec(memory_space=pltpu.MemorySpace.SMEM)
    in_specs = [vmem, vmem, smem] + [vmem] * (len(packed) - 1)   # operand 2 = packed scalars
    return pl.pallas_call(
        ex_decoder_kernel,
        out_shape=jax.ShapeDtypeStruct((BATCH, DIM_OUT), jnp.float32),
        in_specs=in_specs,
        out_specs=vmem,
    )(z_gauss, zt, *packed)


# ---------------------------------- main --------------------------------------
if __name__ == "__main__":
    root = jax.random.PRNGKey(0)
    k_in, k_par = jax.random.split(root)
    z_gauss = jax.random.normal(k_in, (BATCH, NSTYLE), dtype=jnp.float32)
    params = init_params(k_par)
    packed = pack_params(params)

    out = ex_decoder_forward(packed, z_gauss)
    out = jax.block_until_ready(out)

    assert out.shape == (BATCH, DIM_OUT), out.shape
    assert bool(jnp.all(jnp.isfinite(out)))
    print("KERNEL_OK")
</pallas_src>

<mosaic_0001>
module attributes {stable_mosaic.version = 11 : i64} {
  func.func @ex_decoder_kernel(%arg0: memref<4x5xf32, #tpu.memory_space<vmem>>, %arg1: memref<5x4xf32, #tpu.memory_space<vmem>>, %arg2: memref<232xf32, #tpu.memory_space<smem>>, %arg3: memref<5x32xf32, #tpu.memory_space<vmem>>, %arg4: memref<32x32xf32, #tpu.memory_space<vmem>>, %arg5: memref<32x32xf32, #tpu.memory_space<vmem>>, %arg6: memref<32x5xf32, #tpu.memory_space<vmem>>, %arg7: memref<32x32xf32, #tpu.memory_space<vmem>>, %arg8: memref<32x32xf32, #tpu.memory_space<vmem>>, %arg9: memref<8x32xf32, #tpu.memory_space<vmem>>, %arg10: memref<32x8xf32, #tpu.memory_space<vmem>>, %arg11: memref<64x520xf32, #tpu.memory_space<vmem>>, %arg12: memref<2x520xf32, #tpu.memory_space<vmem>>, %arg13: memref<32x520xf32, #tpu.memory_space<vmem>>, %arg14: memref<520x40xf32, #tpu.memory_space<vmem>>, %arg15: memref<4x40xf32, #tpu.memory_space<vmem>>, %arg16: memref<4x40xf32, #tpu.memory_space<vmem>>) attributes {dimension_semantics = [], scalar_prefetch = 0 : i64, scratch_operands = 0 : i64, tpu.core_type = #tpu.core_type<tc>} {
    %c0 = arith.constant 0 : index
    %c0_0 = arith.constant 0 : index
    %0 = vector.load %arg9[%c0, %c0_0] : memref<8x32xf32, #tpu.memory_space<vmem>>, vector<1x32xf32>
    %c1 = arith.constant 1 : index
    %c0_1 = arith.constant 0 : index
    %1 = vector.load %arg9[%c1, %c0_1] : memref<8x32xf32, #tpu.memory_space<vmem>>, vector<1x32xf32>
    %c2 = arith.constant 2 : index
    %c0_2 = arith.constant 0 : index
    %2 = vector.load %arg9[%c2, %c0_2] : memref<8x32xf32, #tpu.memory_space<vmem>>, vector<1x32xf32>
    %c3 = arith.constant 3 : index
    %c0_3 = arith.constant 0 : index
    %3 = vector.load %arg9[%c3, %c0_3] : memref<8x32xf32, #tpu.memory_space<vmem>>, vector<1x32xf32>
    %c4 = arith.constant 4 : index
    %c0_4 = arith.constant 0 : index
    %4 = vector.load %arg9[%c4, %c0_4] : memref<8x32xf32, #tpu.memory_space<vmem>>, vector<1x32xf32>
    %c0_5 = arith.constant 0 : index
    %c0_6 = arith.constant 0 : index
    %5 = vector.load %arg0[%c0_5, %c0_6] : memref<4x5xf32, #tpu.memory_space<vmem>>, vector<4x5xf32>
    %c0_7 = arith.constant 0 : index
    %c0_8 = arith.constant 0 : index
    %6 = vector.load %arg3[%c0_7, %c0_8] : memref<5x32xf32, #tpu.memory_space<vmem>>, vector<5x32xf32>
    %cst = arith.constant dense<0.000000e+00> : vector<4x32xf32>
    %7 = tpu.matmul %5, %6, %cst {dimension_numbers = #tpu.dot_dimension_numbers<[1], [0], [0], [1], [0, 0, 1, 1], [], []>} : vector<4x5xf32>, vector<5x32xf32>, vector<4x32xf32> -> vector<4x32xf32>
    %8 = vector.broadcast %0 : vector<1x32xf32> to vector<4x32xf32>
    %9 = arith.addf %7, %8 : vector<4x32xf32>
    %cst_9 = arith.constant 1.000000e+00 : f32
    %10 = vector.broadcast %cst_9 : f32 to vector<1x32xf32>
    %11 = arith.addf %10, %1 : vector<1x32xf32>
    %12 = vector.broadcast %11 : vector<1x32xf32> to vector<4x32xf32>
    %13 = arith.mulf %12, %9 : vector<4x32xf32>
    %14 = arith.negf %13 : vector<4x32xf32>
    %15 = math.exp %14 : vector<4x32xf32>
    %cst_10 = arith.constant 1.000000e+00 : f32
    %16 = vector.broadcast %cst_10 : f32 to vector<4x32xf32>
    %17 = arith.addf %16, %15 : vector<4x32xf32>
    %18 = arith.divf %16, %17 : vector<4x32xf32>
    %19 = arith.mulf %9, %18 : vector<4x32xf32>
    %c0_11 = arith.constant 0 : index
    %c0_12 = arith.constant 0 : index
    %20 = vector.load %arg4[%c0_11, %c0_12] : memref<32x32xf32, #tpu.memory_space<vmem>>, vector<32x32xf32>
    %cst_13 = arith.constant dense<0.000000e+00> : vector<4x32xf32>
    %21 = tpu.matmul %19, %20, %cst_13 {dimension_numbers = #tpu.dot_dimension_numbers<[1], [0], [0], [1], [0, 0, 1, 1], [], []>} : vector<4x32xf32>, vector<32x32xf32>, vector<4x32xf32> -> vector<4x32xf32>
    %22 = vector.broadcast %2 : vector<1x32xf32> to vector<4x32xf32>
    %23 = arith.addf %21, %22 : vector<4x32xf32>
    %cst_14 = arith.constant 1.000000e+00 : f32
    %24 = vector.broadcast %cst_14 : f32 to vector<1x32xf32>
    %25 = arith.addf %24, %3 : vector<1x32xf32>
    %26 = vector.broadcast %25 : vector<1x32xf32> to vector<4x32xf32>
    %27 = arith.mulf %26, %23 : vector<4x32xf32>
    %28 = arith.negf %27 : vector<4x32xf32>
    %29 = math.exp %28 : vector<4x32xf32>
    %cst_15 = arith.constant 1.000000e+00 : f32
    %30 = vector.broadcast %cst_15 : f32 to vector<4x32xf32>
    %31 = arith.addf %30, %29 : vector<4x32xf32>
    %32 = arith.divf %30, %31 : vector<4x32xf32>
    %33 = arith.mulf %23, %32 : vector<4x32xf32>
    %c0_16 = arith.constant 0 : index
    %c0_17 = arith.constant 0 : index
    %34 = vector.load %arg5[%c0_16, %c0_17] : memref<32x32xf32, #tpu.memory_space<vmem>>, vector<32x32xf32>
    %cst_18 = arith.constant dense<0.000000e+00> : vector<4x32xf32>
    %35 = tpu.matmul %33, %34, %cst_18 {dimension_numbers = #tpu.dot_dimension_numbers<[1], [0], [0], [1], [0, 0, 1, 1], [], []>} : vector<4x32xf32>, vector<32x32xf32>, vector<4x32xf32> -> vector<4x32xf32>
    %36 = vector.broadcast %4 : vector<1x32xf32> to vector<4x32xf32>
    %37 = arith.addf %35, %36 : vector<4x32xf32>
    %cst_19 = arith.constant 0.000000e+00 : f32
    %38 = vector.broadcast %cst_19 : f32 to vector<4x32xf32>
    %39 = arith.maximumf %37, %38 : vector<4x32xf32>
    %c0_20 = arith.constant 0 : index
    %c0_21 = arith.constant 0 : index
    %40 = vector.load %arg10[%c0_20, %c0_21] : memref<32x8xf32, #tpu.memory_space<vmem>>, vector<32x1xf32>
    %c0_22 = arith.constant 0 : index
    %c1_23 = arith.constant 1 : index
    %41 = vector.load %arg10[%c0_22, %c1_23] : memref<32x8xf32, #tpu.memory_space<vmem>>, vector<32x1xf32>
    %c0_24 = arith.constant 0 : index
    %c2_25 = arith.constant 2 : index
    %42 = vector.load %arg10[%c0_24, %c2_25] : memref<32x8xf32, #tpu.memory_space<vmem>>, vector<32x1xf32>
    %c0_26 = arith.constant 0 : index
    %c3_27 = arith.constant 3 : index
    %43 = vector.load %arg10[%c0_26, %c3_27] : memref<32x8xf32, #tpu.memory_space<vmem>>, vector<32x1xf32>
    %c0_28 = arith.constant 0 : index
    %c4_29 = arith.constant 4 : index
    %44 = vector.load %arg10[%c0_28, %c4_29] : memref<32x8xf32, #tpu.memory_space<vmem>>, vector<32x1xf32>
    %c0_30 = arith.constant 0 : index
    %c0_31 = arith.constant 0 : index
    %45 = vector.load %arg6[%c0_30, %c0_31] : memref<32x5xf32, #tpu.memory_space<vmem>>, vector<32x5xf32>
    %c0_32 = arith.constant 0 : index
    %c0_33 = arith.constant 0 : index
    %46 = vector.load %arg1[%c0_32, %c0_33] : memref<5x4xf32, #tpu.memory_space<vmem>>, vector<5x4xf32>
    %cst_34 = arith.constant dense<0.000000e+00> : vector<32x4xf32>
    %47 = tpu.matmul %45, %46, %cst_34 {dimension_numbers = #tpu.dot_dimension_numbers<[1], [0], [0], [1], [0, 0, 1, 1], [], []>} : vector<32x5xf32>, vector<5x4xf32>, vector<32x4xf32> -> vector<32x4xf32>
    %48 = vector.broadcast %40 : vector<32x1xf32> to vector<32x4xf32>
    %49 = arith.addf %47, %48 : vector<32x4xf32>
    %cst_35 = arith.constant 1.000000e+00 : f32
    %50 = vector.broadcast %cst_35 : f32 to vector<32x1xf32>
    %51 = arith.addf %50, %41 : vector<32x1xf32>
    %52 = vector.broadcast %51 : vector<32x1xf32> to vector<32x4xf32>
    %53 = arith.mulf %52, %49 : vector<32x4xf32>
    %54 = arith.negf %53 : vector<32x4xf32>
    %55 = math.exp %54 : vector<32x4xf32>
    %cst_36 = arith.constant 1.000000e+00 : f32
    %56 = vector.broadcast %cst_36 : f32 to vector<32x4xf32>
    %57 = arith.addf %56, %55 : vector<32x4xf32>
    %58 = arith.divf %56, %57 : vector<32x4xf32>
    %59 = arith.mulf %49, %58 : vector<32x4xf32>
    %c0_37 = arith.constant 0 : index
    %c0_38 = arith.constant 0 : index
    %60 = vector.load %arg7[%c0_37, %c0_38] : memref<32x32xf32, #tpu.memory_space<vmem>>, vector<32x32xf32>
    %cst_39 = arith.constant dense<0.000000e+00> : vector<32x4xf32>
    %61 = tpu.matmul %60, %59, %cst_39 {dimension_numbers = #tpu.dot_dimension_numbers<[1], [0], [0], [1], [0, 0, 1, 1], [], []>} : vector<32x32xf32>, vector<32x4xf32>, vector<32x4xf32> -> vector<32x4xf32>
    %62 = vector.broadcast %42 : vector<32x1xf32> to vector<32x4xf32>
    %63 = arith.addf %61, %62 : vector<32x4xf32>
    %cst_40 = arith.constant 1.000000e+00 : f32
    %64 = vector.broadcast %cst_40 : f32 to vector<32x1xf32>
    %65 = arith.addf %64, %43 : vector<32x1xf32>
    %66 = vector.broadcast %65 : vector<32x1xf32> to vector<32x4xf32>
    %67 = arith.mulf %66, %63 : vector<32x4xf32>
    %68 = arith.negf %67 : vector<32x4xf32>
    %69 = math.exp %68 : vector<32x4xf32>
    %cst_41 = arith.constant 1.000000e+00 : f32
    %70 = vector.broadcast %cst_41 : f32 to vector<32x4xf32>
    %71 = arith.addf %70, %69 : vector<32x4xf32>
    %72 = arith.divf %70, %71 : vector<32x4xf32>
    %73 = arith.mulf %63, %72 : vector<32x4xf32>
    %c0_42 = arith.constant 0 : index
    %c0_43 = arith.constant 0 : index
    %74 = vector.load %arg8[%c0_42, %c0_43] : memref<32x32xf32, #tpu.memory_space<vmem>>, vector<32x32xf32>
    %cst_44 = arith.constant dense<0.000000e+00> : vector<32x4xf32>
    %75 = tpu.matmul %74, %73, %cst_44 {dimension_numbers = #tpu.dot_dimension_numbers<[1], [0], [0], [1], [0, 0, 1, 1], [], []>} : vector<32x32xf32>, vector<32x4xf32>, vector<32x4xf32> -> vector<32x4xf32>
    %76 = vector.broadcast %44 : vector<32x1xf32> to vector<32x4xf32>
    %77 = arith.addf %75, %76 : vector<32x4xf32>
    %cst_45 = arith.constant 0.000000e+00 : f32
    %78 = vector.broadcast %cst_45 : f32 to vector<32x4xf32>
    %79 = arith.maximumf %77, %78 : vector<32x4xf32>
    %c0_46 = arith.constant 0 : index
    %80 = memref.load %arg2[%c0_46] : memref<232xf32, #tpu.memory_space<smem>>
    %c1_47 = arith.constant 1 : index
    %81 = memref.load %arg2[%c1_47] : memref<232xf32, #tpu.memory_space<smem>>
    %c5 = arith.constant 5 : index
    %c0_48 = arith.constant 0 : index
    %82 = vector.load %arg9[%c5, %c0_48] : memref<8x32xf32, #tpu.memory_space<vmem>>, vector<1x32xf32>
    %c6 = arith.constant 6 : index
    %c0_49 = arith.constant 0 : index
    %83 = vector.load %arg9[%c6, %c0_49] : memref<8x32xf32, #tpu.memory_space<vmem>>, vector<1x32xf32>
    %c0_50 = arith.constant 0 : index
    %c5_51 = arith.constant 5 : index
    %84 = vector.load %arg10[%c0_50, %c5_51] : memref<32x8xf32, #tpu.memory_space<vmem>>, vector<32x1xf32>
    %c0_52 = arith.constant 0 : index
    %c6_53 = arith.constant 6 : index
    %85 = vector.load %arg10[%c0_52, %c6_53] : memref<32x8xf32, #tpu.memory_space<vmem>>, vector<32x1xf32>
    %86 = vector.broadcast %80 : f32 to vector<4x32xf32>
    %87 = arith.mulf %39, %86 : vector<4x32xf32>
    %88 = vector.broadcast %82 : vector<1x32xf32> to vector<4x32xf32>
    %89 = arith.addf %87, %88 : vector<4x32xf32>
    %90 = vector.broadcast %81 : f32 to vector<4x32xf32>
    %91 = arith.mulf %39, %90 : vector<4x32xf32>
    %92 = vector.broadcast %83 : vector<1x32xf32> to vector<4x32xf32>
    %93 = arith.addf %91, %92 : vector<4x32xf32>
    %94 = vector.broadcast %80 : f32 to vector<32x4xf32>
    %95 = arith.mulf %79, %94 : vector<32x4xf32>
    %96 = vector.broadcast %84 : vector<32x1xf32> to vector<32x4xf32>
    %97 = arith.addf %95, %96 : vector<32x4xf32>
    %98 = vector.broadcast %81 : f32 to vector<32x4xf32>
    %99 = arith.mulf %79, %98 : vector<32x4xf32>
    %100 = vector.broadcast %85 : vector<32x1xf32> to vector<32x4xf32>
    %101 = arith.addf %99, %100 : vector<32x4xf32>
    %c4_54 = arith.constant 4 : index
    %102 = memref.load %arg2[%c4_54] : memref<232xf32, #tpu.memory_space<smem>>
    %103 = vector.broadcast %102 : f32 to vector<4x32xf32>
    %104 = arith.mulf %89, %103 : vector<4x32xf32>
    %c6_55 = arith.constant 6 : index
    %105 = memref.load %arg2[%c6_55] : memref<232xf32, #tpu.memory_space<smem>>
    %106 = vector.broadcast %105 : f32 to vector<4x32xf32>
    %107 = arith.mulf %93, %106 : vector<4x32xf32>
    %108 = arith.addf %104, %107 : vector<4x32xf32>
    %c8 = arith.constant 8 : index
    %109 = memref.load %arg2[%c8] : memref<232xf32, #tpu.memory_space<smem>>
    %110 = vector.broadcast %109 : f32 to vector<4x32xf32>
    %111 = arith.addf %108, %110 : vector<4x32xf32>
    %c5_56 = arith.constant 5 : index
    %112 = memref.load %arg2[%c5_56] : memref<232xf32, #tpu.memory_space<smem>>
    %113 = vector.broadcast %112 : f32 to vector<4x32xf32>
    %114 = arith.mulf %89, %113 : vector<4x32xf32>
    %c7 = arith.constant 7 : index
    %115 = memref.load %arg2[%c7] : memref<232xf32, #tpu.memory_space<smem>>
    %116 = vector.broadcast %115 : f32 to vector<4x32xf32>
    %117 = arith.mulf %93, %116 : vector<4x32xf32>
    %118 = arith.addf %114, %117 : vector<4x32xf32>
    %c9 = arith.constant 9 : index
    %119 = memref.load %arg2[%c9] : memref<232xf32, #tpu.memory_space<smem>>
    %120 = vector.broadcast %119 : f32 to vector<4x32xf32>
    %121 = arith.addf %118, %120 : vector<4x32xf32>
    %c10 = arith.constant 10 : index
    %122 = memref.load %arg2[%c10] : memref<232xf32, #tpu.memory_space<smem>>
    %123 = vector.broadcast %122 : f32 to vector<4x32xf32>
    %124 = arith.mulf %89, %123 : vector<4x32xf32>
    %c12 = arith.constant 12 : index
    %125 = memref.load %arg2[%c12] : memref<232xf32, #tpu.memory_space<smem>>
    %126 = vector.broadcast %125 : f32 to vector<4x32xf32>
    %127 = arith.mulf %93, %126 : vector<4x32xf32>
    %128 = arith.addf %124, %127 : vector<4x32xf32>
    %c14 = arith.constant 14 : index
    %129 = memref.load %arg2[%c14] : memref<232xf32, #tpu.memory_space<smem>>
    %130 = vector.broadcast %129 : f32 to vector<4x32xf32>
    %131 = arith.addf %128, %130 : vector<4x32xf32>
    %c11 = arith.constant 11 : index
    %132 = memref.load %arg2[%c11] : memref<232xf32, #tpu.memory_space<smem>>
    %133 = vector.broadcast %132 : f32 to vector<4x32xf32>
    %134 = arith.mulf %89, %133 : vector<4x32xf32>
    %c13 = arith.constant 13 : index
    %135 = memref.load %arg2[%c13] : memref<232xf32, #tpu.memory_space<smem>>
    %136 = vector.broadcast %135 : f32 to vector<4x32xf32>
    %137 = arith.mulf %93, %136 : vector<4x32xf32>
    %138 = arith.addf %134, %137 : vector<4x32xf32>
    %c15 = arith.constant 15 : index
    %139 = memref.load %arg2[%c15] : memref<232xf32, #tpu.memory_space<smem>>
    %140 = vector.broadcast %139 : f32 to vector<4x32xf32>
    %141 = arith.addf %138, %140 : vector<4x32xf32>
    %c16 = arith.constant 16 : index
    %142 = memref.load %arg2[%c16] : memref<232xf32, #tpu.memory_space<smem>>
    %143 = vector.broadcast %142 : f32 to vector<4x32xf32>
    %144 = arith.mulf %89, %143 : vector<4x32xf32>
    %c18 = arith.constant 18 : index
    %145 = memref.load %arg2[%c18] : memref<232xf32, #tpu.memory_space<smem>>
    %146 = vector.broadcast %145 : f32 to vector<4x32xf32>
    %147 = arith.mulf %93, %146 : vector<4x32xf32>
    %148 = arith.addf %144, %147 : vector<4x32xf32>
    %c20 = arith.constant 20 : index
    %149 = memref.load %arg2[%c20] : memref<232xf32, #tpu.memory_space<smem>>
    %150 = vector.broadcast %149 : f32 to vector<4x32xf32>
    %151 = arith.addf %148, %150 : vector<4x32xf32>
    %c17 = arith.constant 17 : index
    %152 = memref.load %arg2[%c17] : memref<232xf32, #tpu.memory_space<smem>>
    %153 = vector.broadcast %152 : f32 to vector<4x32xf32>
    %154 = arith.mulf %89, %153 : vector<4x32xf32>
    %c19 = arith.constant 19 : index
    %155 = memref.load %arg2[%c19] : memref<232xf32, #tpu.memory_space<smem>>
    %156 = vector.broadcast %155 : f32 to vector<4x32xf32>
    %157 = arith.mulf %93, %156 : vector<4x32xf32>
    %158 = arith.addf %154, %157 : vector<4x32xf32>
    %c21 = arith.constant 21 : index
    %159 = memref.load %arg2[%c21] : memref<232xf32, #tpu.memory_space<smem>>
    %160 = vector.broadcast %159 : f32 to vector<4x32xf32>
    %161 = arith.addf %158, %160 : vector<4x32xf32>
    %162 = vector.broadcast %122 : f32 to vector<32x4xf32>
    %163 = arith.mulf %97, %162 : vector<32x4xf32>
    %164 = vector.broadcast %125 : f32 to vector<32x4xf32>
    %165 = arith.mulf %101, %164 : vector<32x4xf32>
    %166 = arith.addf %163, %165 : vector<32x4xf32>
    %167 = vector.broadcast %129 : f32 to vector<32x4xf32>
    %168 = arith.addf %166, %167 : vector<32x4xf32>
    %169 = vector.broadcast %132 : f32 to vector<32x4xf32>
    %170 = arith.mulf %97, %169 : vector<32x4xf32>
    %171 = vector.broadcast %135 : f32 to vector<32x4xf32>
    %172 = arith.mulf %101, %171 : vector<32x4xf32>
    %173 = arith.addf %170, %172 : vector<32x4xf32>
    %174 = vector.broadcast %139 : f32 to vector<32x4xf32>
    %175 = arith.addf %173, %174 : vector<32x4xf32>
    %176 = vector.broadcast %142 : f32 to vector<32x4xf32>
    %177 = arith.mulf %97, %176 : vector<32x4xf32>
    %178 = vector.broadcast %145 : f32 to vector<32x4xf32>
    %179 = arith.mulf %101, %178 : vector<32x4xf32>
    %180 = arith.addf %177, %179 : vector<32x4xf32>
    %181 = vector.broadcast %149 : f32 to vector<32x4xf32>
    %182 = arith.addf %180, %181 : vector<32x4xf32>
    %183 = vector.broadcast %152 : f32 to vector<32x4xf32>
    %184 = arith.mulf %97, %183 : vector<32x4xf32>
    %185 = vector.broadcast %155 : f32 to vector<32x4xf32>
    %186 = arith.mulf %101, %185 : vector<32x4xf32>
    %187 = arith.addf %184, %186 : vector<32x4xf32>
    %188 = vector.broadcast %159 : f32 to vector<32x4xf32>
    %189 = arith.addf %187, %188 : vector<32x4xf32>
    %190 = vector.broadcast %102 : f32 to vector<32x4xf32>
    %191 = arith.mulf %97, %190 : vector<32x4xf32>
    %192 = vector.broadcast %105 : f32 to vector<32x4xf32>
    %193 = arith.mulf %101, %192 : vector<32x4xf32>
    %194 = arith.addf %191, %193 : vector<32x4xf32>
    %195 = vector.broadcast %109 : f32 to vector<32x4xf32>
    %196 = arith.addf %194, %195 : vector<32x4xf32>
    %197 = vector.broadcast %112 : f32 to vector<32x4xf32>
    %198 = arith.mulf %97, %197 : vector<32x4xf32>
    %199 = vector.broadcast %115 : f32 to vector<32x4xf32>
    %200 = arith.mulf %101, %199 : vector<32x4xf32>
    %201 = arith.addf %198, %200 : vector<32x4xf32>
    %202 = vector.broadcast %119 : f32 to vector<32x4xf32>
    %203 = arith.addf %201, %202 : vector<32x4xf32>
    %204 = vector.extract_strided_slice %168 {offsets = [0, 0], sizes = [32, 1], strides = [1, 1]} : vector<32x4xf32> to vector<32x1xf32>
    %205 = vector.extract_strided_slice %111 {offsets = [0, 0], sizes = [1, 32], strides = [1, 1]} : vector<4x32xf32> to vector<1x32xf32>
    %206 = vector.broadcast %204 : vector<32x1xf32> to vector<32x32xf32>
    %207 = vector.broadcast %205 : vector<1x32xf32> to vector<32x32xf32>
    %208 = arith.mulf %206, %207 : vector<32x32xf32>
    %209 = vector.extract_strided_slice %175 {offsets = [0, 0], sizes = [32, 1], strides = [1, 1]} : vector<32x4xf32> to vector<32x1xf32>
    %210 = vector.extract_strided_slice %121 {offsets = [0, 0], sizes = [1, 32], strides = [1, 1]} : vector<4x32xf32> to vector<1x32xf32>
    %211 = vector.broadcast %209 : vector<32x1xf32> to vector<32x32xf32>
    %212 = vector.broadcast %210 : vector<1x32xf32> to vector<32x32xf32>
    %213 = arith.mulf %211, %212 : vector<32x32xf32>
    %214 = arith.addf %208, %213 : vector<32x32xf32>
    %cst_57 = arith.constant dense<0xFF800000> : vector<32xf32>
    %215 = vector.multi_reduction <maximumf>, %214, %cst_57 [0] : vector<32x32xf32> to vector<32xf32>
    %216 = vector.shape_cast %215 : vector<32xf32> to vector<1x32xf32>
    %217 = vector.broadcast %216 : vector<1x32xf32> to vector<32x32xf32>
    %218 = arith.subf %214, %217 : vector<32x32xf32>
    %219 = math.exp %218 : vector<32x32xf32>
    %cst_58 = arith.constant dense<0.000000e+00> : vector<32xf32>
    %220 = vector.multi_reduction <add>, %219, %cst_58 [0] : vector<32x32xf32> to vector<32xf32>
    %221 = vector.shape_cast %220 : vector<32xf32> to vector<1x32xf32>
    %222 = tpu.reciprocal %221 {approx = true} : vector<1x32xf32> -> vector<1x32xf32>
    %223 = vector.broadcast %222 : vector<1x32xf32> to vector<32x32xf32>
    %224 = arith.mulf %219, %223 : vector<32x32xf32>
    %225 = vector.extract_strided_slice %182 {offsets = [0, 0], sizes = [32, 1], strides = [1, 1]} : vector<32x4xf32> to vector<32x1xf32>
    %226 = vector.broadcast %225 : vector<32x1xf32> to vector<32x32xf32>
    %227 = arith.mulf %224, %226 : vector<32x32xf32>
    %cst_59 = arith.constant dense<0.000000e+00> : vector<32xf32>
    %228 = vector.multi_reduction <add>, %227, %cst_59 [0] : vector<32x32xf32> to vector<32xf32>
    %229 = vector.shape_cast %228 : vector<32xf32> to vector<1x32xf32>
    %230 = vector.extract_strided_slice %189 {offsets = [0, 0], sizes = [32, 1], strides = [1, 1]} : vector<32x4xf32> to vector<32x1xf32>
    %231 = vector.broadcast %230 : vector<32x1xf32> to vector<32x32xf32>
    %232 = arith.mulf %224, %231 : vector<32x32xf32>
    %cst_60 = arith.constant dense<0.000000e+00> : vector<32xf32>
    %233 = vector.multi_reduction <add>, %232, %cst_60 [0] : vector<32x32xf32> to vector<32xf32>
    %234 = vector.shape_cast %233 : vector<32xf32> to vector<1x32xf32>
    %235 = vector.extract_strided_slice %196 {offsets = [0, 0], sizes = [32, 1], strides = [1, 1]} : vector<32x4xf32> to vector<32x1xf32>
    %236 = vector.extract_strided_slice %131 {offsets = [0, 0], sizes = [1, 32], strides = [1, 1]} : vector<4x32xf32> to vector<1x32xf32>
    %237 = vector.broadcast %235 : vector<32x1xf32> to vector<32x32xf32>
    %238 = vector.broadcast %236 : vector<1x32xf32> to vector<32x32xf32>
    %239 = arith.mulf %237, %238 : vector<32x32xf32>
    %240 = vector.extract_strided_slice %203 {offsets = [0, 0], sizes = [32, 1], strides = [1, 1]} : vector<32x4xf32> to vector<32x1xf32>
    %241 = vector.extract_strided_slice %141 {offsets = [0, 0], sizes = [1, 32], strides = [1, 1]} : vector<4x32xf32> to vector<1x32xf32>
    %242 = vector.broadcast %240 : vector<32x1xf32> to vector<32x32xf32>
    %243 = vector.broadcast %241 : vector<1x32xf32> to vector<32x32xf32>
    %244 = arith.mulf %242, %243 : vector<32x32xf32>
    %245 = arith.addf %239, %244 : vector<32x32xf32>
    %cst_61 = arith.constant dense<0xFF800000> : vector<32xf32>
    %246 = vector.multi_reduction <maximumf>, %245, %cst_61 [1] : vector<32x32xf32> to vector<32xf32>
    %247 = vector.shape_cast %246 : vector<32xf32> to vector<32x1xf32>
    %248 = vector.broadcast %247 : vector<32x1xf32> to vector<32x32xf32>
    %249 = arith.subf %245, %248 : vector<32x32xf32>
    %250 = math.exp %249 : vector<32x32xf32>
    %cst_62 = arith.constant dense<0.000000e+00> : vector<32xf32>
    %251 = vector.multi_reduction <add>, %250, %cst_62 [1] : vector<32x32xf32> to vector<32xf32>
    %252 = vector.shape_cast %251 : vector<32xf32> to vector<32x1xf32>
    %253 = tpu.reciprocal %252 {approx = true} : vector<32x1xf32> -> vector<32x1xf32>
    %254 = vector.broadcast %253 : vector<32x1xf32> to vector<32x32xf32>
    %255 = arith.mulf %250, %254 : vector<32x32xf32>
    %256 = vector.extract_strided_slice %151 {offsets = [0, 0], sizes = [1, 32], strides = [1, 1]} : vector<4x32xf32> to vector<1x32xf32>
    %257 = vector.broadcast %256 : vector<1x32xf32> to vector<32x32xf32>
    %258 = arith.mulf %255, %257 : vector<32x32xf32>
    %cst_63 = arith.constant dense<0.000000e+00> : vector<32xf32>
    %259 = vector.multi_reduction <add>, %258, %cst_63 [1] : vector<32x32xf32> to vector<32xf32>
    %260 = vector.shape_cast %259 : vector<32xf32> to vector<32x1xf32>
    %261 = vector.extract_strided_slice %161 {offsets = [0, 0], sizes = [1, 32], strides = [1, 1]} : vector<4x32xf32> to vector<1x32xf32>
    %262 = vector.broadcast %261 : vector<1x32xf32> to vector<32x32xf32>
    %263 = arith.mulf %255, %262 : vector<32x32xf32>
    %cst_64 = arith.constant dense<0.000000e+00> : vector<32xf32>
    %264 = vector.multi_reduction <add>, %263, %cst_64 [1] : vector<32x32xf32> to vector<32xf32>
    %265 = vector.shape_cast %264 : vector<32xf32> to vector<32x1xf32>
    %266 = vector.extract_strided_slice %168 {offsets = [0, 1], sizes = [32, 1], strides = [1, 1]} : vector<32x4xf32> to vector<32x1xf32>
    %267 = vector.extract_strided_slice %111 {offsets = [1, 0], sizes = [1, 32], strides = [1, 1]} : vector<4x32xf32> to vector<1x32xf32>
    %268 = vector.broadcast %266 : vector<32x1xf32> to vector<32x32xf32>
    %269 = vector.broadcast %267 : vector<1x32xf32> to vector<32x32xf32>
    %270 = arith.mulf %268, %269 : vector<32x32xf32>
    %271 = vector.extract_strided_slice %175 {offsets = [0, 1], sizes = [32, 1], strides = [1, 1]} : vector<32x4xf32> to vector<32x1xf32>
    %272 = vector.extract_strided_slice %121 {offsets = [1, 0], sizes = [1, 32], strides = [1, 1]} : vector<4x32xf32> to vector<1x32xf32>
    %273 = vector.broadcast %271 : vector<32x1xf32> to vector<32x32xf32>
    %274 = vector.broadcast %272 : vector<1x32xf32> to vector<32x32xf32>
    %275 = arith.mulf %273, %274 : vector<32x32xf32>
    %276 = arith.addf %270, %275 : vector<32x32xf32>
    %cst_65 = arith.constant dense<0xFF800000> : vector<32xf32>
    %277 = vector.multi_reduction <maximumf>, %276, %cst_65 [0] : vector<32x32xf32> to vector<32xf32>
    %278 = vector.shape_cast %277 : vector<32xf32> to vector<1x32xf32>
    %279 = vector.broadcast %278 : vector<1x32xf32> to vector<32x32xf32>
    %280 = arith.subf %276, %279 : vector<32x32xf32>
    %281 = math.exp %280 : vector<32x32xf32>
    %cst_66 = arith.constant dense<0.000000e+00> : vector<32xf32>
    %282 = vector.multi_reduction <add>, %281, %cst_66 [0] : vector<32x32xf32> to vector<32xf32>
    %283 = vector.shape_cast %282 : vector<32xf32> to vector<1x32xf32>
    %284 = tpu.reciprocal %283 {approx = true} : vector<1x32xf32> -> vector<1x32xf32>
    %285 = vector.broadcast %284 : vector<1x32xf32> to vector<32x32xf32>
    %286 = arith.mulf %281, %285 : vector<32x32xf32>
    %287 = vector.extract_strided_slice %182 {offsets = [0, 1], sizes = [32, 1], strides = [1, 1]} : vector<32x4xf32> to vector<32x1xf32>
    %288 = vector.broadcast %287 : vector<32x1xf32> to vector<32x32xf32>
    %289 = arith.mulf %286, %288 : vector<32x32xf32>
    %cst_67 = arith.constant dense<0.000000e+00> : vector<32xf32>
    %290 = vector.multi_reduction <add>, %289, %cst_67 [0] : vector<32x32xf32> to vector<32xf32>
    %291 = vector.shape_cast %290 : vector<32xf32> to vector<1x32xf32>
    %292 = vector.extract_strided_slice %189 {offsets = [0, 1], sizes = [32, 1], strides = [1, 1]} : vector<32x4xf32> to vector<32x1xf32>
    %293 = vector.broadcast %292 : vector<32x1xf32> to vector<32x32xf32>
    %294 = arith.mulf %286, %293 : vector<32x32xf32>
    %cst_68 = arith.constant dense<0.000000e+00> : vector<32xf32>
    %295 = vector.multi_reduction <add>, %294, %cst_68 [0] : vector<32x32xf32> to vector<32xf32>
    %296 = vector.shape_cast %295 : vector<32xf32> to vector<1x32xf32>
    %297 = vector.extract_strided_slice %196 {offsets = [0, 1], sizes = [32, 1], strides = [1, 1]} : vector<32x4xf32> to vector<32x1xf32>
    %298 = vector.extract_strided_slice %131 {offsets = [1, 0], sizes = [1, 32], strides = [1, 1]} : vector<4x32xf32> to vector<1x32xf32>
    %299 = vector.broadcast %297 : vector<32x1xf32> to vector<32x32xf32>
    %300 = vector.broadcast %298 : vector<1x32xf32> to vector<32x32xf32>
    %301 = arith.mulf %299, %300 : vector<32x32xf32>
    %302 = vector.extract_strided_slice %203 {offsets = [0, 1], sizes = [32, 1], strides = [1, 1]} : vector<32x4xf32> to vector<32x1xf32>
    %303 = vector.extract_strided_slice %141 {offsets = [1, 0], sizes = [1, 32], strides = [1, 1]} : vector<4x32xf32> to vector<1x32xf32>
    %304 = vector.broadcast %302 : vector<32x1xf32> to vector<32x32xf32>
    %305 = vector.broadcast %303 : vector<1x32xf32> to vector<32x32xf32>
    %306 = arith.mulf %304, %305 : vector<32x32xf32>
    %307 = arith.addf %301, %306 : vector<32x32xf32>
    %cst_69 = arith.constant dense<0xFF800000> : vector<32xf32>
    %308 = vector.multi_reduction <maximumf>, %307, %cst_69 [1] : vector<32x32xf32> to vector<32xf32>
    %309 = vector.shape_cast %308 : vector<32xf32> to vector<32x1xf32>
    %310 = vector.broadcast %309 : vector<32x1xf32> to vector<32x32xf32>
    %311 = arith.subf %307, %310 : vector<32x32xf32>
    %312 = math.exp %311 : vector<32x32xf32>
    %cst_70 = arith.constant dense<0.000000e+00> : vector<32xf32>
    %313 = vector.multi_reduction <add>, %312, %cst_70 [1] : vector<32x32xf32> to vector<32xf32>
    %314 = vector.shape_cast %313 : vector<32xf32> to vector<32x1xf32>
    %315 = tpu.reciprocal %314 {approx = true} : vector<32x1xf32> -> vector<32x1xf32>
    %316 = vector.broadcast %315 : vector<32x1xf32> to vector<32x32xf32>
    %317 = arith.mulf %312, %316 : vector<32x32xf32>
    %318 = vector.extract_strided_slice %151 {offsets = [1, 0], sizes = [1, 32], strides = [1, 1]} : vector<4x32xf32> to vector<1x32xf32>
    %319 = vector.broadcast %318 : vector<1x32xf32> to vector<32x32xf32>
    %320 = arith.mulf %317, %319 : vector<32x32xf32>
    %cst_71 = arith.constant dense<0.000000e+00> : vector<32xf32>
    %321 = vector.multi_reduction <add>, %320, %cst_71 [1] : vector<32x32xf32> to vector<32xf32>
    %322 = vector.shape_cast %321 : vector<32xf32> to vector<32x1xf32>
    %323 = vector.extract_strided_slice %161 {offsets = [1, 0], sizes = [1, 32], strides = [1, 1]} : vector<4x32xf32> to vector<1x32xf32>
    %324 = vector.broadcast %323 : vector<1x32xf32> to vector<32x32xf32>
    %325 = arith.mulf %317, %324 : vector<32x32xf32>
    %cst_72 = arith.constant dense<0.000000e+00> : vector<32xf32>
    %326 = vector.multi_reduction <add>, %325, %cst_72 [1] : vector<32x32xf32> to vector<32xf32>
    %327 = vector.shape_cast %326 : vector<32xf32> to vector<32x1xf32>
    %328 = vector.extract_strided_slice %168 {offsets = [0, 2], sizes = [32, 1], strides = [1, 1]} : vector<32x4xf32> to vector<32x1xf32>
    %329 = vector.extract_strided_slice %111 {offsets = [2, 0], sizes = [1, 32], strides = [1, 1]} : vector<4x32xf32> to vector<1x32xf32>
    %330 = vector.broadcast %328 : vector<32x1xf32> to vector<32x32xf32>
    %331 = vector.broadcast %329 : vector<1x32xf32> to vector<32x32xf32>
    %332 = arith.mulf %330, %331 : vector<32x32xf32>
    %333 = vector.extract_strided_slice %175 {offsets = [0, 2], sizes = [32, 1], strides = [1, 1]} : vector<32x4xf32> to vector<32x1xf32>
    %334 = vector.extract_strided_slice %121 {offsets = [2, 0], sizes = [1, 32], strides = [1, 1]} : vector<4x32xf32> to vector<1x32xf32>
    %335 = vector.broadcast %333 : vector<32x1xf32> to vector<32x32xf32>
    %336 = vector.broadcast %334 : vector<1x32xf32> to vector<32x32xf32>
    %337 = arith.mulf %335, %336 : vector<32x32xf32>
    %338 = arith.addf %332, %337 : vector<32x32xf32>
    %cst_73 = arith.constant dense<0xFF800000> : vector<32xf32>
    %339 = vector.multi_reduction <maximumf>, %338, %cst_73 [0] : vector<32x32xf32> to vector<32xf32>
    %340 = vector.shape_cast %339 : vector<32xf32> to vector<1x32xf32>
    %341 = vector.broadcast %340 : vector<1x32xf32> to vector<32x32xf32>
    %342 = arith.subf %338, %341 : vector<32x32xf32>
    %343 = math.exp %342 : vector<32x32xf32>
    %cst_74 = arith.constant dense<0.000000e+00> : vector<32xf32>
    %344 = vector.multi_reduction <add>, %343, %cst_74 [0] : vector<32x32xf32> to vector<32xf32>
    %345 = vector.shape_cast %344 : vector<32xf32> to vector<1x32xf32>
    %346 = tpu.reciprocal %345 {approx = true} : vector<1x32xf32> -> vector<1x32xf32>
    %347 = vector.broadcast %346 : vector<1x32xf32> to vector<32x32xf32>
    %348 = arith.mulf %343, %347 : vector<32x32xf32>
    %349 = vector.extract_strided_slice %182 {offsets = [0, 2], sizes = [32, 1], strides = [1, 1]} : vector<32x4xf32> to vector<32x1xf32>
    %350 = vector.broadcast %349 : vector<32x1xf32> to vector<32x32xf32>
    %351 = arith.mulf %348, %350 : vector<32x32xf32>
    %cst_75 = arith.constant dense<0.000000e+00> : vector<32xf32>
    %352 = vector.multi_reduction <add>, %351, %cst_75 [0] : vector<32x32xf32> to vector<32xf32>
    %353 = vector.shape_cast %352 : vector<32xf32> to vector<1x32xf32>
    %354 = vector.extract_strided_slice %189 {offsets = [0, 2], sizes = [32, 1], strides = [1, 1]} : vector<32x4xf32> to vector<32x1xf32>
    %355 = vector.broadcast %354 : vector<32x1xf32> to vector<32x32xf32>
    %356 = arith.mulf %348, %355 : vector<32x32xf32>
    %cst_76 = arith.constant dense<0.000000e+00> : vector<32xf32>
    %357 = vector.multi_reduction <add>, %356, %cst_76 [0] : vector<32x32xf32> to vector<32xf32>
    %358 = vector.shape_cast %357 : vector<32xf32> to vector<1x32xf32>
    %359 = vector.extract_strided_slice %196 {offsets = [0, 2], sizes = [32, 1], strides = [1, 1]} : vector<32x4xf32> to vector<32x1xf32>
    %360 = vector.extract_strided_slice %131 {offsets = [2, 0], sizes = [1, 32], strides = [1, 1]} : vector<4x32xf32> to vector<1x32xf32>
    %361 = vector.broadcast %359 : vector<32x1xf32> to vector<32x32xf32>
    %362 = vector.broadcast %360 : vector<1x32xf32> to vector<32x32xf32>
    %363 = arith.mulf %361, %362 : vector<32x32xf32>
    %364 = vector.extract_strided_slice %203 {offsets = [0, 2], sizes = [32, 1], strides = [1, 1]} : vector<32x4xf32> to vector<32x1xf32>
    %365 = vector.extract_strided_slice %141 {offsets = [2, 0], sizes = [1, 32], strides = [1, 1]} : vector<4x32xf32> to vector<1x32xf32>
    %366 = vector.broadcast %364 : vector<32x1xf32> to vector<32x32xf32>
    %367 = vector.broadcast %365 : vector<1x32xf32> to vector<32x32xf32>
    %368 = arith.mulf %366, %367 : vector<32x32xf32>
    %369 = arith.addf %363, %368 : vector<32x32xf32>
    %cst_77 = arith.constant dense<0xFF800000> : vector<32xf32>
    %370 = vector.multi_reduction <maximumf>, %369, %cst_77 [1] : vector<32x32xf32> to vector<32xf32>
    %371 = vector.shape_cast %370 : vector<32xf32> to vector<32x1xf32>
    %372 = vector.broadcast %371 : vector<32x1xf32> to vector<32x32xf32>
    %373 = arith.subf %369, %372 : vector<32x32xf32>
    %374 = math.exp %373 : vector<32x32xf32>
    %cst_78 = arith.constant dense<0.000000e+00> : vector<32xf32>
    %375 = vector.multi_reduction <add>, %374, %cst_78 [1] : vector<32x32xf32> to vector<32xf32>
    %376 = vector.shape_cast %375 : vector<32xf32> to vector<32x1xf32>
    %377 = tpu.reciprocal %376 {approx = true} : vector<32x1xf32> -> vector<32x1xf32>
    %378 = vector.broadcast %377 : vector<32x1xf32> to vector<32x32xf32>
    %379 = arith.mulf %374, %378 : vector<32x32xf32>
    %380 = vector.extract_strided_slice %151 {offsets = [2, 0], sizes = [1, 32], strides = [1, 1]} : vector<4x32xf32> to vector<1x32xf32>
    %381 = vector.broadcast %380 : vector<1x32xf32> to vector<32x32xf32>
    %382 = arith.mulf %379, %381 : vector<32x32xf32>
    %cst_79 = arith.constant dense<0.000000e+00> : vector<32xf32>
    %383 = vector.multi_reduction <add>, %382, %cst_79 [1] : vector<32x32xf32> to vector<32xf32>
    %384 = vector.shape_cast %383 : vector<32xf32> to vector<32x1xf32>
    %385 = vector.extract_strided_slice %161 {offsets = [2, 0], sizes = [1, 32], strides = [1, 1]} : vector<4x32xf32> to vector<1x32xf32>
    %386 = vector.broadcast %385 : vector<1x32xf32> to vector<32x32xf32>
    %387 = arith.mulf %379, %386 : vector<32x32xf32>
    %cst_80 = arith.constant dense<0.000000e+00> : vector<32xf32>
    %388 = vector.multi_reduction <add>, %387, %cst_80 [1] : vector<32x32xf32> to vector<32xf32>
    %389 = vector.shape_cast %388 : vector<32xf32> to vector<32x1xf32>
    %390 = vector.extract_strided_slice %168 {offsets = [0, 3], sizes = [32, 1], strides = [1, 1]} : vector<32x4xf32> to vector<32x1xf32>
    %391 = vector.extract_strided_slice %111 {offsets = [3, 0], sizes = [1, 32], strides = [1, 1]} : vector<4x32xf32> to vector<1x32xf32>
    %392 = vector.broadcast %390 : vector<32x1xf32> to vector<32x32xf32>
    %393 = vector.broadcast %391 : vector<1x32xf32> to vector<32x32xf32>
    %394 = arith.mulf %392, %393 : vector<32x32xf32>
    %395 = vector.extract_strided_slice %175 {offsets = [0, 3], sizes = [32, 1], strides = [1, 1]} : vector<32x4xf32> to vector<32x1xf32>
    %396 = vector.extract_strided_slice %121 {offsets = [3, 0], sizes = [1, 32], strides = [1, 1]} : vector<4x32xf32> to vector<1x32xf32>
    %397 = vector.broadcast %395 : vector<32x1xf32> to vector<32x32xf32>
    %398 = vector.broadcast %396 : vector<1x32xf32> to vector<32x32xf32>
    %399 = arith.mulf %397, %398 : vector<32x32xf32>
    %400 = arith.addf %394, %399 : vector<32x32xf32>
    %cst_81 = arith.constant dense<0xFF800000> : vector<32xf32>
    %401 = vector.multi_reduction <maximumf>, %400, %cst_81 [0] : vector<32x32xf32> to vector<32xf32>
    %402 = vector.shape_cast %401 : vector<32xf32> to vector<1x32xf32>
    %403 = vector.broadcast %402 : vector<1x32xf32> to vector<32x32xf32>
    %404 = arith.subf %400, %403 : vector<32x32xf32>
    %405 = math.exp %404 : vector<32x32xf32>
    %cst_82 = arith.constant dense<0.000000e+00> : vector<32xf32>
    %406 = vector.multi_reduction <add>, %405, %cst_82 [0] : vector<32x32xf32> to vector<32xf32>
    %407 = vector.shape_cast %406 : vector<32xf32> to vector<1x32xf32>
    %408 = tpu.reciprocal %407 {approx = true} : vector<1x32xf32> -> vector<1x32xf32>
    %409 = vector.broadcast %408 : vector<1x32xf32> to vector<32x32xf32>
    %410 = arith.mulf %405, %409 : vector<32x32xf32>
    %411 = vector.extract_strided_slice %182 {offsets = [0, 3], sizes = [32, 1], strides = [1, 1]} : vector<32x4xf32> to vector<32x1xf32>
    %412 = vector.broadcast %411 : vector<32x1xf32> to vector<32x32xf32>
    %413 = arith.mulf %410, %412 : vector<32x32xf32>
    %cst_83 = arith.constant dense<0.000000e+00> : vector<32xf32>
    %414 = vector.multi_reduction <add>, %413, %cst_83 [0] : vector<32x32xf32> to vector<32xf32>
    %415 = vector.shape_cast %414 : vector<32xf32> to vector<1x32xf32>
    %416 = vector.extract_strided_slice %189 {offsets = [0, 3], sizes = [32, 1], strides = [1, 1]} : vector<32x4xf32> to vector<32x1xf32>
    %417 = vector.broadcast %416 : vector<32x1xf32> to vector<32x32xf32>
    %418 = arith.mulf %410, %417 : vector<32x32xf32>
    %cst_84 = arith.constant dense<0.000000e+00> : vector<32xf32>
    %419 = vector.multi_reduction <add>, %418, %cst_84 [0] : vector<32x32xf32> to vector<32xf32>
    %420 = vector.shape_cast %419 : vector<32xf32> to vector<1x32xf32>
    %421 = vector.extract_strided_slice %196 {offsets = [0, 3], sizes = [32, 1], strides = [1, 1]} : vector<32x4xf32> to vector<32x1xf32>
    %422 = vector.extract_strided_slice %131 {offsets = [3, 0], sizes = [1, 32], strides = [1, 1]} : vector<4x32xf32> to vector<1x32xf32>
    %423 = vector.broadcast %421 : vector<32x1xf32> to vector<32x32xf32>
    %424 = vector.broadcast %422 : vector<1x32xf32> to vector<32x32xf32>
    %425 = arith.mulf %423, %424 : vector<32x32xf32>
    %426 = vector.extract_strided_slice %203 {offsets = [0, 3], sizes = [32, 1], strides = [1, 1]} : vector<32x4xf32> to vector<32x1xf32>
    %427 = vector.extract_strided_slice %141 {offsets = [3, 0], sizes = [1, 32], strides = [1, 1]} : vector<4x32xf32> to vector<1x32xf32>
    %428 = vector.broadcast %426 : vector<32x1xf32> to vector<32x32xf32>
    %429 = vector.broadcast %427 : vector<1x32xf32> to vector<32x32xf32>
    %430 = arith.mulf %428, %429 : vector<32x32xf32>
    %431 = arith.addf %425, %430 : vector<32x32xf32>
    %cst_85 = arith.constant dense<0xFF800000> : vector<32xf32>
    %432 = vector.multi_reduction <maximumf>, %431, %cst_85 [1] : vector<32x32xf32> to vector<32xf32>
    %433 = vector.shape_cast %432 : vector<32xf32> to vector<32x1xf32>
    %434 = vector.broadcast %433 : vector<32x1xf32> to vector<32x32xf32>
    %435 = arith.subf %431, %434 : vector<32x32xf32>
    %436 = math.exp %435 : vector<32x32xf32>
    %cst_86 = arith.constant dense<0.000000e+00> : vector<32xf32>
    %437 = vector.multi_reduction <add>, %436, %cst_86 [1] : vector<32x32xf32> to vector<32xf32>
    %438 = vector.shape_cast %437 : vector<32xf32> to vector<32x1xf32>
    %439 = tpu.reciprocal %438 {approx = true} : vector<32x1xf32> -> vector<32x1xf32>
    %440 = vector.broadcast %439 : vector<32x1xf32> to vector<32x32xf32>
    %441 = arith.mulf %436, %440 : vector<32x32xf32>
    %442 = vector.extract_strided_slice %151 {offsets = [3, 0], sizes = [1, 32], strides = [1, 1]} : vector<4x32xf32> to vector<1x32xf32>
    %443 = vector.broadcast %442 : vector<1x32xf32> to vector<32x32xf32>
    %444 = arith.mulf %441, %443 : vector<32x32xf32>
    %cst_87 = arith.constant dense<0.000000e+00> : vector<32xf32>
    %445 = vector.multi_reduction <add>, %444, %cst_87 [1] : vector<32x32xf32> to vector<32xf32>
    %446 = vector.shape_cast %445 : vector<32xf32> to vector<32x1xf32>
    %447 = vector.extract_strided_slice %161 {offsets = [3, 0], sizes = [1, 32], strides = [1, 1]} : vector<4x32xf32> to vector<1x32xf32>
    %448 = vector.broadcast %447 : vector<1x32xf32> to vector<32x32xf32>
    %449 = arith.mulf %441, %448 : vector<32x32xf32>
    %cst_88 = arith.constant dense<0.000000e+00> : vector<32xf32>
    %450 = vector.multi_reduction <add>, %449, %cst_88 [1] : vector<32x32xf32> to vector<32xf32>
    %451 = vector.shape_cast %450 : vector<32xf32> to vector<32x1xf32>
    %452 = tpu.concatenate %229, %291, %353, %415 in 0 : vector<1x32xf32>, vector<1x32xf32>, vector<1x32xf32>, vector<1x32xf32> -> vector<4x32xf32>
    %453 = tpu.concatenate %234, %296, %358, %420 in 0 : vector<1x32xf32>, vector<1x32xf32>, vector<1x32xf32>, vector<1x32xf32> -> vector<4x32xf32>
    %c22 = arith.constant 22 : index
    %454 = memref.load %arg2[%c22] : memref<232xf32, #tpu.memory_space<smem>>
    %455 = vector.broadcast %454 : f32 to vector<4x32xf32>
    %456 = arith.mulf %452, %455 : vector<4x32xf32>
    %c24 = arith.constant 24 : index
    %457 = memref.load %arg2[%c24] : memref<232xf32, #tpu.memory_space<smem>>
    %458 = vector.broadcast %457 : f32 to vector<4x32xf32>
    %459 = arith.mulf %453, %458 : vector<4x32xf32>
    %460 = arith.addf %456, %459 : vector<4x32xf32>
    %c26 = arith.constant 26 : index
    %461 = memref.load %arg2[%c26] : memref<232xf32, #tpu.memory_space<smem>>
    %462 = vector.broadcast %461 : f32 to vector<4x32xf32>
    %463 = arith.addf %460, %462 : vector<4x32xf32>
    %c23 = arith.constant 23 : index
    %464 = memref.load %arg2[%c23] : memref<232xf32, #tpu.memory_space<smem>>
    %465 = vector.broadcast %464 : f32 to vector<4x32xf32>
    %466 = arith.mulf %452, %465 : vector<4x32xf32>
    %c25 = arith.constant 25 : index
    %467 = memref.load %arg2[%c25] : memref<232xf32, #tpu.memory_space<smem>>
    %468 = vector.broadcast %467 : f32 to vector<4x32xf32>
    %469 = arith.mulf %453, %468 : vector<4x32xf32>
    %470 = arith.addf %466, %469 : vector<4x32xf32>
    %c27 = arith.constant 27 : index
    %471 = memref.load %arg2[%c27] : memref<232xf32, #tpu.memory_space<smem>>
    %472 = vector.broadcast %471 : f32 to vector<4x32xf32>
    %473 = arith.addf %470, %472 : vector<4x32xf32>
    %474 = arith.addf %89, %463 : vector<4x32xf32>
    %475 = arith.addf %93, %473 : vector<4x32xf32>
    %476 = arith.addf %474, %475 : vector<4x32xf32>
    %cst_89 = arith.constant 5.000000e-01 : f32
    %477 = vector.broadcast %cst_89 : f32 to vector<4x32xf32>
    %478 = arith.mulf %476, %477 : vector<4x32xf32>
    %479 = arith.subf %474, %478 : vector<4x32xf32>
    %480 = arith.subf %475, %478 : vector<4x32xf32>
    %481 = arith.mulf %479, %479 : vector<4x32xf32>
    %482 = arith.mulf %480, %480 : vector<4x32xf32>
    %483 = arith.addf %481, %482 : vector<4x32xf32>
    %cst_90 = arith.constant 5.000000e-01 : f32
    %484 = vector.broadcast %cst_90 : f32 to vector<4x32xf32>
    %485 = arith.mulf %483, %484 : vector<4x32xf32>
    %cst_91 = arith.constant 9.99999974E-6 : f32
    %486 = vector.broadcast %cst_91 : f32 to vector<4x32xf32>
    %487 = arith.addf %485, %486 : vector<4x32xf32>
    %488 = math.rsqrt %487 : vector<4x32xf32>
    %489 = arith.mulf %479, %488 : vector<4x32xf32>
    %c28 = arith.constant 28 : index
    %490 = memref.load %arg2[%c28] : memref<232xf32, #tpu.memory_space<smem>>
    %491 = vector.broadcast %490 : f32 to vector<4x32xf32>
    %492 = arith.mulf %489, %491 : vector<4x32xf32>
    %c30 = arith.constant 30 : index
    %493 = memref.load %arg2[%c30] : memref<232xf32, #tpu.memory_space<smem>>
    %494 = vector.broadcast %493 : f32 to vector<4x32xf32>
    %495 = arith.addf %492, %494 : vector<4x32xf32>
    %496 = arith.mulf %480, %488 : vector<4x32xf32>
    %c29 = arith.constant 29 : index
    %497 = memref.load %arg2[%c29] : memref<232xf32, #tpu.memory_space<smem>>
    %498 = vector.broadcast %497 : f32 to vector<4x32xf32>
    %499 = arith.mulf %496, %498 : vector<4x32xf32>
    %c31 = arith.constant 31 : index
    %500 = memref.load %arg2[%c31] : memref<232xf32, #tpu.memory_space<smem>>
    %501 = vector.broadcast %500 : f32 to vector<4x32xf32>
    %502 = arith.addf %499, %501 : vector<4x32xf32>
    %cst_92 = arith.constant 0.000000e+00 : f32
    %503 = vector.broadcast %cst_92 : f32 to vector<4x32xf32>
    %cst_93 = arith.constant 0.000000e+00 : f32
    %504 = vector.broadcast %cst_93 : f32 to vector<4x32xf32>
    %c32 = arith.constant 32 : index
    %505 = memref.load %arg2[%c32] : memref<232xf32, #tpu.memory_space<smem>>
    %506 = vector.broadcast %505 : f32 to vector<4x32xf32>
    %507 = arith.mulf %495, %506 : vector<4x32xf32>
    %c48 = arith.constant 48 : index
    %508 = memref.load %arg2[%c48] : memref<232xf32, #tpu.memory_space<smem>>
    %509 = vector.broadcast %508 : f32 to vector<4x32xf32>
    %510 = arith.mulf %502, %509 : vector<4x32xf32>
    %511 = arith.addf %507, %510 : vector<4x32xf32>
    %c64 = arith.constant 64 : index
    %512 = memref.load %arg2[%c64] : memref<232xf32, #tpu.memory_space<smem>>
    %513 = vector.broadcast %512 : f32 to vector<4x32xf32>
    %514 = arith.addf %511, %513 : vector<4x32xf32>
    %cst_94 = arith.constant 0.000000e+00 : f32
    %515 = vector.broadcast %cst_94 : f32 to vector<4x32xf32>
    %516 = arith.maximumf %514, %515 : vector<4x32xf32>
    %c80 = arith.constant 80 : index
    %517 = memref.load %arg2[%c80] : memref<232xf32, #tpu.memory_space<smem>>
    %518 = vector.broadcast %517 : f32 to vector<4x32xf32>
    %519 = arith.mulf %516, %518 : vector<4x32xf32>
    %520 = arith.addf %503, %519 : vector<4x32xf32>
    %c96 = arith.constant 96 : index
    %521 = memref.load %arg2[%c96] : memref<232xf32, #tpu.memory_space<smem>>
    %522 = vector.broadcast %521 : f32 to vector<4x32xf32>
    %523 = arith.mulf %516, %522 : vector<4x32xf32>
    %524 = arith.addf %504, %523 : vector<4x32xf32>
    %c33 = arith.constant 33 : index
    %525 = memref.load %arg2[%c33] : memref<232xf32, #tpu.memory_space<smem>>
    %526 = vector.broadcast %525 : f32 to vector<4x32xf32>
    %527 = arith.mulf %495, %526 : vector<4x32xf32>
    %c49 = arith.constant 49 : index
    %528 = memref.load %arg2[%c49] : memref<232xf32, #tpu.memory_space<smem>>
    %529 = vector.broadcast %528 : f32 to vector<4x32xf32>
    %530 = arith.mulf %502, %529 : vector<4x32xf32>
    %531 = arith.addf %527, %530 : vector<4x32xf32>
    %c65 = arith.constant 65 : index
    %532 = memref.load %arg2[%c65] : memref<232xf32, #tpu.memory_space<smem>>
    %533 = vector.broadcast %532 : f32 to vector<4x32xf32>
    %534 = arith.addf %531, %533 : vector<4x32xf32>
    %cst_95 = arith.constant 0.000000e+00 : f32
    %535 = vector.broadcast %cst_95 : f32 to vector<4x32xf32>
    %536 = arith.maximumf %534, %535 : vector<4x32xf32>
    %c81 = arith.constant 81 : index
    %537 = memref.load %arg2[%c81] : memref<232xf32, #tpu.memory_space<smem>>
    %538 = vector.broadcast %537 : f32 to vector<4x32xf32>
    %539 = arith.mulf %536, %538 : vector<4x32xf32>
    %540 = arith.addf %520, %539 : vector<4x32xf32>
    %c97 = arith.constant 97 : index
    %541 = memref.load %arg2[%c97] : memref<232xf32, #tpu.memory_space<smem>>
    %542 = vector.broadcast %541 : f32 to vector<4x32xf32>
    %543 = arith.mulf %536, %542 : vector<4x32xf32>
    %544 = arith.addf %524, %543 : vector<4x32xf32>
    %c34 = arith.constant 34 : index
    %545 = memref.load %arg2[%c34] : memref<232xf32, #tpu.memory_space<smem>>
    %546 = vector.broadcast %545 : f32 to vector<4x32xf32>
    %547 = arith.mulf %495, %546 : vector<4x32xf32>
    %c50 = arith.constant 50 : index
    %548 = memref.load %arg2[%c50] : memref<232xf32, #tpu.memory_space<smem>>
    %549 = vector.broadcast %548 : f32 to vector<4x32xf32>
    %550 = arith.mulf %502, %549 : vector<4x32xf32>
    %551 = arith.addf %547, %550 : vector<4x32xf32>
    %c66 = arith.constant 66 : index
    %552 = memref.load %arg2[%c66] : memref<232xf32, #tpu.memory_space<smem>>
    %553 = vector.broadcast %552 : f32 to vector<4x32xf32>
    %554 = arith.addf %551, %553 : vector<4x32xf32>
    %cst_96 = arith.constant 0.000000e+00 : f32
    %555 = vector.broadcast %cst_96 : f32 to vector<4x32xf32>
    %556 = arith.maximumf %554, %555 : vector<4x32xf32>
    %c82 = arith.constant 82 : index
    %557 = memref.load %arg2[%c82] : memref<232xf32, #tpu.memory_space<smem>>
    %558 = vector.broadcast %557 : f32 to vector<4x32xf32>
    %559 = arith.mulf %556, %558 : vector<4x32xf32>
    %560 = arith.addf %540, %559 : vector<4x32xf32>
    %c98 = arith.constant 98 : index
    %561 = memref.load %arg2[%c98] : memref<232xf32, #tpu.memory_space<smem>>
    %562 = vector.broadcast %561 : f32 to vector<4x32xf32>
    %563 = arith.mulf %556, %562 : vector<4x32xf32>
    %564 = arith.addf %544, %563 : vector<4x32xf32>
    %c35 = arith.constant 35 : index
    %565 = memref.load %arg2[%c35] : memref<232xf32, #tpu.memory_space<smem>>
    %566 = vector.broadcast %565 : f32 to vector<4x32xf32>
    %567 = arith.mulf %495, %566 : vector<4x32xf32>
    %c51 = arith.constant 51 : index
    %568 = memref.load %arg2[%c51] : memref<232xf32, #tpu.memory_space<smem>>
    %569 = vector.broadcast %568 : f32 to vector<4x32xf32>
    %570 = arith.mulf %502, %569 : vector<4x32xf32>
    %571 = arith.addf %567, %570 : vector<4x32xf32>
    %c67 = arith.constant 67 : index
    %572 = memref.load %arg2[%c67] : memref<232xf32, #tpu.memory_space<smem>>
    %573 = vector.broadcast %572 : f32 to vector<4x32xf32>
    %574 = arith.addf %571, %573 : vector<4x32xf32>
    %cst_97 = arith.constant 0.000000e+00 : f32
    %575 = vector.broadcast %cst_97 : f32 to vector<4x32xf32>
    %576 = arith.maximumf %574, %575 : vector<4x32xf32>
    %c83 = arith.constant 83 : index
    %577 = memref.load %arg2[%c83] : memref<232xf32, #tpu.memory_space<smem>>
    %578 = vector.broadcast %577 : f32 to vector<4x32xf32>
    %579 = arith.mulf %576, %578 : vector<4x32xf32>
    %580 = arith.addf %560, %579 : vector<4x32xf32>
    %c99 = arith.constant 99 : index
    %581 = memref.load %arg2[%c99] : memref<232xf32, #tpu.memory_space<smem>>
    %582 = vector.broadcast %581 : f32 to vector<4x32xf32>
    %583 = arith.mulf %576, %582 : vector<4x32xf32>
    %584 = arith.addf %564, %583 : vector<4x32xf32>
    %c36 = arith.constant 36 : index
    %585 = memref.load %arg2[%c36] : memref<232xf32, #tpu.memory_space<smem>>
    %586 = vector.broadcast %585 : f32 to vector<4x32xf32>
    %587 = arith.mulf %495, %586 : vector<4x32xf32>
    %c52 = arith.constant 52 : index
    %588 = memref.load %arg2[%c52] : memref<232xf32, #tpu.memory_space<smem>>
    %589 = vector.broadcast %588 : f32 to vector<4x32xf32>
    %590 = arith.mulf %502, %589 : vector<4x32xf32>
    %591 = arith.addf %587, %590 : vector<4x32xf32>
    %c68 = arith.constant 68 : index
    %592 = memref.load %arg2[%c68] : memref<232xf32, #tpu.memory_space<smem>>
    %593 = vector.broadcast %592 : f32 to vector<4x32xf32>
    %594 = arith.addf %591, %593 : vector<4x32xf32>
    %cst_98 = arith.constant 0.000000e+00 : f32
    %595 = vector.broadcast %cst_98 : f32 to vector<4x32xf32>
    %596 = arith.maximumf %594, %595 : vector<4x32xf32>
    %c84 = arith.constant 84 : index
    %597 = memref.load %arg2[%c84] : memref<232xf32, #tpu.memory_space<smem>>
    %598 = vector.broadcast %597 : f32 to vector<4x32xf32>
    %599 = arith.mulf %596, %598 : vector<4x32xf32>
    %600 = arith.addf %580, %599 : vector<4x32xf32>
    %c100 = arith.constant 100 : index
    %601 = memref.load %arg2[%c100] : memref<232xf32, #tpu.memory_space<smem>>
    %602 = vector.broadcast %601 : f32 to vector<4x32xf32>
    %603 = arith.mulf %596, %602 : vector<4x32xf32>
    %604 = arith.addf %584, %603 : vector<4x32xf32>
    %c37 = arith.constant 37 : index
    %605 = memref.load %arg2[%c37] : memref<232xf32, #tpu.memory_space<smem>>
    %606 = vector.broadcast %605 : f32 to vector<4x32xf32>
    %607 = arith.mulf %495, %606 : vector<4x32xf32>
    %c53 = arith.constant 53 : index
    %608 = memref.load %arg2[%c53] : memref<232xf32, #tpu.memory_space<smem>>
    %609 = vector.broadcast %608 : f32 to vector<4x32xf32>
    %610 = arith.mulf %502, %609 : vector<4x32xf32>
    %611 = arith.addf %607, %610 : vector<4x32xf32>
    %c69 = arith.constant 69 : index
    %612 = memref.load %arg2[%c69] : memref<232xf32, #tpu.memory_space<smem>>
    %613 = vector.broadcast %612 : f32 to vector<4x32xf32>
    %614 = arith.addf %611, %613 : vector<4x32xf32>
    %cst_99 = arith.constant 0.000000e+00 : f32
    %615 = vector.broadcast %cst_99 : f32 to vector<4x32xf32>
    %616 = arith.maximumf %614, %615 : vector<4x32xf32>
    %c85 = arith.constant 85 : index
    %617 = memref.load %arg2[%c85] : memref<232xf32, #tpu.memory_space<smem>>
    %618 = vector.broadcast %617 : f32 to vector<4x32xf32>
    %619 = arith.mulf %616, %618 : vector<4x32xf32>
    %620 = arith.addf %600, %619 : vector<4x32xf32>
    %c101 = arith.constant 101 : index
    %621 = memref.load %arg2[%c101] : memref<232xf32, #tpu.memory_space<smem>>
    %622 = vector.broadcast %621 : f32 to vector<4x32xf32>
    %623 = arith.mulf %616, %622 : vector<4x32xf32>
    %624 = arith.addf %604, %623 : vector<4x32xf32>
    %c38 = arith.constant 38 : index
    %625 = memref.load %arg2[%c38] : memref<232xf32, #tpu.memory_space<smem>>
    %626 = vector.broadcast %625 : f32 to vector<4x32xf32>
    %627 = arith.mulf %495, %626 : vector<4x32xf32>
    %c54 = arith.constant 54 : index
    %628 = memref.load %arg2[%c54] : memref<232xf32, #tpu.memory_space<smem>>
    %629 = vector.broadcast %628 : f32 to vector<4x32xf32>
    %630 = arith.mulf %502, %629 : vector<4x32xf32>
    %631 = arith.addf %627, %630 : vector<4x32xf32>
    %c70 = arith.constant 70 : index
    %632 = memref.load %arg2[%c70] : memref<232xf32, #tpu.memory_space<smem>>
    %633 = vector.broadcast %632 : f32 to vector<4x32xf32>
    %634 = arith.addf %631, %633 : vector<4x32xf32>
    %cst_100 = arith.constant 0.000000e+00 : f32
    %635 = vector.broadcast %cst_100 : f32 to vector<4x32xf32>
    %636 = arith.maximumf %634, %635 : vector<4x32xf32>
    %c86 = arith.constant 86 : index
    %637 = memref.load %arg2[%c86] : memref<232xf32, #tpu.memory_space<smem>>
    %638 = vector.broadcast %637 : f32 to vector<4x32xf32>
    %639 = arith.mulf %636, %638 : vector<4x32xf32>
    %640 = arith.addf %620, %639 : vector<4x32xf32>
    %c102 = arith.constant 102 : index
    %641 = memref.load %arg2[%c102] : memref<232xf32, #tpu.memory_space<smem>>
    %642 = vector.broadcast %641 : f32 to vector<4x32xf32>
    %643 = arith.mulf %636, %642 : vector<4x32xf32>
    %644 = arith.addf %624, %643 : vector<4x32xf32>
    %c39 = arith.constant 39 : index
    %645 = memref.load %arg2[%c39] : memref<232xf32, #tpu.memory_space<smem>>
    %646 = vector.broadcast %645 : f32 to vector<4x32xf32>
    %647 = arith.mulf %495, %646 : vector<4x32xf32>
    %c55 = arith.constant 55 : index
    %648 = memref.load %arg2[%c55] : memref<232xf32, #tpu.memory_space<smem>>
    %649 = vector.broadcast %648 : f32 to vector<4x32xf32>
    %650 = arith.mulf %502, %649 : vector<4x32xf32>
    %651 = arith.addf %647, %650 : vector<4x32xf32>
    %c71 = arith.constant 71 : index
    %652 = memref.load %arg2[%c71] : memref<232xf32, #tpu.memory_space<smem>>
    %653 = vector.broadcast %652 : f32 to vector<4x32xf32>
    %654 = arith.addf %651, %653 : vector<4x32xf32>
    %cst_101 = arith.constant 0.000000e+00 : f32
    %655 = vector.broadcast %cst_101 : f32 to vector<4x32xf32>
    %656 = arith.maximumf %654, %655 : vector<4x32xf32>
    %c87 = arith.constant 87 : index
    %657 = memref.load %arg2[%c87] : memref<232xf32, #tpu.memory_space<smem>>
    %658 = vector.broadcast %657 : f32 to vector<4x32xf32>
    %659 = arith.mulf %656, %658 : vector<4x32xf32>
    %660 = arith.addf %640, %659 : vector<4x32xf32>
    %c103 = arith.constant 103 : index
    %661 = memref.load %arg2[%c103] : memref<232xf32, #tpu.memory_space<smem>>
    %662 = vector.broadcast %661 : f32 to vector<4x32xf32>
    %663 = arith.mulf %656, %662 : vector<4x32xf32>
    %664 = arith.addf %644, %663 : vector<4x32xf32>
    %c40 = arith.constant 40 : index
    %665 = memref.load %arg2[%c40] : memref<232xf32, #tpu.memory_space<smem>>
    %666 = vector.broadcast %665 : f32 to vector<4x32xf32>
    %667 = arith.mulf %495, %666 : vector<4x32xf32>
    %c56 = arith.constant 56 : index
    %668 = memref.load %arg2[%c56] : memref<232xf32, #tpu.memory_space<smem>>
    %669 = vector.broadcast %668 : f32 to vector<4x32xf32>
    %670 = arith.mulf %502, %669 : vector<4x32xf32>
    %671 = arith.addf %667, %670 : vector<4x32xf32>
    %c72 = arith.constant 72 : index
    %672 = memref.load %arg2[%c72] : memref<232xf32, #tpu.memory_space<smem>>
    %673 = vector.broadcast %672 : f32 to vector<4x32xf32>
    %674 = arith.addf %671, %673 : vector<4x32xf32>
    %cst_102 = arith.constant 0.000000e+00 : f32
    %675 = vector.broadcast %cst_102 : f32 to vector<4x32xf32>
    %676 = arith.maximumf %674, %675 : vector<4x32xf32>
    %c88 = arith.constant 88 : index
    %677 = memref.load %arg2[%c88] : memref<232xf32, #tpu.memory_space<smem>>
    %678 = vector.broadcast %677 : f32 to vector<4x32xf32>
    %679 = arith.mulf %676, %678 : vector<4x32xf32>
    %680 = arith.addf %660, %679 : vector<4x32xf32>
    %c104 = arith.constant 104 : index
    %681 = memref.load %arg2[%c104] : memref<232xf32, #tpu.memory_space<smem>>
    %682 = vector.broadcast %681 : f32 to vector<4x32xf32>
    %683 = arith.mulf %676, %682 : vector<4x32xf32>
    %684 = arith.addf %664, %683 : vector<4x32xf32>
    %c41 = arith.constant 41 : index
    %685 = memref.load %arg2[%c41] : memref<232xf32, #tpu.memory_space<smem>>
    %686 = vector.broadcast %685 : f32 to vector<4x32xf32>
    %687 = arith.mulf %495, %686 : vector<4x32xf32>
    %c57 = arith.constant 57 : index
    %688 = memref.load %arg2[%c57] : memref<232xf32, #tpu.memory_space<smem>>
    %689 = vector.broadcast %688 : f32 to vector<4x32xf32>
    %690 = arith.mulf %502, %689 : vector<4x32xf32>
    %691 = arith.addf %687, %690 : vector<4x32xf32>
    %c73 = arith.constant 73 : index
    %692 = memref.load %arg2[%c73] : memref<232xf32, #tpu.memory_space<smem>>
    %693 = vector.broadcast %692 : f32 to vector<4x32xf32>
    %694 = arith.addf %691, %693 : vector<4x32xf32>
    %cst_103 = arith.constant 0.000000e+00 : f32
    %695 = vector.broadcast %cst_103 : f32 to vector<4x32xf32>
    %696 = arith.maximumf %694, %695 : vector<4x32xf32>
    %c89 = arith.constant 89 : index
    %697 = memref.load %arg2[%c89] : memref<232xf32, #tpu.memory_space<smem>>
    %698 = vector.broadcast %697 : f32 to vector<4x32xf32>
    %699 = arith.mulf %696, %698 : vector<4x32xf32>
    %700 = arith.addf %680, %699 : vector<4x32xf32>
    %c105 = arith.constant 105 : index
    %701 = memref.load %arg2[%c105] : memref<232xf32, #tpu.memory_space<smem>>
    %702 = vector.broadcast %701 : f32 to vector<4x32xf32>
    %703 = arith.mulf %696, %702 : vector<4x32xf32>
    %704 = arith.addf %684, %703 : vector<4x32xf32>
    %c42 = arith.constant 42 : index
    %705 = memref.load %arg2[%c42] : memref<232xf32, #tpu.memory_space<smem>>
    %706 = vector.broadcast %705 : f32 to vector<4x32xf32>
    %707 = arith.mulf %495, %706 : vector<4x32xf32>
    %c58 = arith.constant 58 : index
    %708 = memref.load %arg2[%c58] : memref<232xf32, #tpu.memory_space<smem>>
    %709 = vector.broadcast %708 : f32 to vector<4x32xf32>
    %710 = arith.mulf %502, %709 : vector<4x32xf32>
    %711 = arith.addf %707, %710 : vector<4x32xf32>
    %c74 = arith.constant 74 : index
    %712 = memref.load %arg2[%c74] : memref<232xf32, #tpu.memory_space<smem>>
    %713 = vector.broadcast %712 : f32 to vector<4x32xf32>
    %714 = arith.addf %711, %713 : vector<4x32xf32>
    %cst_104 = arith.constant 0.000000e+00 : f32
    %715 = vector.broadcast %cst_104 : f32 to vector<4x32xf32>
    %716 = arith.maximumf %714, %715 : vector<4x32xf32>
    %c90 = arith.constant 90 : index
    %717 = memref.load %arg2[%c90] : memref<232xf32, #tpu.memory_space<smem>>
    %718 = vector.broadcast %717 : f32 to vector<4x32xf32>
    %719 = arith.mulf %716, %718 : vector<4x32xf32>
    %720 = arith.addf %700, %719 : vector<4x32xf32>
    %c106 = arith.constant 106 : index
    %721 = memref.load %arg2[%c106] : memref<232xf32, #tpu.memory_space<smem>>
    %722 = vector.broadcast %721 : f32 to vector<4x32xf32>
    %723 = arith.mulf %716, %722 : vector<4x32xf32>
    %724 = arith.addf %704, %723 : vector<4x32xf32>
    %c43 = arith.constant 43 : index
    %725 = memref.load %arg2[%c43] : memref<232xf32, #tpu.memory_space<smem>>
    %726 = vector.broadcast %725 : f32 to vector<4x32xf32>
    %727 = arith.mulf %495, %726 : vector<4x32xf32>
    %c59 = arith.constant 59 : index
    %728 = memref.load %arg2[%c59] : memref<232xf32, #tpu.memory_space<smem>>
    %729 = vector.broadcast %728 : f32 to vector<4x32xf32>
    %730 = arith.mulf %502, %729 : vector<4x32xf32>
    %731 = arith.addf %727, %730 : vector<4x32xf32>
    %c75 = arith.constant 75 : index
    %732 = memref.load %arg2[%c75] : memref<232xf32, #tpu.memory_space<smem>>
    %733 = vector.broadcast %732 : f32 to vector<4x32xf32>
    %734 = arith.addf %731, %733 : vector<4x32xf32>
    %cst_105 = arith.constant 0.000000e+00 : f32
    %735 = vector.broadcast %cst_105 : f32 to vector<4x32xf32>
    %736 = arith.maximumf %734, %735 : vector<4x32xf32>
    %c91 = arith.constant 91 : index
    %737 = memref.load %arg2[%c91] : memref<232xf32, #tpu.memory_space<smem>>
    %738 = vector.broadcast %737 : f32 to vector<4x32xf32>
    %739 = arith.mulf %736, %738 : vector<4x32xf32>
    %740 = arith.addf %720, %739 : vector<4x32xf32>
    %c107 = arith.constant 107 : index
    %741 = memref.load %arg2[%c107] : memref<232xf32, #tpu.memory_space<smem>>
    %742 = vector.broadcast %741 : f32 to vector<4x32xf32>
    %743 = arith.mulf %736, %742 : vector<4x32xf32>
    %744 = arith.addf %724, %743 : vector<4x32xf32>
    %c44 = arith.constant 44 : index
    %745 = memref.load %arg2[%c44] : memref<232xf32, #tpu.memory_space<smem>>
    %746 = vector.broadcast %745 : f32 to vector<4x32xf32>
    %747 = arith.mulf %495, %746 : vector<4x32xf32>
    %c60 = arith.constant 60 : index
    %748 = memref.load %arg2[%c60] : memref<232xf32, #tpu.memory_space<smem>>
    %749 = vector.broadcast %748 : f32 to vector<4x32xf32>
    %750 = arith.mulf %502, %749 : vector<4x32xf32>
    %751 = arith.addf %747, %750 : vector<4x32xf32>
    %c76 = arith.constant 76 : index
    %752 = memref.load %arg2[%c76] : memref<232xf32, #tpu.memory_space<smem>>
    %753 = vector.broadcast %752 : f32 to vector<4x32xf32>
    %754 = arith.addf %751, %753 : vector<4x32xf32>
    %cst_106 = arith.constant 0.000000e+00 : f32
    %755 = vector.broadcast %cst_106 : f32 to vector<4x32xf32>
    %756 = arith.maximumf %754, %755 : vector<4x32xf32>
    %c92 = arith.constant 92 : index
    %757 = memref.load %arg2[%c92] : memref<232xf32, #tpu.memory_space<smem>>
    %758 = vector.broadcast %757 : f32 to vector<4x32xf32>
    %759 = arith.mulf %756, %758 : vector<4x32xf32>
    %760 = arith.addf %740, %759 : vector<4x32xf32>
    %c108 = arith.constant 108 : index
    %761 = memref.load %arg2[%c108] : memref<232xf32, #tpu.memory_space<smem>>
    %762 = vector.broadcast %761 : f32 to vector<4x32xf32>
    %763 = arith.mulf %756, %762 : vector<4x32xf32>
    %764 = arith.addf %744, %763 : vector<4x32xf32>
    %c45 = arith.constant 45 : index
    %765 = memref.load %arg2[%c45] : memref<232xf32, #tpu.memory_space<smem>>
    %766 = vector.broadcast %765 : f32 to vector<4x32xf32>
    %767 = arith.mulf %495, %766 : vector<4x32xf32>
    %c61 = arith.constant 61 : index
    %768 = memref.load %arg2[%c61] : memref<232xf32, #tpu.memory_space<smem>>
    %769 = vector.broadcast %768 : f32 to vector<4x32xf32>
    %770 = arith.mulf %502, %769 : vector<4x32xf32>
    %771 = arith.addf %767, %770 : vector<4x32xf32>
    %c77 = arith.constant 77 : index
    %772 = memref.load %arg2[%c77] : memref<232xf32, #tpu.memory_space<smem>>
    %773 = vector.broadcast %772 : f32 to vector<4x32xf32>
    %774 = arith.addf %771, %773 : vector<4x32xf32>
    %cst_107 = arith.constant 0.000000e+00 : f32
    %775 = vector.broadcast %cst_107 : f32 to vector<4x32xf32>
    %776 = arith.maximumf %774, %775 : vector<4x32xf32>
    %c93 = arith.constant 93 : index
    %777 = memref.load %arg2[%c93] : memref<232xf32, #tpu.memory_space<smem>>
    %778 = vector.broadcast %777 : f32 to vector<4x32xf32>
    %779 = arith.mulf %776, %778 : vector<4x32xf32>
    %780 = arith.addf %760, %779 : vector<4x32xf32>
    %c109 = arith.constant 109 : index
    %781 = memref.load %arg2[%c109] : memref<232xf32, #tpu.memory_space<smem>>
    %782 = vector.broadcast %781 : f32 to vector<4x32xf32>
    %783 = arith.mulf %776, %782 : vector<4x32xf32>
    %784 = arith.addf %764, %783 : vector<4x32xf32>
    %c46 = arith.constant 46 : index
    %785 = memref.load %arg2[%c46] : memref<232xf32, #tpu.memory_space<smem>>
    %786 = vector.broadcast %785 : f32 to vector<4x32xf32>
    %787 = arith.mulf %495, %786 : vector<4x32xf32>
    %c62 = arith.constant 62 : index
    %788 = memref.load %arg2[%c62] : memref<232xf32, #tpu.memory_space<smem>>
    %789 = vector.broadcast %788 : f32 to vector<4x32xf32>
    %790 = arith.mulf %502, %789 : vector<4x32xf32>
    %791 = arith.addf %787, %790 : vector<4x32xf32>
    %c78 = arith.constant 78 : index
    %792 = memref.load %arg2[%c78] : memref<232xf32, #tpu.memory_space<smem>>
    %793 = vector.broadcast %792 : f32 to vector<4x32xf32>
    %794 = arith.addf %791, %793 : vector<4x32xf32>
    %cst_108 = arith.constant 0.000000e+00 : f32
    %795 = vector.broadcast %cst_108 : f32 to vector<4x32xf32>
    %796 = arith.maximumf %794, %795 : vector<4x32xf32>
    %c94 = arith.constant 94 : index
    %797 = memref.load %arg2[%c94] : memref<232xf32, #tpu.memory_space<smem>>
    %798 = vector.broadcast %797 : f32 to vector<4x32xf32>
    %799 = arith.mulf %796, %798 : vector<4x32xf32>
    %800 = arith.addf %780, %799 : vector<4x32xf32>
    %c110 = arith.constant 110 : index
    %801 = memref.load %arg2[%c110] : memref<232xf32, #tpu.memory_space<smem>>
    %802 = vector.broadcast %801 : f32 to vector<4x32xf32>
    %803 = arith.mulf %796, %802 : vector<4x32xf32>
    %804 = arith.addf %784, %803 : vector<4x32xf32>
    %c47 = arith.constant 47 : index
    %805 = memref.load %arg2[%c47] : memref<232xf32, #tpu.memory_space<smem>>
    %806 = vector.broadcast %805 : f32 to vector<4x32xf32>
    %807 = arith.mulf %495, %806 : vector<4x32xf32>
    %c63 = arith.constant 63 : index
    %808 = memref.load %arg2[%c63] : memref<232xf32, #tpu.memory_space<smem>>
    %809 = vector.broadcast %808 : f32 to vector<4x32xf32>
    %810 = arith.mulf %502, %809 : vector<4x32xf32>
    %811 = arith.addf %807, %810 : vector<4x32xf32>
    %c79 = arith.constant 79 : index
    %812 = memref.load %arg2[%c79] : memref<232xf32, #tpu.memory_space<smem>>
    %813 = vector.broadcast %812 : f32 to vector<4x32xf32>
    %814 = arith.addf %811, %813 : vector<4x32xf32>
    %cst_109 = arith.constant 0.000000e+00 : f32
    %815 = vector.broadcast %cst_109 : f32 to vector<4x32xf32>
    %816 = arith.maximumf %814, %815 : vector<4x32xf32>
    %c95 = arith.constant 95 : index
    %817 = memref.load %arg2[%c95] : memref<232xf32, #tpu.memory_space<smem>>
    %818 = vector.broadcast %817 : f32 to vector<4x32xf32>
    %819 = arith.mulf %816, %818 : vector<4x32xf32>
    %820 = arith.addf %800, %819 : vector<4x32xf32>
    %c111 = arith.constant 111 : index
    %821 = memref.load %arg2[%c111] : memref<232xf32, #tpu.memory_space<smem>>
    %822 = vector.broadcast %821 : f32 to vector<4x32xf32>
    %823 = arith.mulf %816, %822 : vector<4x32xf32>
    %824 = arith.addf %804, %823 : vector<4x32xf32>
    %825 = arith.addf %495, %820 : vector<4x32xf32>
    %c112 = arith.constant 112 : index
    %826 = memref.load %arg2[%c112] : memref<232xf32, #tpu.memory_space<smem>>
    %827 = vector.broadcast %826 : f32 to vector<4x32xf32>
    %828 = arith.addf %825, %827 : vector<4x32xf32>
    %829 = arith.addf %502, %824 : vector<4x32xf32>
    %c113 = arith.constant 113 : index
    %830 = memref.load %arg2[%c113] : memref<232xf32, #tpu.memory_space<smem>>
    %831 = vector.broadcast %830 : f32 to vector<4x32xf32>
    %832 = arith.addf %829, %831 : vector<4x32xf32>
    %833 = arith.addf %828, %832 : vector<4x32xf32>
    %cst_110 = arith.constant 5.000000e-01 : f32
    %834 = vector.broadcast %cst_110 : f32 to vector<4x32xf32>
    %835 = arith.mulf %833, %834 : vector<4x32xf32>
    %836 = arith.subf %828, %835 : vector<4x32xf32>
    %837 = arith.subf %832, %835 : vector<4x32xf32>
    %838 = arith.mulf %836, %836 : vector<4x32xf32>
    %839 = arith.mulf %837, %837 : vector<4x32xf32>
    %840 = arith.addf %838, %839 : vector<4x32xf32>
    %cst_111 = arith.constant 5.000000e-01 : f32
    %841 = vector.broadcast %cst_111 : f32 to vector<4x32xf32>
    %842 = arith.mulf %840, %841 : vector<4x32xf32>
    %cst_112 = arith.constant 9.99999974E-6 : f32
    %843 = vector.broadcast %cst_112 : f32 to vector<4x32xf32>
    %844 = arith.addf %842, %843 : vector<4x32xf32>
    %845 = math.rsqrt %844 : vector<4x32xf32>
    %846 = arith.mulf %836, %845 : vector<4x32xf32>
    %c114 = arith.constant 114 : index
    %847 = memref.load %arg2[%c114] : memref<232xf32, #tpu.memory_space<smem>>
    %848 = vector.broadcast %847 : f32 to vector<4x32xf32>
    %849 = arith.mulf %846, %848 : vector<4x32xf32>
    %c116 = arith.constant 116 : index
    %850 = memref.load %arg2[%c116] : memref<232xf32, #tpu.memory_space<smem>>
    %851 = vector.broadcast %850 : f32 to vector<4x32xf32>
    %852 = arith.addf %849, %851 : vector<4x32xf32>
    %853 = arith.mulf %837, %845 : vector<4x32xf32>
    %c115 = arith.constant 115 : index
    %854 = memref.load %arg2[%c115] : memref<232xf32, #tpu.memory_space<smem>>
    %855 = vector.broadcast %854 : f32 to vector<4x32xf32>
    %856 = arith.mulf %853, %855 : vector<4x32xf32>
    %c117 = arith.constant 117 : index
    %857 = memref.load %arg2[%c117] : memref<232xf32, #tpu.memory_space<smem>>
    %858 = vector.broadcast %857 : f32 to vector<4x32xf32>
    %859 = arith.addf %856, %858 : vector<4x32xf32>
    %860 = tpu.concatenate %260, %322, %384, %446 in 1 : vector<32x1xf32>, vector<32x1xf32>, vector<32x1xf32>, vector<32x1xf32> -> vector<32x4xf32>
    %861 = tpu.concatenate %265, %327, %389, %451 in 1 : vector<32x1xf32>, vector<32x1xf32>, vector<32x1xf32>, vector<32x1xf32> -> vector<32x4xf32>
    %862 = vector.broadcast %454 : f32 to vector<32x4xf32>
    %863 = arith.mulf %860, %862 : vector<32x4xf32>
    %864 = vector.broadcast %457 : f32 to vector<32x4xf32>
    %865 = arith.mulf %861, %864 : vector<32x4xf32>
    %866 = arith.addf %863, %865 : vector<32x4xf32>
    %867 = vector.broadcast %461 : f32 to vector<32x4xf32>
    %868 = arith.addf %866, %867 : vector<32x4xf32>
    %869 = vector.broadcast %464 : f32 to vector<32x4xf32>
    %870 = arith.mulf %860, %869 : vector<32x4xf32>
    %871 = vector.broadcast %467 : f32 to vector<32x4xf32>
    %872 = arith.mulf %861, %871 : vector<32x4xf32>
    %873 = arith.addf %870, %872 : vector<32x4xf32>
    %874 = vector.broadcast %471 : f32 to vector<32x4xf32>
    %875 = arith.addf %873, %874 : vector<32x4xf32>
    %876 = arith.addf %97, %868 : vector<32x4xf32>
    %877 = arith.addf %101, %875 : vector<32x4xf32>
    %878 = arith.addf %876, %877 : vector<32x4xf32>
    %cst_113 = arith.constant 5.000000e-01 : f32
    %879 = vector.broadcast %cst_113 : f32 to vector<32x4xf32>
    %880 = arith.mulf %878, %879 : vector<32x4xf32>
    %881 = arith.subf %876, %880 : vector<32x4xf32>
    %882 = arith.subf %877, %880 : vector<32x4xf32>
    %883 = arith.mulf %881, %881 : vector<32x4xf32>
    %884 = arith.mulf %882, %882 : vector<32x4xf32>
    %885 = arith.addf %883, %884 : vector<32x4xf32>
    %cst_114 = arith.constant 5.000000e-01 : f32
    %886 = vector.broadcast %cst_114 : f32 to vector<32x4xf32>
    %887 = arith.mulf %885, %886 : vector<32x4xf32>
    %cst_115 = arith.constant 9.99999974E-6 : f32
    %888 = vector.broadcast %cst_115 : f32 to vector<32x4xf32>
    %889 = arith.addf %887, %888 : vector<32x4xf32>
    %890 = math.rsqrt %889 : vector<32x4xf32>
    %891 = arith.mulf %881, %890 : vector<32x4xf32>
    %892 = vector.broadcast %490 : f32 to vector<32x4xf32>
    %893 = arith.mulf %891, %892 : vector<32x4xf32>
    %894 = vector.broadcast %493 : f32 to vector<32x4xf32>
    %895 = arith.addf %893, %894 : vector<32x4xf32>
    %896 = arith.mulf %882, %890 : vector<32x4xf32>
    %897 = vector.broadcast %497 : f32 to vector<32x4xf32>
    %898 = arith.mulf %896, %897 : vector<32x4xf32>
    %899 = vector.broadcast %500 : f32 to vector<32x4xf32>
    %900 = arith.addf %898, %899 : vector<32x4xf32>
    %cst_116 = arith.constant 0.000000e+00 : f32
    %901 = vector.broadcast %cst_116 : f32 to vector<32x4xf32>
    %cst_117 = arith.constant 0.000000e+00 : f32
    %902 = vector.broadcast %cst_117 : f32 to vector<32x4xf32>
    %903 = vector.broadcast %505 : f32 to vector<32x4xf32>
    %904 = arith.mulf %895, %903 : vector<32x4xf32>
    %905 = vector.broadcast %508 : f32 to vector<32x4xf32>
    %906 = arith.mulf %900, %905 : vector<32x4xf32>
    %907 = arith.addf %904, %906 : vector<32x4xf32>
    %908 = vector.broadcast %512 : f32 to vector<32x4xf32>
    %909 = arith.addf %907, %908 : vector<32x4xf32>
    %cst_118 = arith.constant 0.000000e+00 : f32
    %910 = vector.broadcast %cst_118 : f32 to vector<32x4xf32>
    %911 = arith.maximumf %909, %910 : vector<32x4xf32>
    %912 = vector.broadcast %517 : f32 to vector<32x4xf32>
    %913 = arith.mulf %911, %912 : vector<32x4xf32>
    %914 = arith.addf %901, %913 : vector<32x4xf32>
    %915 = vector.broadcast %521 : f32 to vector<32x4xf32>
    %916 = arith.mulf %911, %915 : vector<32x4xf32>
    %917 = arith.addf %902, %916 : vector<32x4xf32>
    %918 = vector.broadcast %525 : f32 to vector<32x4xf32>
    %919 = arith.mulf %895, %918 : vector<32x4xf32>
    %920 = vector.broadcast %528 : f32 to vector<32x4xf32>
    %921 = arith.mulf %900, %920 : vector<32x4xf32>
    %922 = arith.addf %919, %921 : vector<32x4xf32>
    %923 = vector.broadcast %532 : f32 to vector<32x4xf32>
    %924 = arith.addf %922, %923 : vector<32x4xf32>
    %cst_119 = arith.constant 0.000000e+00 : f32
    %925 = vector.broadcast %cst_119 : f32 to vector<32x4xf32>
    %926 = arith.maximumf %924, %925 : vector<32x4xf32>
    %927 = vector.broadcast %537 : f32 to vector<32x4xf32>
    %928 = arith.mulf %926, %927 : vector<32x4xf32>
    %929 = arith.addf %914, %928 : vector<32x4xf32>
    %930 = vector.broadcast %541 : f32 to vector<32x4xf32>
    %931 = arith.mulf %926, %930 : vector<32x4xf32>
    %932 = arith.addf %917, %931 : vector<32x4xf32>
    %933 = vector.broadcast %545 : f32 to vector<32x4xf32>
    %934 = arith.mulf %895, %933 : vector<32x4xf32>
    %935 = vector.broadcast %548 : f32 to vector<32x4xf32>
    %936 = arith.mulf %900, %935 : vector<32x4xf32>
    %937 = arith.addf %934, %936 : vector<32x4xf32>
    %938 = vector.broadcast %552 : f32 to vector<32x4xf32>
    %939 = arith.addf %937, %938 : vector<32x4xf32>
    %cst_120 = arith.constant 0.000000e+00 : f32
    %940 = vector.broadcast %cst_120 : f32 to vector<32x4xf32>
    %941 = arith.maximumf %939, %940 : vector<32x4xf32>
    %942 = vector.broadcast %557 : f32 to vector<32x4xf32>
    %943 = arith.mulf %941, %942 : vector<32x4xf32>
    %944 = arith.addf %929, %943 : vector<32x4xf32>
    %945 = vector.broadcast %561 : f32 to vector<32x4xf32>
    %946 = arith.mulf %941, %945 : vector<32x4xf32>
    %947 = arith.addf %932, %946 : vector<32x4xf32>
    %948 = vector.broadcast %565 : f32 to vector<32x4xf32>
    %949 = arith.mulf %895, %948 : vector<32x4xf32>
    %950 = vector.broadcast %568 : f32 to vector<32x4xf32>
    %951 = arith.mulf %900, %950 : vector<32x4xf32>
    %952 = arith.addf %949, %951 : vector<32x4xf32>
    %953 = vector.broadcast %572 : f32 to vector<32x4xf32>
    %954 = arith.addf %952, %953 : vector<32x4xf32>
    %cst_121 = arith.constant 0.000000e+00 : f32
    %955 = vector.broadcast %cst_121 : f32 to vector<32x4xf32>
    %956 = arith.maximumf %954, %955 : vector<32x4xf32>
    %957 = vector.broadcast %577 : f32 to vector<32x4xf32>
    %958 = arith.mulf %956, %957 : vector<32x4xf32>
    %959 = arith.addf %944, %958 : vector<32x4xf32>
    %960 = vector.broadcast %581 : f32 to vector<32x4xf32>
    %961 = arith.mulf %956, %960 : vector<32x4xf32>
    %962 = arith.addf %947, %961 : vector<32x4xf32>
    %963 = vector.broadcast %585 : f32 to vector<32x4xf32>
    %964 = arith.mulf %895, %963 : vector<32x4xf32>
    %965 = vector.broadcast %588 : f32 to vector<32x4xf32>
    %966 = arith.mulf %900, %965 : vector<32x4xf32>
    %967 = arith.addf %964, %966 : vector<32x4xf32>
    %968 = vector.broadcast %592 : f32 to vector<32x4xf32>
    %969 = arith.addf %967, %968 : vector<32x4xf32>
    %cst_122 = arith.constant 0.000000e+00 : f32
    %970 = vector.broadcast %cst_122 : f32 to vector<32x4xf32>
    %971 = arith.maximumf %969, %970 : vector<32x4xf32>
    %972 = vector.broadcast %597 : f32 to vector<32x4xf32>
    %973 = arith.mulf %971, %972 : vector<32x4xf32>
    %974 = arith.addf %959, %973 : vector<32x4xf32>
    %975 = vector.broadcast %601 : f32 to vector<32x4xf32>
    %976 = arith.mulf %971, %975 : vector<32x4xf32>
    %977 = arith.addf %962, %976 : vector<32x4xf32>
    %978 = vector.broadcast %605 : f32 to vector<32x4xf32>
    %979 = arith.mulf %895, %978 : vector<32x4xf32>
    %980 = vector.broadcast %608 : f32 to vector<32x4xf32>
    %981 = arith.mulf %900, %980 : vector<32x4xf32>
    %982 = arith.addf %979, %981 : vector<32x4xf32>
    %983 = vector.broadcast %612 : f32 to vector<32x4xf32>
    %984 = arith.addf %982, %983 : vector<32x4xf32>
    %cst_123 = arith.constant 0.000000e+00 : f32
    %985 = vector.broadcast %cst_123 : f32 to vector<32x4xf32>
    %986 = arith.maximumf %984, %985 : vector<32x4xf32>
    %987 = vector.broadcast %617 : f32 to vector<32x4xf32>
    %988 = arith.mulf %986, %987 : vector<32x4xf32>
    %989 = arith.addf %974, %988 : vector<32x4xf32>
    %990 = vector.broadcast %621 : f32 to vector<32x4xf32>
    %991 = arith.mulf %986, %990 : vector<32x4xf32>
    %992 = arith.addf %977, %991 : vector<32x4xf32>
    %993 = vector.broadcast %625 : f32 to vector<32x4xf32>
    %994 = arith.mulf %895, %993 : vector<32x4xf32>
    %995 = vector.broadcast %628 : f32 to vector<32x4xf32>
    %996 = arith.mulf %900, %995 : vector<32x4xf32>
    %997 = arith.addf %994, %996 : vector<32x4xf32>
    %998 = vector.broadcast %632 : f32 to vector<32x4xf32>
    %999 = arith.addf %997, %998 : vector<32x4xf32>
    %cst_124 = arith.constant 0.000000e+00 : f32
    %1000 = vector.broadcast %cst_124 : f32 to vector<32x4xf32>
    %1001 = arith.maximumf %999, %1000 : vector<32x4xf32>
    %1002 = vector.broadcast %637 : f32 to vector<32x4xf32>
    %1003 = arith.mulf %1001, %1002 : vector<32x4xf32>
    %1004 = arith.addf %989, %1003 : vector<32x4xf32>
    %1005 = vector.broadcast %641 : f32 to vector<32x4xf32>
    %1006 = arith.mulf %1001, %1005 : vector<32x4xf32>
    %1007 = arith.addf %992, %1006 : vector<32x4xf32>
    %1008 = vector.broadcast %645 : f32 to vector<32x4xf32>
    %1009 = arith.mulf %895, %1008 : vector<32x4xf32>
    %1010 = vector.broadcast %648 : f32 to vector<32x4xf32>
    %1011 = arith.mulf %900, %1010 : vector<32x4xf32>
    %1012 = arith.addf %1009, %1011 : vector<32x4xf32>
    %1013 = vector.broadcast %652 : f32 to vector<32x4xf32>
    %1014 = arith.addf %1012, %1013 : vector<32x4xf32>
    %cst_125 = arith.constant 0.000000e+00 : f32
    %1015 = vector.broadcast %cst_125 : f32 to vector<32x4xf32>
    %1016 = arith.maximumf %1014, %1015 : vector<32x4xf32>
    %1017 = vector.broadcast %657 : f32 to vector<32x4xf32>
    %1018 = arith.mulf %1016, %1017 : vector<32x4xf32>
    %1019 = arith.addf %1004, %1018 : vector<32x4xf32>
    %1020 = vector.broadcast %661 : f32 to vector<32x4xf32>
    %1021 = arith.mulf %1016, %1020 : vector<32x4xf32>
    %1022 = arith.addf %1007, %1021 : vector<32x4xf32>
    %1023 = vector.broadcast %665 : f32 to vector<32x4xf32>
    %1024 = arith.mulf %895, %1023 : vector<32x4xf32>
    %1025 = vector.broadcast %668 : f32 to vector<32x4xf32>
    %1026 = arith.mulf %900, %1025 : vector<32x4xf32>
    %1027 = arith.addf %1024, %1026 : vector<32x4xf32>
    %1028 = vector.broadcast %672 : f32 to vector<32x4xf32>
    %1029 = arith.addf %1027, %1028 : vector<32x4xf32>
    %cst_126 = arith.constant 0.000000e+00 : f32
    %1030 = vector.broadcast %cst_126 : f32 to vector<32x4xf32>
    %1031 = arith.maximumf %1029, %1030 : vector<32x4xf32>
    %1032 = vector.broadcast %677 : f32 to vector<32x4xf32>
    %1033 = arith.mulf %1031, %1032 : vector<32x4xf32>
    %1034 = arith.addf %1019, %1033 : vector<32x4xf32>
    %1035 = vector.broadcast %681 : f32 to vector<32x4xf32>
    %1036 = arith.mulf %1031, %1035 : vector<32x4xf32>
    %1037 = arith.addf %1022, %1036 : vector<32x4xf32>
    %1038 = vector.broadcast %685 : f32 to vector<32x4xf32>
    %1039 = arith.mulf %895, %1038 : vector<32x4xf32>
    %1040 = vector.broadcast %688 : f32 to vector<32x4xf32>
    %1041 = arith.mulf %900, %1040 : vector<32x4xf32>
    %1042 = arith.addf %1039, %1041 : vector<32x4xf32>
    %1043 = vector.broadcast %692 : f32 to vector<32x4xf32>
    %1044 = arith.addf %1042, %1043 : vector<32x4xf32>
    %cst_127 = arith.constant 0.000000e+00 : f32
    %1045 = vector.broadcast %cst_127 : f32 to vector<32x4xf32>
    %1046 = arith.maximumf %1044, %1045 : vector<32x4xf32>
    %1047 = vector.broadcast %697 : f32 to vector<32x4xf32>
    %1048 = arith.mulf %1046, %1047 : vector<32x4xf32>
    %1049 = arith.addf %1034, %1048 : vector<32x4xf32>
    %1050 = vector.broadcast %701 : f32 to vector<32x4xf32>
    %1051 = arith.mulf %1046, %1050 : vector<32x4xf32>
    %1052 = arith.addf %1037, %1051 : vector<32x4xf32>
    %1053 = vector.broadcast %705 : f32 to vector<32x4xf32>
    %1054 = arith.mulf %895, %1053 : vector<32x4xf32>
    %1055 = vector.broadcast %708 : f32 to vector<32x4xf32>
    %1056 = arith.mulf %900, %1055 : vector<32x4xf32>
    %1057 = arith.addf %1054, %1056 : vector<32x4xf32>
    %1058 = vector.broadcast %712 : f32 to vector<32x4xf32>
    %1059 = arith.addf %1057, %1058 : vector<32x4xf32>
    %cst_128 = arith.constant 0.000000e+00 : f32
    %1060 = vector.broadcast %cst_128 : f32 to vector<32x4xf32>
    %1061 = arith.maximumf %1059, %1060 : vector<32x4xf32>
    %1062 = vector.broadcast %717 : f32 to vector<32x4xf32>
    %1063 = arith.mulf %1061, %1062 : vector<32x4xf32>
    %1064 = arith.addf %1049, %1063 : vector<32x4xf32>
    %1065 = vector.broadcast %721 : f32 to vector<32x4xf32>
    %1066 = arith.mulf %1061, %1065 : vector<32x4xf32>
    %1067 = arith.addf %1052, %1066 : vector<32x4xf32>
    %1068 = vector.broadcast %725 : f32 to vector<32x4xf32>
    %1069 = arith.mulf %895, %1068 : vector<32x4xf32>
    %1070 = vector.broadcast %728 : f32 to vector<32x4xf32>
    %1071 = arith.mulf %900, %1070 : vector<32x4xf32>
    %1072 = arith.addf %1069, %1071 : vector<32x4xf32>
    %1073 = vector.broadcast %732 : f32 to vector<32x4xf32>
    %1074 = arith.addf %1072, %1073 : vector<32x4xf32>
    %cst_129 = arith.constant 0.000000e+00 : f32
    %1075 = vector.broadcast %cst_129 : f32 to vector<32x4xf32>
    %1076 = arith.maximumf %1074, %1075 : vector<32x4xf32>
    %1077 = vector.broadcast %737 : f32 to vector<32x4xf32>
    %1078 = arith.mulf %1076, %1077 : vector<32x4xf32>
    %1079 = arith.addf %1064, %1078 : vector<32x4xf32>
    %1080 = vector.broadcast %741 : f32 to vector<32x4xf32>
    %1081 = arith.mulf %1076, %1080 : vector<32x4xf32>
    %1082 = arith.addf %1067, %1081 : vector<32x4xf32>
    %1083 = vector.broadcast %745 : f32 to vector<32x4xf32>
    %1084 = arith.mulf %895, %1083 : vector<32x4xf32>
    %1085 = vector.broadcast %748 : f32 to vector<32x4xf32>
    %1086 = arith.mulf %900, %1085 : vector<32x4xf32>
    %1087 = arith.addf %1084, %1086 : vector<32x4xf32>
    %1088 = vector.broadcast %752 : f32 to vector<32x4xf32>
    %1089 = arith.addf %1087, %1088 : vector<32x4xf32>
    %cst_130 = arith.constant 0.000000e+00 : f32
    %1090 = vector.broadcast %cst_130 : f32 to vector<32x4xf32>
    %1091 = arith.maximumf %1089, %1090 : vector<32x4xf32>
    %1092 = vector.broadcast %757 : f32 to vector<32x4xf32>
    %1093 = arith.mulf %1091, %1092 : vector<32x4xf32>
    %1094 = arith.addf %1079, %1093 : vector<32x4xf32>
    %1095 = vector.broadcast %761 : f32 to vector<32x4xf32>
    %1096 = arith.mulf %1091, %1095 : vector<32x4xf32>
    %1097 = arith.addf %1082, %1096 : vector<32x4xf32>
    %1098 = vector.broadcast %765 : f32 to vector<32x4xf32>
    %1099 = arith.mulf %895, %1098 : vector<32x4xf32>
    %1100 = vector.broadcast %768 : f32 to vector<32x4xf32>
    %1101 = arith.mulf %900, %1100 : vector<32x4xf32>
    %1102 = arith.addf %1099, %1101 : vector<32x4xf32>
    %1103 = vector.broadcast %772 : f32 to vector<32x4xf32>
    %1104 = arith.addf %1102, %1103 : vector<32x4xf32>
    %cst_131 = arith.constant 0.000000e+00 : f32
    %1105 = vector.broadcast %cst_131 : f32 to vector<32x4xf32>
    %1106 = arith.maximumf %1104, %1105 : vector<32x4xf32>
    %1107 = vector.broadcast %777 : f32 to vector<32x4xf32>
    %1108 = arith.mulf %1106, %1107 : vector<32x4xf32>
    %1109 = arith.addf %1094, %1108 : vector<32x4xf32>
    %1110 = vector.broadcast %781 : f32 to vector<32x4xf32>
    %1111 = arith.mulf %1106, %1110 : vector<32x4xf32>
    %1112 = arith.addf %1097, %1111 : vector<32x4xf32>
    %1113 = vector.broadcast %785 : f32 to vector<32x4xf32>
    %1114 = arith.mulf %895, %1113 : vector<32x4xf32>
    %1115 = vector.broadcast %788 : f32 to vector<32x4xf32>
    %1116 = arith.mulf %900, %1115 : vector<32x4xf32>
    %1117 = arith.addf %1114, %1116 : vector<32x4xf32>
    %1118 = vector.broadcast %792 : f32 to vector<32x4xf32>
    %1119 = arith.addf %1117, %1118 : vector<32x4xf32>
    %cst_132 = arith.constant 0.000000e+00 : f32
    %1120 = vector.broadcast %cst_132 : f32 to vector<32x4xf32>
    %1121 = arith.maximumf %1119, %1120 : vector<32x4xf32>
    %1122 = vector.broadcast %797 : f32 to vector<32x4xf32>
    %1123 = arith.mulf %1121, %1122 : vector<32x4xf32>
    %1124 = arith.addf %1109, %1123 : vector<32x4xf32>
    %1125 = vector.broadcast %801 : f32 to vector<32x4xf32>
    %1126 = arith.mulf %1121, %1125 : vector<32x4xf32>
    %1127 = arith.addf %1112, %1126 : vector<32x4xf32>
    %1128 = vector.broadcast %805 : f32 to vector<32x4xf32>
    %1129 = arith.mulf %895, %1128 : vector<32x4xf32>
    %1130 = vector.broadcast %808 : f32 to vector<32x4xf32>
    %1131 = arith.mulf %900, %1130 : vector<32x4xf32>
    %1132 = arith.addf %1129, %1131 : vector<32x4xf32>
    %1133 = vector.broadcast %812 : f32 to vector<32x4xf32>
    %1134 = arith.addf %1132, %1133 : vector<32x4xf32>
    %cst_133 = arith.constant 0.000000e+00 : f32
    %1135 = vector.broadcast %cst_133 : f32 to vector<32x4xf32>
    %1136 = arith.maximumf %1134, %1135 : vector<32x4xf32>
    %1137 = vector.broadcast %817 : f32 to vector<32x4xf32>
    %1138 = arith.mulf %1136, %1137 : vector<32x4xf32>
    %1139 = arith.addf %1124, %1138 : vector<32x4xf32>
    %1140 = vector.broadcast %821 : f32 to vector<32x4xf32>
    %1141 = arith.mulf %1136, %1140 : vector<32x4xf32>
    %1142 = arith.addf %1127, %1141 : vector<32x4xf32>
    %1143 = arith.addf %895, %1139 : vector<32x4xf32>
    %1144 = vector.broadcast %826 : f32 to vector<32x4xf32>
    %1145 = arith.addf %1143, %1144 : vector<32x4xf32>
    %1146 = arith.addf %900, %1142 : vector<32x4xf32>
    %1147 = vector.broadcast %830 : f32 to vector<32x4xf32>
    %1148 = arith.addf %1146, %1147 : vector<32x4xf32>
    %1149 = arith.addf %1145, %1148 : vector<32x4xf32>
    %cst_134 = arith.constant 5.000000e-01 : f32
    %1150 = vector.broadcast %cst_134 : f32 to vector<32x4xf32>
    %1151 = arith.mulf %1149, %1150 : vector<32x4xf32>
    %1152 = arith.subf %1145, %1151 : vector<32x4xf32>
    %1153 = arith.subf %1148, %1151 : vector<32x4xf32>
    %1154 = arith.mulf %1152, %1152 : vector<32x4xf32>
    %1155 = arith.mulf %1153, %1153 : vector<32x4xf32>
    %1156 = arith.addf %1154, %1155 : vector<32x4xf32>
    %cst_135 = arith.constant 5.000000e-01 : f32
    %1157 = vector.broadcast %cst_135 : f32 to vector<32x4xf32>
    %1158 = arith.mulf %1156, %1157 : vector<32x4xf32>
    %cst_136 = arith.constant 9.99999974E-6 : f32
    %1159 = vector.broadcast %cst_136 : f32 to vector<32x4xf32>
    %1160 = arith.addf %1158, %1159 : vector<32x4xf32>
    %1161 = math.rsqrt %1160 : vector<32x4xf32>
    %1162 = arith.mulf %1152, %1161 : vector<32x4xf32>
    %1163 = vector.broadcast %847 : f32 to vector<32x4xf32>
    %1164 = arith.mulf %1162, %1163 : vector<32x4xf32>
    %1165 = vector.broadcast %850 : f32 to vector<32x4xf32>
    %1166 = arith.addf %1164, %1165 : vector<32x4xf32>
    %1167 = arith.mulf %1153, %1161 : vector<32x4xf32>
    %1168 = vector.broadcast %854 : f32 to vector<32x4xf32>
    %1169 = arith.mulf %1167, %1168 : vector<32x4xf32>
    %1170 = vector.broadcast %857 : f32 to vector<32x4xf32>
    %1171 = arith.addf %1169, %1170 : vector<32x4xf32>
    %c118 = arith.constant 118 : index
    %1172 = memref.load %arg2[%c118] : memref<232xf32, #tpu.memory_space<smem>>
    %1173 = vector.broadcast %1172 : f32 to vector<4x32xf32>
    %1174 = arith.mulf %852, %1173 : vector<4x32xf32>
    %c120 = arith.constant 120 : index
    %1175 = memref.load %arg2[%c120] : memref<232xf32, #tpu.memory_space<smem>>
    %1176 = vector.broadcast %1175 : f32 to vector<4x32xf32>
    %1177 = arith.mulf %859, %1176 : vector<4x32xf32>
    %1178 = arith.addf %1174, %1177 : vector<4x32xf32>
    %c122 = arith.constant 122 : index
    %1179 = memref.load %arg2[%c122] : memref<232xf32, #tpu.memory_space<smem>>
    %1180 = vector.broadcast %1179 : f32 to vector<4x32xf32>
    %1181 = arith.addf %1178, %1180 : vector<4x32xf32>
    %c119 = arith.constant 119 : index
    %1182 = memref.load %arg2[%c119] : memref<232xf32, #tpu.memory_space<smem>>
    %1183 = vector.broadcast %1182 : f32 to vector<4x32xf32>
    %1184 = arith.mulf %852, %1183 : vector<4x32xf32>
    %c121 = arith.constant 121 : index
    %1185 = memref.load %arg2[%c121] : memref<232xf32, #tpu.memory_space<smem>>
    %1186 = vector.broadcast %1185 : f32 to vector<4x32xf32>
    %1187 = arith.mulf %859, %1186 : vector<4x32xf32>
    %1188 = arith.addf %1184, %1187 : vector<4x32xf32>
    %c123 = arith.constant 123 : index
    %1189 = memref.load %arg2[%c123] : memref<232xf32, #tpu.memory_space<smem>>
    %1190 = vector.broadcast %1189 : f32 to vector<4x32xf32>
    %1191 = arith.addf %1188, %1190 : vector<4x32xf32>
    %c124 = arith.constant 124 : index
    %1192 = memref.load %arg2[%c124] : memref<232xf32, #tpu.memory_space<smem>>
    %c126 = arith.constant 126 : index
    %1193 = memref.load %arg2[%c126] : memref<232xf32, #tpu.memory_space<smem>>
    %c128 = arith.constant 128 : index
    %1194 = memref.load %arg2[%c128] : memref<232xf32, #tpu.memory_space<smem>>
    %c125 = arith.constant 125 : index
    %1195 = memref.load %arg2[%c125] : memref<232xf32, #tpu.memory_space<smem>>
    %c127 = arith.constant 127 : index
    %1196 = memref.load %arg2[%c127] : memref<232xf32, #tpu.memory_space<smem>>
    %c129 = arith.constant 129 : index
    %1197 = memref.load %arg2[%c129] : memref<232xf32, #tpu.memory_space<smem>>
    %c130 = arith.constant 130 : index
    %1198 = memref.load %arg2[%c130] : memref<232xf32, #tpu.memory_space<smem>>
    %c132 = arith.constant 132 : index
    %1199 = memref.load %arg2[%c132] : memref<232xf32, #tpu.memory_space<smem>>
    %c134 = arith.constant 134 : index
    %1200 = memref.load %arg2[%c134] : memref<232xf32, #tpu.memory_space<smem>>
    %c131 = arith.constant 131 : index
    %1201 = memref.load %arg2[%c131] : memref<232xf32, #tpu.memory_space<smem>>
    %c133 = arith.constant 133 : index
    %1202 = memref.load %arg2[%c133] : memref<232xf32, #tpu.memory_space<smem>>
    %c135 = arith.constant 135 : index
    %1203 = memref.load %arg2[%c135] : memref<232xf32, #tpu.memory_space<smem>>
    %1204 = vector.broadcast %1192 : f32 to vector<32x4xf32>
    %1205 = arith.mulf %1166, %1204 : vector<32x4xf32>
    %1206 = vector.broadcast %1193 : f32 to vector<32x4xf32>
    %1207 = arith.mulf %1171, %1206 : vector<32x4xf32>
    %1208 = arith.addf %1205, %1207 : vector<32x4xf32>
    %1209 = vector.broadcast %1194 : f32 to vector<32x4xf32>
    %1210 = arith.addf %1208, %1209 : vector<32x4xf32>
    %1211 = vector.broadcast %1195 : f32 to vector<32x4xf32>
    %1212 = arith.mulf %1166, %1211 : vector<32x4xf32>
    %1213 = vector.broadcast %1196 : f32 to vector<32x4xf32>
    %1214 = arith.mulf %1171, %1213 : vector<32x4xf32>
    %1215 = arith.addf %1212, %1214 : vector<32x4xf32>
    %1216 = vector.broadcast %1197 : f32 to vector<32x4xf32>
    %1217 = arith.addf %1215, %1216 : vector<32x4xf32>
    %1218 = vector.broadcast %1198 : f32 to vector<32x4xf32>
    %1219 = arith.mulf %1166, %1218 : vector<32x4xf32>
    %1220 = vector.broadcast %1199 : f32 to vector<32x4xf32>
    %1221 = arith.mulf %1171, %1220 : vector<32x4xf32>
    %1222 = arith.addf %1219, %1221 : vector<32x4xf32>
    %1223 = vector.broadcast %1200 : f32 to vector<32x4xf32>
    %1224 = arith.addf %1222, %1223 : vector<32x4xf32>
    %1225 = vector.broadcast %1201 : f32 to vector<32x4xf32>
    %1226 = arith.mulf %1166, %1225 : vector<32x4xf32>
    %1227 = vector.broadcast %1202 : f32 to vector<32x4xf32>
    %1228 = arith.mulf %1171, %1227 : vector<32x4xf32>
    %1229 = arith.addf %1226, %1228 : vector<32x4xf32>
    %1230 = vector.broadcast %1203 : f32 to vector<32x4xf32>
    %1231 = arith.addf %1229, %1230 : vector<32x4xf32>
    %1232 = vector.extract_strided_slice %1210 {offsets = [0, 0], sizes = [32, 1], strides = [1, 1]} : vector<32x4xf32> to vector<32x1xf32>
    %1233 = vector.extract_strided_slice %1181 {offsets = [0, 0], sizes = [1, 32], strides = [1, 1]} : vector<4x32xf32> to vector<1x32xf32>
    %1234 = vector.broadcast %1232 : vector<32x1xf32> to vector<32x32xf32>
    %1235 = vector.broadcast %1233 : vector<1x32xf32> to vector<32x32xf32>
    %1236 = arith.mulf %1234, %1235 : vector<32x32xf32>
    %1237 = vector.extract_strided_slice %1217 {offsets = [0, 0], sizes = [32, 1], strides = [1, 1]} : vector<32x4xf32> to vector<32x1xf32>
    %1238 = vector.extract_strided_slice %1191 {offsets = [0, 0], sizes = [1, 32], strides = [1, 1]} : vector<4x32xf32> to vector<1x32xf32>
    %1239 = vector.broadcast %1237 : vector<32x1xf32> to vector<32x32xf32>
    %1240 = vector.broadcast %1238 : vector<1x32xf32> to vector<32x32xf32>
    %1241 = arith.mulf %1239, %1240 : vector<32x32xf32>
    %1242 = arith.addf %1236, %1241 : vector<32x32xf32>
    %cst_137 = arith.constant dense<0xFF800000> : vector<32xf32>
    %1243 = vector.multi_reduction <maximumf>, %1242, %cst_137 [0] : vector<32x32xf32> to vector<32xf32>
    %1244 = vector.shape_cast %1243 : vector<32xf32> to vector<1x32xf32>
    %1245 = vector.broadcast %1244 : vector<1x32xf32> to vector<32x32xf32>
    %1246 = arith.subf %1242, %1245 : vector<32x32xf32>
    %1247 = math.exp %1246 : vector<32x32xf32>
    %cst_138 = arith.constant dense<0.000000e+00> : vector<32xf32>
    %1248 = vector.multi_reduction <add>, %1247, %cst_138 [0] : vector<32x32xf32> to vector<32xf32>
    %1249 = vector.shape_cast %1248 : vector<32xf32> to vector<1x32xf32>
    %1250 = tpu.reciprocal %1249 {approx = true} : vector<1x32xf32> -> vector<1x32xf32>
    %1251 = vector.broadcast %1250 : vector<1x32xf32> to vector<32x32xf32>
    %1252 = arith.mulf %1247, %1251 : vector<32x32xf32>
    %1253 = vector.extract_strided_slice %1224 {offsets = [0, 0], sizes = [32, 1], strides = [1, 1]} : vector<32x4xf32> to vector<32x1xf32>
    %1254 = vector.broadcast %1253 : vector<32x1xf32> to vector<32x32xf32>
    %1255 = arith.mulf %1252, %1254 : vector<32x32xf32>
    %cst_139 = arith.constant dense<0.000000e+00> : vector<32xf32>
    %1256 = vector.multi_reduction <add>, %1255, %cst_139 [0] : vector<32x32xf32> to vector<32xf32>
    %1257 = vector.shape_cast %1256 : vector<32xf32> to vector<1x32xf32>
    %1258 = vector.extract_strided_slice %1231 {offsets = [0, 0], sizes = [32, 1], strides = [1, 1]} : vector<32x4xf32> to vector<32x1xf32>
    %1259 = vector.broadcast %1258 : vector<32x1xf32> to vector<32x32xf32>
    %1260 = arith.mulf %1252, %1259 : vector<32x32xf32>
    %cst_140 = arith.constant dense<0.000000e+00> : vector<32xf32>
    %1261 = vector.multi_reduction <add>, %1260, %cst_140 [0] : vector<32x32xf32> to vector<32xf32>
    %1262 = vector.shape_cast %1261 : vector<32xf32> to vector<1x32xf32>
    %1263 = vector.extract_strided_slice %1210 {offsets = [0, 1], sizes = [32, 1], strides = [1, 1]} : vector<32x4xf32> to vector<32x1xf32>
    %1264 = vector.extract_strided_slice %1181 {offsets = [1, 0], sizes = [1, 32], strides = [1, 1]} : vector<4x32xf32> to vector<1x32xf32>
    %1265 = vector.broadcast %1263 : vector<32x1xf32> to vector<32x32xf32>
    %1266 = vector.broadcast %1264 : vector<1x32xf32> to vector<32x32xf32>
    %1267 = arith.mulf %1265, %1266 : vector<32x32xf32>
    %1268 = vector.extract_strided_slice %1217 {offsets = [0, 1], sizes = [32, 1], strides = [1, 1]} : vector<32x4xf32> to vector<32x1xf32>
    %1269 = vector.extract_strided_slice %1191 {offsets = [1, 0], sizes = [1, 32], strides = [1, 1]} : vector<4x32xf32> to vector<1x32xf32>
    %1270 = vector.broadcast %1268 : vector<32x1xf32> to vector<32x32xf32>
    %1271 = vector.broadcast %1269 : vector<1x32xf32> to vector<32x32xf32>
    %1272 = arith.mulf %1270, %1271 : vector<32x32xf32>
    %1273 = arith.addf %1267, %1272 : vector<32x32xf32>
    %cst_141 = arith.constant dense<0xFF800000> : vector<32xf32>
    %1274 = vector.multi_reduction <maximumf>, %1273, %cst_141 [0] : vector<32x32xf32> to vector<32xf32>
    %1275 = vector.shape_cast %1274 : vector<32xf32> to vector<1x32xf32>
    %1276 = vector.broadcast %1275 : vector<1x32xf32> to vector<32x32xf32>
    %1277 = arith.subf %1273, %1276 : vector<32x32xf32>
    %1278 = math.exp %1277 : vector<32x32xf32>
    %cst_142 = arith.constant dense<0.000000e+00> : vector<32xf32>
    %1279 = vector.multi_reduction <add>, %1278, %cst_142 [0] : vector<32x32xf32> to vector<32xf32>
    %1280 = vector.shape_cast %1279 : vector<32xf32> to vector<1x32xf32>
    %1281 = tpu.reciprocal %1280 {approx = true} : vector<1x32xf32> -> vector<1x32xf32>
    %1282 = vector.broadcast %1281 : vector<1x32xf32> to vector<32x32xf32>
    %1283 = arith.mulf %1278, %1282 : vector<32x32xf32>
    %1284 = vector.extract_strided_slice %1224 {offsets = [0, 1], sizes = [32, 1], strides = [1, 1]} : vector<32x4xf32> to vector<32x1xf32>
    %1285 = vector.broadcast %1284 : vector<32x1xf32> to vector<32x32xf32>
    %1286 = arith.mulf %1283, %1285 : vector<32x32xf32>
    %cst_143 = arith.constant dense<0.000000e+00> : vector<32xf32>
    %1287 = vector.multi_reduction <add>, %1286, %cst_143 [0] : vector<32x32xf32> to vector<32xf32>
    %1288 = vector.shape_cast %1287 : vector<32xf32> to vector<1x32xf32>
    %1289 = vector.extract_strided_slice %1231 {offsets = [0, 1], sizes = [32, 1], strides = [1, 1]} : vector<32x4xf32> to vector<32x1xf32>
    %1290 = vector.broadcast %1289 : vector<32x1xf32> to vector<32x32xf32>
    %1291 = arith.mulf %1283, %1290 : vector<32x32xf32>
    %cst_144 = arith.constant dense<0.000000e+00> : vector<32xf32>
    %1292 = vector.multi_reduction <add>, %1291, %cst_144 [0] : vector<32x32xf32> to vector<32xf32>
    %1293 = vector.shape_cast %1292 : vector<32xf32> to vector<1x32xf32>
    %1294 = vector.extract_strided_slice %1210 {offsets = [0, 2], sizes = [32, 1], strides = [1, 1]} : vector<32x4xf32> to vector<32x1xf32>
    %1295 = vector.extract_strided_slice %1181 {offsets = [2, 0], sizes = [1, 32], strides = [1, 1]} : vector<4x32xf32> to vector<1x32xf32>
    %1296 = vector.broadcast %1294 : vector<32x1xf32> to vector<32x32xf32>
    %1297 = vector.broadcast %1295 : vector<1x32xf32> to vector<32x32xf32>
    %1298 = arith.mulf %1296, %1297 : vector<32x32xf32>
    %1299 = vector.extract_strided_slice %1217 {offsets = [0, 2], sizes = [32, 1], strides = [1, 1]} : vector<32x4xf32> to vector<32x1xf32>
    %1300 = vector.extract_strided_slice %1191 {offsets = [2, 0], sizes = [1, 32], strides = [1, 1]} : vector<4x32xf32> to vector<1x32xf32>
    %1301 = vector.broadcast %1299 : vector<32x1xf32> to vector<32x32xf32>
    %1302 = vector.broadcast %1300 : vector<1x32xf32> to vector<32x32xf32>
    %1303 = arith.mulf %1301, %1302 : vector<32x32xf32>
    %1304 = arith.addf %1298, %1303 : vector<32x32xf32>
    %cst_145 = arith.constant dense<0xFF800000> : vector<32xf32>
    %1305 = vector.multi_reduction <maximumf>, %1304, %cst_145 [0] : vector<32x32xf32> to vector<32xf32>
    %1306 = vector.shape_cast %1305 : vector<32xf32> to vector<1x32xf32>
    %1307 = vector.broadcast %1306 : vector<1x32xf32> to vector<32x32xf32>
    %1308 = arith.subf %1304, %1307 : vector<32x32xf32>
    %1309 = math.exp %1308 : vector<32x32xf32>
    %cst_146 = arith.constant dense<0.000000e+00> : vector<32xf32>
    %1310 = vector.multi_reduction <add>, %1309, %cst_146 [0] : vector<32x32xf32> to vector<32xf32>
    %1311 = vector.shape_cast %1310 : vector<32xf32> to vector<1x32xf32>
    %1312 = tpu.reciprocal %1311 {approx = true} : vector<1x32xf32> -> vector<1x32xf32>
    %1313 = vector.broadcast %1312 : vector<1x32xf32> to vector<32x32xf32>
    %1314 = arith.mulf %1309, %1313 : vector<32x32xf32>
    %1315 = vector.extract_strided_slice %1224 {offsets = [0, 2], sizes = [32, 1], strides = [1, 1]} : vector<32x4xf32> to vector<32x1xf32>
    %1316 = vector.broadcast %1315 : vector<32x1xf32> to vector<32x32xf32>
    %1317 = arith.mulf %1314, %1316 : vector<32x32xf32>
    %cst_147 = arith.constant dense<0.000000e+00> : vector<32xf32>
    %1318 = vector.multi_reduction <add>, %1317, %cst_147 [0] : vector<32x32xf32> to vector<32xf32>
    %1319 = vector.shape_cast %1318 : vector<32xf32> to vector<1x32xf32>
    %1320 = vector.extract_strided_slice %1231 {offsets = [0, 2], sizes = [32, 1], strides = [1, 1]} : vector<32x4xf32> to vector<32x1xf32>
    %1321 = vector.broadcast %1320 : vector<32x1xf32> to vector<32x32xf32>
    %1322 = arith.mulf %1314, %1321 : vector<32x32xf32>
    %cst_148 = arith.constant dense<0.000000e+00> : vector<32xf32>
    %1323 = vector.multi_reduction <add>, %1322, %cst_148 [0] : vector<32x32xf32> to vector<32xf32>
    %1324 = vector.shape_cast %1323 : vector<32xf32> to vector<1x32xf32>
    %1325 = vector.extract_strided_slice %1210 {offsets = [0, 3], sizes = [32, 1], strides = [1, 1]} : vector<32x4xf32> to vector<32x1xf32>
    %1326 = vector.extract_strided_slice %1181 {offsets = [3, 0], sizes = [1, 32], strides = [1, 1]} : vector<4x32xf32> to vector<1x32xf32>
    %1327 = vector.broadcast %1325 : vector<32x1xf32> to vector<32x32xf32>
    %1328 = vector.broadcast %1326 : vector<1x32xf32> to vector<32x32xf32>
    %1329 = arith.mulf %1327, %1328 : vector<32x32xf32>
    %1330 = vector.extract_strided_slice %1217 {offsets = [0, 3], sizes = [32, 1], strides = [1, 1]} : vector<32x4xf32> to vector<32x1xf32>
    %1331 = vector.extract_strided_slice %1191 {offsets = [3, 0], sizes = [1, 32], strides = [1, 1]} : vector<4x32xf32> to vector<1x32xf32>
    %1332 = vector.broadcast %1330 : vector<32x1xf32> to vector<32x32xf32>
    %1333 = vector.broadcast %1331 : vector<1x32xf32> to vector<32x32xf32>
    %1334 = arith.mulf %1332, %1333 : vector<32x32xf32>
    %1335 = arith.addf %1329, %1334 : vector<32x32xf32>
    %cst_149 = arith.constant dense<0xFF800000> : vector<32xf32>
    %1336 = vector.multi_reduction <maximumf>, %1335, %cst_149 [0] : vector<32x32xf32> to vector<32xf32>
    %1337 = vector.shape_cast %1336 : vector<32xf32> to vector<1x32xf32>
    %1338 = vector.broadcast %1337 : vector<1x32xf32> to vector<32x32xf32>
    %1339 = arith.subf %1335, %1338 : vector<32x32xf32>
    %1340 = math.exp %1339 : vector<32x32xf32>
    %cst_150 = arith.constant dense<0.000000e+00> : vector<32xf32>
    %1341 = vector.multi_reduction <add>, %1340, %cst_150 [0] : vector<32x32xf32> to vector<32xf32>
    %1342 = vector.shape_cast %1341 : vector<32xf32> to vector<1x32xf32>
    %1343 = tpu.reciprocal %1342 {approx = true} : vector<1x32xf32> -> vector<1x32xf32>
    %1344 = vector.broadcast %1343 : vector<1x32xf32> to vector<32x32xf32>
    %1345 = arith.mulf %1340, %1344 : vector<32x32xf32>
    %1346 = vector.extract_strided_slice %1224 {offsets = [0, 3], sizes = [32, 1], strides = [1, 1]} : vector<32x4xf32> to vector<32x1xf32>
    %1347 = vector.broadcast %1346 : vector<32x1xf32> to vector<32x32xf32>
    %1348 = arith.mulf %1345, %1347 : vector<32x32xf32>
    %cst_151 = arith.constant dense<0.000000e+00> : vector<32xf32>
    %1349 = vector.multi_reduction <add>, %1348, %cst_151 [0] : vector<32x32xf32> to vector<32xf32>
    %1350 = vector.shape_cast %1349 : vector<32xf32> to vector<1x32xf32>
    %1351 = vector.extract_strided_slice %1231 {offsets = [0, 3], sizes = [32, 1], strides = [1, 1]} : vector<32x4xf32> to vector<32x1xf32>
    %1352 = vector.broadcast %1351 : vector<32x1xf32> to vector<32x32xf32>
    %1353 = arith.mulf %1345, %1352 : vector<32x32xf32>
    %cst_152 = arith.constant dense<0.000000e+00> : vector<32xf32>
    %1354 = vector.multi_reduction <add>, %1353, %cst_152 [0] : vector<32x32xf32> to vector<32xf32>
    %1355 = vector.shape_cast %1354 : vector<32xf32> to vector<1x32xf32>
    %1356 = tpu.concatenate %1257, %1288, %1319, %1350 in 0 : vector<1x32xf32>, vector<1x32xf32>, vector<1x32xf32>, vector<1x32xf32> -> vector<4x32xf32>
    %1357 = tpu.concatenate %1262, %1293, %1324, %1355 in 0 : vector<1x32xf32>, vector<1x32xf32>, vector<1x32xf32>, vector<1x32xf32> -> vector<4x32xf32>
    %c136 = arith.constant 136 : index
    %1358 = memref.load %arg2[%c136] : memref<232xf32, #tpu.memory_space<smem>>
    %1359 = vector.broadcast %1358 : f32 to vector<4x32xf32>
    %1360 = arith.mulf %1356, %1359 : vector<4x32xf32>
    %c138 = arith.constant 138 : index
    %1361 = memref.load %arg2[%c138] : memref<232xf32, #tpu.memory_space<smem>>
    %1362 = vector.broadcast %1361 : f32 to vector<4x32xf32>
    %1363 = arith.mulf %1357, %1362 : vector<4x32xf32>
    %1364 = arith.addf %1360, %1363 : vector<4x32xf32>
    %c140 = arith.constant 140 : index
    %1365 = memref.load %arg2[%c140] : memref<232xf32, #tpu.memory_space<smem>>
    %1366 = vector.broadcast %1365 : f32 to vector<4x32xf32>
    %1367 = arith.addf %1364, %1366 : vector<4x32xf32>
    %c137 = arith.constant 137 : index
    %1368 = memref.load %arg2[%c137] : memref<232xf32, #tpu.memory_space<smem>>
    %1369 = vector.broadcast %1368 : f32 to vector<4x32xf32>
    %1370 = arith.mulf %1356, %1369 : vector<4x32xf32>
    %c139 = arith.constant 139 : index
    %1371 = memref.load %arg2[%c139] : memref<232xf32, #tpu.memory_space<smem>>
    %1372 = vector.broadcast %1371 : f32 to vector<4x32xf32>
    %1373 = arith.mulf %1357, %1372 : vector<4x32xf32>
    %1374 = arith.addf %1370, %1373 : vector<4x32xf32>
    %c141 = arith.constant 141 : index
    %1375 = memref.load %arg2[%c141] : memref<232xf32, #tpu.memory_space<smem>>
    %1376 = vector.broadcast %1375 : f32 to vector<4x32xf32>
    %1377 = arith.addf %1374, %1376 : vector<4x32xf32>
    %1378 = arith.addf %852, %1367 : vector<4x32xf32>
    %1379 = arith.addf %859, %1377 : vector<4x32xf32>
    %1380 = arith.addf %1378, %1379 : vector<4x32xf32>
    %cst_153 = arith.constant 5.000000e-01 : f32
    %1381 = vector.broadcast %cst_153 : f32 to vector<4x32xf32>
    %1382 = arith.mulf %1380, %1381 : vector<4x32xf32>
    %1383 = arith.subf %1378, %1382 : vector<4x32xf32>
    %1384 = arith.subf %1379, %1382 : vector<4x32xf32>
    %1385 = arith.mulf %1383, %1383 : vector<4x32xf32>
    %1386 = arith.mulf %1384, %1384 : vector<4x32xf32>
    %1387 = arith.addf %1385, %1386 : vector<4x32xf32>
    %cst_154 = arith.constant 5.000000e-01 : f32
    %1388 = vector.broadcast %cst_154 : f32 to vector<4x32xf32>
    %1389 = arith.mulf %1387, %1388 : vector<4x32xf32>
    %cst_155 = arith.constant 9.99999974E-6 : f32
    %1390 = vector.broadcast %cst_155 : f32 to vector<4x32xf32>
    %1391 = arith.addf %1389, %1390 : vector<4x32xf32>
    %1392 = math.rsqrt %1391 : vector<4x32xf32>
    %1393 = arith.mulf %1383, %1392 : vector<4x32xf32>
    %c142 = arith.constant 142 : index
    %1394 = memref.load %arg2[%c142] : memref<232xf32, #tpu.memory_space<smem>>
    %1395 = vector.broadcast %1394 : f32 to vector<4x32xf32>
    %1396 = arith.mulf %1393, %1395 : vector<4x32xf32>
    %c144 = arith.constant 144 : index
    %1397 = memref.load %arg2[%c144] : memref<232xf32, #tpu.memory_space<smem>>
    %1398 = vector.broadcast %1397 : f32 to vector<4x32xf32>
    %1399 = arith.addf %1396, %1398 : vector<4x32xf32>
    %1400 = arith.mulf %1384, %1392 : vector<4x32xf32>
    %c143 = arith.constant 143 : index
    %1401 = memref.load %arg2[%c143] : memref<232xf32, #tpu.memory_space<smem>>
    %1402 = vector.broadcast %1401 : f32 to vector<4x32xf32>
    %1403 = arith.mulf %1400, %1402 : vector<4x32xf32>
    %c145 = arith.constant 145 : index
    %1404 = memref.load %arg2[%c145] : memref<232xf32, #tpu.memory_space<smem>>
    %1405 = vector.broadcast %1404 : f32 to vector<4x32xf32>
    %1406 = arith.addf %1403, %1405 : vector<4x32xf32>
    %cst_156 = arith.constant 0.000000e+00 : f32
    %1407 = vector.broadcast %cst_156 : f32 to vector<4x32xf32>
    %cst_157 = arith.constant 0.000000e+00 : f32
    %1408 = vector.broadcast %cst_157 : f32 to vector<4x32xf32>
    %c146 = arith.constant 146 : index
    %1409 = memref.load %arg2[%c146] : memref<232xf32, #tpu.memory_space<smem>>
    %1410 = vector.broadcast %1409 : f32 to vector<4x32xf32>
    %1411 = arith.mulf %1399, %1410 : vector<4x32xf32>
    %c162 = arith.constant 162 : index
    %1412 = memref.load %arg2[%c162] : memref<232xf32, #tpu.memory_space<smem>>
    %1413 = vector.broadcast %1412 : f32 to vector<4x32xf32>
    %1414 = arith.mulf %1406, %1413 : vector<4x32xf32>
    %1415 = arith.addf %1411, %1414 : vector<4x32xf32>
    %c178 = arith.constant 178 : index
    %1416 = memref.load %arg2[%c178] : memref<232xf32, #tpu.memory_space<smem>>
    %1417 = vector.broadcast %1416 : f32 to vector<4x32xf32>
    %1418 = arith.addf %1415, %1417 : vector<4x32xf32>
    %cst_158 = arith.constant 0.000000e+00 : f32
    %1419 = vector.broadcast %cst_158 : f32 to vector<4x32xf32>
    %1420 = arith.maximumf %1418, %1419 : vector<4x32xf32>
    %c194 = arith.constant 194 : index
    %1421 = memref.load %arg2[%c194] : memref<232xf32, #tpu.memory_space<smem>>
    %1422 = vector.broadcast %1421 : f32 to vector<4x32xf32>
    %1423 = arith.mulf %1420, %1422 : vector<4x32xf32>
    %1424 = arith.addf %1407, %1423 : vector<4x32xf32>
    %c210 = arith.constant 210 : index
    %1425 = memref.load %arg2[%c210] : memref<232xf32, #tpu.memory_space<smem>>
    %1426 = vector.broadcast %1425 : f32 to vector<4x32xf32>
    %1427 = arith.mulf %1420, %1426 : vector<4x32xf32>
    %1428 = arith.addf %1408, %1427 : vector<4x32xf32>
    %c147 = arith.constant 147 : index
    %1429 = memref.load %arg2[%c147] : memref<232xf32, #tpu.memory_space<smem>>
    %1430 = vector.broadcast %1429 : f32 to vector<4x32xf32>
    %1431 = arith.mulf %1399, %1430 : vector<4x32xf32>
    %c163 = arith.constant 163 : index
    %1432 = memref.load %arg2[%c163] : memref<232xf32, #tpu.memory_space<smem>>
    %1433 = vector.broadcast %1432 : f32 to vector<4x32xf32>
    %1434 = arith.mulf %1406, %1433 : vector<4x32xf32>
    %1435 = arith.addf %1431, %1434 : vector<4x32xf32>
    %c179 = arith.constant 179 : index
    %1436 = memref.load %arg2[%c179] : memref<232xf32, #tpu.memory_space<smem>>
    %1437 = vector.broadcast %1436 : f32 to vector<4x32xf32>
    %1438 = arith.addf %1435, %1437 : vector<4x32xf32>
    %cst_159 = arith.constant 0.000000e+00 : f32
    %1439 = vector.broadcast %cst_159 : f32 to vector<4x32xf32>
    %1440 = arith.maximumf %1438, %1439 : vector<4x32xf32>
    %c195 = arith.constant 195 : index
    %1441 = memref.load %arg2[%c195] : memref<232xf32, #tpu.memory_space<smem>>
    %1442 = vector.broadcast %1441 : f32 to vector<4x32xf32>
    %1443 = arith.mulf %1440, %1442 : vector<4x32xf32>
    %1444 = arith.addf %1424, %1443 : vector<4x32xf32>
    %c211 = arith.constant 211 : index
    %1445 = memref.load %arg2[%c211] : memref<232xf32, #tpu.memory_space<smem>>
    %1446 = vector.broadcast %1445 : f32 to vector<4x32xf32>
    %1447 = arith.mulf %1440, %1446 : vector<4x32xf32>
    %1448 = arith.addf %1428, %1447 : vector<4x32xf32>
    %c148 = arith.constant 148 : index
    %1449 = memref.load %arg2[%c148] : memref<232xf32, #tpu.memory_space<smem>>
    %1450 = vector.broadcast %1449 : f32 to vector<4x32xf32>
    %1451 = arith.mulf %1399, %1450 : vector<4x32xf32>
    %c164 = arith.constant 164 : index
    %1452 = memref.load %arg2[%c164] : memref<232xf32, #tpu.memory_space<smem>>
    %1453 = vector.broadcast %1452 : f32 to vector<4x32xf32>
    %1454 = arith.mulf %1406, %1453 : vector<4x32xf32>
    %1455 = arith.addf %1451, %1454 : vector<4x32xf32>
    %c180 = arith.constant 180 : index
    %1456 = memref.load %arg2[%c180] : memref<232xf32, #tpu.memory_space<smem>>
    %1457 = vector.broadcast %1456 : f32 to vector<4x32xf32>
    %1458 = arith.addf %1455, %1457 : vector<4x32xf32>
    %cst_160 = arith.constant 0.000000e+00 : f32
    %1459 = vector.broadcast %cst_160 : f32 to vector<4x32xf32>
    %1460 = arith.maximumf %1458, %1459 : vector<4x32xf32>
    %c196 = arith.constant 196 : index
    %1461 = memref.load %arg2[%c196] : memref<232xf32, #tpu.memory_space<smem>>
    %1462 = vector.broadcast %1461 : f32 to vector<4x32xf32>
    %1463 = arith.mulf %1460, %1462 : vector<4x32xf32>
    %1464 = arith.addf %1444, %1463 : vector<4x32xf32>
    %c212 = arith.constant 212 : index
    %1465 = memref.load %arg2[%c212] : memref<232xf32, #tpu.memory_space<smem>>
    %1466 = vector.broadcast %1465 : f32 to vector<4x32xf32>
    %1467 = arith.mulf %1460, %1466 : vector<4x32xf32>
    %1468 = arith.addf %1448, %1467 : vector<4x32xf32>
    %c149 = arith.constant 149 : index
    %1469 = memref.load %arg2[%c149] : memref<232xf32, #tpu.memory_space<smem>>
    %1470 = vector.broadcast %1469 : f32 to vector<4x32xf32>
    %1471 = arith.mulf %1399, %1470 : vector<4x32xf32>
    %c165 = arith.constant 165 : index
    %1472 = memref.load %arg2[%c165] : memref<232xf32, #tpu.memory_space<smem>>
    %1473 = vector.broadcast %1472 : f32 to vector<4x32xf32>
    %1474 = arith.mulf %1406, %1473 : vector<4x32xf32>
    %1475 = arith.addf %1471, %1474 : vector<4x32xf32>
    %c181 = arith.constant 181 : index
    %1476 = memref.load %arg2[%c181] : memref<232xf32, #tpu.memory_space<smem>>
    %1477 = vector.broadcast %1476 : f32 to vector<4x32xf32>
    %1478 = arith.addf %1475, %1477 : vector<4x32xf32>
    %cst_161 = arith.constant 0.000000e+00 : f32
    %1479 = vector.broadcast %cst_161 : f32 to vector<4x32xf32>
    %1480 = arith.maximumf %1478, %1479 : vector<4x32xf32>
    %c197 = arith.constant 197 : index
    %1481 = memref.load %arg2[%c197] : memref<232xf32, #tpu.memory_space<smem>>
    %1482 = vector.broadcast %1481 : f32 to vector<4x32xf32>
    %1483 = arith.mulf %1480, %1482 : vector<4x32xf32>
    %1484 = arith.addf %1464, %1483 : vector<4x32xf32>
    %c213 = arith.constant 213 : index
    %1485 = memref.load %arg2[%c213] : memref<232xf32, #tpu.memory_space<smem>>
    %1486 = vector.broadcast %1485 : f32 to vector<4x32xf32>
    %1487 = arith.mulf %1480, %1486 : vector<4x32xf32>
    %1488 = arith.addf %1468, %1487 : vector<4x32xf32>
    %c150 = arith.constant 150 : index
    %1489 = memref.load %arg2[%c150] : memref<232xf32, #tpu.memory_space<smem>>
    %1490 = vector.broadcast %1489 : f32 to vector<4x32xf32>
    %1491 = arith.mulf %1399, %1490 : vector<4x32xf32>
    %c166 = arith.constant 166 : index
    %1492 = memref.load %arg2[%c166] : memref<232xf32, #tpu.memory_space<smem>>
    %1493 = vector.broadcast %1492 : f32 to vector<4x32xf32>
    %1494 = arith.mulf %1406, %1493 : vector<4x32xf32>
    %1495 = arith.addf %1491, %1494 : vector<4x32xf32>
    %c182 = arith.constant 182 : index
    %1496 = memref.load %arg2[%c182] : memref<232xf32, #tpu.memory_space<smem>>
    %1497 = vector.broadcast %1496 : f32 to vector<4x32xf32>
    %1498 = arith.addf %1495, %1497 : vector<4x32xf32>
    %cst_162 = arith.constant 0.000000e+00 : f32
    %1499 = vector.broadcast %cst_162 : f32 to vector<4x32xf32>
    %1500 = arith.maximumf %1498, %1499 : vector<4x32xf32>
    %c198 = arith.constant 198 : index
    %1501 = memref.load %arg2[%c198] : memref<232xf32, #tpu.memory_space<smem>>
    %1502 = vector.broadcast %1501 : f32 to vector<4x32xf32>
    %1503 = arith.mulf %1500, %1502 : vector<4x32xf32>
    %1504 = arith.addf %1484, %1503 : vector<4x32xf32>
    %c214 = arith.constant 214 : index
    %1505 = memref.load %arg2[%c214] : memref<232xf32, #tpu.memory_space<smem>>
    %1506 = vector.broadcast %1505 : f32 to vector<4x32xf32>
    %1507 = arith.mulf %1500, %1506 : vector<4x32xf32>
    %1508 = arith.addf %1488, %1507 : vector<4x32xf32>
    %c151 = arith.constant 151 : index
    %1509 = memref.load %arg2[%c151] : memref<232xf32, #tpu.memory_space<smem>>
    %1510 = vector.broadcast %1509 : f32 to vector<4x32xf32>
    %1511 = arith.mulf %1399, %1510 : vector<4x32xf32>
    %c167 = arith.constant 167 : index
    %1512 = memref.load %arg2[%c167] : memref<232xf32, #tpu.memory_space<smem>>
    %1513 = vector.broadcast %1512 : f32 to vector<4x32xf32>
    %1514 = arith.mulf %1406, %1513 : vector<4x32xf32>
    %1515 = arith.addf %1511, %1514 : vector<4x32xf32>
    %c183 = arith.constant 183 : index
    %1516 = memref.load %arg2[%c183] : memref<232xf32, #tpu.memory_space<smem>>
    %1517 = vector.broadcast %1516 : f32 to vector<4x32xf32>
    %1518 = arith.addf %1515, %1517 : vector<4x32xf32>
    %cst_163 = arith.constant 0.000000e+00 : f32
    %1519 = vector.broadcast %cst_163 : f32 to vector<4x32xf32>
    %1520 = arith.maximumf %1518, %1519 : vector<4x32xf32>
    %c199 = arith.constant 199 : index
    %1521 = memref.load %arg2[%c199] : memref<232xf32, #tpu.memory_space<smem>>
    %1522 = vector.broadcast %1521 : f32 to vector<4x32xf32>
    %1523 = arith.mulf %1520, %1522 : vector<4x32xf32>
    %1524 = arith.addf %1504, %1523 : vector<4x32xf32>
    %c215 = arith.constant 215 : index
    %1525 = memref.load %arg2[%c215] : memref<232xf32, #tpu.memory_space<smem>>
    %1526 = vector.broadcast %1525 : f32 to vector<4x32xf32>
    %1527 = arith.mulf %1520, %1526 : vector<4x32xf32>
    %1528 = arith.addf %1508, %1527 : vector<4x32xf32>
    %c152 = arith.constant 152 : index
    %1529 = memref.load %arg2[%c152] : memref<232xf32, #tpu.memory_space<smem>>
    %1530 = vector.broadcast %1529 : f32 to vector<4x32xf32>
    %1531 = arith.mulf %1399, %1530 : vector<4x32xf32>
    %c168 = arith.constant 168 : index
    %1532 = memref.load %arg2[%c168] : memref<232xf32, #tpu.memory_space<smem>>
    %1533 = vector.broadcast %1532 : f32 to vector<4x32xf32>
    %1534 = arith.mulf %1406, %1533 : vector<4x32xf32>
    %1535 = arith.addf %1531, %1534 : vector<4x32xf32>
    %c184 = arith.constant 184 : index
    %1536 = memref.load %arg2[%c184] : memref<232xf32, #tpu.memory_space<smem>>
    %1537 = vector.broadcast %1536 : f32 to vector<4x32xf32>
    %1538 = arith.addf %1535, %1537 : vector<4x32xf32>
    %cst_164 = arith.constant 0.000000e+00 : f32
    %1539 = vector.broadcast %cst_164 : f32 to vector<4x32xf32>
    %1540 = arith.maximumf %1538, %1539 : vector<4x32xf32>
    %c200 = arith.constant 200 : index
    %1541 = memref.load %arg2[%c200] : memref<232xf32, #tpu.memory_space<smem>>
    %1542 = vector.broadcast %1541 : f32 to vector<4x32xf32>
    %1543 = arith.mulf %1540, %1542 : vector<4x32xf32>
    %1544 = arith.addf %1524, %1543 : vector<4x32xf32>
    %c216 = arith.constant 216 : index
    %1545 = memref.load %arg2[%c216] : memref<232xf32, #tpu.memory_space<smem>>
    %1546 = vector.broadcast %1545 : f32 to vector<4x32xf32>
    %1547 = arith.mulf %1540, %1546 : vector<4x32xf32>
    %1548 = arith.addf %1528, %1547 : vector<4x32xf32>
    %c153 = arith.constant 153 : index
    %1549 = memref.load %arg2[%c153] : memref<232xf32, #tpu.memory_space<smem>>
    %1550 = vector.broadcast %1549 : f32 to vector<4x32xf32>
    %1551 = arith.mulf %1399, %1550 : vector<4x32xf32>
    %c169 = arith.constant 169 : index
    %1552 = memref.load %arg2[%c169] : memref<232xf32, #tpu.memory_space<smem>>
    %1553 = vector.broadcast %1552 : f32 to vector<4x32xf32>
    %1554 = arith.mulf %1406, %1553 : vector<4x32xf32>
    %1555 = arith.addf %1551, %1554 : vector<4x32xf32>
    %c185 = arith.constant 185 : index
    %1556 = memref.load %arg2[%c185] : memref<232xf32, #tpu.memory_space<smem>>
    %1557 = vector.broadcast %1556 : f32 to vector<4x32xf32>
    %1558 = arith.addf %1555, %1557 : vector<4x32xf32>
    %cst_165 = arith.constant 0.000000e+00 : f32
    %1559 = vector.broadcast %cst_165 : f32 to vector<4x32xf32>
    %1560 = arith.maximumf %1558, %1559 : vector<4x32xf32>
    %c201 = arith.constant 201 : index
    %1561 = memref.load %arg2[%c201] : memref<232xf32, #tpu.memory_space<smem>>
    %1562 = vector.broadcast %1561 : f32 to vector<4x32xf32>
    %1563 = arith.mulf %1560, %1562 : vector<4x32xf32>
    %1564 = arith.addf %1544, %1563 : vector<4x32xf32>
    %c217 = arith.constant 217 : index
    %1565 = memref.load %arg2[%c217] : memref<232xf32, #tpu.memory_space<smem>>
    %1566 = vector.broadcast %1565 : f32 to vector<4x32xf32>
    %1567 = arith.mulf %1560, %1566 : vector<4x32xf32>
    %1568 = arith.addf %1548, %1567 : vector<4x32xf32>
    %c154 = arith.constant 154 : index
    %1569 = memref.load %arg2[%c154] : memref<232xf32, #tpu.memory_space<smem>>
    %1570 = vector.broadcast %1569 : f32 to vector<4x32xf32>
    %1571 = arith.mulf %1399, %1570 : vector<4x32xf32>
    %c170 = arith.constant 170 : index
    %1572 = memref.load %arg2[%c170] : memref<232xf32, #tpu.memory_space<smem>>
    %1573 = vector.broadcast %1572 : f32 to vector<4x32xf32>
    %1574 = arith.mulf %1406, %1573 : vector<4x32xf32>
    %1575 = arith.addf %1571, %1574 : vector<4x32xf32>
    %c186 = arith.constant 186 : index
    %1576 = memref.load %arg2[%c186] : memref<232xf32, #tpu.memory_space<smem>>
    %1577 = vector.broadcast %1576 : f32 to vector<4x32xf32>
    %1578 = arith.addf %1575, %1577 : vector<4x32xf32>
    %cst_166 = arith.constant 0.000000e+00 : f32
    %1579 = vector.broadcast %cst_166 : f32 to vector<4x32xf32>
    %1580 = arith.maximumf %1578, %1579 : vector<4x32xf32>
    %c202 = arith.constant 202 : index
    %1581 = memref.load %arg2[%c202] : memref<232xf32, #tpu.memory_space<smem>>
    %1582 = vector.broadcast %1581 : f32 to vector<4x32xf32>
    %1583 = arith.mulf %1580, %1582 : vector<4x32xf32>
    %1584 = arith.addf %1564, %1583 : vector<4x32xf32>
    %c218 = arith.constant 218 : index
    %1585 = memref.load %arg2[%c218] : memref<232xf32, #tpu.memory_space<smem>>
    %1586 = vector.broadcast %1585 : f32 to vector<4x32xf32>
    %1587 = arith.mulf %1580, %1586 : vector<4x32xf32>
    %1588 = arith.addf %1568, %1587 : vector<4x32xf32>
    %c155 = arith.constant 155 : index
    %1589 = memref.load %arg2[%c155] : memref<232xf32, #tpu.memory_space<smem>>
    %1590 = vector.broadcast %1589 : f32 to vector<4x32xf32>
    %1591 = arith.mulf %1399, %1590 : vector<4x32xf32>
    %c171 = arith.constant 171 : index
    %1592 = memref.load %arg2[%c171] : memref<232xf32, #tpu.memory_space<smem>>
    %1593 = vector.broadcast %1592 : f32 to vector<4x32xf32>
    %1594 = arith.mulf %1406, %1593 : vector<4x32xf32>
    %1595 = arith.addf %1591, %1594 : vector<4x32xf32>
    %c187 = arith.constant 187 : index
    %1596 = memref.load %arg2[%c187] : memref<232xf32, #tpu.memory_space<smem>>
    %1597 = vector.broadcast %1596 : f32 to vector<4x32xf32>
    %1598 = arith.addf %1595, %1597 : vector<4x32xf32>
    %cst_167 = arith.constant 0.000000e+00 : f32
    %1599 = vector.broadcast %cst_167 : f32 to vector<4x32xf32>
    %1600 = arith.maximumf %1598, %1599 : vector<4x32xf32>
    %c203 = arith.constant 203 : index
    %1601 = memref.load %arg2[%c203] : memref<232xf32, #tpu.memory_space<smem>>
    %1602 = vector.broadcast %1601 : f32 to vector<4x32xf32>
    %1603 = arith.mulf %1600, %1602 : vector<4x32xf32>
    %1604 = arith.addf %1584, %1603 : vector<4x32xf32>
    %c219 = arith.constant 219 : index
    %1605 = memref.load %arg2[%c219] : memref<232xf32, #tpu.memory_space<smem>>
    %1606 = vector.broadcast %1605 : f32 to vector<4x32xf32>
    %1607 = arith.mulf %1600, %1606 : vector<4x32xf32>
    %1608 = arith.addf %1588, %1607 : vector<4x32xf32>
    %c156 = arith.constant 156 : index
    %1609 = memref.load %arg2[%c156] : memref<232xf32, #tpu.memory_space<smem>>
    %1610 = vector.broadcast %1609 : f32 to vector<4x32xf32>
    %1611 = arith.mulf %1399, %1610 : vector<4x32xf32>
    %c172 = arith.constant 172 : index
    %1612 = memref.load %arg2[%c172] : memref<232xf32, #tpu.memory_space<smem>>
    %1613 = vector.broadcast %1612 : f32 to vector<4x32xf32>
    %1614 = arith.mulf %1406, %1613 : vector<4x32xf32>
    %1615 = arith.addf %1611, %1614 : vector<4x32xf32>
    %c188 = arith.constant 188 : index
    %1616 = memref.load %arg2[%c188] : memref<232xf32, #tpu.memory_space<smem>>
    %1617 = vector.broadcast %1616 : f32 to vector<4x32xf32>
    %1618 = arith.addf %1615, %1617 : vector<4x32xf32>
    %cst_168 = arith.constant 0.000000e+00 : f32
    %1619 = vector.broadcast %cst_168 : f32 to vector<4x32xf32>
    %1620 = arith.maximumf %1618, %1619 : vector<4x32xf32>
    %c204 = arith.constant 204 : index
    %1621 = memref.load %arg2[%c204] : memref<232xf32, #tpu.memory_space<smem>>
    %1622 = vector.broadcast %1621 : f32 to vector<4x32xf32>
    %1623 = arith.mulf %1620, %1622 : vector<4x32xf32>
    %1624 = arith.addf %1604, %1623 : vector<4x32xf32>
    %c220 = arith.constant 220 : index
    %1625 = memref.load %arg2[%c220] : memref<232xf32, #tpu.memory_space<smem>>
    %1626 = vector.broadcast %1625 : f32 to vector<4x32xf32>
    %1627 = arith.mulf %1620, %1626 : vector<4x32xf32>
    %1628 = arith.addf %1608, %1627 : vector<4x32xf32>
    %c157 = arith.constant 157 : index
    %1629 = memref.load %arg2[%c157] : memref<232xf32, #tpu.memory_space<smem>>
    %1630 = vector.broadcast %1629 : f32 to vector<4x32xf32>
    %1631 = arith.mulf %1399, %1630 : vector<4x32xf32>
    %c173 = arith.constant 173 : index
    %1632 = memref.load %arg2[%c173] : memref<232xf32, #tpu.memory_space<smem>>
    %1633 = vector.broadcast %1632 : f32 to vector<4x32xf32>
    %1634 = arith.mulf %1406, %1633 : vector<4x32xf32>
    %1635 = arith.addf %1631, %1634 : vector<4x32xf32>
    %c189 = arith.constant 189 : index
    %1636 = memref.load %arg2[%c189] : memref<232xf32, #tpu.memory_space<smem>>
    %1637 = vector.broadcast %1636 : f32 to vector<4x32xf32>
    %1638 = arith.addf %1635, %1637 : vector<4x32xf32>
    %cst_169 = arith.constant 0.000000e+00 : f32
    %1639 = vector.broadcast %cst_169 : f32 to vector<4x32xf32>
    %1640 = arith.maximumf %1638, %1639 : vector<4x32xf32>
    %c205 = arith.constant 205 : index
    %1641 = memref.load %arg2[%c205] : memref<232xf32, #tpu.memory_space<smem>>
    %1642 = vector.broadcast %1641 : f32 to vector<4x32xf32>
    %1643 = arith.mulf %1640, %1642 : vector<4x32xf32>
    %1644 = arith.addf %1624, %1643 : vector<4x32xf32>
    %c221 = arith.constant 221 : index
    %1645 = memref.load %arg2[%c221] : memref<232xf32, #tpu.memory_space<smem>>
    %1646 = vector.broadcast %1645 : f32 to vector<4x32xf32>
    %1647 = arith.mulf %1640, %1646 : vector<4x32xf32>
    %1648 = arith.addf %1628, %1647 : vector<4x32xf32>
    %c158 = arith.constant 158 : index
    %1649 = memref.load %arg2[%c158] : memref<232xf32, #tpu.memory_space<smem>>
    %1650 = vector.broadcast %1649 : f32 to vector<4x32xf32>
    %1651 = arith.mulf %1399, %1650 : vector<4x32xf32>
    %c174 = arith.constant 174 : index
    %1652 = memref.load %arg2[%c174] : memref<232xf32, #tpu.memory_space<smem>>
    %1653 = vector.broadcast %1652 : f32 to vector<4x32xf32>
    %1654 = arith.mulf %1406, %1653 : vector<4x32xf32>
    %1655 = arith.addf %1651, %1654 : vector<4x32xf32>
    %c190 = arith.constant 190 : index
    %1656 = memref.load %arg2[%c190] : memref<232xf32, #tpu.memory_space<smem>>
    %1657 = vector.broadcast %1656 : f32 to vector<4x32xf32>
    %1658 = arith.addf %1655, %1657 : vector<4x32xf32>
    %cst_170 = arith.constant 0.000000e+00 : f32
    %1659 = vector.broadcast %cst_170 : f32 to vector<4x32xf32>
    %1660 = arith.maximumf %1658, %1659 : vector<4x32xf32>
    %c206 = arith.constant 206 : index
    %1661 = memref.load %arg2[%c206] : memref<232xf32, #tpu.memory_space<smem>>
    %1662 = vector.broadcast %1661 : f32 to vector<4x32xf32>
    %1663 = arith.mulf %1660, %1662 : vector<4x32xf32>
    %1664 = arith.addf %1644, %1663 : vector<4x32xf32>
    %c222 = arith.constant 222 : index
    %1665 = memref.load %arg2[%c222] : memref<232xf32, #tpu.memory_space<smem>>
    %1666 = vector.broadcast %1665 : f32 to vector<4x32xf32>
    %1667 = arith.mulf %1660, %1666 : vector<4x32xf32>
    %1668 = arith.addf %1648, %1667 : vector<4x32xf32>
    %c159 = arith.constant 159 : index
    %1669 = memref.load %arg2[%c159] : memref<232xf32, #tpu.memory_space<smem>>
    %1670 = vector.broadcast %1669 : f32 to vector<4x32xf32>
    %1671 = arith.mulf %1399, %1670 : vector<4x32xf32>
    %c175 = arith.constant 175 : index
    %1672 = memref.load %arg2[%c175] : memref<232xf32, #tpu.memory_space<smem>>
    %1673 = vector.broadcast %1672 : f32 to vector<4x32xf32>
    %1674 = arith.mulf %1406, %1673 : vector<4x32xf32>
    %1675 = arith.addf %1671, %1674 : vector<4x32xf32>
    %c191 = arith.constant 191 : index
    %1676 = memref.load %arg2[%c191] : memref<232xf32, #tpu.memory_space<smem>>
    %1677 = vector.broadcast %1676 : f32 to vector<4x32xf32>
    %1678 = arith.addf %1675, %1677 : vector<4x32xf32>
    %cst_171 = arith.constant 0.000000e+00 : f32
    %1679 = vector.broadcast %cst_171 : f32 to vector<4x32xf32>
    %1680 = arith.maximumf %1678, %1679 : vector<4x32xf32>
    %c207 = arith.constant 207 : index
    %1681 = memref.load %arg2[%c207] : memref<232xf32, #tpu.memory_space<smem>>
    %1682 = vector.broadcast %1681 : f32 to vector<4x32xf32>
    %1683 = arith.mulf %1680, %1682 : vector<4x32xf32>
    %1684 = arith.addf %1664, %1683 : vector<4x32xf32>
    %c223 = arith.constant 223 : index
    %1685 = memref.load %arg2[%c223] : memref<232xf32, #tpu.memory_space<smem>>
    %1686 = vector.broadcast %1685 : f32 to vector<4x32xf32>
    %1687 = arith.mulf %1680, %1686 : vector<4x32xf32>
    %1688 = arith.addf %1668, %1687 : vector<4x32xf32>
    %c160 = arith.constant 160 : index
    %1689 = memref.load %arg2[%c160] : memref<232xf32, #tpu.memory_space<smem>>
    %1690 = vector.broadcast %1689 : f32 to vector<4x32xf32>
    %1691 = arith.mulf %1399, %1690 : vector<4x32xf32>
    %c176 = arith.constant 176 : index
    %1692 = memref.load %arg2[%c176] : memref<232xf32, #tpu.memory_space<smem>>
    %1693 = vector.broadcast %1692 : f32 to vector<4x32xf32>
    %1694 = arith.mulf %1406, %1693 : vector<4x32xf32>
    %1695 = arith.addf %1691, %1694 : vector<4x32xf32>
    %c192 = arith.constant 192 : index
    %1696 = memref.load %arg2[%c192] : memref<232xf32, #tpu.memory_space<smem>>
    %1697 = vector.broadcast %1696 : f32 to vector<4x32xf32>
    %1698 = arith.addf %1695, %1697 : vector<4x32xf32>
    %cst_172 = arith.constant 0.000000e+00 : f32
    %1699 = vector.broadcast %cst_172 : f32 to vector<4x32xf32>
    %1700 = arith.maximumf %1698, %1699 : vector<4x32xf32>
    %c208 = arith.constant 208 : index
    %1701 = memref.load %arg2[%c208] : memref<232xf32, #tpu.memory_space<smem>>
    %1702 = vector.broadcast %1701 : f32 to vector<4x32xf32>
    %1703 = arith.mulf %1700, %1702 : vector<4x32xf32>
    %1704 = arith.addf %1684, %1703 : vector<4x32xf32>
    %c224 = arith.constant 224 : index
    %1705 = memref.load %arg2[%c224] : memref<232xf32, #tpu.memory_space<smem>>
    %1706 = vector.broadcast %1705 : f32 to vector<4x32xf32>
    %1707 = arith.mulf %1700, %1706 : vector<4x32xf32>
    %1708 = arith.addf %1688, %1707 : vector<4x32xf32>
    %c161 = arith.constant 161 : index
    %1709 = memref.load %arg2[%c161] : memref<232xf32, #tpu.memory_space<smem>>
    %1710 = vector.broadcast %1709 : f32 to vector<4x32xf32>
    %1711 = arith.mulf %1399, %1710 : vector<4x32xf32>
    %c177 = arith.constant 177 : index
    %1712 = memref.load %arg2[%c177] : memref<232xf32, #tpu.memory_space<smem>>
    %1713 = vector.broadcast %1712 : f32 to vector<4x32xf32>
    %1714 = arith.mulf %1406, %1713 : vector<4x32xf32>
    %1715 = arith.addf %1711, %1714 : vector<4x32xf32>
    %c193 = arith.constant 193 : index
    %1716 = memref.load %arg2[%c193] : memref<232xf32, #tpu.memory_space<smem>>
    %1717 = vector.broadcast %1716 : f32 to vector<4x32xf32>
    %1718 = arith.addf %1715, %1717 : vector<4x32xf32>
    %cst_173 = arith.constant 0.000000e+00 : f32
    %1719 = vector.broadcast %cst_173 : f32 to vector<4x32xf32>
    %1720 = arith.maximumf %1718, %1719 : vector<4x32xf32>
    %c209 = arith.constant 209 : index
    %1721 = memref.load %arg2[%c209] : memref<232xf32, #tpu.memory_space<smem>>
    %1722 = vector.broadcast %1721 : f32 to vector<4x32xf32>
    %1723 = arith.mulf %1720, %1722 : vector<4x32xf32>
    %1724 = arith.addf %1704, %1723 : vector<4x32xf32>
    %c225 = arith.constant 225 : index
    %1725 = memref.load %arg2[%c225] : memref<232xf32, #tpu.memory_space<smem>>
    %1726 = vector.broadcast %1725 : f32 to vector<4x32xf32>
    %1727 = arith.mulf %1720, %1726 : vector<4x32xf32>
    %1728 = arith.addf %1708, %1727 : vector<4x32xf32>
    %1729 = arith.addf %1399, %1724 : vector<4x32xf32>
    %c226 = arith.constant 226 : index
    %1730 = memref.load %arg2[%c226] : memref<232xf32, #tpu.memory_space<smem>>
    %1731 = vector.broadcast %1730 : f32 to vector<4x32xf32>
    %1732 = arith.addf %1729, %1731 : vector<4x32xf32>
    %1733 = arith.addf %1406, %1728 : vector<4x32xf32>
    %c227 = arith.constant 227 : index
    %1734 = memref.load %arg2[%c227] : memref<232xf32, #tpu.memory_space<smem>>
    %1735 = vector.broadcast %1734 : f32 to vector<4x32xf32>
    %1736 = arith.addf %1733, %1735 : vector<4x32xf32>
    %1737 = arith.addf %1732, %1736 : vector<4x32xf32>
    %cst_174 = arith.constant 5.000000e-01 : f32
    %1738 = vector.broadcast %cst_174 : f32 to vector<4x32xf32>
    %1739 = arith.mulf %1737, %1738 : vector<4x32xf32>
    %1740 = arith.subf %1732, %1739 : vector<4x32xf32>
    %1741 = arith.subf %1736, %1739 : vector<4x32xf32>
    %1742 = arith.mulf %1740, %1740 : vector<4x32xf32>
    %1743 = arith.mulf %1741, %1741 : vector<4x32xf32>
    %1744 = arith.addf %1742, %1743 : vector<4x32xf32>
    %cst_175 = arith.constant 5.000000e-01 : f32
    %1745 = vector.broadcast %cst_175 : f32 to vector<4x32xf32>
    %1746 = arith.mulf %1744, %1745 : vector<4x32xf32>
    %cst_176 = arith.constant 9.99999974E-6 : f32
    %1747 = vector.broadcast %cst_176 : f32 to vector<4x32xf32>
    %1748 = arith.addf %1746, %1747 : vector<4x32xf32>
    %1749 = math.rsqrt %1748 : vector<4x32xf32>
    %1750 = arith.mulf %1740, %1749 : vector<4x32xf32>
    %c228 = arith.constant 228 : index
    %1751 = memref.load %arg2[%c228] : memref<232xf32, #tpu.memory_space<smem>>
    %1752 = vector.broadcast %1751 : f32 to vector<4x32xf32>
    %1753 = arith.mulf %1750, %1752 : vector<4x32xf32>
    %c230 = arith.constant 230 : index
    %1754 = memref.load %arg2[%c230] : memref<232xf32, #tpu.memory_space<smem>>
    %1755 = vector.broadcast %1754 : f32 to vector<4x32xf32>
    %1756 = arith.addf %1753, %1755 : vector<4x32xf32>
    %1757 = arith.mulf %1741, %1749 : vector<4x32xf32>
    %c229 = arith.constant 229 : index
    %1758 = memref.load %arg2[%c229] : memref<232xf32, #tpu.memory_space<smem>>
    %1759 = vector.broadcast %1758 : f32 to vector<4x32xf32>
    %1760 = arith.mulf %1757, %1759 : vector<4x32xf32>
    %c231 = arith.constant 231 : index
    %1761 = memref.load %arg2[%c231] : memref<232xf32, #tpu.memory_space<smem>>
    %1762 = vector.broadcast %1761 : f32 to vector<4x32xf32>
    %1763 = arith.addf %1760, %1762 : vector<4x32xf32>
    %1764 = tpu.concatenate %1756, %1763 in 1 : vector<4x32xf32>, vector<4x32xf32> -> vector<4x64xf32>
    %c0_177 = arith.constant 0 : index
    %c0_178 = arith.constant 0 : index
    %1765 = vector.load %arg11[%c0_177, %c0_178] : memref<64x520xf32, #tpu.memory_space<vmem>>, vector<64x520xf32>
    %cst_179 = arith.constant dense<0.000000e+00> : vector<4x520xf32>
    %1766 = tpu.matmul %1764, %1765, %cst_179 {dimension_numbers = #tpu.dot_dimension_numbers<[1], [0], [0], [1], [0, 0, 1, 1], [], []>} : vector<4x64xf32>, vector<64x520xf32>, vector<4x520xf32> -> vector<4x520xf32>
    %c0_180 = arith.constant 0 : index
    %c0_181 = arith.constant 0 : index
    %1767 = vector.load %arg12[%c0_180, %c0_181] : memref<2x520xf32, #tpu.memory_space<vmem>>, vector<1x520xf32>
    %1768 = vector.broadcast %1767 : vector<1x520xf32> to vector<4x520xf32>
    %1769 = arith.addf %1766, %1768 : vector<4x520xf32>
    %1770 = math.tanh %1769 : vector<4x520xf32>
    %cst_182 = arith.constant 6.500000e+00 : f32
    %1771 = vector.broadcast %cst_182 : f32 to vector<4x520xf32>
    %1772 = arith.mulf %1770, %1771 : vector<4x520xf32>
    %cst_183 = arith.constant 6.500000e+00 : f32
    %1773 = vector.broadcast %cst_183 : f32 to vector<4x520xf32>
    %1774 = arith.addf %1772, %1773 : vector<4x520xf32>
    %cst_184 = arith.constant 0.000000e+00 : f32
    %cst_185 = arith.constant 11.999999 : f32
    %1775 = vector.broadcast %cst_184 : f32 to vector<4x520xf32>
    %1776 = arith.maximumf %1775, %1774 : vector<4x520xf32>
    %1777 = vector.broadcast %cst_185 : f32 to vector<4x520xf32>
    %1778 = arith.minimumf %1777, %1776 : vector<4x520xf32>
    %1779 = math.floor %1778 : vector<4x520xf32>
    %1780 = arith.subf %1778, %1779 : vector<4x520xf32>
    %c1_186 = arith.constant 1 : index
    %c0_187 = arith.constant 0 : index
    %1781 = vector.load %arg12[%c1_186, %c0_187] : memref<2x520xf32, #tpu.memory_space<vmem>>, vector<1x520xf32>
    %1782 = vector.broadcast %1781 : vector<1x520xf32> to vector<4x520xf32>
    %1783 = arith.cmpf oeq, %1779, %1782 : vector<4x520xf32>
    %cst_188 = arith.constant 1.000000e+00 : f32
    %1784 = vector.broadcast %cst_188 : f32 to vector<4x520xf32>
    %1785 = arith.subf %1784, %1780 : vector<4x520xf32>
    %cst_189 = arith.constant 0.000000e+00 : f32
    %1786 = vector.broadcast %cst_189 : f32 to vector<4x520xf32>
    %1787 = arith.select %1783, %1785, %1786 : vector<4x520xi1>, vector<4x520xf32>
    %cst_190 = arith.constant 1.000000e+00 : f32
    %1788 = vector.broadcast %cst_190 : f32 to vector<4x520xf32>
    %1789 = arith.addf %1779, %1788 : vector<4x520xf32>
    %1790 = vector.broadcast %1781 : vector<1x520xf32> to vector<4x520xf32>
    %1791 = arith.cmpf oeq, %1789, %1790 : vector<4x520xf32>
    %cst_191 = arith.constant 0.000000e+00 : f32
    %1792 = vector.broadcast %cst_191 : f32 to vector<4x520xf32>
    %1793 = arith.select %1791, %1780, %1792 : vector<4x520xi1>, vector<4x520xf32>
    %1794 = arith.addf %1787, %1793 : vector<4x520xf32>
    %c0_192 = arith.constant 0 : index
    %c0_193 = arith.constant 0 : index
    %1795 = vector.load %arg13[%c0_192, %c0_193] : memref<32x520xf32, #tpu.memory_space<vmem>>, vector<32x520xf32>
    %cst_194 = arith.constant dense<0.000000e+00> : vector<4x520xf32>
    %1796 = tpu.matmul %39, %1795, %cst_194 {dimension_numbers = #tpu.dot_dimension_numbers<[1], [0], [0], [1], [0, 0, 1, 1], [], []>} : vector<4x32xf32>, vector<32x520xf32>, vector<4x520xf32> -> vector<4x520xf32>
    %1797 = arith.mulf %1796, %1794 : vector<4x520xf32>
    %c0_195 = arith.constant 0 : index
    %c0_196 = arith.constant 0 : index
    %1798 = vector.load %arg14[%c0_195, %c0_196] : memref<520x40xf32, #tpu.memory_space<vmem>>, vector<520x40xf32>
    %cst_197 = arith.constant dense<0.000000e+00> : vector<4x40xf32>
    %1799 = tpu.matmul %1797, %1798, %cst_197 {dimension_numbers = #tpu.dot_dimension_numbers<[1], [0], [0], [1], [0, 0, 1, 1], [], []>} : vector<4x520xf32>, vector<520x40xf32>, vector<4x40xf32> -> vector<4x40xf32>
    %c3_198 = arith.constant 3 : index
    %c0_199 = arith.constant 0 : index
    %1800 = vector.load %arg15[%c3_198, %c0_199] : memref<4x40xf32, #tpu.memory_space<vmem>>, vector<1x40xf32>
    %1801 = vector.broadcast %1800 : vector<1x40xf32> to vector<4x40xf32>
    %1802 = arith.mulf %1801, %1799 : vector<4x40xf32>
    %c2_200 = arith.constant 2 : index
    %c0_201 = arith.constant 0 : index
    %1803 = vector.load %arg15[%c2_200, %c0_201] : memref<4x40xf32, #tpu.memory_space<vmem>>, vector<1x40xf32>
    %1804 = vector.broadcast %1803 : vector<1x40xf32> to vector<4x40xf32>
    %1805 = arith.addf %1802, %1804 : vector<4x40xf32>
    %1806 = arith.mulf %1805, %1799 : vector<4x40xf32>
    %c1_202 = arith.constant 1 : index
    %c0_203 = arith.constant 0 : index
    %1807 = vector.load %arg15[%c1_202, %c0_203] : memref<4x40xf32, #tpu.memory_space<vmem>>, vector<1x40xf32>
    %1808 = vector.broadcast %1807 : vector<1x40xf32> to vector<4x40xf32>
    %1809 = arith.addf %1806, %1808 : vector<4x40xf32>
    %1810 = arith.mulf %1809, %1799 : vector<4x40xf32>
    %c0_204 = arith.constant 0 : index
    %c0_205 = arith.constant 0 : index
    %1811 = vector.load %arg15[%c0_204, %c0_205] : memref<4x40xf32, #tpu.memory_space<vmem>>, vector<1x40xf32>
    %1812 = vector.broadcast %1811 : vector<1x40xf32> to vector<4x40xf32>
    %1813 = arith.addf %1810, %1812 : vector<4x40xf32>
    %1814 = arith.addf %1799, %1813 : vector<4x40xf32>
    %c0_206 = arith.constant 0 : index
    %c0_207 = arith.constant 0 : index
    %1815 = vector.load %arg16[%c0_206, %c0_207] : memref<4x40xf32, #tpu.memory_space<vmem>>, vector<4x40xf32>
    tpu.vector_store %arg16[%c0_206, %c0_207], %1814 {strides = array<i32>} : memref<4x40xf32, #tpu.memory_space<vmem>>, vector<4x40xf32>,
    return
  }
}

</mosaic_0001>

<bundles_post_ra>
// kernel: ex_decoder_forward.1
= control target key start
LH: loop header
LB: loop body
LE: loop exit
PB: predicated region body
PF: predicated region fallthrough
CT: control target
= control target key end

     0   :  { %s10279_s0 = inlined_call_operand.vmem [shape: f32[4,5], index: 0, kind: input, shape index: {}]   ;;  %s10280_s1 = inlined_call_operand.vmem [shape: f32[5,4], index: 1, kind: input, shape index: {}]   ;;  %s10281_s2 = inlined_call_operand.vmem [shape: f32[232], index: 2, kind: input, shape index: {}]   ;;  %s10282_s3 = inlined_call_operand.vmem [shape: f32[5,32], index: 3, kind: input, shape index: {}]   ;;  %s10283_s4 = inlined_call_operand.vmem [shape: f32[32,32], index: 4, kind: input, shape index: {}]   ;;  %s10284_s5 = inlined_call_operand.vmem [shape: f32[32,32], index: 5, kind: input, shape index: {}]   ;;  %s10285_s6 = inlined_call_operand.vmem [shape: f32[32,5], index: 6, kind: input, shape index: {}]   ;;  %s10286_s7 = inlined_call_operand.vmem [shape: f32[32,32], index: 7, kind: input, shape index: {}]   ;;  %s10287_s8 = inlined_call_operand.vmem [shape: f32[32,32], index: 8, kind: input, shape index: {}]   ;;  %s10288_s9 = inlined_call_operand.vmem [shape: f32[8,32], index: 9, kind: input, shape index: {}]   ;;  %s10289_s10 = inlined_call_operand.vmem [shape: f32[32,8], index: 10, kind: input, shape index: {}]   ;;  %s10290_s11 = inlined_call_operand.vmem [shape: f32[64,520], index: 11, kind: input, shape index: {}]   ;;  %s10291_s12 = inlined_call_operand.vmem [shape: f32[2,520], index: 12, kind: input, shape index: {}]   ;;  %s10292_s13 = inlined_call_operand.vmem [shape: f32[32,520], index: 13, kind: input, shape index: {}]   ;;  %s10293_s14 = inlined_call_operand.vmem [shape: f32[520,40], index: 14, kind: input, shape index: {}]   ;;  %s10294_s15 = inlined_call_operand.vmem [shape: f32[4,40], index: 15, kind: input, shape index: {}]   ;;  %s10295_s16 = inlined_call_operand.hbm [shape: f32[4,40], index: 16, kind: output, shape index: {}]  }
   0x1   :  { %10600 = sst [smem:[#allocation169_spill]] %s10279_s0 }
   0x2   :  { %10601 = sst [smem:[#allocation170_spill]] %s10290_s11 }
   0x3   :  { %10602 = sst [smem:[#allocation171_spill]] %s10291_s12 }
   0x4   :  { %10603 = sst [smem:[#allocation172_spill]] %s10292_s13 }
   0x5   :  { %10604 = sst [smem:[#allocation173_spill]] %s10293_s14 }
   0x6   :  { %10605 = sst [smem:[#allocation174_spill]] %s10294_s15 }
   0x7   :  { %10606 = sst [smem:[#allocation175_spill]] %s10295_s16 }
   0x8   :  { %21 = vsyncpa [#allocation4], 0 }
   0x9   :  { %22 = vsyncpa [#allocation3], 0  ;;  %s32_s23 = sshll.u32 %s10281_s2, 4  ;;  %s5652_s24 = smov [#allocation2]   ;;  %s33_s23 = int_to_ptr.vmem [resolvable:$true] %s32_s23 }
   0xa   :  { %35 = dma.vmem_to_smem %s33_s23, 32, %s5652_s24, [#allocation4]  }
   0xb   :  { %5648 = dma.done.wait [#allocation4], 32  }
   0xc   :  { %5649 = vsyncadd [#allocation4], 4294967264 }
   0xd   :  { %66 = sfence }
   0xe   :  { %vm79_vm0 = vcmask 1044480   ;;  %v215_v0 = vld [vmem:[%s10280_s1] sm:$0x1f]  ;;  %vm75_vm1 = vcmask 39936   ;;  %v5760_v2 = vld [vmem:[%s10289_s10 + $0x10] sm:$0xff]  ;;  %v10296_v4 = vmov 0  }
   0xf   :  { %v211_v1 = vld [vmem:[%s10285_s6] sm:$0xff]  ;;  %4969 = vmatpush.msk.msra.mxu3 %vm79_vm0, %v215_v0  ;;  %5242 = vset.pattern.permute.xlu1 %v10296_v4  ;;  %v10298_v6 = vmov 1   ;;  %v212_v7 = vld [vmem:[%s10285_s6 + $0x8] sm:$0xff]  ;;  %v5783_v8 = vld [vmem:[%s10289_s10 + $0x18] sm:$0xff]  ;;  %v5804_v13 = vadd.f32 1.0, %v5760_v2  ;;  %s10607_s29 = sld [smem:[#allocation169_spill]] }
  0x10   :  { %v5765_v3 = vld [vmem:[%s10289_s10] sm:$0xff]  ;;  %4970 = vmatmul.msk.f32.vlgmr.msra.gmra.mxu3 %vm75_vm1, %v211_v1  ;;  %228 = vperm.xlu1 %5242, %v5760_v2   ;;  %v5788_v9 = vld [vmem:[%s10289_s10 + $0x8] sm:$0xff]  ;;  %v5791_v10 = vadd.f32 1.0, %v5783_v8  ;;  %v213_v11 = vld [vmem:[%s10285_s6 + $0x10] sm:$0xff]  ;;  %v10302_v48 = vmov 2   ;;  %v10300_v59 = vmov 3  }
  0x11   :  { %v5770_v5 = vadd.f32 1.0, %v5765_v3  ;;  %5241 = vset.pattern.permute.xlu0 %v10296_v4  ;;  %5243 = vset.pattern.permute.xlu2 %v10298_v6  ;;  %v5801_v12 = vadd.f32 1.0, %v5788_v9  ;;  %v214_v14 = vld [vmem:[%s10285_s6 + $0x18] sm:$0xff]  ;;  %v73_v15 = vld [vmem:[%s10282_s3] sm:$0x1f]  ;;  %s614_s27 = sld [smem:[#allocation2]] }
  0x12   :  { %218 = vperm.xlu0 %5241, %v5765_v3   ;;  %4963 = vmatpush.msk.msra.mxu0 %vm79_vm0, %v73_v15  ;;  %s4990_s28 = sld [smem:[#allocation2 + $0x1]] }
  0x13   :  { %286 = vperm.xlu2 %5243, %v5770_v5   ;;  %s6065_s3 = sld [smem:[#allocation2 + $0x14]] }
  0x14   :  { %s4997_s6 = sld [smem:[#allocation2 + $0xa]] }
  0x15   :  { %v72_v16 = vld [vmem:[%s10607_s29] sm:$0xf]  ;;  %s5004_s29 = sld [smem:[#allocation2 + $0x12]] }
  0x16   :  { %4964 = vmatmul.msk.f32.vlgmr.msra.gmra.mxu0 %vm75_vm1, %v72_v16  ;;  %s4998_s2 = sld [smem:[#allocation2 + $0xc]] }
  0x17   :  { %s4994_s30 = sld [smem:[#allocation2 + $0x5]] }
  0x18   :  { %4971 = vmatmul.msk.f32.gmra.mxu3 %vm75_vm1, %v212_v7  ;;  %233 = vperm.xlu1 %5242, %v5783_v8   ;;  %s4995_s0 = sld [smem:[#allocation2 + $0x7]] }
  0x19   :  { %s5006_s1 = sld [smem:[#allocation2 + $0x11]] }
  0x1a   :  { %223 = vperm.xlu0 %5241, %v5788_v9   ;;  %s5007_s17 = sld [smem:[#allocation2 + $0x13]] }
  0x1b   :  { %301 = vperm.xlu2 %5243, %v5791_v10   ;;  %s4991_s18 = sld [smem:[#allocation2 + $0x4]] }
  0x1c   :  { %s4992_s19 = sld [smem:[#allocation2 + $0x6]] }
  0x1d   :  { %s5002_s20 = sld [smem:[#allocation2 + $0xf]] }
  0x1e   :  { %s6075_s21 = sld [smem:[#allocation2 + $0xe]] }
  0x1f   :  { %s6116_s22 = sld [smem:[#allocation2 + $0x9]] }
  0x20   :  { %4972 = vmatmul.msk.f32.gmra.mxu3 %vm75_vm1, %v213_v11  ;;  %5245 = vset.pattern.permute.xlu1 %v10298_v6  ;;  %s5008_s23 = sld [smem:[#allocation2 + $0x15]] }
  0x21   :  { %291 = vperm.xlu1 %5245, %v5801_v12   ;;  %s4993_s10 = sld [smem:[#allocation2 + $0x8]] }
  0x22   :  { %5244 = vset.pattern.permute.xlu0 %v10298_v6  ;;  %s7346_s24 = sld [smem:[#allocation2 + $0x60]] }
  0x23   :  { %296 = vperm.xlu0 %5244, %v5804_v13   ;;  %5246 = vset.pattern.permute.xlu2 %v10302_v48  ;;  %s7348_s25 = sld [smem:[#allocation2 + $0x51]] }
  0x24   :  { %393 = vperm.xlu2 %5246, %v5765_v3   ;;  %s7352_s26 = sld [smem:[#allocation2 + $0x42]] }
  0x25   :  { %s7380_s16 = sld [smem:[#allocation2 + $0x34]] }
  0x26   :  { %s7385_s15 = sld [smem:[#allocation2 + $0x44]] }
  0x27   :  { %s7388_s12 = sld [smem:[#allocation2 + $0x54]] }
  0x28   :  { %4973 = vmatmul.msk.f32.gmra.mxu3 %vm75_vm1, %v214_v14  ;;  %s7391_s14 = sld [smem:[#allocation2 + $0x64]] }
  0x29   :  { %5247 = vset.pattern.permute.xlu1 %v10302_v48  ;;  %s7397_s13 = sld [smem:[#allocation2 + $0x25]] }
  0x2a   :  { %397 = vperm.xlu1 %5247, %v5788_v9   ;;  %s7399_s11 = sld [smem:[#allocation2 + $0x35]] }
  0x2b   :  { %5248 = vset.pattern.permute.xlu0 %v10302_v48 }
  0x2c   :  { %405 = vperm.xlu0 %5248, %v5783_v8   ;;  %401 = vperm.xlu2 %5246, %v5760_v2   ;;  %10713 = sst [smem:[#allocation56_spill]] %s7385_s15 }
  0x2d   :  { %10714 = sst [smem:[#allocation57_spill]] %s7388_s12 }
  0x2e   :  { %10715 = sst [smem:[#allocation58_spill]] %s7391_s14 }
  0x2f   :  { %10716 = sst [smem:[#allocation59_spill]] %s7397_s13 }
  0x30   :  { %10717 = sst [smem:[#allocation60_spill]] %s7399_s11 }
  0x31   :  { %s7401_s15 = sld [smem:[#allocation2 + $0x45]] }
  0x32   :  { %5249 = vset.pattern.permute.xlu1 %v10300_v59  ;;  %s7403_s12 = sld [smem:[#allocation2 + $0x55]] }
  0x33   :  { %450 = vperm.xlu1 %5249, %v5770_v5   ;;  %s7407_s14 = sld [smem:[#allocation2 + $0x65]] }
  0x34   :  { %5250 = vset.pattern.permute.xlu2 %v10300_v59  ;;  %s7409_s13 = sld [smem:[#allocation2 + $0x26]] }
  0x35   :  { %454 = vperm.xlu2 %5250, %v5801_v12   ;;  %s7417_s11 = sld [smem:[#allocation2 + $0x56]] }
  0x37   :  { %10718 = sst [smem:[#allocation61_spill]] %s7401_s15 }
  0x38   :  { %10719 = sst [smem:[#allocation62_spill]] %s7403_s12 }
  0x39   :  { %10720 = sst [smem:[#allocation63_spill]] %s7407_s14 }
  0x3a   :  { %10721 = sst [smem:[#allocation64_spill]] %s7409_s13 }
  0x3b   :  { %458 = vperm.xlu1 %5249, %v5804_v13   ;;  %s7413_s15 = sld [smem:[#allocation2 + $0x36]] }
  0x3c   :  { %s7415_s12 = sld [smem:[#allocation2 + $0x46]] }
  0x3d   :  { %462 = vperm.xlu2 %5250, %v5791_v10   ;;  %10724 = sst [smem:[#allocation65_spill]] %s7417_s11 }
  0x3e   :  { %s7421_s14 = sld [smem:[#allocation2 + $0x27]] }
  0x3f   :  { %s7423_s13 = sld [smem:[#allocation2 + $0x37]] }
  0x40   :  { %s7431_s11 = sld [smem:[#allocation2 + $0x47]] }
  0x44   :  { %10726 = sst [smem:[#allocation67_spill]] %s7421_s14 }
  0x45   :  { %10727 = sst [smem:[#allocation68_spill]] %s7423_s13 }
  0x46   :  { %10728 = sst [smem:[#allocation69_spill]] %s7431_s11 }
  0x47   :  { %s7435_s13 = sld [smem:[#allocation2 + $0x57]] }
  0x48   :  { %s7444_s11 = sld [smem:[#allocation2 + $0x67]] }
  0x49   :  { %s7454_s14 = sld [smem:[#allocation2 + $0x38]] }
  0x4d   :  { %10729 = sst [smem:[#allocation70_spill]] %s7435_s13 }
  0x4e   :  { %10730 = sst [smem:[#allocation71_spill]] %s7444_s11 }
  0x4f   :  { %s7449_s13 = sld [smem:[#allocation2 + $0x28]] }
  0x50   :  { %s7462_s11 = sld [smem:[#allocation2 + $0x48]] }
  0x55   :  { %10731 = sst [smem:[#allocation72_spill]] %s7449_s13 }
  0x56   :  { %s7464_s13 = sld [smem:[#allocation2 + $0x58]] }
  0x6d   :  { %v287_v22 = vpop.permute.xlu2 %286 }
  0x75   :  { %v302_v42 = vpop.permute.xlu2 %301 }
  0x82   :  { %v229_v17 = vpop.permute.xlu1 %228 }
  0x84   :  { %v219_v18 = vpop.permute.xlu0 %218 }
  0x8a   :  { %v234_v19 = vpop.permute.xlu1 %233 }
  0x8c   :  { %v224_v23 = vpop.permute.xlu0 %223 }
  0x93   :  { %v268_v20 = vpop.f32.mrf.mxu3  ;;  %v292_v26 = vpop.permute.xlu1 %291 }
  0x94   :  { %v5823_v21 = vadd.f32 %v268_v20, %v219_v18 }
  0x95   :  { %v297_v32 = vpop.permute.xlu0 %296 }
  0x96   :  { %v304_v24 = vmul.f32 %v287_v22, %v5823_v21 }
  0x98   :  { %v4974_v29 = vmul.f32 -1.442695, %v304_v24 }
  0x9a   :  { %5394 = vpow2.f32 %v4974_v29 }
  0x9b   :  { %v271_v25 = vpop.f32.mrf.mxu3 }
  0x9c   :  { %v5826_v27 = vadd.f32 %v271_v25, %v224_v23 }
  0x9e   :  { %v305_v28 = vmul.f32 %v292_v26, %v5826_v27 }
  0xa0   :  { %v4975_v30 = vmul.f32 -1.442695, %v305_v28  ;;  %v5395_v36 = vpop.eup %5394 }
  0xa1   :  { %v5832_v39 = vadd.f32 1.0, %v5395_v36 }
  0xa2   :  { %5396 = vpow2.f32 %v4975_v30 }
  0xa3   :  { %v274_v31 = vpop.f32.mrf.mxu3  ;;  %vm329_vm2 = vweird.f32 %v5832_v39  ;;  %v333_v29 = vand.u32 2147483647, %v5832_v39  ;;  %v335_v30 = vand.u32 2147483648, %v5832_v39 }
  0xa4   :  { %v5829_v33 = vadd.f32 %v274_v31, %v229_v17 }
  0xa5   :  { %vm334_vm1 = vcmp.eq.f32.partialorder %v333_v29, 8.507059e+37 }
  0xa6   :  { %v306_v34 = vmul.f32 %v297_v32, %v5829_v33 }
  0xa8   :  { %v4976_v35 = vmul.f32 -1.442695, %v306_v34  ;;  %v5397_v37 = vpop.eup %5396 }
  0xa9   :  { %v5836_v41 = vadd.f32 1.0, %v5397_v37 }
  0xaa   :  { %5398 = vpow2.f32 %v4976_v35 }
  0xab   :  { %v277_v38 = vpop.f32.mrf.mxu3  ;;  %5400 = vrcp.f32 %v5832_v39  ;;  %vm344_vm8 = vweird.f32 %v5836_v41  ;;  %v350_v20 = vand.u32 2147483648, %v5836_v41 }
  0xac   :  { %v5834_v40 = vadd.f32 %v277_v38, %v234_v19  ;;  %5402 = vrcp.f32 %v5836_v41  ;;  %v348_v19 = vand.u32 2147483647, %v5836_v41  ;;  %v336_v38 = vor.u32 1.1754944e-38, %v335_v30 }
  0xad   :  { %v351_v13 = vor.u32 1.1754944e-38, %v350_v20 }
  0xae   :  { %v307_v43 = vmul.f32 %v302_v42, %v5834_v40  ;;  %vm349_vm0 = vcmp.eq.f32.partialorder %v348_v19, 8.507059e+37 }
  0xb0   :  { %v5399_v44 = vpop.eup %5398  ;;  %v4977_v45 = vmul.f32 -1.442695, %v307_v43 }
  0xb1   :  { %v5841_v46 = vadd.f32 1.0, %v5399_v44  ;;  %v5844_v47 = vpop.eup %5400 }
  0xb2   :  { %5404 = vpow2.f32 %v4977_v45  ;;  %v5848_v49 = vpop.eup %5402  ;;  %v325_v55 = vmul.f32 %v5844_v47, %v5832_v39  ;;  %vm330_vm9 = vweird.f32 %v5844_v47  ;;  %v390_v45 = vld [vmem:[%s10286_s7 + $0x10] sm:$0xff] }
  0xb3   :  { %5406 = vrcp.f32 %v5841_v46  ;;  %v340_v54 = vmul.f32 %v5848_v49, %v5836_v41  ;;  %vm345_vm4 = vweird.f32 %v5848_v49  ;;  %vm359_vm5 = vweird.f32 %v5841_v46  ;;  %vm331_vm15 = vmor %vm329_vm2, %vm330_vm9 }
  0xb4   :  { %v326_v58 = vsub.f32 1.0, %v325_v55  ;;  %v363_v14 = vand.u32 2147483647, %v5841_v46  ;;  %v365_v5 = vand.u32 2147483648, %v5841_v46  ;;  %vm5883_vm11 = vmor %vm344_vm8, %vm345_vm4  ;;  %vm131_vm2 = vcmask 261120   ;;  %v391_v55 = vld [vmem:[%s10286_s7 + $0x18] sm:$0xff] }
  0xb5   :  { %v341_v57 = vsub.f32 1.0, %v340_v54  ;;  %v126_v54 = vld [vmem:[%s10283_s4] sm:$0xff] }
  0xb6   :  { %v327_v0 = vmul.f32 %v5844_v47, %v326_v58  ;;  %v366_v28 = vor.u32 1.1754944e-38, %v365_v5  ;;  %vm364_vm14 = vcmp.eq.f32.partialorder %v363_v14, 8.507059e+37 }
  0xb7   :  { %v342_v63 = vmul.f32 %v5848_v49, %v341_v57 }
  0xb8   :  { %v5405_v50 = vpop.eup %5404  ;;  %v328_v25 = vadd.f32 %v5844_v47, %v327_v0 }
  0xb9   :  { %v5407_v51 = vpop.eup %5406  ;;  %v323_v52 = vadd.f32 1.0, %v5405_v50  ;;  %v343_v17 = vadd.f32 %v5848_v49, %v342_v63  ;;  %v128_v50 = vld [vmem:[%s10283_s4 + $0x10] sm:$0xff] }
  0xba   :  { %v355_v53 = vmul.f32 %v5407_v51, %v5841_v46  ;;  %vm360_vm3 = vweird.f32 %v5407_v51  ;;  %v332_v36 = vsel %vm331_vm15, %v5844_v47, %v328_v25  ;;  %v100_v46 = vpop.f32.mrf.mxu0 }
  0xbb   :  { %5408 = vrcp.f32 %v323_v52  ;;  %v380_v11 = vand.u32 2147483648, %v323_v52  ;;  %v378_v16 = vand.u32 2147483647, %v323_v52  ;;  %vm5870_vm7 = vmor %vm359_vm5, %vm360_vm3  ;;  %vm374_vm10 = vweird.f32 %v323_v52 }
  0xbc   :  { %v356_v56 = vsub.f32 1.0, %v355_v53  ;;  %v347_v32 = vsel %vm5883_vm11, %v5848_v49, %v343_v17  ;;  %v337_v42 = vsel %vm334_vm1, %v336_v38, %v332_v36  ;;  %v129_v49 = vld [vmem:[%s10283_s4 + $0x18] sm:$0xff]  ;;  %v406_v36 = vpop.permute.xlu0 %405 }
  0xbd   :  { %v381_v26 = vor.u32 1.1754944e-38, %v380_v11  ;;  %vm379_vm13 = vcmp.eq.f32.partialorder %v378_v16, 8.507059e+37  ;;  %v352_v37 = vsel %vm349_vm0, %v351_v13, %v347_v32  ;;  %v384_v39 = vmul.f32 %v337_v42, %v5823_v21  ;;  %v5385_v21 = vld [vmem:[%s10288_s9] ss:$0 sm:$0xff]  ;;  %147 = vmatpush.msra.mxu1 %v129_v49  ;;  %v398_v16 = vpop.permute.xlu1 %397 }
  0xbe   :  { %v357_v60 = vmul.f32 %v5407_v51, %v356_v56  ;;  %v385_v43 = vmul.f32 %v352_v37, %v5826_v27  ;;  %v68_v27 = vld [vmem:[%s10288_s9 + $0x1] sm:$0x1]  ;;  %v101_v47 = vadd.f32 %v5385_v21, %v100_v46  ;;  %v5658_v21 = vmov 5  }
  0xbf   :  { %v103_v10 = vadd.f32 1.0, %v68_v27  ;;  %148 = vmatpush.msra.mxu1 %v128_v50 }
  0xc0   :  { %v358_v7 = vadd.f32 %v5407_v51, %v357_v60 }
  0xc1   :  { %v5409_v61 = vpop.eup %5408  ;;  %v104_v44 = vperm.slane %v103_v10, 0 }
  0xc2   :  { %v370_v62 = vmul.f32 %v5409_v61, %v323_v52  ;;  %vm375_vm6 = vweird.f32 %v5409_v61  ;;  %v362_v23 = vsel %vm5870_vm7, %v5407_v51, %v358_v7  ;;  %v127_v52 = vld [vmem:[%s10283_s4 + $0x8] sm:$0xff]  ;;  %s5000_s4 = sld [smem:[#allocation2 + $0xb]] }
  0xc3   :  { %vm376_vm12 = vmor %vm374_vm10, %vm375_vm6  ;;  %v367_v35 = vsel %vm364_vm14, %v366_v28, %v362_v23  ;;  %v105_v51 = vmul.f32 %v104_v44, %v101_v47  ;;  %149 = vmatpush.msra.mxu1 %v127_v52 }
  0xc4   :  { %v371_v1 = vsub.f32 1.0, %v370_v62  ;;  %v386_v41 = vmul.f32 %v367_v35, %v5829_v33  ;;  %v389_v33 = vld [vmem:[%s10286_s7 + $0x8] sm:$0xff] }
  0xc5   :  { %v4965_v53 = vmul.f32 -1.442695, %v105_v51  ;;  %150 = vmatpush.msra.mxu1 %v126_v54  ;;  %v451_v20 = vpop.permute.xlu1 %450 }
  0xc6   :  { %v372_v15 = vmul.f32 %v5409_v61, %v371_v1 }
  0xc7   :  { %5410 = vpow2.f32 %v4965_v53 }
  0xc8   :  { %v373_v22 = vadd.f32 %v5409_v61, %v372_v15  ;;  %v394_v15 = vpop.permute.xlu2 %393 }
  0xca   :  { %v377_v31 = vsel %vm376_vm12, %v5409_v61, %v373_v22 }
  0xcb   :  { %v382_v34 = vsel %vm379_vm13, %v381_v26, %v377_v31  ;;  %v5657_v26 = vmov 4  }
  0xcc   :  { %v387_v12 = vmul.f32 %v382_v34, %v5834_v40  ;;  %v388_v40 = vld [vmem:[%s10286_s7] sm:$0xff]  ;;  %5252 = vset.pattern.permute.xlu1 %v5657_v26  ;;  %5251 = vset.pattern.permute.xlu0 %v5657_v26  ;;  %s5001_s7 = sld [smem:[#allocation2 + $0xd]] }
  0xcd   :  { %v5411_v56 = vpop.eup %5410  ;;  %558 = vperm.xlu1 %5252, %v5788_v9   ;;  %554 = vperm.xlu0 %5251, %v5765_v3   ;;  %v459_v32 = vpop.permute.xlu1 %458 }
  0xce   :  { %432 = vmatpush.msrb.mxu0 %v387_v12  ;;  %v109_v57 = vadd.f32 1.0, %v5411_v56  ;;  %5253 = vset.pattern.permute.xlu2 %v5657_v26 }
  0xcf   :  { %562 = vperm.xlu2 %5253, %v5760_v2  }
  0xd0   :  { %433 = vmatpush.msrb.mxu0 %v386_v41  ;;  %5412 = vrcp.f32 %v109_v57  ;;  %v121_v61 = vand.u32 2147483648, %v109_v57  ;;  %vm115_vm3 = vweird.f32 %v109_v57  ;;  %v119_v63 = vand.u32 2147483647, %v109_v57  ;;  %v402_v17 = vpop.permute.xlu2 %401 }
  0xd2   :  { %434 = vmatpush.msrb.mxu0 %v385_v43  ;;  %v122_v1 = vor.u32 1.1754944e-38, %v121_v61  ;;  %vm120_vm6 = vcmp.eq.f32.partialorder %v119_v63, 8.507059e+37 }
  0xd4   :  { %435 = vmatpush.msrb.mxu0 %v384_v39 }
  0xd5   :  { %4978 = vmatmul.msk.f32.vlgmr.msrb.gmra.mxu0 %vm131_vm2, %v388_v40  ;;  %566 = vperm.xlu1 %5252, %v5783_v8  }
  0xd6   :  { %v5413_v58 = vpop.eup %5412  ;;  %5255 = vset.pattern.permute.xlu0 %v5658_v21 }
  0xd7   :  { %v111_v60 = vmul.f32 %v5413_v58, %v109_v57  ;;  %vm116_vm4 = vweird.f32 %v5413_v58  ;;  %635 = vperm.xlu0 %5255, %v5788_v9   ;;  %5254 = vset.pattern.permute.xlu2 %v5658_v21 }
  0xd8   :  { %vm117_vm5 = vmor %vm115_vm3, %vm116_vm4  ;;  %v455_v24 = vpop.permute.xlu2 %454  ;;  %631 = vperm.xlu2 %5254, %v5765_v3  }
  0xd9   :  { %v112_v62 = vsub.f32 1.0, %v111_v60 }
  0xdb   :  { %v113_v0 = vmul.f32 %v5413_v58, %v112_v62 }
  0xdd   :  { %4979 = vmatmul.msk.f32.gmra.mxu0 %vm131_vm2, %v389_v33  ;;  %v114_v7 = vadd.f32 %v5413_v58, %v113_v0  ;;  %5256 = vset.pattern.permute.xlu1 %v5658_v21  ;;  %v549_v21 = vld [vmem:[%s10287_s8] sm:$0xff] }
  0xde   :  { %639 = vperm.xlu1 %5256, %v5760_v2  }
  0xdf   :  { %v118_v11 = vsel %vm117_vm5, %v5413_v58, %v114_v7 }
  0xe0   :  { %v123_v14 = vsel %vm120_vm6, %v122_v1, %v118_v11  ;;  %v463_v39 = vpop.permute.xlu2 %462  ;;  %643 = vperm.xlu2 %5254, %v5783_v8  }
  0xe1   :  { %v125_v5 = vmul.f32 %v123_v14, %v101_v47 }
  0xe3   :  { %4966 = vmatmul.msk.f32.vlgmr.msra.gmra.mxu1 %vm131_vm2, %v125_v5 }
  0xe5   :  { %4980 = vmatmul.msk.f32.gmra.mxu0 %vm131_vm2, %v390_v45 }
  0xed   :  { %4981 = vmatmul.msk.f32.gmra.mxu0 %vm131_vm2, %v391_v55  ;;  %v5659_v55 = vmov 6  }
  0xee   :  { %5257 = vset.pattern.permute.xlu1 %v5659_v55  ;;  %5259 = vset.pattern.permute.xlu0 %v5659_v55 }
  0xef   :  { %655 = vperm.xlu1 %5257, %v5765_v3   ;;  %663 = vperm.xlu0 %5259, %v5760_v2  }
  0xf0   :  { %5258 = vset.pattern.permute.xlu2 %v5659_v55 }
  0xf1   :  { %659 = vperm.xlu2 %5258, %v5788_v9  }
  0xf7   :  { %667 = vperm.xlu1 %5257, %v5783_v8   ;;  %5262 = vset.pattern.permute.xlu0 %v10296_v4 }
  0xf9   :  { %5260 = vset.pattern.permute.xlu2 %v10296_v4 }
  0xff   :  { %5261 = vset.pattern.permute.xlu1 %v10296_v4 }
 0x152   :  { %v437_v18 = vpop.f32.mrf.mxu0 }
 0x153   :  { %v5941_v19 = vadd.f32 %v437_v18, %v394_v15 }
 0x155   :  { %v465_v22 = vmul.f32 %v451_v20, %v5941_v19 }
 0x157   :  { %v4982_v29 = vmul.f32 -1.442695, %v465_v22 }
 0x159   :  { %5414 = vpow2.f32 %v4982_v29 }
 0x15a   :  { %v440_v23 = vpop.f32.mrf.mxu0 }
 0x15b   :  { %v5944_v25 = vadd.f32 %v440_v23, %v398_v16 }
 0x15d   :  { %v466_v28 = vmul.f32 %v455_v24, %v5944_v25 }
 0x15f   :  { %v4983_v30 = vmul.f32 -1.442695, %v466_v28  ;;  %v5415_v12 = vpop.eup %5414 }
 0x160   :  { %v5954_v41 = vadd.f32 1.0, %v5415_v12 }
 0x161   :  { %5416 = vpow2.f32 %v4983_v30 }
 0x162   :  { %v443_v31 = vpop.f32.mrf.mxu0  ;;  %vm490_vm7 = vweird.f32 %v5954_v41  ;;  %v494_v24 = vand.u32 2147483647, %v5954_v41  ;;  %v496_v26 = vand.u32 2147483648, %v5954_v41 }
 0x163   :  { %v5950_v34 = vadd.f32 %v443_v31, %v402_v17 }
 0x164   :  { %v497_v12 = vor.u32 1.1754944e-38, %v496_v26 }
 0x165   :  { %v467_v35 = vmul.f32 %v459_v32, %v5950_v34 }
 0x167   :  { %v4984_v13 = vmul.f32 -1.442695, %v467_v35  ;;  %v5417_v37 = vpop.eup %5416 }
 0x168   :  { %v5958_v43 = vadd.f32 1.0, %v5417_v37  ;;  %v5386_v37 = vld [vmem:[%s10288_s9 + $0x2] ss:$0 sm:$0xff] }
 0x169   :  { %5418 = vpow2.f32 %v4984_v13 }
 0x16a   :  { %v446_v38 = vpop.f32.mrf.mxu0  ;;  %5420 = vrcp.f32 %v5954_v41  ;;  %vm505_vm13 = vweird.f32 %v5958_v43  ;;  %v509_v15 = vand.u32 2147483647, %v5958_v43  ;;  %v511_v16 = vand.u32 2147483648, %v5958_v43 }
 0x16b   :  { %v5956_v42 = vadd.f32 %v446_v38, %v406_v36  ;;  %5422 = vrcp.f32 %v5958_v43  ;;  %v70_v36 = vld [vmem:[%s10288_s9 + $0x3] sm:$0x1]  ;;  %v152_v38 = vpop.f32.mrf.mxu1 }
 0x16c   :  { %v512_v32 = vor.u32 1.1754944e-38, %v511_v16  ;;  %vm510_vm6 = vcmp.eq.f32.partialorder %v509_v15, 8.507059e+37  ;;  %v6069_v15 = vstv %s614_s27  ;;  %v6071_v16 = vstv %s4990_s28  ;;  %s7358_s27 = sld [smem:[#allocation2 + $0x52]] }
 0x16d   :  { %v468_v40 = vmul.f32 %v463_v39, %v5956_v42  ;;  %v153_v39 = vadd.f32 %v5386_v37, %v152_v38  ;;  %v6104_v37 = vstv %s5007_s17  ;;  %v6106_v38 = vstv %s4991_s18  ;;  %s7322_s17 = sld [smem:[#allocation2 + $0x30]] }
 0x16e   :  { %s7328_s18 = sld [smem:[#allocation2 + $0x21]] }
 0x16f   :  { %v5419_v33 = vpop.eup %5418  ;;  %v4985_v27 = vmul.f32 -1.442695, %v468_v40  ;;  %s7360_s28 = sld [smem:[#allocation2 + $0x62]] }
 0x170   :  { %v5963_v10 = vadd.f32 1.0, %v5419_v33  ;;  %v5966_v44 = vpop.eup %5420 }
 0x171   :  { %5424 = vpow2.f32 %v4985_v27  ;;  %v5970_v45 = vpop.eup %5422  ;;  %v486_v52 = vmul.f32 %v5966_v44, %v5954_v41  ;;  %vm491_vm14 = vweird.f32 %v5966_v44  ;;  %v181_v27 = vld [vmem:[%s10284_s5 + $0x18] sm:$0xff] }
 0x172   :  { %5426 = vrcp.f32 %v5963_v10  ;;  %v501_v51 = vmul.f32 %v5970_v45, %v5958_v43  ;;  %vm506_vm9 = vweird.f32 %v5970_v45  ;;  %vm520_vm10 = vweird.f32 %v5963_v10  ;;  %vm492_vm5 = vmor %vm490_vm7, %vm491_vm14  ;;  %198 = vmatpush.msra.mxu2 %v181_v27 }
 0x173   :  { %v487_v56 = vsub.f32 1.0, %v486_v52  ;;  %v524_v2 = vand.u32 2147483647, %v5963_v10  ;;  %v526_v3 = vand.u32 2147483648, %v5963_v10  ;;  %vm6003_vm0 = vmor %vm505_vm13, %vm506_vm9  ;;  %vm495_vm7 = vcmp.eq.f32.partialorder %v494_v24, 8.507059e+37 }
 0x174   :  { %v502_v54 = vsub.f32 1.0, %v501_v51  ;;  %v155_v43 = vadd.f32 1.0, %v70_v36  ;;  %v6083_v24 = vstv %s5000_s4  ;;  %v6102_v36 = vstv %s6065_s3  ;;  %s5013_s4 = sld [smem:[#allocation2 + $0x19]] }
 0x175   :  { %v488_v62 = vmul.f32 %v5966_v44, %v487_v56  ;;  %v527_v8 = vor.u32 1.1754944e-38, %v526_v3  ;;  %vm525_vm4 = vcmp.eq.f32.partialorder %v524_v2, 8.507059e+37  ;;  %v552_v56 = vld [vmem:[%s10287_s8 + $0x18] sm:$0xff]  ;;  %10620 = vst [vmem:[#allocation12_spill] sm:$0xff] %v6102_v36  ;;  %v6118_v27 = vstv %s5002_s20  ;;  %s5014_s3 = sld [smem:[#allocation2 + $0x1b]] }
 0x176   :  { %v503_v61 = vmul.f32 %v5970_v45, %v502_v54  ;;  %v156_v33 = vperm.slane %v155_v43, 0  ;;  %vm1972_vm13 = vcmask 1041408   ;;  %vm2379_vm14 = vcmask 7168   ;;  %s7332_s20 = sld [smem:[#allocation2 + $0x40]] }
 0x177   :  { %v5425_v46 = vpop.eup %5424  ;;  %v489_v22 = vadd.f32 %v5966_v44, %v488_v62 }
 0x178   :  { %v5427_v47 = vpop.eup %5426  ;;  %v484_v49 = vadd.f32 1.0, %v5425_v46  ;;  %v504_v14 = vadd.f32 %v5970_v45, %v503_v61  ;;  %v178_v46 = vld [vmem:[%s10284_s5] sm:$0xff] }
 0x179   :  { %v516_v50 = vmul.f32 %v5427_v47, %v5963_v10  ;;  %vm521_vm8 = vweird.f32 %v5427_v47  ;;  %v493_v9 = vsel %vm492_vm5, %v5966_v44, %v489_v22  ;;  %v180_v10 = vld [vmem:[%s10284_s5 + $0x10] sm:$0xff]  ;;  %v179_v44 = vld [vmem:[%s10284_s5 + $0x8] sm:$0xff]  ;;  %s7350_s5 = sld [smem:[#allocation2 + $0x61]] }
 0x17a   :  { %5428 = vrcp.f32 %v484_v49  ;;  %v541_v1 = vand.u32 2147483648, %v484_v49  ;;  %v539_v11 = vand.u32 2147483647, %v484_v49  ;;  %vm5989_vm12 = vmor %vm520_vm10, %vm521_vm8  ;;  %vm535_vm15 = vweird.f32 %v484_v49  ;;  %199 = vmatpush.msra.mxu2 %v180_v10 }
 0x17b   :  { %v517_v53 = vsub.f32 1.0, %v516_v50  ;;  %v508_v29 = vsel %vm6003_vm0, %v5970_v45, %v504_v14  ;;  %v551_v50 = vld [vmem:[%s10287_s8 + $0x10] sm:$0xff]  ;;  %vm2389_vm0 = vcmask 23552  }
 0x17c   :  { %v542_v23 = vor.u32 1.1754944e-38, %v541_v1  ;;  %vm540_vm3 = vcmp.eq.f32.partialorder %v539_v11, 8.507059e+37  ;;  %v513_v13 = vsel %vm510_vm6, %v512_v32, %v508_v29  ;;  %200 = vmatpush.msra.mxu2 %v179_v44  ;;  %v6061_v1 = vpop.permute.xlu2 %562  ;;  %v555_v11 = vpop.permute.xlu0 %554  ;;  %v6087_v29 = vstv %s4997_s6  ;;  %s7293_s6 = sld [smem:[#allocation2 + $0x1c]] }
 0x17d   :  { %v518_v57 = vmul.f32 %v5427_v47, %v517_v53  ;;  %v546_v40 = vmul.f32 %v513_v13, %v5944_v25  ;;  %v157_v25 = vmul.f32 %v156_v33, %v153_v39  ;;  %v6099_v13 = vstv %s5006_s1  ;;  %s7318_s1 = sld [smem:[#allocation2 + $0x20]] }
 0x17e   :  { %201 = vmatpush.msra.mxu2 %v178_v46 }
 0x17f   :  { %v519_v0 = vadd.f32 %v5427_v47, %v518_v57  ;;  %v4967_v45 = vmul.f32 -1.442695, %v157_v25 }
 0x180   :  { %v5429_v58 = vpop.eup %5428 }
 0x181   :  { %v531_v60 = vmul.f32 %v5429_v58, %v484_v49  ;;  %vm536_vm11 = vweird.f32 %v5429_v58  ;;  %v523_v18 = vsel %vm5989_vm12, %v5427_v47, %v519_v0  ;;  %5430 = vpow2.f32 %v4967_v45  ;;  %v559_v0 = vpop.permute.xlu1 %558 }
 0x182   :  { %vm537_vm1 = vmor %vm535_vm15, %vm536_vm11  ;;  %v528_v31 = vsel %vm525_vm4, %v527_v8, %v523_v18  ;;  %v6081_v8 = vstv %s5004_s29  ;;  %v6127_v45 = vstv %s6075_s21  ;;  %vm1970_vm12 = vcmask 1040384   ;;  %s5010_s29 = sld [smem:[#allocation2 + $0x18]] }
 0x183   :  { %v532_v63 = vsub.f32 1.0, %v531_v60  ;;  %v547_v41 = vmul.f32 %v528_v31, %v5950_v34  ;;  %10617 = vst [vmem:[#allocation9_spill] sm:$0xff] %v6081_v8  ;;  %v6091_v31 = vstv %s4994_s30  ;;  %vm2384_vm15 = vcmask 15360   ;;  %s7309_s30 = sld [smem:[#allocation2 + $0x1d]] }
 0x184   :  { %v632_v3 = vpop.permute.xlu2 %631  ;;  %v636_v33 = vpop.permute.xlu0 %635  ;;  %s7336_s21 = sld [smem:[#allocation2 + $0x41]] }
 0x185   :  { %v533_v7 = vmul.f32 %v5429_v58, %v532_v63 }
 0x187   :  { %v534_v17 = vadd.f32 %v5429_v58, %v533_v7  ;;  %v5431_v47 = vpop.eup %5430 }
 0x188   :  { %v161_v49 = vadd.f32 1.0, %v5431_v47 }
 0x189   :  { %v538_v28 = vsel %vm537_vm1, %v5429_v58, %v534_v17  ;;  %v6063_v2 = vpop.permute.xlu1 %566 }
 0x18a   :  { %v543_v30 = vsel %vm540_vm3, %v542_v23, %v538_v28  ;;  %5432 = vrcp.f32 %v161_v49  ;;  %v173_v53 = vand.u32 2147483648, %v161_v49  ;;  %vm167_vm8 = vweird.f32 %v161_v49 }
 0x18b   :  { %v548_v35 = vmul.f32 %v543_v30, %v5956_v42  ;;  %v498_v42 = vsel %vm495_vm7, %v497_v12, %v493_v9  ;;  %v171_v55 = vand.u32 2147483647, %v161_v49  ;;  %v6085_v28 = vstv %s5001_s7  ;;  %s5011_s7 = sld [smem:[#allocation2 + $0x1a]] }
 0x18c   :  { %v545_v34 = vmul.f32 %v498_v42, %v5941_v19  ;;  %v550_v19 = vld [vmem:[%s10287_s8 + $0x8] sm:$0xff]  ;;  %v174_v58 = vor.u32 1.1754944e-38, %v173_v53  ;;  %s5003_s8 = sld [smem:[#allocation2 + $0x10]]  ;;  %v6073_v17 = vpop.permute.xlu2 %643  ;;  %v6089_v30 = vstv %s4998_s2  ;;  %v6097_v9 = vstv %s4995_s0 }
 0x18d   :  { %593 = vmatpush.msrb.mxu1 %v548_v35  ;;  %vm172_vm11 = vcmp.eq.f32.partialorder %v171_v55, 8.507059e+37  ;;  %s7301_s2 = sld [smem:[#allocation2 + $0x1e]] }
 0x18e   :  { %s7312_s0 = sld [smem:[#allocation2 + $0x1f]] }
 0x18f   :  { %594 = vmatpush.msrb.mxu1 %v547_v41  ;;  %v6108_v41 = vstv %s4992_s19  ;;  %s7330_s19 = sld [smem:[#allocation2 + $0x31]] }
 0x190   :  { %v5433_v51 = vpop.eup %5432 }
 0x191   :  { %595 = vmatpush.msrb.mxu1 %v546_v40  ;;  %v163_v52 = vmul.f32 %v5433_v51, %v161_v49  ;;  %vm168_vm9 = vweird.f32 %v5433_v51  ;;  %v6067_v7 = vpop.permute.xlu1 %639 }
 0x192   :  { %vm169_vm10 = vmor %vm167_vm8, %vm168_vm9  ;;  %v6077_v20 = vstv %s5003_s8  ;;  %s5012_s8 = sld [smem:[#allocation2 + $0x17]] }
 0x193   :  { %596 = vmatpush.msrb.mxu1 %v545_v34  ;;  %v164_v54 = vsub.f32 1.0, %v163_v52  ;;  %10616 = vst [vmem:[#allocation8_spill] sm:$0xff] %v6077_v20 }
 0x194   :  { %4986 = vmatmul.msk.f32.vlgmr.msrb.gmra.mxu1 %vm131_vm2, %v549_v21 }
 0x195   :  { %v165_v57 = vmul.f32 %v5433_v51, %v164_v54 }
 0x197   :  { %v166_v60 = vadd.f32 %v5433_v51, %v165_v57 }
 0x199   :  { %v170_v61 = vsel %vm169_vm10, %v5433_v51, %v166_v60  ;;  %v656_v26 = vpop.permute.xlu1 %655 }
 0x19a   :  { %v175_v62 = vsel %vm172_vm11, %v174_v58, %v170_v61  ;;  %vm1974_vm11 = vcmask 1042432  }
 0x19b   :  { %v177_v63 = vmul.f32 %v175_v62, %v153_v39 }
 0x19c   :  { %4987 = vmatmul.msk.f32.gmra.mxu1 %vm131_vm2, %v550_v19  ;;  %v660_v19 = vpop.permute.xlu2 %659 }
 0x19d   :  { %4968 = vmatmul.msk.f32.vlgmr.msra.gmra.mxu2 %vm131_vm2, %v177_v63 }
 0x1a4   :  { %4988 = vmatmul.msk.f32.gmra.mxu1 %vm131_vm2, %v551_v50 }
 0x1ac   :  { %4989 = vmatmul.msk.f32.gmra.mxu1 %vm131_vm2, %v552_v56 }
 0x211   :  { %v598_v14 = vpop.f32.mrf.mxu1 }
 0x212   :  { %v599_v5 = vadd.f32 %v598_v14, %v555_v11  ;;  %v6161_v11 = vstv %s6116_s22  ;;  %v6163_v14 = vstv %s5008_s23  ;;  %s7338_s22 = sld [smem:[#allocation2 + $0x22]] }
 0x213   :  { %s7342_s23 = sld [smem:[#allocation2 + $0x32]] }
 0x214   :  { %v610_v18 = vmax.f32 %v599_v5, 0.0 }
 0x216   :  { %v626_v22 = vmul.f32 %v6069_v15, %v610_v18  ;;  %v650_v23 = vmul.f32 %v6071_v16, %v610_v18 }
 0x218   :  { %v6093_v32 = vadd.f32 %v632_v3, %v626_v22  ;;  %v6095_v35 = vadd.f32 %v656_v26, %v650_v23  ;;  %v6165_v23 = vstv %s4993_s10  ;;  %s7344_s10 = sld [smem:[#allocation2 + $0x50]] }
 0x219   :  { %v601_v12 = vpop.f32.mrf.mxu1 }
 0x21a   :  { %10618 = vst [vmem:[#allocation10_spill] sm:$0xff] %v6093_v32  ;;  %v602_v43 = vadd.f32 %v601_v12, %v559_v0  ;;  %v766_v42 = vmul.f32 %v6077_v20, %v6093_v32  ;;  %v770_v39 = vmul.f32 %v6081_v8, %v6095_v35  ;;  %v750_v40 = vmul.f32 %v6083_v24, %v6093_v32 }
 0x21b   :  { %10619 = vst [vmem:[#allocation11_spill] sm:$0xff] %v6095_v35  ;;  %v754_v10 = vmul.f32 %v6085_v28, %v6095_v35  ;;  %v734_v34 = vmul.f32 %v6087_v29, %v6093_v32  ;;  %v738_v21 = vmul.f32 %v6089_v30, %v6095_v35  ;;  %v814_v46 = vmul.f32 %v6091_v31, %v6093_v32 }
 0x21c   :  { %v611_v25 = vmax.f32 %v602_v43, 0.0  ;;  %v774_v44 = vadd.f32 %v770_v39, %v766_v42  ;;  %v818_v50 = vmul.f32 %v6097_v9, %v6095_v35  ;;  %v782_v51 = vmul.f32 %v6099_v13, %v6093_v32  ;;  %v664_v43 = vpop.permute.xlu0 %663 }
 0x21d   :  { %v758_v47 = vadd.f32 %v754_v10, %v750_v40  ;;  %v742_v49 = vadd.f32 %v738_v21, %v734_v34  ;;  %v786_v55 = vmul.f32 %v6104_v37, %v6095_v35  ;;  %v798_v58 = vmul.f32 %v6106_v38, %v6093_v32 }
 0x21e   :  { %v627_v52 = vmul.f32 %v6069_v15, %v611_v25  ;;  %v651_v53 = vmul.f32 %v6071_v16, %v611_v25  ;;  %v6138_v54 = vadd.f32 %v774_v44, %v6102_v36  ;;  %v802_v60 = vmul.f32 %v6108_v41, %v6095_v35 }
 0x21f   :  { %v6143_v56 = vadd.f32 %v758_v47, %v6118_v27  ;;  %v6146_v57 = vadd.f32 %v742_v49, %v6127_v45  ;;  %v822_v3 = vadd.f32 %v818_v50, %v814_v46  ;;  %v790_v5 = vadd.f32 %v786_v55, %v782_v51 }
 0x220   :  { %v6152_v61 = vadd.f32 %v636_v33, %v627_v52  ;;  %v6154_v62 = vadd.f32 %v660_v19, %v651_v53  ;;  %929 = vperm.xlu0 %5262, %v6138_v54   ;;  %v806_v18 = vadd.f32 %v802_v60, %v798_v58 }
 0x221   :  { %857 = vperm.xlu1 %5261, %v6143_v56   ;;  %832 = vperm.xlu2 %5260, %v6146_v57   ;;  %v604_v63 = vpop.f32.mrf.mxu1  ;;  %v6178_v33 = vadd.f32 %v822_v3, %v6161_v11  ;;  %v6181_v34 = vadd.f32 %v790_v5, %v6163_v14 }
 0x222   :  { %10621 = vst [vmem:[#allocation13_spill] sm:$0xff] %v6152_v61  ;;  %v605_v0 = vadd.f32 %v604_v63, %v6061_v1  ;;  %v783_v26 = vmul.f32 %v6099_v13, %v6152_v61  ;;  %v787_v12 = vmul.f32 %v6104_v37, %v6154_v62  ;;  %v815_v1 = vmul.f32 %v6091_v31, %v6152_v61 }
 0x223   :  { %10622 = vst [vmem:[#allocation14_spill] sm:$0xff] %v6154_v62  ;;  %v819_v42 = vmul.f32 %v6097_v9, %v6154_v62  ;;  %v6184_v21 = vadd.f32 %v806_v18, %v6165_v23  ;;  %v751_v44 = vmul.f32 %v6083_v24, %v6152_v61  ;;  %v755_v49 = vmul.f32 %v6085_v28, %v6154_v62 }
 0x224   :  { %v612_v22 = vmax.f32 %v605_v0, 0.0  ;;  %v791_v10 = vadd.f32 %v787_v12, %v783_v26 }
 0x225   :  { %v823_v25 = vadd.f32 %v819_v42, %v815_v1  ;;  %v759_v60 = vadd.f32 %v755_v49, %v751_v44 }
 0x226   :  { %v628_v39 = vmul.f32 %v6069_v15, %v612_v22  ;;  %v652_v40 = vmul.f32 %v6071_v16, %v612_v22  ;;  %v6195_v47 = vadd.f32 %v791_v10, %v6163_v14 }
 0x227   :  { %v6202_v51 = vadd.f32 %v823_v25, %v6161_v11  ;;  %v6222_v26 = vadd.f32 %v759_v60, %v6118_v27 }
 0x228   :  { %v6189_v46 = vadd.f32 %v6067_v7, %v628_v39  ;;  %v6191_v19 = vadd.f32 %v664_v43, %v652_v40  ;;  %1028 = vperm.xlu0 %5262, %v6178_v33   ;;  %v668_v40 = vpop.permute.xlu1 %667 }
 0x229   :  { %966 = vperm.xlu1 %5261, %v6181_v34   ;;  %1003 = vperm.xlu2 %5260, %v6184_v21   ;;  %v607_v50 = vpop.f32.mrf.mxu1 }
 0x22a   :  { %10623 = vst [vmem:[#allocation15_spill] sm:$0xff] %v6189_v46  ;;  %v608_v7 = vadd.f32 %v607_v50, %v6063_v2  ;;  %v784_v52 = vmul.f32 %v6099_v13, %v6189_v46  ;;  %v788_v53 = vmul.f32 %v6104_v37, %v6191_v19  ;;  %v736_v55 = vmul.f32 %v6087_v29, %v6189_v46 }
 0x22b   :  { %10624 = vst [vmem:[#allocation16_spill] sm:$0xff] %v6191_v19  ;;  %v740_v58 = vmul.f32 %v6089_v30, %v6191_v19  ;;  %v800_v63 = vmul.f32 %v6106_v38, %v6189_v46  ;;  %v804_v0 = vmul.f32 %v6108_v41, %v6191_v19  ;;  %v752_v5 = vmul.f32 %v6083_v24, %v6189_v46 }
 0x22c   :  { %v613_v2 = vmax.f32 %v608_v7, 0.0  ;;  %v792_v3 = vadd.f32 %v788_v53, %v784_v52  ;;  %v756_v18 = vmul.f32 %v6085_v28, %v6191_v19  ;;  %v816_v44 = vmul.f32 %v6091_v31, %v6189_v46 }
 0x22d   :  { %v744_v22 = vadd.f32 %v740_v58, %v736_v55  ;;  %v808_v12 = vadd.f32 %v804_v0, %v800_v63  ;;  %v820_v52 = vmul.f32 %v6097_v9, %v6191_v19 }
 0x22e   :  { %v629_v43 = vmul.f32 %v6069_v15, %v613_v2  ;;  %v653_v1 = vmul.f32 %v6071_v16, %v613_v2  ;;  %v6227_v42 = vadd.f32 %v792_v3, %v6163_v14  ;;  %v760_v39 = vadd.f32 %v756_v18, %v752_v5 }
 0x22f   :  { %v6230_v10 = vadd.f32 %v744_v22, %v6127_v45  ;;  %v6233_v25 = vadd.f32 %v808_v12, %v6165_v23  ;;  %v824_v63 = vadd.f32 %v820_v52, %v816_v44  ;;  %v5387_v22 = vld [vmem:[%s10288_s9 + $0x4] ss:$0 sm:$0xff]  ;;  %v203_v12 = vpop.f32.mrf.mxu2 }
 0x230   :  { %v6238_v49 = vadd.f32 %v6073_v17, %v629_v43  ;;  %v6240_v50 = vadd.f32 %v668_v40, %v653_v1  ;;  %5265 = vset.pattern.permute.xlu0 %v10298_v6  ;;  %v6244_v7 = vadd.f32 %v760_v39, %v6118_v27 }
 0x231   :  { %5263 = vset.pattern.permute.xlu1 %v10298_v6  ;;  %5264 = vset.pattern.permute.xlu2 %v10298_v6  ;;  %v6276_v1 = vadd.f32 %v824_v63, %v6161_v11 }
 0x232   :  { %10625 = vst [vmem:[#allocation17_spill] sm:$0xff] %v6238_v49  ;;  %1256 = vperm.xlu0 %5265, %v6181_v34   ;;  %1134 = vperm.xlu1 %5263, %v6146_v57   ;;  %v737_v17 = vmul.f32 %v6087_v29, %v6238_v49  ;;  %v741_v53 = vmul.f32 %v6089_v30, %v6240_v50 }
 0x233   :  { %10626 = vst [vmem:[#allocation18_spill] sm:$0xff] %v6240_v50  ;;  %1155 = vperm.xlu2 %5264, %v6143_v56   ;;  %v817_v55 = vmul.f32 %v6091_v31, %v6238_v49  ;;  %v821_v58 = vmul.f32 %v6097_v9, %v6240_v50  ;;  %v785_v0 = vmul.f32 %v6099_v13, %v6238_v49 }
 0x234   :  { %v745_v60 = vadd.f32 %v741_v53, %v737_v17  ;;  %v789_v2 = vmul.f32 %v6104_v37, %v6240_v50  ;;  %v753_v5 = vmul.f32 %v6083_v24, %v6238_v49  ;;  %v757_v18 = vmul.f32 %v6085_v28, %v6240_v50 }
 0x235   :  { %v825_v3 = vadd.f32 %v821_v58, %v817_v55  ;;  %v801_v40 = vmul.f32 %v6106_v38, %v6238_v49  ;;  %v805_v17 = vmul.f32 %v6108_v41, %v6240_v50  ;;  %v204_v53 = vadd.f32 %v5387_v22, %v203_v12 }
 0x236   :  { %v6273_v43 = vadd.f32 %v745_v60, %v6127_v45  ;;  %v793_v39 = vadd.f32 %v789_v2, %v785_v0  ;;  %v761_v52 = vadd.f32 %v757_v18, %v753_v5  ;;  %v799_v58 = vmul.f32 %v6106_v38, %v6152_v61  ;;  %v5389_v5 = vld [vmem:[%s10288_s9 + $0x6] ss:$0 sm:$0xff] }
 0x237   :  { %v6281_v44 = vadd.f32 %v825_v3, %v6161_v11  ;;  %v803_v60 = vmul.f32 %v6108_v41, %v6154_v62  ;;  %v809_v0 = vadd.f32 %v805_v17, %v801_v40  ;;  %v6297_v2 = vmax.f32 %v204_v53, 0.0  ;;  %v5388_v3 = vld [vmem:[%s10288_s9 + $0x5] ss:$0 sm:$0xff]  ;;  %s5009_s9 = sld [smem:[#allocation2 + $0x16]] }
 0x238   :  { %v6286_v55 = vadd.f32 %v793_v39, %v6163_v14  ;;  %v6293_v63 = vadd.f32 %v761_v52, %v6118_v27  ;;  %v767_v53 = vmul.f32 %v6077_v20, %v6152_v61 }
 0x239   :  { %10628 = vst [vmem:[#allocation20_spill] sm:$0xff] %v6297_v2  ;;  %v6308_v18 = vadd.f32 %v809_v0, %v6165_v23  ;;  %v619_v22 = vmul.f32 %v6069_v15, %v6297_v2  ;;  %v623_v12 = vmul.f32 %v6071_v16, %v6297_v2  ;;  %v807_v39 = vadd.f32 %v803_v60, %v799_v58 }
 0x23a   :  { %10627 = vst [vmem:[#allocation19_spill] sm:$0xff] %v6286_v55  ;;  %1310 = vperm.xlu0 %5265, %v6178_v33   ;;  %5266 = vset.pattern.permute.xlu1 %v10302_v48  ;;  %v771_v0 = vmul.f32 %v6081_v8, %v6154_v62 }
 0x23b   :  { %1223 = vperm.xlu2 %5264, %v6138_v54   ;;  %1568 = vperm.xlu1 %5266, %v6184_v21   ;;  %v6314_v40 = vadd.f32 %v5388_v3, %v619_v22  ;;  %v6316_v52 = vadd.f32 %v5389_v5, %v623_v12  ;;  %v6319_v17 = vadd.f32 %v807_v39, %v6165_v23 }
 0x23c   :  { %v775_v12 = vadd.f32 %v771_v0, %v767_v53 }
 0x23d   :  { %10629 = vst [vmem:[#allocation21_spill] sm:$0xff] %v6314_v40  ;;  %v676_v15 = vmul.f32 %v6106_v38, %v6314_v40  ;;  %v679_v16 = vmul.f32 %v6108_v41, %v6316_v52  ;;  %v696_v60 = vmul.f32 %v6087_v29, %v6314_v40  ;;  %v699_v3 = vmul.f32 %v6089_v30, %v6316_v52 }
 0x23e   :  { %10630 = vst [vmem:[#allocation22_spill] sm:$0xff] %v6316_v52  ;;  %v686_v5 = vmul.f32 %v6091_v31, %v6314_v40  ;;  %v689_v38 = vmul.f32 %v6097_v9, %v6316_v52  ;;  %v706_v41 = vmul.f32 %v6083_v24, %v6314_v40  ;;  %v709_v22 = vmul.f32 %v6085_v28, %v6316_v52 }
 0x23f   :  { %v680_v58 = vadd.f32 %v679_v16, %v676_v15  ;;  %v700_v15 = vadd.f32 %v699_v3, %v696_v60  ;;  %v6359_v24 = vadd.f32 %v775_v12, %v6102_v36  ;;  %v735_v28 = vmul.f32 %v6087_v29, %v6152_v61 }
 0x240   :  { %v690_v16 = vadd.f32 %v689_v38, %v686_v5  ;;  %v726_v29 = vmul.f32 %v6099_v13, %v6314_v40  ;;  %v10632_v13 = vmov 0  }
 0x241   :  { %v6347_v39 = vadd.f32 %v6165_v23, %v680_v58  ;;  %v6350_v31 = vadd.f32 %v6127_v45, %v700_v15 }
 0x242   :  { %5279 = vset.pattern.permute.xlu0 %v10296_v4  ;;  %v710_v4 = vadd.f32 %v709_v22, %v706_v41 }
 0x243   :  { %1289 = vperm.xlu2 %5264, %v6184_v21   ;;  %1008 = vperm.xlu0 %5279, %v6319_v17   ;;  %v6455_v22 = vperm.slane %v6347_v39, 1  ;;  %v6522_v2 = vperm.slane %v6347_v39, 3 }
 0x244   :  { %5268 = vset.pattern.permute.xlu1 %v10300_v59  ;;  %v6356_v9 = vadd.f32 %v6118_v27, %v710_v4  ;;  %v739_v4 = vmul.f32 %v6089_v30, %v6154_v62  ;;  %v729_v30 = vmul.f32 %v6104_v37, %v6316_v52 }
 0x245   :  { %1847 = vperm.xlu1 %5268, %v6184_v21   ;;  %v6353_v21 = vadd.f32 %v6161_v11, %v690_v16 }
 0x246   :  { %v743_v27 = vadd.f32 %v739_v4, %v735_v28  ;;  %v730_v23 = vadd.f32 %v729_v30, %v726_v29 }
 0x247   :  { %v6451_v41 = vperm.slane %v6353_v21, 1 }
 0x248   :  { %v6377_v11 = vadd.f32 %v743_v27, %v6127_v45  ;;  %v6389_v45 = vadd.f32 %v6163_v14, %v730_v23 }
 0x24a   :  { %10631 = vst [vmem:[#allocation23_spill] sm:$0xff] %v6389_v45 }
 0x24b   :  { %5267 = vset.pattern.permute.xlu2 %v10302_v48  ;;  %5282 = vset.pattern.permute.xlu0 %v10298_v6 }
 0x24c   :  { %1589 = vperm.xlu2 %5267, %v6178_v33   ;;  %1227 = vperm.xlu0 %5282, %v6359_v24  }
 0x24d   :  { %5270 = vset.pattern.permute.xlu1 %v10302_v48 }
 0x24e   :  { %1413 = vperm.xlu1 %5270, %v6146_v57  }
 0x254   :  { %5269 = vset.pattern.permute.xlu2 %v10300_v59  ;;  %1293 = vperm.xlu0 %5282, %v6319_v17  }
 0x255   :  { %1868 = vperm.xlu2 %5269, %v6178_v33   ;;  %v6427_v33 = vperm.slane %v6353_v21, 0 }
 0x256   :  { %5273 = vset.pattern.permute.xlu1 %v10300_v59 }
 0x257   :  { %1713 = vperm.xlu1 %5273, %v6143_v56  }
 0x25c   :  { %5289 = vset.pattern.permute.xlu0 %v10300_v59 }
 0x25d   :  { %5271 = vset.pattern.permute.xlu2 %v10302_v48  ;;  %1696 = vperm.xlu0 %5289, %v6377_v11  }
 0x25e   :  { %1434 = vperm.xlu2 %5271, %v6143_v56  }
 0x25f   :  { %5275 = vset.pattern.permute.xlu1 %v10302_v48 }
 0x260   :  { %1535 = vperm.xlu1 %5275, %v6181_v34  }
 0x265   :  { %5291 = vset.pattern.permute.xlu0 %v10302_v48 }
 0x266   :  { %5272 = vset.pattern.permute.xlu2 %v10300_v59  ;;  %1506 = vperm.xlu0 %5291, %v6359_v24  }
 0x267   :  { %1692 = vperm.xlu2 %5272, %v6146_v57   ;;  %v6421_v57 = vperm.slane %v6347_v39, 0 }
 0x268   :  { %5277 = vset.pattern.permute.xlu1 %v10632_v13 }
 0x269   :  { %837 = vperm.xlu1 %5277, %v6377_v11  }
 0x26e   :  { %5294 = vset.pattern.permute.xlu0 %v10300_v59 }
 0x26f   :  { %5274 = vset.pattern.permute.xlu2 %v10302_v48  ;;  %1818 = vperm.xlu0 %5294, %v6195_v47  }
 0x270   :  { %1502 = vperm.xlu2 %5274, %v6138_v54  }
 0x271   :  { %934 = vperm.xlu1 %5277, %v6359_v24  }
 0x277   :  { %5297 = vset.pattern.permute.xlu0 %v10632_v13 }
 0x278   :  { %5276 = vset.pattern.permute.xlu2 %v10300_v59  ;;  %976 = vperm.xlu0 %5297, %v6227_v42  }
 0x279   :  { %1033 = vperm.xlu1 %5277, %v6202_v51   ;;  %1781 = vperm.xlu2 %5276, %v6138_v54  }
 0x27b   :  { %v833_v37 = vpop.permute.xlu2 %832 }
 0x27c   :  { %v851_v53 = vmul.f32 %v6421_v57, %v833_v37  ;;  %v769_v37 = vmul.f32 %v6077_v20, %v6238_v49 }
 0x280   :  { %5298 = vset.pattern.permute.xlu0 %v10298_v6 }
 0x281   :  { %5281 = vset.pattern.permute.xlu1 %v10298_v6  ;;  %1814 = vperm.xlu2 %5276, %v6181_v34  }
 0x282   :  { %1142 = vperm.xlu0 %5298, %v6230_v10   ;;  %1159 = vperm.xlu1 %5281, %v6222_v26  }
 0x283   :  { %v6413_v56 = vpop.permute.xlu2 %1003 }
 0x289   :  { %5278 = vset.pattern.permute.xlu2 %v10632_v13 }
 0x28a   :  { %5301 = vset.pattern.permute.xlu0 %v10302_v48  ;;  %1260 = vperm.xlu1 %5281, %v6195_v47  }
 0x28b   :  { %862 = vperm.xlu2 %5278, %v6222_v26   ;;  %1576 = vperm.xlu0 %5301, %v6233_v25  }
 0x28d   :  { %v1156_v54 = vpop.permute.xlu2 %1155 }
 0x28e   :  { %v1171_v16 = vmul.f32 %v6451_v41, %v1156_v54  ;;  %v773_v54 = vmul.f32 %v6081_v8, %v6240_v50 }
 0x292   :  { %1314 = vperm.xlu1 %5281, %v6202_v51   ;;  %v6424_v14 = vpop.permute.xlu0 %929 }
 0x293   :  { %10633 = vst [vmem:[#allocation24_spill] sm:$0xff] %v6424_v14  ;;  %971 = vperm.xlu2 %5278, %v6195_v47   ;;  %5303 = vset.pattern.permute.xlu0 %v10300_v59  ;;  %v858_v34 = vpop.permute.xlu1 %857 }
 0x294   :  { %1855 = vperm.xlu0 %5303, %v6233_v25   ;;  %v876_v0 = vmul.f32 %v6427_v33, %v858_v34 }
 0x295   :  { %v6434_v58 = vpop.permute.xlu2 %1223 }
 0x296   :  { %10634 = vst [vmem:[#allocation25_spill] sm:$0xff] %v6434_v58  ;;  %v6436_v60 = vadd.f32 %v876_v0, %v851_v53  ;;  %v777_v53 = vadd.f32 %v773_v54, %v769_v37 }
 0x298   :  { %v6496_v0 = vadd.f32 %v777_v53, %v6102_v36  ;;  %v6575_v32 = vsel %vm131_vm2, %v6436_v60, -inf }
 0x29a   :  { %5284 = vset.pattern.permute.xlu1 %v10302_v48  ;;  %v6439_v3 = vpop.permute.xlu0 %1028  ;;  %10637 = vst [vmem:[#allocation28_spill] sm:$0xff] %v6496_v0 }
 0x29b   :  { %5280 = vset.pattern.permute.xlu2 %v10298_v6  ;;  %1593 = vperm.xlu1 %5284, %v6202_v51   ;;  %v6443_v5 = vpop.permute.xlu1 %966 }
 0x29c   :  { %10635 = vst [vmem:[#allocation26_spill] sm:$0xff] %v6443_v5  ;;  %1138 = vperm.xlu2 %5280, %v6377_v11   ;;  %5305 = vset.pattern.permute.xlu0 %v10302_v48 }
 0x29d   :  { %1421 = vperm.xlu0 %5305, %v6230_v10   ;;  %v6448_v38 = vpop.permute.xlu2 %1289 }
 0x2a3   :  { %5286 = vset.pattern.permute.xlu1 %v10300_v59 }
 0x2a4   :  { %5283 = vset.pattern.permute.xlu2 %v10302_v48  ;;  %1872 = vperm.xlu1 %5286, %v6202_v51   ;;  %v6459_v12 = vpop.permute.xlu0 %1256  ;;  %v1135_v15 = vpop.permute.xlu1 %1134 }
 0x2a5   :  { %10636 = vst [vmem:[#allocation27_spill] sm:$0xff] %v6459_v12  ;;  %1572 = vperm.xlu2 %5283, %v6319_v17   ;;  %5308 = vset.pattern.permute.xlu0 %v10300_v59  ;;  %v1150_v28 = vmul.f32 %v6455_v22, %v1135_v15 }
 0x2a6   :  { %1721 = vperm.xlu0 %5308, %v6244_v7   ;;  %v6466_v4 = vpop.permute.xlu2 %1589 }
 0x2a7   :  { %v6468_v27 = vadd.f32 %v1171_v16, %v1150_v28  ;;  %v6501_v16 = vperm.slane %v6353_v21, 2 }
 0x2a9   :  { %v6605_v40 = vsel %vm131_vm2, %v6468_v27, -inf }
 0x2ac   :  { %5288 = vset.pattern.permute.xlu1 %v10302_v48  ;;  %v6471_v51 = vpop.permute.xlu0 %1310 }
 0x2ad   :  { %5285 = vset.pattern.permute.xlu2 %v10300_v59  ;;  %1438 = vperm.xlu1 %5288, %v6222_v26   ;;  %v6475_v29 = vpop.permute.xlu1 %1568 }
 0x2ae   :  { %1851 = vperm.xlu2 %5285, %v6319_v17   ;;  %1822 = vperm.xlu0 %5308, %v6227_v42  }
 0x2af   :  { %v6479_v30 = vpop.permute.xlu2 %1868 }
 0x2b5   :  { %5293 = vset.pattern.permute.xlu1 %v10300_v59  ;;  %v6482_v23 = vpop.permute.xlu0 %1008 }
 0x2b6   :  { %5287 = vset.pattern.permute.xlu2 %v10302_v48  ;;  %5312 = vset.pattern.permute.xlu0 %v10632_v13  ;;  %v772_v48 = vmul.f32 %v6081_v8, %v6191_v19 }
 0x2b7   :  { %1785 = vperm.xlu1 %5293, %v6359_v24   ;;  %1417 = vperm.xlu2 %5287, %v6377_v11   ;;  %v6492_v17 = vpop.permute.xlu1 %1847  ;;  %v6506_v24 = vperm.slane %v6347_v39, 2 }
 0x2b8   :  { %847 = vperm.xlu0 %5312, %v6273_v43   ;;  %v1435_v34 = vpop.permute.xlu2 %1434 }
 0x2b9   :  { %v1450_v28 = vmul.f32 %v6501_v16, %v1435_v34  ;;  %v10640_v34 = vmov 2  }
 0x2be   :  { %v6498_v15 = vpop.permute.xlu0 %1227 }
 0x2bf   :  { %10638 = vst [vmem:[#allocation29_spill] sm:$0xff] %v6498_v15  ;;  %5296 = vset.pattern.permute.xlu1 %v10632_v13  ;;  %5290 = vset.pattern.permute.xlu2 %v10300_v59  ;;  %v768_v59 = vmul.f32 %v6077_v20, %v6189_v46 }
 0x2c0   :  { %944 = vperm.xlu0 %5312, %v6496_v0   ;;  %867 = vperm.xlu1 %5296, %v6244_v7   ;;  %v1414_v11 = vpop.permute.xlu1 %1413 }
 0x2c1   :  { %1717 = vperm.xlu2 %5290, %v6222_v26   ;;  %v1429_v37 = vmul.f32 %v6506_v24, %v1414_v11  ;;  %v1693_v54 = vpop.permute.xlu2 %1692  ;;  %v6527_v26 = vperm.slane %v6353_v21, 3  ;;  %v776_v39 = vadd.f32 %v772_v48, %v768_v59  ;;  %v10643_v21 = vmov 1  }
 0x2c3   :  { %v6513_v53 = vadd.f32 %v1450_v28, %v1429_v37  ;;  %v1708_v28 = vmul.f32 %v6522_v2, %v1693_v54  ;;  %v6540_v46 = vadd.f32 %v776_v39, %v6102_v36 }
 0x2c5   :  { %10639 = vst [vmem:[#allocation30_spill] sm:$0xff] %v6513_v53 }
 0x2c6   :  { %v6515_v6 = vpop.permute.xlu0 %1293 }
 0x2c8   :  { %1043 = vperm.xlu0 %5312, %v6281_v44   ;;  %1013 = vperm.xlu1 %5296, %v6233_v25  }
 0x2c9   :  { %5292 = vset.pattern.permute.xlu2 %v10640_v34  ;;  %v1714_v11 = vpop.permute.xlu1 %1713 }
 0x2ca   :  { %1539 = vperm.xlu2 %5292, %v6195_v47   ;;  %v1729_v37 = vmul.f32 %v6527_v26, %v1714_v11  ;;  %v6533_v50 = vpop.permute.xlu2 %1502 }
 0x2cb   :  { %10641 = vst [vmem:[#allocation31_spill] sm:$0xff] %v6533_v50 }
 0x2cc   :  { %v6535_v49 = vadd.f32 %v1729_v37, %v1708_v28  ;;  %v10648_v28 = vmov 3  }
 0x2ce   :  { %10642 = vst [vmem:[#allocation32_spill] sm:$0xff] %v6535_v49 }
 0x2cf   :  { %v6537_v19 = vpop.permute.xlu0 %1696 }
 0x2d0   :  { %5317 = vset.pattern.permute.xlu0 %v10643_v21  ;;  %5300 = vset.pattern.permute.xlu1 %v10643_v21 }
 0x2d1   :  { %1322 = vperm.xlu0 %5317, %v6281_v44   ;;  %1231 = vperm.xlu1 %5300, %v6540_v46  }
 0x2d2   :  { %5295 = vset.pattern.permute.xlu2 %v10632_v13  ;;  %v6547_v47 = vpop.permute.xlu1 %1535 }
 0x2d3   :  { %10644 = vst [vmem:[#allocation33_spill] sm:$0xff] %v6547_v47  ;;  %842 = vperm.xlu2 %5295, %v6230_v10   ;;  %v6550_v48 = vpop.permute.xlu2 %1781 }
 0x2d4   :  { %10645 = vst [vmem:[#allocation34_spill] sm:$0xff] %v6550_v48 }
 0x2d8   :  { %v6552_v59 = vpop.permute.xlu0 %1506 }
 0x2d9   :  { %10646 = vst [vmem:[#allocation35_spill] sm:$0xff] %v6552_v59  ;;  %5319 = vset.pattern.permute.xlu0 %v10640_v34  ;;  %1297 = vperm.xlu1 %5300, %v6233_v25  }
 0x2da   :  { %1601 = vperm.xlu0 %5319, %v6281_v44  }
 0x2db   :  { %939 = vperm.xlu2 %5295, %v6540_v46   ;;  %v838_v54 = vpop.permute.xlu1 %837  ;;  %v6558_v11 = vpop.permute.xlu2 %1814 }
 0x2dc   :  { %10647 = vst [vmem:[#allocation36_spill] sm:$0xff] %v6558_v11  ;;  %v852_v62 = vmul.f32 %v6421_v57, %v838_v54 }
 0x2e1   :  { %5307 = vset.pattern.permute.xlu1 %v10648_v28  ;;  %v6561_v37 = vpop.permute.xlu0 %1818 }
 0x2e2   :  { %10649 = vst [vmem:[#allocation37_spill] sm:$0xff] %v6561_v37  ;;  %5321 = vset.pattern.permute.xlu0 %v10648_v28  ;;  %1700 = vperm.xlu1 %5307, %v6230_v10  }
 0x2e3   :  { %1038 = vperm.xlu2 %5295, %v6276_v1   ;;  %1880 = vperm.xlu0 %5321, %v6281_v44   ;;  %v6567_v25 = vpop.permute.xlu1 %934 }
 0x2e4   :  { %10650 = vst [vmem:[#allocation38_spill] sm:$0xff] %v6567_v25 }
 0x2e5   :  { %v863_v39 = vpop.permute.xlu2 %862 }
 0x2e6   :  { %v877_v61 = vmul.f32 %v6427_v33, %v863_v39 }
 0x2e8   :  { %v6571_v35 = vadd.f32 %v877_v61, %v852_v62 }
 0x2ea   :  { %v6579_v10 = vsel %vm131_vm2, %v6571_v35, -inf  ;;  %5309 = vset.pattern.permute.xlu1 %v10643_v21  ;;  %v6582_v44 = vpop.permute.xlu0 %976 }
 0x2eb   :  { %10651 = vst [vmem:[#allocation39_spill] sm:$0xff] %v6582_v44  ;;  %5299 = vset.pattern.permute.xlu2 %v10643_v21  ;;  %1264 = vperm.xlu1 %5309, %v6227_v42   ;;  %v6588_v61 = vpop.permute.xlu1 %1033 }
 0x2ec   :  { %1163 = vperm.xlu2 %5299, %v6244_v7  }
 0x2ed   :  { %v6591_v62 = vpop.permute.xlu2 %971 }
 0x2ee   :  { %10652 = vst [vmem:[#allocation40_spill] sm:$0xff] %v6591_v62  ;;  %v6647_v62 = vperm.slane %v6350_v31, 2 }
 0x2f3   :  { %5310 = vset.pattern.permute.xlu1 %v10640_v34 }
 0x2f4   :  { %1318 = vperm.xlu2 %5299, %v6276_v1   ;;  %1510 = vperm.xlu1 %5310, %v6540_v46   ;;  %v1143_v54 = vpop.permute.xlu0 %1142  ;;  %v1160_v39 = vpop.permute.xlu1 %1159 }
 0x2f5   :  { %v6597_v45 = vmul.f32 %v6455_v22, %v1143_v54  ;;  %v1172_v36 = vmul.f32 %v6451_v41, %v1160_v39  ;;  %v6625_v39 = vperm.slane %v6356_v9, 3 }
 0x2f6   :  { %v1139_v8 = vpop.permute.xlu2 %1138 }
 0x2f7   :  { %v1151_v52 = vmul.f32 %v6455_v22, %v1139_v8  ;;  %v1884_v47 = vmul.f32 %v6625_v39, %v6479_v30 }
 0x2f9   :  { %v6601_v20 = vadd.f32 %v1172_v36, %v1151_v52  ;;  %v6622_v52 = vperm.slane %v6350_v31, 3 }
 0x2fb   :  { %v6609_v48 = vsel %vm131_vm2, %v6601_v20, -inf  ;;  %v1863_v37 = vmul.f32 %v6622_v52, %v6492_v17  ;;  %v6644_v17 = vperm.slane %v6356_v9, 2 }
 0x2fc   :  { %5302 = vset.pattern.permute.xlu2 %v10640_v34  ;;  %5314 = vset.pattern.permute.xlu1 %v10632_v13  ;;  %v6615_v54 = vpop.permute.xlu1 %1260 }
 0x2fd   :  { %10653 = vst [vmem:[#allocation41_spill] sm:$0xff] %v6615_v54  ;;  %1597 = vperm.xlu2 %5302, %v6276_v1   ;;  %981 = vperm.xlu1 %5314, %v6286_v55   ;;  %v6619_v8 = vpop.permute.xlu0 %1576  ;;  %v6641_v44 = vadd.f32 %v1884_v47, %v1863_v37 }
 0x2ff   :  { %v1573_v36 = vpop.permute.xlu2 %1572  ;;  %v1892_v5 = vsel %vm131_vm2, %v6641_v44, -inf }
 0x304   :  { %v6629_v11 = vpop.permute.xlu1 %1314 }
 0x305   :  { %5304 = vset.pattern.permute.xlu2 %v10648_v28  ;;  %5315 = vset.pattern.permute.xlu1 %v10643_v21 }
 0x306   :  { %1876 = vperm.xlu2 %5304, %v6276_v1   ;;  %1146 = vperm.xlu1 %5315, %v6273_v43   ;;  %v6637_v59 = vpop.permute.xlu0 %1855  ;;  %v1585_v1 = vmul.f32 %v6647_v62, %v1573_v36 }
 0x308   :  { %v6639_v50 = vpop.permute.xlu2 %1851 }
 0x30d   :  { %1893 = vmax.xlane.f32.xlu0 %v1892_v5  ;;  %v1594_v30 = vpop.permute.xlu1 %1593 }
 0x30e   :  { %5306 = vset.pattern.permute.xlu2 %v10640_v34  ;;  %1167 = vperm.xlu1 %5315, %v6293_v63   ;;  %v1606_v47 = vmul.f32 %v6644_v17, %v1594_v30 }
 0x30f   :  { %1442 = vperm.xlu2 %5306, %v6244_v7   ;;  %v1422_v37 = vpop.permute.xlu0 %1421 }
 0x310   :  { %v6657_v25 = vmul.f32 %v6506_v24, %v1422_v37  ;;  %v6659_v14 = vadd.f32 %v1606_v47, %v1585_v1  ;;  %v1709_v1 = vmul.f32 %v6522_v2, %v6537_v19 }
 0x311   :  { %v1418_v54 = vpop.permute.xlu2 %1417 }
 0x312   :  { %v1616_v5 = vsel %vm131_vm2, %v6659_v14, -inf }
 0x315   :  { %1617 = vmax.xlane.f32.xlu0 %v1616_v5 }
 0x316   :  { %5318 = vset.pattern.permute.xlu1 %v10640_v34  ;;  %v6664_v36 = vpop.permute.xlu1 %1872 }
 0x317   :  { %1543 = vperm.xlu2 %5306, %v6227_v42   ;;  %1580 = vperm.xlu1 %5318, %v6308_v18   ;;  %v6680_v42 = vsel %vm131_vm2, %v6535_v49, -inf }
 0x318   :  { %v1722_v7 = vpop.permute.xlu0 %1721 }
 0x319   :  { %v6669_v30 = vmul.f32 %v6527_v26, %v1722_v7  ;;  %v1430_v7 = vmul.f32 %v6506_v24, %v1418_v54  ;;  %v6698_v54 = vsel %vm131_vm2, %v6513_v53, -inf }
 0x31b   :  { %v1718_v37 = vpop.permute.xlu2 %1717 }
 0x31c   :  { %v1730_v47 = vmul.f32 %v6527_v26, %v1718_v37 }
 0x31e   :  { %v6674_v12 = vadd.f32 %v1730_v47, %v1709_v1 }
 0x31f   :  { %5311 = vset.pattern.permute.xlu2 %v10648_v28  ;;  %5320 = vset.pattern.permute.xlu1 %v10648_v28  ;;  %v1439_v5 = vpop.permute.xlu1 %1438 }
 0x320   :  { %10654 = vst [vmem:[#allocation42_spill] sm:$0xff] %v6674_v12  ;;  %v6685_v15 = vsel %vm131_vm2, %v6674_v12, -inf  ;;  %1789 = vperm.xlu2 %5311, %v6540_v46   ;;  %1859 = vperm.xlu1 %5320, %v6308_v18   ;;  %v1451_v19 = vmul.f32 %v6501_v16, %v1439_v5  ;;  %v6690_v37 = vpop.permute.xlu0 %1822 }
 0x321   :  { %10655 = vst [vmem:[#allocation43_spill] sm:$0xff] %v6690_v37 }
 0x322   :  { %v6694_v47 = vadd.f32 %v1451_v19, %v1430_v7 }
 0x324   :  { %10656 = vst [vmem:[#allocation44_spill] sm:$0xff] %v6694_v47  ;;  %v6702_v12 = vsel %vm131_vm2, %v6694_v47, -inf  ;;  %v6704_v46 = vpop.permute.xlu2 %1539 }
 0x325   :  { %10657 = vst [vmem:[#allocation45_spill] sm:$0xff] %v6704_v46 }
 0x328   :  { %5313 = vset.pattern.permute.xlu2 %v10632_v13  ;;  %5322 = vset.pattern.permute.xlu1 %v10640_v34 }
 0x329   :  { %872 = vperm.xlu2 %5313, %v6293_v63   ;;  %1425 = vperm.xlu1 %5322, %v6273_v43   ;;  %v6712_v7 = vpop.permute.xlu1 %1785 }
 0x32a   :  { %10658 = vst [vmem:[#allocation46_spill] sm:$0xff] %v6712_v7  ;;  %v848_v19 = vpop.permute.xlu0 %847  ;;  %v6730_v7 = vperm.slane %v6350_v31, 0 }
 0x32b   :  { %v6715_v1 = vmul.f32 %v6421_v57, %v848_v19 }
 0x32d   :  { %v843_v37 = vpop.permute.xlu2 %842 }
 0x32e   :  { %v853_v13 = vmul.f32 %v6421_v57, %v843_v37  ;;  %v6733_v57 = vperm.slane %v6356_v9, 0 }
 0x331   :  { %1018 = vperm.xlu2 %5313, %v6308_v18   ;;  %1446 = vperm.xlu1 %5322, %v6293_v63  }
 0x332   :  { %v868_v5 = vpop.permute.xlu1 %867 }
 0x333   :  { %v878_v46 = vmul.f32 %v6427_v33, %v868_v5 }
 0x335   :  { %v6721_v49 = vadd.f32 %v878_v46, %v853_v13  ;;  %v6723_v58 = vpop.permute.xlu2 %939 }
 0x336   :  { %10659 = vst [vmem:[#allocation47_spill] sm:$0xff] %v6723_v58 }
 0x339   :  { %5316 = vset.pattern.permute.xlu2 %v10643_v21  ;;  %5324 = vset.pattern.permute.xlu1 %v10648_v28 }
 0x33a   :  { %1235 = vperm.xlu2 %5316, %v6496_v0   ;;  %1725 = vperm.xlu1 %5324, %v6293_v63   ;;  %v1014_v19 = vpop.permute.xlu1 %1013 }
 0x33b   :  { %v1024_v13 = vmul.f32 %v6730_v7, %v1014_v19 }
 0x33d   :  { %v1039_v37 = vpop.permute.xlu2 %1038 }
 0x33e   :  { %v1049_v46 = vmul.f32 %v6733_v57, %v1039_v37  ;;  %v6755_v37 = vperm.slane %v6350_v31, 1 }
 0x340   :  { %v6737_v5 = vadd.f32 %v1049_v46, %v1024_v13  ;;  %v6758_v13 = vperm.slane %v6356_v9, 1 }
 0x342   :  { %1301 = vperm.xlu2 %5316, %v6308_v18   ;;  %5325 = vset.pattern.permute.xlu1 %v10643_v21  ;;  %v1061_v63 = vsel %vm131_vm2, %v6737_v5, -inf }
 0x343   :  { %1062 = vmax.xlane.f32.xlu0 %v1061_v63  ;;  %1268 = vperm.xlu1 %5325, %v6286_v55   ;;  %v6744_v58 = vpop.permute.xlu1 %1231  ;;  %v6764_v63 = vpop.permute.xlu0 %944 }
 0x344   :  { %10661 = vst [vmem:[#allocation49_spill] sm:$0xff] %v6764_v63 }
 0x346   :  { %v1164_v47 = vpop.permute.xlu2 %1163 }
 0x347   :  { %v1173_v53 = vmul.f32 %v6451_v41, %v1164_v47 }
 0x349   :  { %v6748_v19 = vadd.f32 %v1173_v53, %v6597_v45 }
 0x34a   :  { %5323 = vset.pattern.permute.xlu2 %v10648_v28 }
 0x34b   :  { %1704 = vperm.xlu2 %5323, %v6273_v43   ;;  %5326 = vset.pattern.permute.xlu1 %v10640_v34  ;;  %v1298_v18 = vpop.permute.xlu1 %1297 }
 0x34c   :  { %1514 = vperm.xlu1 %5326, %v6496_v0   ;;  %v1307_v47 = vmul.f32 %v6755_v37, %v1298_v18 }
 0x34e   :  { %v1319_v46 = vpop.permute.xlu2 %1318 }
 0x34f   :  { %v1328_v45 = vmul.f32 %v6758_v13, %v1319_v46  ;;  %v6774_v46 = vpop.permute.xlu0 %1043 }
 0x351   :  { %v6762_v53 = vadd.f32 %v1328_v45, %v1307_v47 }
 0x353   :  { %10660 = vst [vmem:[#allocation48_spill] sm:$0xff] %v6762_v53  ;;  %v1340_v43 = vsel %vm131_vm2, %v6762_v53, -inf  ;;  %5327 = vset.pattern.permute.xlu2 %v10640_v34 }
 0x354   :  { %1341 = vmax.xlane.f32.xlu0 %v1340_v43  ;;  %v1701_v31 = vpop.permute.xlu1 %1700  ;;  %5328 = vset.pattern.permute.xlu1 %v10648_v28  ;;  %v1584_v28 = vmul.f32 %v6647_v62, %v6475_v29 }
 0x355   :  { %v1710_v9 = vmul.f32 %v6522_v2, %v1701_v31 }
 0x357   :  { %v6772_v21 = vadd.f32 %v6669_v30, %v1710_v9  ;;  %v1598_v18 = vpop.permute.xlu2 %1597  ;;  %v6780_v55 = vpop.permute.xlu0 %1322  ;;  %v1047_v30 = vmul.f32 %v6733_v57, %v6439_v3  ;;  %v1605_v9 = vmul.f32 %v6644_v17, %v6466_v4  ;;  %v1023_v4 = vmul.f32 %v6730_v7, %v6482_v23 }
 0x35d   :  { %v6776_v47 = vpop.permute.xlu1 %1264 }
 0x35e   :  { %10662 = vst [vmem:[#allocation50_spill] sm:$0xff] %v6776_v47  ;;  %v6796_v47 = vadd.f32 %v1605_v9, %v1584_v28 }
 0x360   :  { %v1877_v45 = vpop.permute.xlu2 %1876  ;;  %v1613_v3 = vsel %vm131_vm2, %v6796_v47, -inf }
 0x366   :  { %v6778_v0 = vpop.permute.xlu1 %1510 }
 0x367   :  { %10663 = vst [vmem:[#allocation51_spill] sm:$0xff] %v6778_v0  ;;  %v1022_v0 = vmul.f32 %v6730_v7, %v6413_v56  ;;  %v1326_v56 = vmul.f32 %v6758_v13, %v6471_v51  ;;  %v1327_v51 = vmul.f32 %v6758_v13, %v6629_v11 }
 0x369   :  { %v1443_v34 = vpop.permute.xlu2 %1442  ;;  %v6802_v29 = vadd.f32 %v1047_v30, %v1022_v0  ;;  %v1305_v0 = vmul.f32 %v6755_v37, %v6448_v38  ;;  %v1885_v38 = vmul.f32 %v6625_v39, %v6664_v36 }
 0x36a   :  { %v1452_v43 = vmul.f32 %v6501_v16, %v1443_v34  ;;  %v6798_v34 = vpop.permute.xlu0 %1601 }
 0x36b   :  { %v1055_v28 = vsel %vm131_vm2, %v6802_v29, -inf  ;;  %v6818_v30 = vadd.f32 %v1326_v56, %v1305_v0  ;;  %v1864_v56 = vmul.f32 %v6622_v52, %v6639_v50  ;;  %v1865_v50 = vmul.f32 %v6622_v52, %v6637_v59 }
 0x36c   :  { %v6786_v31 = vadd.f32 %v1452_v43, %v6657_v25  ;;  %v1048_v25 = vmul.f32 %v6733_v57, %v6588_v61 }
 0x36e   :  { %v6816_v43 = vadd.f32 %v1048_v25, %v1023_v4  ;;  %v1334_v25 = vsel %vm131_vm2, %v6818_v30, -inf }
 0x36f   :  { %v6794_v53 = vpop.permute.xlu1 %981 }
 0x370   :  { %10665 = vst [vmem:[#allocation53_spill] sm:$0xff] %v6816_v43  ;;  %v1058_v23 = vsel %vm131_vm2, %v6816_v43, -inf }
 0x371   :  { %v6800_v63 = vpop.permute.xlu2 %1543 }
 0x372   :  { %10664 = vst [vmem:[#allocation52_spill] sm:$0xff] %v6800_v63 }
 0x374   :  { %1614 = vmax.xlane.f32.xlu2 %v1613_v3  ;;  %v1881_v3 = vpop.permute.xlu0 %1880 }
 0x376   :  { %1056 = vmax.xlane.f32.xlu1 %v1055_v28  ;;  %v1306_v28 = vmul.f32 %v6755_v37, %v6515_v6  ;;  %v1886_v6 = vmul.f32 %v6625_v39, %v1877_v45 }
 0x378   :  { %v1147_v61 = vpop.permute.xlu1 %1146  ;;  %v6834_v4 = vadd.f32 %v1327_v51, %v1306_v28  ;;  %v6860_v59 = vadd.f32 %v1886_v6, %v1865_v50 }
 0x379   :  { %v1153_v0 = vmul.f32 %v6455_v22, %v1147_v61  ;;  %v1607_v22 = vmul.f32 %v6644_v17, %v1598_v18  ;;  %v10667_v18 = vmax.f32 %v6605_v40, %v6609_v48  ;;  %v1050_v48 = vmul.f32 %v6733_v57, %v6774_v46 }
 0x37a   :  { %v6820_v9 = vpop.permute.xlu2 %1789 }
 0x37b   :  { %10666 = vst [vmem:[#allocation54_spill] sm:$0xff] %v6820_v9  ;;  %v6838_v9 = vadd.f32 %v1885_v38, %v1864_v56 }
 0x37c   :  { %1059 = vmax.xlane.f32.xlu2 %v1058_v23 }
 0x37d   :  { %v1895_v61 = vsel %vm131_vm2, %v6838_v9, -inf }
 0x37e   :  { %1335 = vmax.xlane.f32.xlu1 %v1334_v25  ;;  %v1337_v25 = vsel %vm131_vm2, %v6834_v4, -inf }
 0x380   :  { %v1168_v11 = vpop.permute.xlu1 %1167  ;;  %v1894_v36 = vpop.xlane.xlu0 %1893 }
 0x381   :  { %v1174_v23 = vmul.f32 %v6451_v41, %v1168_v11  ;;  %v1181_v41 = vsel %vm131_vm2, %v6748_v19, -inf }
 0x383   :  { %v6841_v43 = vadd.f32 %v1174_v23, %v1153_v0  ;;  %v873_v63 = vpop.permute.xlu2 %872 }
 0x384   :  { %v879_v51 = vmul.f32 %v6427_v33, %v873_v63  ;;  %1338 = vmax.xlane.f32.xlu2 %v1337_v25  ;;  %v1586_v33 = vmul.f32 %v6647_v62, %v6619_v8  ;;  %v886_v63 = vsel %vm131_vm2, %v6721_v49, -inf  ;;  %v10668_v8 = vmax.f32 %v6575_v32, %v6579_v10 }
 0x385   :  { %v1182_v45 = vsel %vm131_vm2, %v6841_v43, -inf }
 0x386   :  { %v1184_v28 = vmax.f32 %v1181_v41, %v1182_v45  ;;  %v6856_v38 = vadd.f32 %v879_v51, %v6715_v1  ;;  %1896 = vmax.xlane.f32.xlu1 %v1895_v61  ;;  %v6869_v1 = vadd.f32 %v1607_v22, %v1586_v33  ;;  %v1898_v51 = vsel %vm131_vm2, %v6860_v59, -inf }
 0x387   :  { %v1904_v45 = vsub.f32 %v6641_v44, %v1894_v36 }
 0x388   :  { %v1185_v56 = vmax.f32 %v10667_v18, %v1184_v28  ;;  %v887_v11 = vsel %vm131_vm2, %v6856_v38, -inf  ;;  %v1618_v61 = vpop.xlane.xlu0 %1617  ;;  %v1619_v28 = vsel %vm131_vm2, %v6869_v1, -inf }
 0x389   :  { %v889_v0 = vmax.f32 %v886_v63, %v887_v11  ;;  %v1581_v23 = vpop.permute.xlu1 %1580  ;;  %v1626_v18 = vsub.f32 %v6659_v14, %v1618_v61  ;;  %v1887_v11 = vmul.f32 %v6625_v39, %v1881_v3  ;;  %v1608_v14 = vmul.f32 %v6644_v17, %v6798_v34 }
 0x38a   :  { %v1186_v25 = vrot.slane %v1185_v56, 4  ;;  %v1587_v36 = vmul.f32 %v6647_v62, %v1581_v23 }
 0x38b   :  { %v890_v6 = vmax.f32 %v10668_v8, %v889_v0  ;;  %v1019_v50 = vpop.permute.xlu2 %1018 }
 0x38c   :  { %v1187_v41 = vmax.f32 %v1185_v56, %v1186_v25  ;;  %v1025_v40 = vmul.f32 %v6730_v7, %v1019_v50  ;;  %1899 = vmax.xlane.f32.xlu2 %v1898_v51  ;;  %v1908_v7 = vmul.f32 1.442695, %v1904_v45 }
 0x38d   :  { %v891_v22 = vrot.slane %v890_v6, 4 }
 0x38e   :  { %v1188_v32 = vrot.slane %v1187_v41, 2  ;;  %1620 = vmax.xlane.f32.xlu1 %v1619_v28  ;;  %v6882_v33 = vadd.f32 %v1050_v48, %v1025_v40  ;;  %5434 = vpow2.f32 %v1908_v7  ;;  %v6902_v48 = vadd.f32 %v1608_v14, %v1587_v36 }
 0x38f   :  { %v892_v10 = vmax.f32 %v890_v6, %v891_v22  ;;  %v1631_v6 = vmul.f32 1.442695, %v1626_v18 }
 0x390   :  { %v1189_v63 = vmax.f32 %v1187_v41, %v1188_v32  ;;  %v1064_v25 = vsel %vm131_vm2, %v6882_v33, -inf }
 0x391   :  { %v893_v56 = vrot.slane %v892_v10, 2  ;;  %5436 = vpow2.f32 %v1631_v6 }
 0x392   :  { %v1190_v57 = vrot.slane %v1189_v63, 1  ;;  %v1860_v46 = vpop.permute.xlu1 %1859 }
 0x393   :  { %v894_v44 = vmax.f32 %v892_v10, %v893_v56  ;;  %v1866_v0 = vmul.f32 %v6622_v52, %v1860_v46 }
 0x394   :  { %v1191_v8 = vmax.f32 %v1189_v63, %v1190_v57  ;;  %v6890_v50 = vpop.permute.xlu2 %1235  ;;  %1065 = vmax.xlane.f32.xlu2 %v1064_v25  ;;  %v6908_v61 = vpop.eup %5434  ;;  %v1622_v63 = vsel %vm131_vm2, %v6902_v48, -inf }
 0x395   :  { %v895_v39 = vrot.slane %v894_v44, 1  ;;  %v6894_v3 = vadd.f32 %v1887_v11, %v1866_v0  ;;  %v1916_v56 = vsel %vm131_vm2, %v6908_v61, 0.0 }
 0x396   :  { %v1192_v51 = vsub.f32 %v6468_v27, %v1191_v8  ;;  %v1193_v62 = vsub.f32 %v6601_v20, %v1191_v8  ;;  %v1194_v52 = vsub.f32 %v6748_v19, %v1191_v8  ;;  %v1195_v23 = vsub.f32 %v6841_v43, %v1191_v8 }
 0x397   :  { %v896_v41 = vmax.f32 %v894_v44, %v895_v39  ;;  %v1901_v40 = vsel %vm131_vm2, %v6894_v3, -inf }
 0x398   :  { %v1196_v45 = vmul.f32 1.442695, %v1192_v51  ;;  %v1198_v17 = vmul.f32 1.442695, %v1193_v62  ;;  %v1200_v34 = vmul.f32 1.442695, %v1194_v52  ;;  %1902 = vmax.xlane.f32.xlu0 %v1901_v40 }
 0x399   :  { %v1202_v22 = vmul.f32 1.442695, %v1195_v23  ;;  %v897_v27 = vsub.f32 %v6436_v60, %v896_v41  ;;  %v898_v20 = vsub.f32 %v6571_v35, %v896_v41  ;;  %v899_v19 = vsub.f32 %v6721_v49, %v896_v41 }
 0x39a   :  { %5438 = vpow2.f32 %v1196_v45  ;;  %v900_v43 = vsub.f32 %v6856_v38, %v896_v41  ;;  %v1329_v35 = vmul.f32 %v6758_v13, %v6780_v55  ;;  %v6915_v38 = vpop.eup %5436 }
 0x39b   :  { %5440 = vpow2.f32 %v1198_v17  ;;  %v901_v28 = vmul.f32 1.442695, %v897_v27  ;;  %v903_v32 = vmul.f32 1.442695, %v898_v20  ;;  %v1426_v10 = vpop.permute.xlu1 %1425  ;;  %v905_v18 = vmul.f32 1.442695, %v899_v19 }
 0x39c   :  { %5442 = vpow2.f32 %v1200_v34  ;;  %v1302_v7 = vpop.permute.xlu2 %1301  ;;  %1623 = vmax.xlane.f32.xlu2 %v1622_v63  ;;  %v907_v49 = vmul.f32 1.442695, %v900_v43  ;;  %v1432_v14 = vmul.f32 %v6506_v24, %v1426_v10 }
 0x39d   :  { %5444 = vpow2.f32 %v1202_v22  ;;  %v1308_v60 = vmul.f32 %v6755_v37, %v1302_v7  ;;  %v1460_v22 = vsel %vm131_vm2, %v6786_v31, -inf }
 0x39e   :  { %5446 = vpow2.f32 %v901_v28 }
 0x39f   :  { %5448 = vpow2.f32 %v903_v32  ;;  %v6919_v11 = vadd.f32 %v1329_v35, %v1308_v60 }
 0x3a0   :  { %v6921_v57 = vpop.eup %5438  ;;  %5450 = vpow2.f32 %v905_v18  ;;  %1917 = vadd.xlane.f32.xlu0 %v1916_v56  ;;  %v10669_v18 = vmax.f32 %v6698_v54, %v6702_v12  ;;  %v1739_v12 = vsel %vm131_vm2, %v6772_v21, -inf }
 0x3a1   :  { %v6923_v46 = vpop.eup %5440  ;;  %v1204_v55 = vsel %vm131_vm2, %v6921_v57, 0.0  ;;  %5452 = vpow2.f32 %v907_v49  ;;  %v1343_v37 = vsel %vm131_vm2, %v6919_v11, -inf }
 0x3a2   :  { %v6929_v13 = vpop.eup %5442  ;;  %v1205_v44 = vsel %vm131_vm2, %v6923_v46, 0.0  ;;  %1344 = vmax.xlane.f32.xlu1 %v1343_v37 }
 0x3a3   :  { %v6933_v36 = vpop.eup %5444  ;;  %v1206_v0 = vadd.f32 %v1205_v44, %v1204_v55  ;;  %v1447_v25 = vpop.permute.xlu1 %1446  ;;  %v1207_v6 = vsel %vm131_vm2, %v6929_v13, 0.0 }
 0x3a4   :  { %v6935_v8 = vpop.eup %5446  ;;  %v1453_v39 = vmul.f32 %v6501_v16, %v1447_v25  ;;  %v1209_v41 = vsel %vm131_vm2, %v6933_v36, 0.0  ;;  %v1640_v16 = vsel %vm131_vm2, %v6915_v38, 0.0 }
 0x3a5   :  { %v6941_v51 = vpop.eup %5448  ;;  %v1208_v62 = vadd.f32 %v1207_v6, %v1206_v0  ;;  %v909_v52 = vsel %vm131_vm2, %v6935_v8, 0.0  ;;  %v1705_v35 = vpop.permute.xlu2 %1704 }
 0x3a6   :  { %v6945_v23 = vpop.eup %5450  ;;  %v910_v40 = vsel %vm131_vm2, %v6941_v51, 0.0  ;;  %v1457_v45 = vadd.f32 %v1453_v39, %v1432_v14  ;;  %v1711_v44 = vmul.f32 %v6522_v2, %v1705_v35 }
 0x3a7   :  { %v6951_v17 = vpop.eup %5452  ;;  %v1210_v24 = vadd.f32 %v1209_v41, %v1208_v62  ;;  %v911_v34 = vadd.f32 %v910_v40, %v909_v52  ;;  %v912_v27 = vsel %vm131_vm2, %v6945_v23, 0.0 }
 0x3a8   :  { %v1461_v20 = vsel %vm131_vm2, %v1457_v45, -inf  ;;  %1641 = vadd.xlane.f32.xlu0 %v1640_v16  ;;  %v914_v32 = vsel %vm131_vm2, %v6951_v17, 0.0  ;;  %v10670_v16 = vmax.f32 %v6680_v42, %v6685_v15 }
 0x3a9   :  { %v1211_v19 = vrot.slane %v1210_v24, 4  ;;  %v913_v43 = vadd.f32 %v912_v27, %v911_v34  ;;  %v1463_v28 = vmax.f32 %v1460_v22, %v1461_v20 }
 0x3ab   :  { %v1212_v10 = vadd.f32 %v1211_v19, %v1210_v24  ;;  %v915_v63 = vadd.f32 %v914_v32, %v913_v43  ;;  %v1464_v7 = vmax.f32 %v10669_v18, %v1463_v28  ;;  %v10671_v32 = vld [vmem:[#allocation30_spill] sm:$0xff] }
 0x3ac   :  { %v1726_v49 = vpop.permute.xlu1 %1725 }
 0x3ad   :  { %v1213_v60 = vrot.slane %v1212_v10, 2  ;;  %v916_v56 = vrot.slane %v915_v63, 4  ;;  %v1465_v55 = vrot.slane %v1464_v7, 4  ;;  %v1732_v37 = vmul.f32 %v6527_v26, %v1726_v49 }
 0x3af   :  { %v1214_v0 = vadd.f32 %v1213_v60, %v1212_v10  ;;  %v917_v25 = vadd.f32 %v916_v56, %v915_v63  ;;  %v1466_v6 = vmax.f32 %v1464_v7, %v1465_v55  ;;  %v6967_v14 = vadd.f32 %v1732_v37, %v1711_v44  ;;  %v10672_v63 = vld [vmem:[#allocation44_spill] sm:$0xff] }
 0x3b1   :  { %v1215_v39 = vrot.slane %v1214_v0, 1  ;;  %v918_v62 = vrot.slane %v917_v25, 2  ;;  %v1467_v52 = vrot.slane %v1466_v6, 2  ;;  %v1740_v54 = vsel %vm131_vm2, %v6967_v14, -inf }
 0x3b2   :  { %v1742_v26 = vmax.f32 %v1739_v12, %v1740_v54 }
 0x3b3   :  { %v1216_v41 = vadd.f32 %v1215_v39, %v1214_v0  ;;  %v919_v40 = vadd.f32 %v918_v62, %v917_v25  ;;  %v1468_v24 = vmax.f32 %v1466_v6, %v1467_v52  ;;  %v10674_v39 = vld [vmem:[#allocation29_spill] sm:$0xff] }
 0x3b4   :  { %v1743_v22 = vmax.f32 %v10670_v16, %v1742_v26 }
 0x3b5   :  { %5454 = vrcp.f32 %v1216_v41  ;;  %v920_v2 = vrot.slane %v919_v40, 1  ;;  %v1469_v34 = vrot.slane %v1468_v24, 1 }
 0x3b6   :  { %v1063_v27 = vpop.xlane.xlu0 %1062  ;;  %v1744_v43 = vrot.slane %v1743_v22, 4 }
 0x3b7   :  { %v921_v20 = vadd.f32 %v920_v2, %v919_v40  ;;  %v1470_v19 = vmax.f32 %v1468_v24, %v1469_v34  ;;  %v1069_v28 = vsub.f32 %v6737_v5, %v1063_v27 }
 0x3b8   :  { %v1745_v49 = vmax.f32 %v1743_v22, %v1744_v43  ;;  %v10677_v22 = vld [vmem:[#allocation24_spill] sm:$0xff]  ;;  %v10679_v43 = vld [vmem:[#allocation47_spill] sm:$0xff] }
 0x3b9   :  { %5456 = vrcp.f32 %v921_v20  ;;  %v1471_v10 = vsub.f32 %v10671_v32, %v1470_v19  ;;  %v1472_v18 = vsub.f32 %v10672_v63, %v1470_v19  ;;  %v1473_v7 = vsub.f32 %v6786_v31, %v1470_v19  ;;  %v10673_v31 = vld [vmem:[#allocation25_spill] sm:$0xff]  ;;  %v10678_v20 = vld [vmem:[#allocation38_spill] sm:$0xff] }
 0x3ba   :  { %v1474_v35 = vsub.f32 %v1457_v45, %v1470_v19  ;;  %v6980_v15 = vmul.f32 1.442695, %v1069_v28  ;;  %v1746_v6 = vrot.slane %v1745_v49, 2  ;;  %v10680_v28 = vld [vmem:[#allocation49_spill] sm:$0xff] }
 0x3bb   :  { %v5455_v60 = vpop.eup %5454  ;;  %v1475_v56 = vmul.f32 1.442695, %v1471_v10  ;;  %v1477_v55 = vmul.f32 1.442695, %v1472_v18  ;;  %v1479_v0 = vmul.f32 1.442695, %v1473_v7 }
 0x3bc   :  { %v1218_v42 = vmul.f32 %v5455_v60, %v6921_v57  ;;  %v1219_v37 = vmul.f32 %v5455_v60, %v6923_v46  ;;  %v1220_v5 = vmul.f32 %v5455_v60, %v6929_v13  ;;  %v1221_v44 = vmul.f32 %v5455_v60, %v6933_v36  ;;  %v10675_v46 = vld [vmem:[#allocation27_spill] sm:$0xff]  ;;  %v10676_v13 = vld [vmem:[#allocation41_spill] sm:$0xff]  ;;  %v10682_v10 = vld [vmem:[#allocation40_spill] sm:$0xff] }
 0x3bd   :  { %5458 = vpow2.f32 %v1475_v56  ;;  %v1481_v25 = vmul.f32 1.442695, %v1474_v35  ;;  %v1747_v57 = vmax.f32 %v1745_v49, %v1746_v6  ;;  %v10683_v18 = vld [vmem:[#allocation39_spill] sm:$0xff] }
 0x3be   :  { %v1238_v45 = vmul.f32 %v10673_v31, %v1218_v42  ;;  %v1239_v62 = vmul.f32 %v10674_v39, %v1219_v37  ;;  %v1240_v52 = vmul.f32 %v6744_v58, %v1220_v5  ;;  %v1241_v12 = vmul.f32 %v6890_v50, %v1221_v44 }
 0x3bf   :  { %v5457_v54 = vpop.eup %5456  ;;  %5460 = vpow2.f32 %v1477_v55  ;;  %v1271_v41 = vmul.f32 %v10675_v46, %v1218_v42  ;;  %v1272_v40 = vmul.f32 %v10676_v13, %v1219_v37 }
 0x3c0   :  { %v923_v36 = vmul.f32 %v5457_v54, %v6935_v8  ;;  %v924_v24 = vmul.f32 %v5457_v54, %v6941_v51  ;;  %v925_v26 = vmul.f32 %v5457_v54, %v6945_v23  ;;  %v926_v2 = vmul.f32 %v5457_v54, %v6951_v17  ;;  %v10681_v23 = vld [vmem:[#allocation26_spill] sm:$0xff] }
 0x3c1   :  { %v1242_v34 = vsel %vm131_vm2, %v1238_v45, 0.0  ;;  %v1243_v58 = vsel %vm131_vm2, %v1239_v62, 0.0  ;;  %v1245_v50 = vsel %vm131_vm2, %v1240_v52, 0.0  ;;  %v1247_v16 = vsel %vm131_vm2, %v1241_v12, 0.0 }
 0x3c2   :  { %v947_v27 = vmul.f32 %v10677_v22, %v923_v36  ;;  %v948_v19 = vmul.f32 %v10678_v20, %v924_v24  ;;  %v949_v8 = vmul.f32 %v10679_v43, %v925_v26  ;;  %v950_v51 = vmul.f32 %v10680_v28, %v926_v2  ;;  %v10684_v22 = vld [vmem:[#allocation50_spill] sm:$0xff] }
 0x3c3   :  { %v7004_v32 = vpop.eup %5458  ;;  %v984_v17 = vmul.f32 %v10681_v23, %v923_v36  ;;  %v985_v63 = vmul.f32 %v10682_v10, %v924_v24  ;;  %v986_v7 = vmul.f32 %v10683_v18, %v925_v26  ;;  %v987_v35 = vmul.f32 %v6794_v53, %v926_v2  ;;  %v1269_v26 = vpop.permute.xlu1 %1268  ;;  %v10685_v10 = vld [vmem:[#allocation32_spill] sm:$0xff] }
 0x3c4   :  { %v951_v49 = vsel %vm131_vm2, %v947_v27, 0.0  ;;  %v952_v60 = vsel %vm131_vm2, %v948_v19, 0.0  ;;  %v954_v56 = vsel %vm131_vm2, %v949_v8, 0.0  ;;  %v956_v55 = vsel %vm131_vm2, %v950_v51, 0.0 }
 0x3c5   :  { %v7014_v42 = vpop.eup %5460  ;;  %v953_v37 = vadd.f32 %v952_v60, %v951_v49  ;;  %v988_v6 = vsel %vm131_vm2, %v984_v17, 0.0  ;;  %v989_v31 = vsel %vm131_vm2, %v985_v63, 0.0  ;;  %v991_v45 = vsel %vm131_vm2, %v986_v7, 0.0 }
 0x3c6   :  { %v990_v39 = vadd.f32 %v989_v31, %v988_v6  ;;  %v993_v53 = vsel %vm131_vm2, %v987_v35, 0.0  ;;  %v1244_v62 = vadd.f32 %v1243_v58, %v1242_v34  ;;  %5462 = vpow2.f32 %v1479_v0 }
 0x3c7   :  { %v955_v52 = vadd.f32 %v954_v56, %v953_v37  ;;  %5464 = vpow2.f32 %v1481_v25  ;;  %v1483_v12 = vsel %vm131_vm2, %v7004_v32, 0.0  ;;  %v1484_v54 = vsel %vm131_vm2, %v7014_v42, 0.0 }
 0x3c8   :  { %v992_v46 = vadd.f32 %v991_v45, %v990_v39  ;;  %v1246_v13 = vadd.f32 %v1245_v50, %v1244_v62  ;;  %v1485_v36 = vadd.f32 %v1484_v54, %v1483_v12  ;;  %v1748_v24 = vrot.slane %v1747_v57, 1  ;;  %v1342_v12 = vpop.xlane.xlu0 %1341 }
 0x3c9   :  { %v957_v2 = vadd.f32 %v956_v55, %v955_v52  ;;  %v1273_v27 = vmul.f32 %v10684_v22, %v1220_v5  ;;  %v1274_v20 = vmul.f32 %v1269_v26, %v1221_v44  ;;  %v1275_v34 = vsel %vm131_vm2, %v1271_v41, 0.0  ;;  %v10686_v44 = vld [vmem:[#allocation42_spill] sm:$0xff] }
 0x3ca   :  { %v994_v0 = vadd.f32 %v993_v53, %v992_v46  ;;  %v1248_v58 = vadd.f32 %v1247_v16, %v1246_v13  ;;  %v1749_v25 = vmax.f32 %v1747_v57, %v1748_v24  ;;  %v1276_v19 = vsel %vm131_vm2, %v1272_v40, 0.0 }
 0x3cb   :  { %v958_v43 = vrot.slane %v957_v2, 4  ;;  %v1277_v8 = vadd.f32 %v1276_v19, %v1275_v34  ;;  %v1278_v28 = vsel %vm131_vm2, %v1273_v27, 0.0  ;;  %v1280_v50 = vsel %vm131_vm2, %v1274_v20, 0.0 }
 0x3cc   :  { %v7029_v51 = vpop.eup %5462  ;;  %v995_v23 = vrot.slane %v994_v0, 4  ;;  %v1249_v17 = vrot.slane %v1248_v58, 4  ;;  %v1750_v5 = vsub.f32 %v10685_v10, %v1749_v25  ;;  %v1751_v63 = vsub.f32 %v10686_v44, %v1749_v25 }
 0x3cd   :  { %v7033_v41 = vpop.eup %5464  ;;  %v959_v16 = vadd.f32 %v958_v43, %v957_v2  ;;  %v1486_v57 = vsel %vm131_vm2, %v7029_v51, 0.0  ;;  %v1752_v40 = vsub.f32 %v6772_v21, %v1749_v25  ;;  %v1753_v18 = vsub.f32 %v6967_v14, %v1749_v25  ;;  %v10687_v2 = vld [vmem:[#allocation48_spill] sm:$0xff] }
 0x3ce   :  { %v996_v7 = vadd.f32 %v995_v23, %v994_v0  ;;  %v1250_v35 = vadd.f32 %v1249_v17, %v1248_v58  ;;  %v1487_v49 = vadd.f32 %v1486_v57, %v1485_v36  ;;  %v1488_v60 = vsel %vm131_vm2, %v7033_v41, 0.0 }
 0x3cf   :  { %v960_v56 = vrot.slane %v959_v16, 2  ;;  %v1754_v55 = vmul.f32 1.442695, %v1750_v5  ;;  %v1756_v37 = vmul.f32 1.442695, %v1751_v63  ;;  %v1279_v6 = vadd.f32 %v1278_v28, %v1277_v8 }
 0x3d0   :  { %v1251_v31 = vrot.slane %v1250_v35, 2  ;;  %v1489_v45 = vadd.f32 %v1488_v60, %v1487_v49  ;;  %v1758_v39 = vmul.f32 1.442695, %v1752_v40  ;;  %v1760_v53 = vmul.f32 1.442695, %v1753_v18 }
 0x3d1   :  { %v961_v62 = vadd.f32 %v960_v56, %v959_v16  ;;  %5466 = vpow2.f32 %v1754_v55  ;;  %v997_v52 = vrot.slane %v996_v7, 2  ;;  %v1281_v21 = vadd.f32 %v1280_v50, %v1279_v6 }
 0x3d2   :  { %v1252_v14 = vadd.f32 %v1251_v31, %v1250_v35  ;;  %v1490_v54 = vrot.slane %v1489_v45, 4  ;;  %5468 = vpow2.f32 %v1756_v37  ;;  %v1348_v22 = vsub.f32 %v10687_v2, %v1342_v12  ;;  %v10690_v2 = vld [vmem:[#allocation51_spill] sm:$0xff] }
 0x3d3   :  { %v962_v46 = vrot.slane %v961_v62, 1  ;;  %5470 = vpow2.f32 %v1758_v39  ;;  %v998_v13 = vadd.f32 %v997_v52, %v996_v7  ;;  %v1282_v36 = vrot.slane %v1281_v21, 4 }
 0x3d4   :  { %v1253_v24 = vrot.slane %v1252_v14, 1  ;;  %v1491_v26 = vadd.f32 %v1490_v54, %v1489_v45  ;;  %5472 = vpow2.f32 %v1760_v53  ;;  %v1354_v58 = vmul.f32 1.442695, %v1348_v22  ;;  %v1515_v45 = vpop.permute.xlu1 %1514 }
 0x3d5   :  { %v963_v27 = vadd.f32 %v962_v46, %v961_v62  ;;  %v1283_v20 = vadd.f32 %v1282_v36, %v1281_v21  ;;  %5474 = vpow2.f32 %v6980_v15  ;;  %v999_v19 = vrot.slane %v998_v13, 1 }
 0x3d6   :  { %v1254_v34 = vadd.f32 %v1253_v24, %v1252_v14  ;;  %v1492_v0 = vrot.slane %v1491_v26, 2  ;;  %5476 = vpow2.f32 %v1354_v58  ;;  %v10689_v24 = vld [vmem:[#allocation35_spill] sm:$0xff] }
 0x3d7   :  { %v7043_v25 = vpop.eup %5466  ;;  %v1284_v43 = vrot.slane %v1283_v20, 2  ;;  %v1000_v40 = vadd.f32 %v999_v19, %v998_v13  ;;  %v10688_v13 = vld [vmem:[#allocation31_spill] sm:$0xff] }
 0x3d8   :  { %v7045_v8 = vpop.eup %5468  ;;  %v7048_v28 = vsel %vm1970_vm12, %v963_v27, %v1254_v34  ;;  %v1493_v50 = vadd.f32 %v1492_v0, %v1491_v26  ;;  %v1762_v23 = vsel %vm131_vm2, %v7043_v25, 0.0 }
 0x3d9   :  { %v7052_v17 = vpop.eup %5470  ;;  %v1763_v15 = vsel %vm131_vm2, %v7045_v8, 0.0  ;;  %v1285_v10 = vadd.f32 %v1284_v43, %v1283_v20 }
 0x3da   :  { %v7056_v5 = vpop.eup %5472  ;;  %v1494_v44 = vrot.slane %v1493_v50, 1  ;;  %v1764_v63 = vadd.f32 %v1763_v15, %v1762_v23  ;;  %v1765_v57 = vsel %vm131_vm2, %v7052_v17, 0.0 }
 0x3db   :  { %v7058_v16 = vpop.eup %5474  ;;  %v1286_v18 = vrot.slane %v1285_v10, 1  ;;  %v1767_v60 = vsel %vm131_vm2, %v7056_v5, 0.0 }
 0x3dc   :  { %v1495_v7 = vadd.f32 %v1494_v44, %v1493_v50  ;;  %v1766_v35 = vadd.f32 %v1765_v57, %v1764_v63  ;;  %v1085_v49 = vsel %vm131_vm2, %v7058_v16, 0.0  ;;  %v7066_v37 = vpop.eup %5476  ;;  %v10693_v63 = vld [vmem:[#allocation52_spill] sm:$0xff] }
 0x3dd   :  { %v1287_v56 = vadd.f32 %v1286_v18, %v1285_v10  ;;  %1086 = vadd.xlane.f32.xlu0 %v1085_v49  ;;  %v1364_v53 = vsel %vm131_vm2, %v7066_v37, 0.0 }
 0x3de   :  { %5478 = vrcp.f32 %v1495_v7  ;;  %v1768_v55 = vadd.f32 %v1767_v60, %v1766_v35 }
 0x3df   :  { %v7069_v6 = vsel %vm1970_vm12, %v1000_v40, %v1287_v56 }
 0x3e0   :  { %v1769_v31 = vrot.slane %v1768_v55, 4 }
 0x3e2   :  { %v1770_v39 = vadd.f32 %v1769_v31, %v1768_v55 }
 0x3e4   :  { %v5479_v62 = vpop.eup %5478  ;;  %v1771_v52 = vrot.slane %v1770_v39, 2 }
 0x3e5   :  { %v1497_v21 = vmul.f32 %v5479_v62, %v7004_v32  ;;  %v1498_v12 = vmul.f32 %v5479_v62, %v7014_v42  ;;  %v1499_v14 = vmul.f32 %v5479_v62, %v7029_v51  ;;  %v7077_v54 = vmul.f32 %v5479_v62, %v7033_v41  ;;  %1365 = vadd.xlane.f32.xlu0 %v1364_v53  ;;  %v10691_v42 = vld [vmem:[#allocation33_spill] sm:$0xff] }
 0x3e6   :  { %v1772_v46 = vadd.f32 %v1771_v52, %v1770_v39  ;;  %v10692_v51 = vld [vmem:[#allocation45_spill] sm:$0xff] }
 0x3e7   :  { %v1517_v36 = vmul.f32 %v10688_v13, %v1497_v21  ;;  %v1518_v26 = vmul.f32 %v10689_v24, %v1498_v12  ;;  %v1519_v22 = vmul.f32 %v10690_v2, %v1499_v14  ;;  %v1520_v27 = vmul.f32 %v1515_v45, %v7077_v54  ;;  %v1615_v20 = vpop.xlane.xlu2 %1614  ;;  %v10694_v45 = vld [vmem:[#allocation53_spill] sm:$0xff] }
 0x3e8   :  { %v1773_v34 = vrot.slane %v1772_v46, 1  ;;  %v1625_v32 = vsub.f32 %v6796_v47, %v1615_v20  ;;  %v1550_v0 = vmul.f32 %v10691_v42, %v1497_v21  ;;  %v1551_v58 = vmul.f32 %v10692_v51, %v1498_v12  ;;  %v10698_v42 = vld [vmem:[#allocation34_spill] sm:$0xff] }
 0x3e9   :  { %v1521_v41 = vsel %vm131_vm2, %v1517_v36, 0.0  ;;  %v1522_v19 = vsel %vm131_vm2, %v1518_v26, 0.0  ;;  %v1057_v43 = vpop.xlane.xlu1 %1056  ;;  %v1524_v44 = vsel %vm131_vm2, %v1519_v22, 0.0  ;;  %v1552_v57 = vmul.f32 %v10693_v63, %v1499_v14  ;;  %v10699_v51 = vld [vmem:[#allocation46_spill] sm:$0xff] }
 0x3ea   :  { %v1774_v50 = vadd.f32 %v1773_v34, %v1772_v46  ;;  %v1523_v23 = vadd.f32 %v1522_v19, %v1521_v41  ;;  %v1629_v15 = vmul.f32 1.442695, %v1625_v32  ;;  %v1067_v10 = vsub.f32 %v6802_v29, %v1057_v43 }
 0x3eb   :  { %v1554_v47 = vsel %vm131_vm2, %v1550_v0, 0.0  ;;  %v1555_v40 = vsel %vm131_vm2, %v1551_v58, 0.0  ;;  %v1526_v49 = vsel %vm131_vm2, %v1520_v27, 0.0  ;;  %v1557_v60 = vsel %vm131_vm2, %v1552_v57, 0.0 }
 0x3ec   :  { %5480 = vrcp.f32 %v1774_v50  ;;  %v1525_v18 = vadd.f32 %v1524_v44, %v1523_v23  ;;  %v1071_v7 = vmul.f32 1.442695, %v1067_v10  ;;  %v1556_v35 = vadd.f32 %v1555_v40, %v1554_v47  ;;  %v10700_v50 = vld [vmem:[#allocation54_spill] sm:$0xff] }
 0x3ed   :  { %5482 = vpow2.f32 %v1629_v15 }
 0x3ee   :  { %v1527_v56 = vadd.f32 %v1526_v49, %v1525_v18  ;;  %5484 = vpow2.f32 %v1071_v7  ;;  %v7095_v29 = vadd.f32 %v1557_v60, %v1556_v35 }
 0x3ef   :  { %v1060_v55 = vpop.xlane.xlu2 %1059 }
 0x3f0   :  { %v1528_v31 = vrot.slane %v1527_v56, 4  ;;  %v1068_v39 = vsub.f32 %v10694_v45, %v1060_v55 }
 0x3f1   :  { %v1336_v53 = vpop.xlane.xlu1 %1335 }
 0x3f2   :  { %v5481_v62 = vpop.eup %5480  ;;  %v1529_v52 = vadd.f32 %v1528_v31, %v1527_v56  ;;  %v1073_v21 = vmul.f32 1.442695, %v1068_v39  ;;  %v1346_v12 = vsub.f32 %v6818_v30, %v1336_v53 }
 0x3f3   :  { %v7099_v14 = vpop.eup %5482  ;;  %v1776_v46 = vmul.f32 %v5481_v62, %v7043_v25  ;;  %v1777_v13 = vmul.f32 %v5481_v62, %v7045_v8  ;;  %v1778_v36 = vmul.f32 %v5481_v62, %v7052_v17  ;;  %v7105_v24 = vmul.f32 %v5481_v62, %v7056_v5  ;;  %v10695_v25 = vld [vmem:[#allocation36_spill] sm:$0xff]  ;;  %v10696_v8 = vld [vmem:[#allocation37_spill] sm:$0xff]  ;;  %v10697_v17 = vld [vmem:[#allocation43_spill] sm:$0xff] }
 0x3f4   :  { %v7107_v26 = vpop.eup %5484  ;;  %v1530_v2 = vrot.slane %v1529_v52, 2  ;;  %5486 = vpow2.f32 %v1073_v21  ;;  %v1350_v22 = vmul.f32 1.442695, %v1346_v12  ;;  %v1637_v27 = vsel %vm131_vm2, %v7099_v14, 0.0 }
 0x3f5   :  { %1638 = vadd.xlane.f32.xlu2 %v1637_v27  ;;  %v1079_v30 = vsel %vm131_vm2, %v7107_v26, 0.0  ;;  %v1829_v20 = vmul.f32 %v10695_v25, %v1776_v46  ;;  %v1830_v34 = vmul.f32 %v10696_v8, %v1777_v13  ;;  %v1831_v32 = vmul.f32 %v10697_v17, %v1778_v36 }
 0x3f6   :  { %v1531_v5 = vadd.f32 %v1530_v2, %v1529_v52  ;;  %5488 = vpow2.f32 %v1350_v22  ;;  %1080 = vadd.xlane.f32.xlu1 %v1079_v30  ;;  %v1796_v0 = vmul.f32 %v10698_v42, %v1776_v46  ;;  %v1797_v58 = vmul.f32 %v10699_v51, %v1777_v13 }
 0x3f7   :  { %v1339_v41 = vpop.xlane.xlu2 %1338  ;;  %v1833_v19 = vsel %vm131_vm2, %v1829_v20, 0.0  ;;  %v1834_v43 = vsel %vm131_vm2, %v1830_v34, 0.0  ;;  %v1798_v23 = vmul.f32 %v10700_v50, %v1778_v36  ;;  %v1836_v47 = vsel %vm131_vm2, %v1831_v32, 0.0 }
 0x3f8   :  { %v1532_v15 = vrot.slane %v1531_v5, 1  ;;  %v1347_v10 = vsub.f32 %v6834_v4, %v1339_v41  ;;  %v1835_v44 = vadd.f32 %v1834_v43, %v1833_v19  ;;  %v1800_v63 = vsel %vm131_vm2, %v1796_v0, 0.0 }
 0x3f9   :  { %v1897_v57 = vpop.xlane.xlu1 %1896  ;;  %v1801_v40 = vsel %vm131_vm2, %v1797_v58, 0.0  ;;  %v1803_v39 = vsel %vm131_vm2, %v1798_v23, 0.0 }
 0x3fa   :  { %v7125_v18 = vpop.eup %5486  ;;  %v1533_v7 = vadd.f32 %v1532_v15, %v1531_v5  ;;  %v1352_v35 = vmul.f32 1.442695, %v1347_v10  ;;  %v1905_v49 = vsub.f32 %v6838_v9, %v1897_v57  ;;  %v7128_v60 = vadd.f32 %v1836_v47, %v1835_v44  ;;  %v10702_v10 = vld [vmem:[#allocation8_spill] sm:$0xff]  ;;  %v10704_v57 = vld [vmem:[#allocation9_spill] sm:$0xff] }
 0x3fb   :  { %v1082_v4 = vsel %vm131_vm2, %v7125_v18, 0.0  ;;  %v1802_v56 = vadd.f32 %v1801_v40, %v1800_v63  ;;  %v10703_v63 = vld [vmem:[#allocation22_spill] sm:$0xff] }
 0x3fc   :  { %v7132_v55 = vpop.eup %5488  ;;  %v7136_v31 = vsel %vm1972_vm13, %v7048_v28, %v1533_v7  ;;  %5490 = vpow2.f32 %v1352_v35  ;;  %v1910_v45 = vmul.f32 1.442695, %v1905_v49  ;;  %v719_v47 = vmul.f32 %v10704_v57, %v10703_v63 }
 0x3fd   :  { %1083 = vadd.xlane.f32.xlu2 %v1082_v4  ;;  %v1358_v9 = vsel %vm131_vm2, %v7132_v55, 0.0  ;;  %v7141_v53 = vadd.f32 %v1803_v39, %v1802_v56  ;;  %v10705_v4 = vld [vmem:[#allocation12_spill] sm:$0xff] }
 0x3fe   :  { %5492 = vpow2.f32 %v1910_v45  ;;  %1359 = vadd.xlane.f32.xlu1 %v1358_v9 }
 0x3ff   :  { %v1900_v62 = vpop.xlane.xlu2 %1899 }
 0x400   :  { %v1906_v52 = vsub.f32 %v6860_v59, %v1900_v62 }
 0x401   :  { %v1621_v21 = vpop.xlane.xlu1 %1620 }
 0x402   :  { %v7144_v12 = vpop.eup %5490  ;;  %v1912_v28 = vmul.f32 1.442695, %v1906_v52  ;;  %v1627_v46 = vsub.f32 %v6869_v1, %v1621_v21 }
 0x403   :  { %v1361_v13 = vsel %vm131_vm2, %v7144_v12, 0.0 }
 0x404   :  { %v7149_v36 = vpop.eup %5492  ;;  %5494 = vpow2.f32 %v1912_v28  ;;  %v1633_v2 = vmul.f32 1.442695, %v1627_v46 }
 0x405   :  { %1362 = vadd.xlane.f32.xlu2 %v1361_v13  ;;  %v1919_v22 = vsel %vm131_vm2, %v7149_v36, 0.0  ;;  %v10706_v13 = vld [vmem:[#allocation23_spill] sm:$0xff] }
 0x406   :  { %5496 = vpow2.f32 %v1633_v2  ;;  %1920 = vadd.xlane.f32.xlu1 %v1919_v22  ;;  %v7191_v2 = vperm.slane %v10706_v13, 0 }
 0x407   :  { %v1066_v59 = vpop.xlane.xlu2 %1065 }
 0x408   :  { %v1070_v27 = vsub.f32 %v6882_v33, %v1066_v59 }
 0x40a   :  { %v7154_v30 = vpop.eup %5494  ;;  %v1077_v25 = vmul.f32 1.442695, %v1070_v27 }
 0x40b   :  { %v1903_v1 = vpop.xlane.xlu0 %1902  ;;  %v1922_v20 = vsel %vm131_vm2, %v7154_v30, 0.0 }
 0x40c   :  { %v7158_v8 = vpop.eup %5496  ;;  %5498 = vpow2.f32 %v1077_v25  ;;  %v1907_v34 = vsub.f32 %v6894_v3, %v1903_v1 }
 0x40d   :  { %1923 = vadd.xlane.f32.xlu2 %v1922_v20  ;;  %v1643_v17 = vsel %vm131_vm2, %v7158_v8, 0.0 }
 0x40e   :  { %v1914_v32 = vmul.f32 1.442695, %v1907_v34  ;;  %1644 = vadd.xlane.f32.xlu1 %v1643_v17  ;;  %v7203_v34 = vperm.slane %v10706_v13, 3 }
 0x40f   :  { %v1624_v5 = vpop.xlane.xlu2 %1623 }
 0x410   :  { %5500 = vpow2.f32 %v1914_v32  ;;  %v1628_v33 = vsub.f32 %v6902_v48, %v1624_v5 }
 0x412   :  { %v7164_v42 = vpop.eup %5498  ;;  %v1635_v0 = vmul.f32 1.442695, %v1628_v33 }
 0x413   :  { %v1088_v58 = vsel %vm131_vm2, %v7164_v42, 0.0  ;;  %v1918_v40 = vpop.xlane.xlu0 %1917 }
 0x414   :  { %5502 = vpow2.f32 %v1635_v0 }
 0x415   :  { %v1345_v51 = vpop.xlane.xlu1 %1344 }
 0x416   :  { %v7168_v41 = vpop.eup %5500  ;;  %v1349_v3 = vsub.f32 %v6919_v11, %v1345_v51  ;;  %1089 = vadd.xlane.f32.xlu1 %v1088_v58  ;;  %v10701_v11 = vld [vmem:[#allocation21_spill] sm:$0xff] }
 0x417   :  { %v1925_v19 = vsel %vm131_vm2, %v7168_v41, 0.0  ;;  %v716_v44 = vmul.f32 %v10702_v10, %v10701_v11 }
 0x418   :  { %v1356_v43 = vmul.f32 1.442695, %v1349_v3  ;;  %1926 = vadd.xlane.f32.xlu0 %v1925_v19 }
 0x419   :  { %v720_v35 = vadd.f32 %v719_v47, %v716_v44  ;;  %v7221_v44 = vperm.slane %v10706_v13, 2 }
 0x41a   :  { %v7173_v50 = vpop.eup %5502  ;;  %5504 = vpow2.f32 %v1356_v43 }
 0x41b   :  { %v1646_v48 = vsel %vm131_vm2, %v7173_v50, 0.0  ;;  %v723_v56 = vadd.f32 %v10705_v4, %v720_v35  ;;  %v1642_v0 = vpop.xlane.xlu0 %1641 }
 0x41c   :  { %1647 = vadd.xlane.f32.xlu2 %v1646_v48 }
 0x41d   :  { %v7187_v52 = vperm.slane %v723_v56, 2  ;;  %v7193_v22 = vperm.slane %v723_v56, 0  ;;  %v7210_v58 = vperm.slane %v723_v56, 1  ;;  %v7218_v10 = vperm.slane %v723_v56, 3 }
 0x420   :  { %v7177_v23 = vpop.eup %5504 }
 0x421   :  { %v1367_v15 = vsel %vm131_vm2, %v7177_v23, 0.0 }
 0x422   :  { %1368 = vadd.xlane.f32.xlu1 %v1367_v15 }
 0x468   :  { %v1639_v7 = vpop.xlane.xlu2 %1638 }
 0x469   :  { %5506 = vrcp.f32 %v1639_v7  ;;  %v1081_v49 = vpop.xlane.xlu1 %1080 }
 0x46a   :  { %5508 = vrcp.f32 %v1081_v49 }
 0x46b   :  { %5510 = vrcp.f32 %v1918_v40 }
 0x46f   :  { %v5507_v45 = vpop.eup %5506 }
 0x470   :  { %v5509_v39 = vpop.eup %5508  ;;  %v1084_v9 = vpop.xlane.xlu2 %1083  ;;  %v1653_v62 = vmul.f32 %v5507_v45, %v7099_v14 }
 0x471   :  { %v5511_v21 = vpop.eup %5510  ;;  %v1360_v28 = vpop.xlane.xlu1 %1359  ;;  %v1095_v46 = vmul.f32 %v5509_v39, %v7107_v26 }
 0x472   :  { %5512 = vrcp.f32 %v1360_v28  ;;  %v1658_v59 = vmul.f32 %v7187_v52, %v1653_v62  ;;  %v1932_v1 = vmul.f32 %v5511_v21, %v6908_v61  ;;  %v7208_v61 = vperm.slane %v10706_v13, 1 }
 0x473   :  { %5514 = vrcp.f32 %v1084_v9  ;;  %v1117_v27 = vmul.f32 %v7191_v2, %v1095_v46  ;;  %v1100_v25 = vmul.f32 %v7193_v22, %v1095_v46  ;;  %v1087_v9 = vpop.xlane.xlu0 %1086 }
 0x474   :  { %v1662_v14 = vsel %vm131_vm2, %v1658_v59, 0.0  ;;  %v1954_v5 = vmul.f32 %v7203_v34, %v1932_v1  ;;  %v1937_v7 = vmul.f32 %v7218_v10, %v1932_v1 }
 0x475   :  { %1663 = vadd.xlane.f32.xlu1 %v1662_v14  ;;  %v1121_v26 = vsel %vm131_vm2, %v1117_v27, 0.0  ;;  %v1104_v20 = vsel %vm131_vm2, %v1100_v25, 0.0 }
 0x476   :  { %1122 = vadd.xlane.f32.xlu0 %v1121_v26  ;;  %1105 = vadd.xlane.f32.xlu2 %v1104_v20  ;;  %v1958_v43 = vsel %vm131_vm2, %v1954_v5, 0.0  ;;  %v1941_v56 = vsel %vm131_vm2, %v1937_v7, 0.0 }
 0x478   :  { %v5513_v17 = vpop.eup %5512  ;;  %v1363_v32 = vpop.xlane.xlu2 %1362 }
 0x479   :  { %v5515_v33 = vpop.eup %5514  ;;  %v1374_v51 = vmul.f32 %v5513_v17, %v7132_v55  ;;  %5516 = vrcp.f32 %v1363_v32  ;;  %v1921_v57 = vpop.xlane.xlu1 %1920 }
 0x47a   :  { %5518 = vrcp.f32 %v1642_v0  ;;  %v1096_v48 = vmul.f32 %v5515_v33, %v7125_v18  ;;  %v1675_v18 = vmul.f32 %v7221_v44, %v1653_v62 }
 0x47b   :  { %v1396_v3 = vmul.f32 %v7208_v61, %v1374_v51  ;;  %v1379_v19 = vmul.f32 %v7210_v58, %v1374_v51  ;;  %5520 = vrcp.f32 %v1921_v57  ;;  %v1366_v27 = vpop.xlane.xlu0 %1365 }
 0x47c   :  { %v1118_v47 = vmul.f32 %v7191_v2, %v1096_v48  ;;  %v1679_v45 = vsel %vm131_vm2, %v1675_v18, 0.0  ;;  %v1101_v62 = vmul.f32 %v7193_v22, %v1096_v48  ;;  %5522 = vrcp.f32 %v1087_v9 }
 0x47d   :  { %1959 = vadd.xlane.f32.xlu1 %v1958_v43  ;;  %v1400_v15 = vsel %vm131_vm2, %v1396_v3, 0.0  ;;  %v1383_v55 = vsel %vm131_vm2, %v1379_v19, 0.0  ;;  %5524 = vrcp.f32 %v1366_v27 }
 0x47e   :  { %1401 = vadd.xlane.f32.xlu0 %v1400_v15  ;;  %1384 = vadd.xlane.f32.xlu2 %v1383_v55  ;;  %v1124_v49 = vsel %vm131_vm2, %v1118_v47, 0.0  ;;  %v1107_v59 = vsel %vm131_vm2, %v1101_v62, 0.0 }
 0x47f   :  { %v5517_v40 = vpop.eup %5516 }
 0x480   :  { %v5519_v35 = vpop.eup %5518  ;;  %v1375_v4 = vmul.f32 %v5517_v40, %v7144_v12  ;;  %v1924_v33 = vpop.xlane.xlu2 %1923 }
 0x481   :  { %v1654_v39 = vmul.f32 %v5519_v35, %v6915_v38  ;;  %v5521_v28 = vpop.eup %5520  ;;  %v1645_v1 = vpop.xlane.xlu1 %1644 }
 0x482   :  { %v1397_v21 = vmul.f32 %v7208_v61, %v1375_v4  ;;  %v1933_v13 = vmul.f32 %v5521_v28, %v7149_v36  ;;  %v5523_v14 = vpop.eup %5522  ;;  %v1380_v26 = vmul.f32 %v7210_v58, %v1375_v4  ;;  %5526 = vrcp.f32 %v1645_v1 }
 0x483   :  { %v1659_v46 = vmul.f32 %v7187_v52, %v1654_v39  ;;  %v1097_v17 = vmul.f32 %v5523_v14, %v7058_v16  ;;  %v5525_v51 = vpop.eup %5524  ;;  %v1676_v3 = vmul.f32 %v7221_v44, %v1654_v39  ;;  %5528 = vrcp.f32 %v1924_v33 }
 0x484   :  { %v1403_v12 = vsel %vm131_vm2, %v1397_v21, 0.0  ;;  %v1938_v25 = vmul.f32 %v7218_v10, %v1933_v13  ;;  %v1955_v20 = vmul.f32 %v7203_v34, %v1933_v13  ;;  %v1386_v32 = vsel %vm131_vm2, %v1380_v26, 0.0 }
 0x485   :  { %1125 = vadd.xlane.f32.xlu1 %v1124_v49  ;;  %v1665_v38 = vsel %vm131_vm2, %v1659_v46, 0.0  ;;  %v1102_v0 = vmul.f32 %v7193_v22, %v1097_v17  ;;  %v1119_v19 = vmul.f32 %v7191_v2, %v1097_v17  ;;  %v1376_v16 = vmul.f32 %v5525_v51, %v7066_v37 }
 0x486   :  { %1942 = vadd.xlane.f32.xlu0 %v1941_v56  ;;  %1680 = vadd.xlane.f32.xlu2 %v1679_v45  ;;  %v1944_v36 = vsel %vm131_vm2, %v1938_v25, 0.0  ;;  %v1961_v5 = vsel %vm131_vm2, %v1955_v20, 0.0  ;;  %v1682_v15 = vsel %vm131_vm2, %v1676_v3, 0.0  ;;  %v10709_v51 = vmov 0  }
 0x487   :  { %v1110_v48 = vsel %vm131_vm2, %v1102_v0, 0.0  ;;  %v1127_v55 = vsel %vm131_vm2, %v1119_v19, 0.0  ;;  %v1381_v40 = vmul.f32 %v7210_v58, %v1376_v16  ;;  %v1398_v18 = vmul.f32 %v7208_v61, %v1376_v16 }
 0x488   :  { %v5527_v43 = vpop.eup %5526 }
 0x489   :  { %v1655_v57 = vmul.f32 %v5527_v43, %v7158_v8  ;;  %v1090_v7 = vpop.xlane.xlu1 %1089  ;;  %v5529_v49 = vpop.eup %5528  ;;  %v1389_v37 = vsel %vm131_vm2, %v1381_v40, 0.0  ;;  %v1406_v4 = vsel %vm131_vm2, %v1398_v18, 0.0  ;;  %v7305_v18 = vstv %s5010_s29  ;;  %s7371_s29 = sld [smem:[#allocation2 + $0x43]] }
 0x48a   :  { %v1934_v56 = vmul.f32 %v5529_v49, %v7154_v30 }
 0x48b   :  { %v1660_v35 = vmul.f32 %v7187_v52, %v1655_v57  ;;  %v1927_v45 = vpop.xlane.xlu0 %1926  ;;  %v1677_v39 = vmul.f32 %v7221_v44, %v1655_v57  ;;  %v7299_v57 = vstv %s5012_s8  ;;  %s7369_s8 = sld [smem:[#allocation2 + $0x33]] }
 0x48c   :  { %v1939_v28 = vmul.f32 %v7218_v10, %v1934_v56  ;;  %v1956_v62 = vmul.f32 %v7203_v34, %v1934_v56 }
 0x48d   :  { %1404 = vadd.xlane.f32.xlu1 %v1403_v12  ;;  %v1668_v8 = vsel %vm131_vm2, %v1660_v35, 0.0  ;;  %v1685_v12 = vsel %vm131_vm2, %v1677_v39, 0.0  ;;  %v7307_v35 = vstv %s5013_s4  ;;  %s7373_s4 = sld [smem:[#allocation2 + $0x53]] }
 0x48e   :  { %1108 = vadd.xlane.f32.xlu0 %v1107_v59  ;;  %1666 = vadd.xlane.f32.xlu2 %v1665_v38  ;;  %v1947_v30 = vsel %vm131_vm2, %v1939_v28, 0.0  ;;  %v1964_v59 = vsel %vm131_vm2, %v1956_v62, 0.0  ;;  %v7326_v28 = vstv %s5014_s3  ;;  %s7378_s3 = sld [smem:[#allocation2 + $0x24]] }
 0x48f   :  { %v1648_v47 = vpop.xlane.xlu2 %1647 }
 0x490   :  { %5530 = vrcp.f32 %v1648_v47 }
 0x491   :  { %5532 = vrcp.f32 %v1090_v7 }
 0x492   :  { %5534 = vrcp.f32 %v1927_v45 }
 0x495   :  { %1945 = vadd.xlane.f32.xlu1 %v1944_v36  ;;  %v1369_v21 = vpop.xlane.xlu1 %1368 }
 0x496   :  { %1387 = vadd.xlane.f32.xlu0 %v1386_v32  ;;  %1962 = vadd.xlane.f32.xlu2 %v1961_v5  ;;  %v5531_v9 = vpop.eup %5530  ;;  %5536 = vrcp.f32 %v1369_v21  ;;  %v7324_v21 = vstv %s5011_s7  ;;  %s7376_s7 = sld [smem:[#allocation2 + $0x63]] }
 0x497   :  { %v5533_v46 = vpop.eup %5532  ;;  %v1656_v13 = vmul.f32 %v5531_v9, %v7173_v50 }
 0x498   :  { %v1098_v38 = vmul.f32 %v5533_v46, %v7164_v42  ;;  %v5535_v25 = vpop.eup %5534 }
 0x499   :  { %v1661_v27 = vmul.f32 %v7187_v52, %v1656_v13  ;;  %v1935_v50 = vmul.f32 %v5535_v25, %v7168_v41 }
 0x49a   :  { %v1120_v14 = vmul.f32 %v7191_v2, %v1098_v38  ;;  %v1103_v1 = vmul.f32 %v7193_v22, %v1098_v38 }
 0x49b   :  { %v1671_v20 = vsel %vm131_vm2, %v1661_v27, 0.0  ;;  %v1957_v52 = vmul.f32 %v7203_v34, %v1935_v50  ;;  %v1940_v33 = vmul.f32 %v7218_v10, %v1935_v50  ;;  %v10710_v27 = vld [vmem:[#allocation10_spill] sm:$0xff] }
 0x49c   :  { %v5537_v26 = vpop.eup %5536  ;;  %v1130_v36 = vsel %vm131_vm2, %v1120_v14, 0.0  ;;  %v1113_v17 = vsel %vm131_vm2, %v1103_v1, 0.0  ;;  %v10711_v14 = vld [vmem:[#allocation11_spill] sm:$0xff]  ;;  %10712 = sst [smem:[#allocation55_spill]] %s7376_s7 }
 0x49d   :  { %1111 = vadd.xlane.f32.xlu1 %v1110_v48  ;;  %v1377_v42 = vmul.f32 %v5537_v26, %v7177_v23  ;;  %v1967_v32 = vsel %vm131_vm2, %v1957_v52, 0.0  ;;  %v1678_v23 = vmul.f32 %v7221_v44, %v1656_v13  ;;  %v1950_v0 = vsel %vm131_vm2, %v1940_v33, 0.0  ;;  %s7419_s7 = sld [smem:[#allocation2 + $0x66]] }
 0x49e   :  { %1683 = vadd.xlane.f32.xlu0 %v1682_v15  ;;  %1128 = vadd.xlane.f32.xlu2 %v1127_v55  ;;  %v7297_v55 = vstv %s5009_s9  ;;  %s7366_s9 = sld [smem:[#allocation2 + $0x23]] }
 0x49f   :  { %v1399_v2 = vmul.f32 %v7208_v61, %v1377_v42  ;;  %v1382_v22 = vmul.f32 %v7210_v58, %v1377_v42  ;;  %v1688_v34 = vsel %vm131_vm2, %v1678_v23, 0.0  ;;  %v10707_v61 = vld [vmem:[#allocation19_spill] sm:$0xff]  ;;  %v10708_v58 = vld [vmem:[#allocation28_spill] sm:$0xff] }
 0x4a1   :  { %v1409_v41 = vsel %vm131_vm2, %v1399_v2, 0.0  ;;  %v1392_v5 = vsel %vm131_vm2, %v1382_v22, 0.0 }
 0x4a3   :  { %10725 = sst [smem:[#allocation66_spill]] %s7419_s7 }
 0x4a4   :  { %s7467_s7 = sld [smem:[#allocation2 + $0x68]] }
 0x4a5   :  { %1390 = vadd.xlane.f32.xlu1 %v1389_v37 }
 0x4a6   :  { %1407 = vadd.xlane.f32.xlu2 %v1406_v4  ;;  %1669 = vadd.xlane.f32.xlu0 %v1668_v8 }
 0x4ad   :  { %1686 = vadd.xlane.f32.xlu1 %v1685_v12 }
 0x4ae   :  { %1948 = vadd.xlane.f32.xlu2 %v1947_v30  ;;  %1965 = vadd.xlane.f32.xlu0 %v1964_v59 }
 0x4b5   :  { %1672 = vadd.xlane.f32.xlu1 %v1671_v20 }
 0x4b6   :  { %1131 = vadd.xlane.f32.xlu0 %v1130_v36  ;;  %1114 = vadd.xlane.f32.xlu2 %v1113_v17 }
 0x4bd   :  { %1968 = vadd.xlane.f32.xlu1 %v1967_v32 }
 0x4be   :  { %1410 = vadd.xlane.f32.xlu0 %v1409_v41  ;;  %1393 = vadd.xlane.f32.xlu2 %v1392_v5 }
 0x4c6   :  { %1951 = vadd.xlane.f32.xlu0 %v1950_v0  ;;  %1689 = vadd.xlane.f32.xlu2 %v1688_v34 }
 0x4d6   :  { %1826 = vperm.xlu1 %5328, %v10707_v61  }
 0x4da   :  { %1793 = vperm.xlu0 %5321, %v10708_v58  }
 0x4de   :  { %1547 = vperm.xlu2 %5327, %v10707_v61   ;;  %5330 = vset.pattern.permute.xlu1 %v10709_v51 }
 0x4e2   :  { %5340 = vset.pattern.permute.xlu0 %v10709_v51 }
 0x4e6   :  { %5329 = vset.pattern.permute.xlu2 %v10709_v51 }
 0x4e8   :  { %v1664_v10 = vpop.xlane.xlu1 %1663 }
 0x4e9   :  { %v1123_v44 = vpop.xlane.xlu0 %1122  ;;  %v1106_v3 = vpop.xlane.xlu2 %1105 }
 0x4f0   :  { %v1960_v19 = vpop.xlane.xlu1 %1959 }
 0x4f1   :  { %v1402_v43 = vpop.xlane.xlu0 %1401  ;;  %v1385_v48 = vpop.xlane.xlu2 %1384 }
 0x4f2   :  { %v2380_v16 = vsel %vm2379_vm14, %v1106_v3, %v1385_v48  ;;  %v2394_v47 = vsel %vm2379_vm14, %v1123_v44, %v1402_v43 }
 0x4f3   :  { %v2385_v7 = vsel %vm2384_vm15, %v2380_v16, %v1664_v10 }
 0x4f8   :  { %v7295_v15 = vpop.xlane.xlu1 %1125 }
 0x4f9   :  { %v1943_v40 = vpop.xlane.xlu0 %1942  ;;  %v1681_v49 = vpop.xlane.xlu2 %1680 }
 0x4fa   :  { %v2390_v37 = vsel %vm2389_vm0, %v2385_v7, %v1943_v40  ;;  %v2398_v4 = vsel %vm2384_vm15, %v2394_v47, %v1681_v49 }
 0x4fb   :  { %v2406_v8 = vmul.f32 %v2390_v37, %v7297_v55  ;;  %v2422_v56 = vmul.f32 %v2390_v37, %v7299_v57  ;;  %v2402_v45 = vsel %vm2389_vm0, %v2398_v4, %v1960_v19 }
 0x4fc   :  { %v2410_v39 = vmul.f32 %v2402_v45, %v7305_v18  ;;  %v2426_v9 = vmul.f32 %v2402_v45, %v7307_v35  ;;  %v10722_v45 = vld [vmem:[#allocation13_spill] sm:$0xff] }
 0x4fe   :  { %v2414_v62 = vadd.f32 %v2410_v39, %v2406_v8  ;;  %v2430_v46 = vadd.f32 %v2426_v9, %v2422_v56  ;;  %v10723_v9 = vld [vmem:[#allocation14_spill] sm:$0xff] }
 0x500   :  { %v2418_v12 = vadd.f32 %v2414_v62, %v7324_v21  ;;  %v2434_v13 = vadd.f32 %v2430_v46, %v7326_v28  ;;  %v1405_v30 = vpop.xlane.xlu1 %1404 }
 0x501   :  { %v1109_v59 = vpop.xlane.xlu0 %1108  ;;  %v1667_v38 = vpop.xlane.xlu2 %1666  ;;  %v2395_v34 = vsel %vm2379_vm14, %v7295_v15, %v1405_v30 }
 0x502   :  { %v2438_v25 = vadd.f32 %v2418_v12, %v10710_v27  ;;  %v2442_v1 = vadd.f32 %v2434_v13, %v10711_v14 }
 0x504   :  { %v2446_v26 = vadd.f32 %v2442_v1, %v2438_v25 }
 0x506   :  { %v2450_v20 = vmul.f32 0.5, %v2446_v26 }
 0x508   :  { %v7354_v50 = vsub.f32 %v2438_v25, %v2450_v20  ;;  %v7356_v36 = vsub.f32 %v2442_v1, %v2450_v20  ;;  %v1946_v17 = vpop.xlane.xlu1 %1945 }
 0x509   :  { %v1388_v42 = vpop.xlane.xlu0 %1387  ;;  %v1963_v52 = vpop.xlane.xlu2 %1962 }
 0x50a   :  { %v2462_v2 = vmul.f32 %v7354_v50, %v7354_v50  ;;  %v2466_v22 = vmul.f32 %v7356_v36, %v7356_v36  ;;  %v2381_v32 = vsel %vm2379_vm14, %v1109_v59, %v1388_v42 }
 0x50b   :  { %v2386_v33 = vsel %vm2384_vm15, %v2381_v32, %v1667_v38 }
 0x50c   :  { %v2470_v41 = vadd.f32 %v2466_v22, %v2462_v2  ;;  %v2391_v61 = vsel %vm2389_vm0, %v2386_v33, %v1946_v17 }
 0x50d   :  { %v2407_v19 = vmul.f32 %v2391_v61, %v7297_v55  ;;  %v2423_v43 = vmul.f32 %v2391_v61, %v7299_v57 }
 0x50e   :  { %v2474_v5 = vmul.f32 0.5, %v2470_v41 }
 0x510   :  { %v2478_v23 = vadd.f32 1e-05, %v2474_v5  ;;  %v1112_v0 = vpop.xlane.xlu1 %1111 }
 0x511   :  { %v1684_v58 = vpop.xlane.xlu0 %1683  ;;  %v1129_v10 = vpop.xlane.xlu2 %1128 }
 0x512   :  { %5538 = vrsqrt.f32 %v2478_v23  ;;  %v2399_v44 = vsel %vm2384_vm15, %v2395_v34, %v1684_v58  ;;  %vm2488_vm3 = vweird.f32 %v2478_v23 }
 0x513   :  { %v2403_v3 = vsel %vm2389_vm0, %v2399_v44, %v1963_v52  ;;  %v7457_v44 = vstv %s7293_s6  ;;  %s7474_s6 = sld [smem:[#allocation2 + $0x29]] }
 0x514   :  { %v2411_v48 = vmul.f32 %v2403_v3, %v7305_v18  ;;  %v2427_v16 = vmul.f32 %v2403_v3, %v7307_v35  ;;  %10732 = vst [vmem:[#allocation30_spill] sm:$0xff] %v7457_v44  ;;  %v7460_v3 = vstv %s7309_s30  ;;  %s7485_s30 = sld [smem:[#allocation2 + $0x39]] }
 0x515   :  { %10733 = vst [vmem:[#allocation44_spill] sm:$0xff] %v7460_v3 }
 0x516   :  { %v2415_v15 = vadd.f32 %v2411_v48, %v2407_v19  ;;  %v2431_v47 = vadd.f32 %v2427_v16, %v2423_v43 }
 0x518   :  { %v5539_v40 = vpop.eup %5538  ;;  %v2419_v7 = vadd.f32 %v2415_v15, %v7324_v21  ;;  %v2435_v49 = vadd.f32 %v2431_v47, %v7326_v28  ;;  %v1391_v37 = vpop.xlane.xlu1 %1390 }
 0x519   :  { %v2483_v4 = vmul.f32 %v5539_v40, %v2478_v23  ;;  %v1408_v8 = vpop.xlane.xlu2 %1407  ;;  %v1670_v56 = vpop.xlane.xlu0 %1669  ;;  %vm2489_vm1 = vweird.f32 %v5539_v40  ;;  %v2382_v25 = vsel %vm2379_vm14, %v1112_v0, %v1391_v37 }
 0x51a   :  { %v2439_v39 = vadd.f32 %v2419_v7, %v10722_v45  ;;  %v2443_v62 = vadd.f32 %v2435_v49, %v10723_v9  ;;  %v2396_v14 = vsel %vm2379_vm14, %v1129_v10, %v1408_v8  ;;  %v2387_v20 = vsel %vm2384_vm15, %v2382_v25, %v1670_v56  ;;  %vm2490_vm4 = vmor %vm2488_vm3, %vm2489_vm1  ;;  %v10736_v49 = vld [vmem:[#allocation15_spill] sm:$0xff]  ;;  %v10737_v56 = vld [vmem:[#allocation16_spill] sm:$0xff] }
 0x51b   :  { %v2484_v46 = vmul.f32 %v5539_v40, %v2483_v4  ;;  %v7480_v7 = vstv %s7312_s0  ;;  %v7495_v9 = vstv %s7322_s17  ;;  %s7506_s0 = sld [smem:[#allocation2 + $0x59]]  ;;  %v7515_v25 = vstv %s7342_s23 }
 0x51c   :  { %v2447_v12 = vadd.f32 %v2443_v62, %v2439_v39  ;;  %10735 = vst [vmem:[#allocation29_spill] sm:$0xff] %v7480_v7  ;;  %s7531_s17 = sld [smem:[#allocation2 + $0x2a]] }
 0x51d   :  { %v2485_v13 = vmul.f32 0.5, %v2484_v46  ;;  %v7501_v46 = vstv %s7330_s19  ;;  %10741 = vst [vmem:[#allocation38_spill] sm:$0xff] %v7515_v25  ;;  %s10752_s19 = sld [smem:[#allocation55_spill]] }
 0x51e   :  { %v2451_v30 = vmul.f32 0.5, %v2447_v12  ;;  %10739 = vst [vmem:[#allocation41_spill] sm:$0xff] %v7501_v46  ;;  %v7504_v12 = vstv %s7338_s22  ;;  %s10755_s22 = sld [smem:[#allocation57_spill]] }
 0x51f   :  { %v2486_v59 = vsub.f32 1.5, %v2485_v13  ;;  %10740 = vst [vmem:[#allocation24_spill] sm:$0xff] %v7504_v12  ;;  %s7570_s23 = sld [smem:[#allocation2 + $0x5a]] }
 0x520   :  { %v7425_v38 = vsub.f32 %v2439_v39, %v2451_v30  ;;  %v7427_v27 = vsub.f32 %v2443_v62, %v2451_v30  ;;  %v1687_v1 = vpop.xlane.xlu1 %1686  ;;  %v7490_v39 = vstv %s7318_s1  ;;  %v7498_v62 = vstv %s7328_s18  ;;  %s7517_s1 = sld [smem:[#allocation2 + $0x69]] }
 0x521   :  { %v2487_v26 = vmul.f32 %v5539_v40, %v2486_v59  ;;  %v2400_v17 = vsel %vm2384_vm15, %v2396_v14, %v1687_v1  ;;  %v1949_v42 = vpop.xlane.xlu2 %1948  ;;  %v1966_v52 = vpop.xlane.xlu0 %1965  ;;  %10738 = vst [vmem:[#allocation27_spill] sm:$0xff] %v7490_v39  ;;  %v7520_v14 = vstv %s7332_s20  ;;  %v7523_v1 = vstv %s7336_s21  ;;  %s7542_s18 = sld [smem:[#allocation2 + $0x3a]] }
 0x522   :  { %v2463_v2 = vmul.f32 %v7425_v38, %v7425_v38  ;;  %v2467_v22 = vmul.f32 %v7427_v27, %v7427_v27  ;;  %v2392_v32 = vsel %vm2389_vm0, %v2387_v20, %v1949_v42  ;;  %v2404_v41 = vsel %vm2389_vm0, %v2400_v17, %v1966_v52  ;;  %10742 = vst [vmem:[#allocation47_spill] sm:$0xff] %v7520_v14  ;;  %s7556_s20 = sld [smem:[#allocation2 + $0x4a]] }
 0x523   :  { %v2491_v5 = vsel %vm2490_vm4, %v5539_v40, %v2487_v26  ;;  %v2408_v33 = vmul.f32 %v2392_v32, %v7297_v55  ;;  %v2424_v23 = vmul.f32 %v2392_v32, %v7299_v57  ;;  %v2412_v0 = vmul.f32 %v2404_v41, %v7305_v18  ;;  %10743 = vst [vmem:[#allocation49_spill] sm:$0xff] %v7523_v1  ;;  %s10754_s21 = sld [smem:[#allocation56_spill]] }
 0x524   :  { %v2522_v34 = vmul.f32 %v2491_v5, %v7354_v50  ;;  %v2534_v61 = vmul.f32 %v2491_v5, %v7356_v36  ;;  %v2471_v58 = vadd.f32 %v2467_v22, %v2463_v2  ;;  %v2428_v10 = vmul.f32 %v2404_v41, %v7307_v35 }
 0x525   :  { %v2416_v19 = vadd.f32 %v2412_v0, %v2408_v33  ;;  %v7477_v40 = vstv %s7301_s2  ;;  %s7492_s2 = sld [smem:[#allocation2 + $0x49]]  ;;  %v7526_v26 = vstv %s7352_s26  ;;  %v7529_v20 = vstv %s7366_s9 }
 0x526   :  { %v2475_v43 = vmul.f32 0.5, %v2471_v58  ;;  %v2432_v48 = vadd.f32 %v2428_v10, %v2424_v23  ;;  %v2526_v36 = vmul.f32 %v2522_v34, %v7457_v44  ;;  %v2538_v16 = vmul.f32 %v2534_v61, %v7460_v3  ;;  %10734 = vst [vmem:[#allocation25_spill] sm:$0xff] %v7477_v40  ;;  %s7584_s26 = sld [smem:[#allocation2 + $0x6a]] }
 0x527   :  { %v2420_v50 = vadd.f32 %v2416_v19, %v7324_v21  ;;  %10744 = vst [vmem:[#allocation26_spill] sm:$0xff] %v7526_v26  ;;  %v7534_v42 = vstv %s7369_s8  ;;  %v7537_v52 = vstv %s7371_s29  ;;  %v7540_v2 = vstv %s7378_s3  ;;  %s10768_s9 = sld [smem:[#allocation64_spill]] }
 0x528   :  { %v7471_v15 = vadd.f32 1e-05, %v2475_v43  ;;  %v2436_v47 = vadd.f32 %v2432_v48, %v7326_v28  ;;  %v7509_v13 = vadd.f32 %v2526_v36, %v7477_v40  ;;  %v7512_v30 = vadd.f32 %v2538_v16, %v7480_v7  ;;  %10745 = vst [vmem:[#allocation40_spill] sm:$0xff] %v7529_v20  ;;  %v1673_v34 = vpop.xlane.xlu1 %1672  ;;  %s7606_s8 = sld [smem:[#allocation2 + $0x3b]] }
 0x529   :  { %v2440_v37 = vadd.f32 %v2420_v50, %v10736_v49  ;;  %v7483_v4 = vpop.xlane.xlu0 %1131  ;;  %v1115_v8 = vpop.xlane.xlu2 %1114  ;;  %10746 = vst [vmem:[#allocation39_spill] sm:$0xff] %v7534_v42  ;;  %v7545_v22 = vstv %s7344_s10  ;;  %v7548_v32 = vstv %s7346_s24  ;;  %v7551_v41 = vstv %s7348_s25  ;;  %s10759_s10 = sld [smem:[#allocation59_spill]] }
 0x52a   :  { %5540 = vrsqrt.f32 %v7471_v15  ;;  %v2444_v45 = vadd.f32 %v2436_v47, %v10737_v56  ;;  %10747 = vst [vmem:[#allocation50_spill] sm:$0xff] %v7537_v52  ;;  %v7554_v5 = vstv %s7380_s16  ;;  %v7565_v61 = vstv %s7350_s5  ;;  %s10758_s16 = sld [smem:[#allocation58_spill]] }
 0x52b   :  { %10748 = vst [vmem:[#allocation32_spill] sm:$0xff] %v7540_v2  ;;  %v7568_v58 = vstv %s7358_s27  ;;  %vm2498_vm5 = vweird.f32 %v7471_v15  ;;  %s10760_s24 = sld [smem:[#allocation60_spill]]  ;;  %v7576_v48 = vstv %s7360_s28  ;;  %v7579_v50 = vstv %s7373_s4 }
 0x52c   :  { %v2448_v59 = vadd.f32 %v2444_v45, %v2440_v37  ;;  %10749 = vst [vmem:[#allocation42_spill] sm:$0xff] %v7545_v22  ;;  %s10762_s25 = sld [smem:[#allocation61_spill]]  ;;  %v7582_v36 = vstv %s10752_s19  ;;  %v7591_v49 = vstv %s10754_s21 }
 0x52d   :  { %10750 = vst [vmem:[#allocation48_spill] sm:$0xff] %v7548_v32  ;;  %s10764_s5 = sld [smem:[#allocation62_spill]] }
 0x52e   :  { %v2452_v17 = vmul.f32 0.5, %v2448_v59  ;;  %10751 = vst [vmem:[#allocation31_spill] sm:$0xff] %v7551_v41  ;;  %s10766_s27 = sld [smem:[#allocation63_spill]] }
 0x52f   :  { %10753 = vst [vmem:[#allocation35_spill] sm:$0xff] %v7554_v5  ;;  %s7596_s28 = sld [smem:[#allocation2 + $0x2b]] }
 0x530   :  { %v7558_v33 = vpop.eup %5540  ;;  %v7560_v23 = vsub.f32 %v2440_v37, %v2452_v17  ;;  %v7562_v0 = vsub.f32 %v2444_v45, %v2452_v17  ;;  %10756 = vst [vmem:[#allocation51_spill] sm:$0xff] %v7565_v61  ;;  %v7594_v37 = vstv %s10755_s22  ;;  %v7601_v59 = vstv %s10758_s16  ;;  %s10773_s29 = sld [smem:[#allocation65_spill]] }
 0x531   :  { %10757 = vst [vmem:[#allocation33_spill] sm:$0xff] %v7568_v58  ;;  %v2493_v10 = vmul.f32 %v7558_v33, %v7471_v15  ;;  %v1411_v19 = vpop.xlane.xlu0 %1410  ;;  %v1394_v43 = vpop.xlane.xlu2 %1393  ;;  %v7604_v17 = vstv %s10759_s10  ;;  %v7609_v63 = vstv %s10760_s24  ;;  %s10775_s4 = sld [smem:[#allocation66_spill]]  ;;  %vm2499_vm6 = vweird.f32 %v7558_v33 }
 0x532   :  { %10761 = vst [vmem:[#allocation45_spill] sm:$0xff] %v7576_v48  ;;  %v2464_v16 = vmul.f32 %v7560_v23, %v7560_v23  ;;  %v2468_v47 = vmul.f32 %v7562_v0, %v7562_v0  ;;  %v2383_v45 = vsel %vm2379_vm14, %v1115_v8, %v1394_v43  ;;  %v7612_v11 = vstv %s10762_s25  ;;  %s7617_s3 = sld [smem:[#allocation2 + $0x4b]]  ;;  %vm2500_vm7 = vmor %vm2498_vm5, %vm2499_vm6 }
 0x533   :  { %10763 = vst [vmem:[#allocation52_spill] sm:$0xff] %v7579_v50  ;;  %v2494_v56 = vmul.f32 %v7558_v33, %v2493_v10  ;;  %s10777_s19 = sld [smem:[#allocation67_spill]]  ;;  %v7624_v43 = vstv %s10768_s9 }
 0x534   :  { %10765 = vst [vmem:[#allocation53_spill] sm:$0xff] %v7582_v36  ;;  %v2472_v51 = vadd.f32 %v2468_v47, %v2464_v16  ;;  %s10778_s21 = sld [smem:[#allocation68_spill]]  ;;  %v7621_v10 = vstv %s10766_s27  ;;  %v2397_v47 = vsel %vm2379_vm14, %v7483_v4, %v1411_v19 }
 0x535   :  { %10767 = vst [vmem:[#allocation36_spill] sm:$0xff] %v7591_v49  ;;  %v2495_v8 = vmul.f32 0.5, %v2494_v56  ;;  %s10780_s22 = sld [smem:[#allocation69_spill]] }
 0x536   :  { %10769 = vst [vmem:[#allocation37_spill] sm:$0xff] %v7594_v37  ;;  %v7615_v37 = vstv %s10764_s5  ;;  %s7626_s16 = sld [smem:[#allocation2 + $0x5b]]  ;;  %v2476_v16 = vmul.f32 0.5, %v2472_v51 }
 0x537   :  { %10770 = vst [vmem:[#allocation43_spill] sm:$0xff] %v7601_v59  ;;  %s10782_s10 = sld [smem:[#allocation70_spill]]  ;;  %v7632_v59 = vstv %s7413_s15  ;;  %v2496_v56 = vsub.f32 1.5, %v2495_v8 }
 0x538   :  { %10771 = vst [vmem:[#allocation34_spill] sm:$0xff] %v7604_v17  ;;  %s10784_s24 = sld [smem:[#allocation71_spill]]  ;;  %v7647_v51 = vadd.f32 1e-05, %v2476_v16  ;;  %v1969_v16 = vpop.xlane.xlu1 %1968 }
 0x539   :  { %10772 = vst [vmem:[#allocation46_spill] sm:$0xff] %v7609_v63  ;;  %s7634_s25 = sld [smem:[#allocation2 + $0x6b]]  ;;  %v7650_v4 = vstv %s10777_s19  ;;  %v1952_v8 = vpop.xlane.xlu0 %1951 }
 0x53a   :  { %10774 = vst [vmem:[#allocation54_spill] sm:$0xff] %v7612_v11  ;;  %s10785_s5 = sld [smem:[#allocation72_spill]]  ;;  %v7640_v11 = vstv %s10773_s29  ;;  %5542 = vrsqrt.f32 %v7647_v51  ;;  %vm2508_vm9 = vweird.f32 %v7647_v51 }
 0x53b   :  { %10776 = vst [vmem:[#allocation8_spill] sm:$0xff] %v7615_v37  ;;  %v2388_v37 = vsel %vm2384_vm15, %v2383_v45, %v1673_v34  ;;  %s7645_s27 = sld [smem:[#allocation2 + $0x2c]]  ;;  %v7653_v34 = vstv %s10778_s21  ;;  %v7656_v19 = vstv %s10780_s22  ;;  %v2497_v45 = vmul.f32 %v7558_v33, %v2496_v56 }
 0x53c   :  { %10779 = vst [vmem:[#allocation9_spill] sm:$0xff] %v7621_v10  ;;  %v7637_v10 = vstv %s7415_s12  ;;  %s7658_s15 = sld [smem:[#allocation2 + $0x3c]]  ;;  %v2393_v56 = vsel %vm2389_vm0, %v2388_v37, %v1952_v8  ;;  %v7700_v8 = vstv %s7464_s13 }
 0x53d   :  { %10781 = vst [vmem:[#allocation12_spill] sm:$0xff] %v7624_v43  ;;  %v7643_v43 = vstv %s10775_s4  ;;  %s7670_s12 = sld [smem:[#allocation2 + $0x4c]]  ;;  %v2409_v15 = vmul.f32 %v2393_v56, %v7297_v55 }
 0x53e   :  { %10783 = vst [vmem:[#allocation23_spill] sm:$0xff] %v7632_v59  ;;  %s7682_s9 = sld [smem:[#allocation2 + $0x5c]] }
 0x53f   :  { %10786 = vst [vmem:[#allocation19_spill] sm:$0xff] %v7637_v10  ;;  %v1690_v10 = vpop.xlane.xlu2 %1689  ;;  %s7688_s29 = sld [smem:[#allocation2 + $0x6c]] }
 0x540   :  { %10787 = vst [vmem:[#allocation28_spill] sm:$0xff] %v7640_v11  ;;  %v7662_v11 = vstv %s10782_s10  ;;  %v7668_v59 = vstv %s10785_s5  ;;  %s7708_s4 = sld [smem:[#allocation2 + $0x3d]] }
 0x541   :  { %10788 = vst [vmem:[#allocation10_spill] sm:$0xff] %v7643_v43  ;;  %v7665_v43 = vstv %s10784_s24  ;;  %s7730_s13 = sld [smem:[#allocation2 + $0x5d]] }
 0x542   :  { %10789 = vst [vmem:[#allocation11_spill] sm:$0xff] %v7650_v4  ;;  %v7763_v4 = vstv %s7606_s8  ;;  %s7949_s8 = sld [smem:[#allocation2 + $0x71]] }
 0x543   :  { %10790 = vst [vmem:[#allocation13_spill] sm:$0xff] %v7653_v34  ;;  %s8064_s19 = sld [smem:[#allocation2 + $0x74]] }
 0x544   :  { %10791 = vst [vmem:[#allocation14_spill] sm:$0xff] %v7656_v19  ;;  %v2501_v19 = vsel %vm2500_vm7, %v7558_v33, %v2497_v45  ;;  %v7694_v33 = vstv %s7462_s11  ;;  %s7716_s11 = sld [smem:[#allocation2 + $0x4d]] }
 0x545   :  { %10792 = vst [vmem:[#allocation15_spill] sm:$0xff] %v7662_v11  ;;  %v2401_v11 = vsel %vm2384_vm15, %v2397_v47, %v1690_v10  ;;  %v2523_v37 = vmul.f32 %v2501_v19, %v7425_v38  ;;  %v2535_v45 = vmul.f32 %v2501_v19, %v7427_v27  ;;  %v7719_v27 = vstv %s7506_s0  ;;  %s7780_s0 = sld [smem:[#allocation2 + $0x5e]] }
 0x546   :  { %10793 = vst [vmem:[#allocation16_spill] sm:$0xff] %v7665_v43  ;;  %v7680_v43 = vstv %s7454_s14  ;;  %v2405_v34 = vsel %vm2389_vm0, %v2401_v11, %v1969_v16  ;;  %s7696_s14 = sld [smem:[#allocation2 + $0x2d]]  ;;  %v7703_v11 = vstv %s7467_s7  ;;  %v7706_v16 = vstv %s7474_s6 }
 0x547   :  { %10794 = vst [vmem:[#allocation73_spill] sm:$0xff] %v7668_v59  ;;  %v2425_v59 = vmul.f32 %v2393_v56, %v7299_v57  ;;  %v2413_v10 = vmul.f32 %v2405_v34, %v7305_v18  ;;  %v2429_v47 = vmul.f32 %v2405_v34, %v7307_v35  ;;  %v7714_v34 = vstv %s7492_s2  ;;  %s7740_s7 = sld [smem:[#allocation2 + $0x6d]] }
 0x548   :  { %10795 = vst [vmem:[#allocation74_spill] sm:$0xff] %v7680_v43  ;;  %v7711_v43 = vstv %s7485_s30  ;;  %v7722_v19 = vstv %s7517_s1  ;;  %s7751_s6 = sld [smem:[#allocation2 + $0x2e]] }
 0x549   :  { %10796 = vst [vmem:[#allocation75_spill] sm:$0xff] %v7694_v33  ;;  %v2417_v38 = vadd.f32 %v2413_v10, %v2409_v15  ;;  %v2433_v56 = vadd.f32 %v2429_v47, %v2425_v59  ;;  %v7732_v59 = vpop.eup %5542  ;;  %v2527_v15 = vmul.f32 %v2523_v37, %v7457_v44  ;;  %v1548_v33 = vpop.permute.xlu2 %1547  ;;  %v7749_v37 = vstv %s7584_s26  ;;  %s7759_s30 = sld [smem:[#allocation2 + $0x3e]] }
 0x54a   :  { %10797 = vst [vmem:[#allocation76_spill] sm:$0xff] %v7700_v8  ;;  %v7728_v8 = vstv %s7542_s18  ;;  %s7771_s2 = sld [smem:[#allocation2 + $0x4e]]  ;;  %vm2509_vm8 = vweird.f32 %v7732_v59 }
 0x54b   :  { %10798 = vst [vmem:[#allocation77_spill] sm:$0xff] %v7703_v11  ;;  %v7725_v11 = vstv %s7531_s17  ;;  %v2421_v10 = vadd.f32 %v2417_v38, %v7324_v21  ;;  %v2437_v47 = vadd.f32 %v2433_v56, %v7326_v28  ;;  %v10809_v38 = vld [vmem:[#allocation17_spill] sm:$0xff]  ;;  %s7787_s1 = sld [smem:[#allocation2 + $0x6e]]  ;;  %vm2510_vm10 = vmor %vm2508_vm9, %vm2509_vm8 }
 0x54c   :  { %10799 = vst [vmem:[#allocation78_spill] sm:$0xff] %v7706_v16  ;;  %v7757_v16 = vstv %s7596_s28  ;;  %s7799_s17 = sld [smem:[#allocation2 + $0x2f]] }
 0x54d   :  { %10800 = vst [vmem:[#allocation79_spill] sm:$0xff] %v7711_v43  ;;  %v2441_v56 = vadd.f32 %v2421_v10, %v10809_v38  ;;  %v1553_v43 = vmul.f32 %v1548_v33, %v7077_v54  ;;  %s7810_s18 = sld [smem:[#allocation2 + $0x3f]] }
 0x54e   :  { %10801 = vst [vmem:[#allocation80_spill] sm:$0xff] %v7714_v34  ;;  %v2503_v34 = vmul.f32 %v7732_v59, %v7647_v51  ;;  %s7912_s26 = sld [smem:[#allocation2 + $0x6f]] }
 0x54f   :  { %10802 = vst [vmem:[#allocation81_spill] sm:$0xff] %v7719_v27  ;;  %v7738_v27 = vstv %s7556_s20  ;;  %v1559_v33 = vsel %vm131_vm2, %v1553_v43, 0.0  ;;  %s7826_s20 = sld [smem:[#allocation2 + $0x4f]] }
 0x550   :  { %10803 = vst [vmem:[#allocation82_spill] sm:$0xff] %v7722_v19  ;;  %v2539_v19 = vmul.f32 %v2535_v45, %v7460_v3  ;;  %v2504_v45 = vmul.f32 %v7732_v59, %v2503_v34  ;;  %v7778_v34 = vstv %s7634_s25  ;;  %v1560_v38 = vadd.f32 %v1559_v33, %v7095_v29  ;;  %s7939_s28 = sld [smem:[#allocation2 + $0x70]] }
 0x551   :  { %10804 = vst [vmem:[#allocation83_spill] sm:$0xff] %v7725_v11  ;;  %v10810_v11 = vld [vmem:[#allocation18_spill] sm:$0xff]  ;;  %v7805_v29 = vstv %s7688_s29  ;;  %v7808_v33 = vstv %s7696_s14  ;;  %s8070_s21 = sld [smem:[#allocation2 + $0x73]] }
 0x552   :  { %10805 = vst [vmem:[#allocation84_spill] sm:$0xff] %v7728_v8  ;;  %v7746_v8 = vstv %s7570_s23  ;;  %v7783_v10 = vadd.f32 %v2539_v19, %v7480_v7  ;;  %v1561_v19 = vrot.slane %v1560_v38, 4  ;;  %s7838_s23 = sld [smem:[#allocation2 + $0x5f]] }
 0x553   :  { %10806 = vst [vmem:[#allocation85_spill] sm:$0xff] %v7738_v27  ;;  %v2445_v27 = vadd.f32 %v2437_v47, %v10810_v11  ;;  %v7774_v11 = vadd.f32 %v2527_v15, %v7477_v40  ;;  %v2505_v47 = vmul.f32 0.5, %v2504_v45  ;;  %v7791_v15 = vstv %s7645_s27  ;;  %s8082_s22 = sld [smem:[#allocation2 + $0x75]] }
 0x554   :  { %10807 = vst [vmem:[#allocation86_spill] sm:$0xff] %v7746_v8  ;;  %v7766_v8 = vstv %s7617_s3  ;;  %v7802_v45 = vstv %s7682_s9  ;;  %s8060_s3 = sld [smem:[#allocation2 + $0x72]] }
 0x555   :  { %10808 = vst [vmem:[#allocation87_spill] sm:$0xff] %v7749_v37  ;;  %v7769_v37 = vstv %s7626_s16  ;;  %v2449_v54 = vadd.f32 %v2445_v27, %v2441_v56  ;;  %s8099_s16 = sld [smem:[#allocation2 + $0x7d]] }
 0x556   :  { %10811 = vst [vmem:[#allocation17_spill] sm:$0xff] %v7757_v16  ;;  %v2546_v16 = vmul.f32 %v7509_v13, %v7490_v39  ;;  %s8118_s10 = sld [smem:[#allocation2 + $0x7f]] }
 0x557   :  { %10812 = vst [vmem:[#allocation18_spill] sm:$0xff] %v7763_v4  ;;  %v2453_v43 = vmul.f32 0.5, %v2449_v54  ;;  %v2506_v54 = vsub.f32 1.5, %v2505_v47  ;;  %v7833_v47 = vstv %s7740_s7  ;;  %s8129_s24 = sld [smem:[#allocation2 + $0x81]] }
 0x558   :  { %10813 = vst [vmem:[#allocation88_spill] sm:$0xff] %v7766_v8  ;;  %v7817_v8 = vstv %s7708_s4  ;;  %s8134_s25 = sld [smem:[#allocation2 + $0x7c]] }
 0x559   :  { %10814 = vst [vmem:[#allocation89_spill] sm:$0xff] %v7769_v37  ;;  %v7814_v37 = vsub.f32 %v2445_v27, %v2453_v43  ;;  %s8142_s5 = sld [smem:[#allocation2 + $0x7e]] }
 0x55a   :  { %10815 = vst [vmem:[#allocation90_spill] sm:$0xff] %v7774_v11  ;;  %v7794_v11 = vstv %s7658_s15  ;;  %s8155_s27 = sld [smem:[#allocation2 + $0x80]] }
 0x55b   :  { %10816 = vst [vmem:[#allocation91_spill] sm:$0xff] %v7778_v34  ;;  %v7797_v34 = vstv %s7670_s12  ;;  %v2469_v27 = vmul.f32 %v7814_v37, %v7814_v37  ;;  %s8306_s15 = sld [smem:[#allocation2 + $0x83]] }
 0x55c   :  { %10817 = vst [vmem:[#allocation92_spill] sm:$0xff] %v7783_v10  ;;  %v7812_v10 = vsub.f32 %v2441_v56, %v2453_v43  ;;  %v7836_v43 = vstv %s7751_s6  ;;  %s8310_s12 = sld [smem:[#allocation2 + $0x85]] }
 0x55d   :  { %10818 = vst [vmem:[#allocation93_spill] sm:$0xff] %v7791_v15  ;;  %v7821_v15 = vstv %s7716_s11  ;;  %s8315_s9 = sld [smem:[#allocation2 + $0x82]] }
 0x55e   :  { %10819 = vst [vmem:[#allocation94_spill] sm:$0xff] %v7794_v11  ;;  %v1562_v11 = vadd.f32 %v1561_v19, %v1560_v38  ;;  %v2465_v56 = vmul.f32 %v7812_v10, %v7812_v10  ;;  %v7842_v19 = vstv %s7759_s30  ;;  %s8319_s29 = sld [smem:[#allocation2 + $0x84]] }
 0x55f   :  { %10820 = vst [vmem:[#allocation95_spill] sm:$0xff] %v7797_v34  ;;  %v1827_v34 = vpop.permute.xlu1 %1826  ;;  %s8345_s14 = sld [smem:[#allocation2 + $0x87]] }
 0x560   :  { %10821 = vst [vmem:[#allocation96_spill] sm:$0xff] %v7802_v45  ;;  %v1832_v45 = vmul.f32 %v1827_v34, %v7105_v24  ;;  %v1563_v34 = vrot.slane %v1562_v11, 2  ;;  %s8348_s4 = sld [smem:[#allocation2 + $0x86]] }
 0x561   :  { %10822 = vst [vmem:[#allocation97_spill] sm:$0xff] %v7805_v29  ;;  %v7824_v29 = vstv %s7730_s13  ;;  %s8878_s11 = sld [smem:[#allocation2 + $0x76]] }
 0x562   :  { %10823 = vst [vmem:[#allocation98_spill] sm:$0xff] %v7808_v33  ;;  %v1838_v38 = vsel %vm131_vm2, %v1832_v45, 0.0  ;;  %v2550_v45 = vmul.f32 %v7512_v30, %v7495_v9  ;;  %s8880_s13 = sld [smem:[#allocation2 + $0x78]] }
 0x563   :  { %10824 = vst [vmem:[#allocation99_spill] sm:$0xff] %v7812_v10  ;;  %v1839_v33 = vadd.f32 %v1838_v38, %v7128_v60  ;;  %v7858_v10 = vstv %s7787_s1  ;;  %s8882_s7 = sld [smem:[#allocation2 + $0x77]] }
 0x564   :  { %10825 = vst [vmem:[#allocation100_spill] sm:$0xff] %v7814_v37  ;;  %v7850_v37 = vstv %s7780_s0  ;;  %s8888_s6 = sld [smem:[#allocation2 + $0x79]] }
 0x565   :  { %10826 = vst [vmem:[#allocation101_spill] sm:$0xff] %v7817_v8  ;;  %v2473_v8 = vadd.f32 %v2469_v27, %v2465_v56  ;;  %v2554_v56 = vadd.f32 %v2550_v45, %v2546_v16  ;;  %v7882_v16 = vstv %s7826_s20  ;;  %s8890_s30 = sld [smem:[#allocation2 + $0x7a]] }
 0x566   :  { %10827 = vst [vmem:[#allocation102_spill] sm:$0xff] %v7821_v15  ;;  %v2507_v15 = vmul.f32 %v7732_v59, %v2506_v54  ;;  %v7861_v54 = vstv %s7799_s17  ;;  %s9319_s0 = sld [smem:[#allocation2 + $0x88]] }
 0x567   :  { %10828 = vst [vmem:[#allocation103_spill] sm:$0xff] %v7824_v29  ;;  %v7845_v29 = vstv %s7771_s2  ;;  %s8897_s2 = sld [smem:[#allocation2 + $0x7b]] }
 0x568   :  { %10829 = vst [vmem:[#allocation104_spill] sm:$0xff] %v7833_v47  ;;  %v1794_v47 = vpop.permute.xlu0 %1793  ;;  %s9322_s1 = sld [smem:[#allocation2 + $0x89]] }
 0x569   :  { %10830 = vst [vmem:[#allocation105_spill] sm:$0xff] %v7836_v43  ;;  %v1564_v43 = vadd.f32 %v1563_v34, %v1562_v11  ;;  %v1799_v4 = vmul.f32 %v1794_v47, %v7105_v24  ;;  %v7869_v11 = vstv %s7810_s18  ;;  %v2582_v34 = vmul.f32 %v7509_v13, %v7498_v62  ;;  %s9327_s17 = sld [smem:[#allocation2 + $0x8a]] }
 0x56a   :  { %10831 = vst [vmem:[#allocation106_spill] sm:$0xff] %v7842_v19  ;;  %v2477_v19 = vmul.f32 0.5, %v2473_v8  ;;  %v2511_v8 = vsel %vm2510_vm10, %v7732_v59, %v2507_v15  ;;  %v7885_v59 = vstv %s7838_s23  ;;  %s9331_s18 = sld [smem:[#allocation2 + $0x8c]] }
 0x56b   :  { %10832 = vst [vmem:[#allocation107_spill] sm:$0xff] %v7845_v29  ;;  %v1840_v29 = vrot.slane %v1839_v33, 4  ;;  %v1565_v60 = vrot.slane %v1564_v43, 1  ;;  %v1805_v24 = vsel %vm131_vm2, %v1799_v4, 0.0  ;;  %v2524_v15 = vmul.f32 %v2511_v8, %v7560_v23  ;;  %s9336_s20 = sld [smem:[#allocation2 + $0x8b]] }
 0x56c   :  { %10833 = vst [vmem:[#allocation108_spill] sm:$0xff] %v7850_v37  ;;  %v7872_v27 = vadd.f32 1e-05, %v2477_v19  ;;  %v1806_v51 = vadd.f32 %v1805_v24, %v7141_v53  ;;  %v2586_v37 = vmul.f32 %v7512_v30, %v7501_v46  ;;  %v2618_v53 = vmul.f32 %v7509_v13, %v7504_v12  ;;  %s9343_s23 = sld [smem:[#allocation2 + $0x8d]] }
 0x56d   :  { %10834 = vst [vmem:[#allocation109_spill] sm:$0xff] %v7858_v10  ;;  %v1841_v47 = vadd.f32 %v1840_v29, %v1839_v33  ;;  %v1566_v38 = vadd.f32 %v1565_v60, %v1564_v43  ;;  %v2558_v10 = vadd.f32 %v2554_v56, %v7520_v14  ;;  %v2622_v60 = vmul.f32 %v7512_v30, %v7515_v25 }
 0x56e   :  { %10835 = vst [vmem:[#allocation110_spill] sm:$0xff] %v7861_v54  ;;  %5544 = vrsqrt.f32 %v7872_v27  ;;  %v1807_v33 = vrot.slane %v1806_v51, 4  ;;  %v2590_v45 = vadd.f32 %v2586_v37, %v2582_v34  ;;  %v2536_v24 = vmul.f32 %v2511_v8, %v7562_v0 }
 0x56f   :  { %10836 = vst [vmem:[#allocation111_spill] sm:$0xff] %v7869_v11  ;;  %v1842_v4 = vrot.slane %v1841_v47, 2  ;;  %v1977_v29 = vsel %vm1972_vm13, %v7069_v6, %v1566_v38  ;;  %v2562_v19 = vmax.f32 %v2558_v10, 0.0  ;;  %v2654_v14 = vmul.f32 %v7509_v13, %v7529_v20 }
 0x570   :  { %10837 = vst [vmem:[#allocation112_spill] sm:$0xff] %v7882_v16  ;;  %v1808_v56 = vadd.f32 %v1807_v33, %v1806_v51  ;;  %v2658_v23 = vmul.f32 %v7512_v30, %v7534_v42  ;;  %v2690_v37 = vmul.f32 %v7509_v13, %v7540_v2  ;;  %v2626_v34 = vadd.f32 %v2622_v60, %v2618_v53 }
 0x571   :  { %10838 = vst [vmem:[#allocation113_spill] sm:$0xff] %v7885_v59  ;;  %v1843_v43 = vadd.f32 %v1842_v4, %v1841_v47  ;;  %v2566_v38 = vmul.f32 %v2562_v19, %v7545_v22  ;;  %v2594_v59 = vadd.f32 %v2590_v45, %v7523_v1  ;;  %v2574_v47 = vmul.f32 %v2562_v19, %v7548_v32 }
 0x572   :  { %v1809_v10 = vrot.slane %v1808_v56, 2  ;;  %v2662_v0 = vadd.f32 %v2658_v23, %v2654_v14  ;;  %v2694_v33 = vmul.f32 %v7512_v30, %v7554_v5  ;;  %v2726_v22 = vmul.f32 %v7509_v13, %v7604_v17 }
 0x573   :  { %v1844_v6 = vrot.slane %v1843_v43, 1  ;;  %v2598_v4 = vmax.f32 %v2594_v59, 0.0  ;;  %v2630_v19 = vadd.f32 %v2626_v34, %v7526_v26  ;;  %v2730_v14 = vmul.f32 %v7512_v30, %v7609_v63 }
 0x574   :  { %v7904_v8 = vpop.eup %5544  ;;  %v1810_v1 = vadd.f32 %v1809_v10, %v1808_v56  ;;  %v2666_v60 = vadd.f32 %v2662_v0, %v7537_v52  ;;  %vm2518_vm15 = vweird.f32 %v7872_v27 }
 0x575   :  { %v1845_v51 = vadd.f32 %v1844_v6, %v1843_v43  ;;  %v2513_v45 = vmul.f32 %v7904_v8, %v7872_v27  ;;  %v2602_v59 = vmul.f32 %v2598_v4, %v7551_v41  ;;  %v2610_v43 = vmul.f32 %v2598_v4, %v7565_v61 }
 0x576   :  { %v1811_v10 = vrot.slane %v1810_v1, 1  ;;  %v2634_v5 = vmax.f32 %v2630_v19, 0.0  ;;  %v2670_v2 = vmax.f32 %v2666_v60, 0.0  ;;  %v10841_v60 = vld [vmem:[#allocation37_spill] sm:$0xff]  ;;  %vm2519_vm14 = vweird.f32 %v7904_v8 }
 0x577   :  { %v1978_v53 = vsel %vm1974_vm11, %v1977_v29, %v1845_v51  ;;  %v2514_v23 = vmul.f32 %v7904_v8, %v2513_v45  ;;  %v2606_v17 = vadd.f32 %v2602_v59, %v2566_v38  ;;  %v2614_v34 = vadd.f32 %v2610_v43, %v2574_v47  ;;  %v10839_v47 = vld [vmem:[#allocation54_spill] sm:$0xff]  ;;  %vm2520_vm0 = vmor %vm2518_vm15, %vm2519_vm14 }
 0x578   :  { %v1984_v6 = vmul.f32 %v7305_v18, %v1978_v53  ;;  %v1994_v56 = vmul.f32 %v7307_v35, %v1978_v53  ;;  %v1812_v32 = vadd.f32 %v1811_v10, %v1810_v1  ;;  %v2698_v29 = vadd.f32 %v2694_v33, %v2690_v37 }
 0x579   :  { %v2515_v63 = vmul.f32 0.5, %v2514_v23  ;;  %v2734_v51 = vadd.f32 %v2730_v14, %v2726_v22  ;;  %v2638_v4 = vmul.f32 %v2634_v5, %v7568_v58  ;;  %v2646_v0 = vmul.f32 %v2634_v5, %v7576_v48  ;;  %v10842_v23 = vld [vmem:[#allocation43_spill] sm:$0xff] }
 0x57a   :  { %v2674_v45 = vmul.f32 %v2670_v2, %v7579_v50  ;;  %v2682_v18 = vmul.f32 %v2670_v2, %v7582_v36  ;;  %v1975_v35 = vsel %vm1974_vm11, %v7136_v31, %v1812_v32  ;;  %v2702_v38 = vadd.f32 %v2698_v29, %v7591_v49 }
 0x57b   :  { %v2516_v61 = vsub.f32 1.5, %v2515_v63  ;;  %v2738_v19 = vadd.f32 %v2734_v51, %v10839_v47  ;;  %v1981_v1 = vmul.f32 %v7297_v55, %v1975_v35  ;;  %v1991_v22 = vmul.f32 %v7299_v57, %v1975_v35  ;;  %v10845_v51 = vld [vmem:[#allocation23_spill] sm:$0xff]  ;;  %v10848_v35 = vld [vmem:[#allocation8_spill] sm:$0xff] }
 0x57c   :  { %v2642_v37 = vadd.f32 %v2638_v4, %v2606_v17  ;;  %v2650_v33 = vadd.f32 %v2646_v0, %v2614_v34  ;;  %v2528_v5 = vmul.f32 %v2524_v15, %v7457_v44  ;;  %v7936_v14 = vstv %s7912_s26  ;;  %v10843_v17 = vld [vmem:[#allocation12_spill] sm:$0xff]  ;;  %v10846_v0 = vld [vmem:[#allocation21_spill] sm:$0xff]  ;;  %s9346_s26 = sld [smem:[#allocation2 + $0x8e]] }
 0x57d   :  { %10840 = vst [vmem:[#allocation114_spill] sm:$0xff] %v7936_v14  ;;  %v2706_v53 = vmax.f32 %v2702_v38, 0.0  ;;  %v2742_v2 = vmax.f32 %v2738_v19, 0.0  ;;  %v1985_v63 = vadd.f32 %v1984_v6, %v1981_v1  ;;  %v1995_v59 = vadd.f32 %v1994_v56, %v1991_v22  ;;  %v10850_v38 = vld [vmem:[#allocation9_spill] sm:$0xff]  ;;  %v10851_v22 = vld [vmem:[#allocation11_spill] sm:$0xff] }
 0x57e   :  { %v2678_v43 = vadd.f32 %v2674_v45, %v2642_v37  ;;  %v2686_v31 = vadd.f32 %v2682_v18, %v2650_v33  ;;  %v2540_v32 = vmul.f32 %v2536_v24, %v7460_v3  ;;  %v2762_v10 = vmul.f32 %v7509_v13, %v10843_v17  ;;  %v10847_v45 = vld [vmem:[#allocation22_spill] sm:$0xff]  ;;  %v10863_v3 = vld [vmem:[#allocation28_spill] sm:$0xff] }
 0x57f   :  { %v2710_v55 = vmul.f32 %v2706_v53, %v10841_v60  ;;  %v2718_v57 = vmul.f32 %v2706_v53, %v10842_v23  ;;  %v2517_v15 = vmul.f32 %v7904_v8, %v2516_v61  ;;  %v1988_v6 = vadd.f32 %v7324_v21, %v1985_v63  ;;  %v10852_v53 = vld [vmem:[#allocation13_spill] sm:$0xff]  ;;  %v10870_v60 = vld [vmem:[#allocation85_spill] sm:$0xff] }
 0x580   :  { %v1998_v56 = vadd.f32 %v7326_v28, %v1995_v59  ;;  %v7952_v24 = vadd.f32 %v2528_v5, %v7477_v40  ;;  %v2766_v4 = vmul.f32 %v7512_v30, %v10845_v51  ;;  %v2746_v21 = vmul.f32 %v2742_v2, %v10848_v35 }
 0x581   :  { %v2714_v34 = vadd.f32 %v2710_v55, %v2678_v43  ;;  %v2722_v29 = vadd.f32 %v2718_v57, %v2686_v31  ;;  %v1999_v61 = vadd.f32 %v1988_v6, %v10846_v0  ;;  %v7961_v28 = vadd.f32 %v2540_v32, %v7480_v7  ;;  %v10853_v43 = vld [vmem:[#allocation19_spill] sm:$0xff] }
 0x582   :  { %10844 = vst [vmem:[#allocation115_spill] sm:$0xff] %v7952_v24  ;;  %v2000_v18 = vadd.f32 %v1998_v56, %v10847_v45  ;;  %v2754_v19 = vmul.f32 %v2742_v2, %v10850_v38  ;;  %v2770_v1 = vadd.f32 %v2766_v4, %v2762_v10  ;;  %v2798_v37 = vmul.f32 %v7509_v13, %v10851_v22  ;;  %v10854_v32 = vld [vmem:[#allocation73_spill] sm:$0xff]  ;;  %v10855_v2 = vld [vmem:[#allocation74_spill] sm:$0xff]  ;;  %v10858_v45 = vld [vmem:[#allocation83_spill] sm:$0xff] }
 0x583   :  { %10849 = vst [vmem:[#allocation21_spill] sm:$0xff] %v7961_v28  ;;  %v2521_v33 = vsel %vm2520_vm0, %v7904_v8, %v2517_v15  ;;  %v2750_v27 = vadd.f32 %v2746_v21, %v2714_v34  ;;  %v2802_v63 = vmul.f32 %v7512_v30, %v10852_v53  ;;  %v2834_v55 = vmul.f32 %v7509_v13, %v10854_v32  ;;  %v10856_v56 = vld [vmem:[#allocation78_spill] sm:$0xff]  ;;  %v10857_v15 = vld [vmem:[#allocation79_spill] sm:$0xff]  ;;  %v10859_v21 = vld [vmem:[#allocation84_spill] sm:$0xff] }
 0x584   :  { %v2001_v5 = vadd.f32 %v2000_v18, %v1999_v61  ;;  %v2758_v59 = vadd.f32 %v2754_v19, %v2722_v29  ;;  %v2774_v31 = vadd.f32 %v2770_v1, %v10853_v43  ;;  %v2838_v57 = vmul.f32 %v7512_v30, %v10855_v2  ;;  %v10865_v28 = vld [vmem:[#allocation17_spill] sm:$0xff]  ;;  %v10869_v43 = vld [vmem:[#allocation80_spill] sm:$0xff]  ;;  %v10871_v53 = vld [vmem:[#allocation93_spill] sm:$0xff] }
 0x585   :  { %v2806_v6 = vadd.f32 %v2802_v63, %v2798_v37  ;;  %v2870_v8 = vmul.f32 %v7509_v13, %v10856_v56  ;;  %v2874_v34 = vmul.f32 %v7512_v30, %v10857_v15  ;;  %v2906_v29 = vmul.f32 %v7509_v13, %v10858_v45  ;;  %v10862_v63 = vld [vmem:[#allocation99_spill] sm:$0xff] }
 0x586   :  { %v2002_v10 = vmul.f32 0.5, %v2001_v5  ;;  %v2778_v4 = vmax.f32 %v2774_v31, 0.0  ;;  %v2842_v0 = vadd.f32 %v2838_v57, %v2834_v55  ;;  %v2910_v19 = vmul.f32 %v7512_v30, %v10859_v21  ;;  %v10864_v55 = vld [vmem:[#allocation10_spill] sm:$0xff]  ;;  %v10867_v45 = vld [vmem:[#allocation75_spill] sm:$0xff] }
 0x587   :  { %v7987_v5 = vstv %s7939_s28  ;;  %v7990_v37 = vstv %s7949_s8  ;;  %v7993_v40 = vmul.f32 %v2521_v33, %v10862_v63  ;;  %v2942_v24 = vmul.f32 %v7509_v13, %v10865_v28  ;;  %s9351_s28 = sld [smem:[#allocation2 + $0x90]] }
 0x588   :  { %v7982_v1 = vsub.f32 %v1999_v61, %v2002_v10  ;;  %v7984_v7 = vsub.f32 %v2000_v18, %v2002_v10  ;;  %10860 = vst [vmem:[#allocation22_spill] sm:$0xff] %v7987_v5  ;;  %v2782_v31 = vmul.f32 %v2778_v4, %v10863_v3  ;;  %v2790_v57 = vmul.f32 %v2778_v4, %v10864_v55  ;;  %v10866_v10 = vld [vmem:[#allocation14_spill] sm:$0xff]  ;;  %s9354_s8 = sld [smem:[#allocation2 + $0x8f]] }
 0x589   :  { %10861 = vst [vmem:[#allocation116_spill] sm:$0xff] %v7990_v37  ;;  %v2810_v21 = vadd.f32 %v2806_v6, %v10866_v10  ;;  %v2846_v15 = vadd.f32 %v2842_v0, %v10867_v45  ;;  %v2878_v2 = vadd.f32 %v2874_v34, %v2870_v8  ;;  %v2914_v38 = vadd.f32 %v2910_v19, %v2906_v29  ;;  %v10868_v55 = vld [vmem:[#allocation18_spill] sm:$0xff]  ;;  %v10872_v6 = vld [vmem:[#allocation94_spill] sm:$0xff]  ;;  %v10876_v19 = vld [vmem:[#allocation77_spill] sm:$0xff] }
 0x58a   :  { %v2005_v61 = vmul.f32 %v7982_v1, %v7982_v1  ;;  %v2006_v18 = vmul.f32 %v7984_v7, %v7984_v7  ;;  %v2786_v56 = vadd.f32 %v2782_v31, %v2750_v27  ;;  %v2794_v63 = vadd.f32 %v2790_v57, %v2758_v59  ;;  %v10873_v59 = vld [vmem:[#allocation15_spill] sm:$0xff]  ;;  %v10874_v34 = vld [vmem:[#allocation16_spill] sm:$0xff] }
 0x58b   :  { %v2814_v35 = vmax.f32 %v2810_v21, 0.0  ;;  %v2850_v4 = vmax.f32 %v2846_v15, 0.0  ;;  %v2946_v28 = vmul.f32 %v7512_v30, %v10868_v55  ;;  %v2882_v23 = vadd.f32 %v2878_v2, %v10869_v43  ;;  %v10875_v21 = vld [vmem:[#allocation76_spill] sm:$0xff]  ;;  %v10880_v45 = vld [vmem:[#allocation82_spill] sm:$0xff] }
 0x58c   :  { %v2007_v3 = vadd.f32 %v2006_v18, %v2005_v61  ;;  %v2918_v32 = vadd.f32 %v2914_v38, %v10870_v60  ;;  %v2978_v22 = vmul.f32 %v7509_v13, %v10871_v53  ;;  %v2982_v0 = vmul.f32 %v7512_v30, %v10872_v6  ;;  %v10877_v53 = vld [vmem:[#allocation100_spill] sm:$0xff] }
 0x58d   :  { %v2818_v8 = vmul.f32 %v2814_v35, %v10873_v59  ;;  %v2826_v29 = vmul.f32 %v2814_v35, %v10874_v34  ;;  %v2854_v15 = vmul.f32 %v2850_v4, %v10875_v21  ;;  %v2862_v31 = vmul.f32 %v2850_v4, %v10876_v19  ;;  %v10881_v35 = vld [vmem:[#allocation86_spill] sm:$0xff]  ;;  %11197 = sst [smem:[#allocation55_spill]] %s9351_s28 }
 0x58e   :  { %v2008_v27 = vmul.f32 0.5, %v2007_v3  ;;  %v2886_v57 = vmax.f32 %v2882_v23, 0.0  ;;  %v2922_v61 = vmax.f32 %v2918_v32, 0.0  ;;  %v2950_v2 = vadd.f32 %v2946_v28, %v2942_v24  ;;  %v10879_v3 = vld [vmem:[#allocation81_spill] sm:$0xff]  ;;  %v10882_v32 = vld [vmem:[#allocation87_spill] sm:$0xff]  ;;  %v10883_v28 = vld [vmem:[#allocation88_spill] sm:$0xff] }
 0x58f   :  { %v2822_v38 = vadd.f32 %v2818_v8, %v2786_v56  ;;  %v2830_v60 = vadd.f32 %v2826_v29, %v2794_v63  ;;  %v2986_v43 = vadd.f32 %v2982_v0, %v2978_v22  ;;  %v8020_v55 = vmul.f32 %v2521_v33, %v10877_v53  ;;  %v10884_v56 = vld [vmem:[#allocation95_spill] sm:$0xff]  ;;  %v10885_v22 = vld [vmem:[#allocation98_spill] sm:$0xff]  ;;  %v10886_v53 = vld [vmem:[#allocation101_spill] sm:$0xff] }
 0x590   :  { %v8017_v18 = vadd.f32 1e-05, %v2008_v27  ;;  %v2890_v6 = vmul.f32 %v2886_v57, %v10879_v3  ;;  %v2898_v59 = vmul.f32 %v2886_v57, %v10880_v45  ;;  %v2926_v34 = vmul.f32 %v2922_v61, %v10881_v35  ;;  %v10887_v57 = vld [vmem:[#allocation105_spill] sm:$0xff]  ;;  %v10888_v35 = vld [vmem:[#allocation106_spill] sm:$0xff] }
 0x591   :  { %10878 = vst [vmem:[#allocation99_spill] sm:$0xff] %v8020_v55  ;;  %v2858_v4 = vadd.f32 %v2854_v15, %v2822_v38  ;;  %v2866_v23 = vadd.f32 %v2862_v31, %v2830_v60  ;;  %v2934_v24 = vmul.f32 %v2922_v61, %v10882_v32  ;;  %v2954_v27 = vadd.f32 %v2950_v2, %v10883_v28  ;;  %v10892_v3 = vld [vmem:[#allocation97_spill] sm:$0xff] }
 0x592   :  { %5546 = vrsqrt.f32 %v8017_v18  ;;  %v2990_v63 = vadd.f32 %v2986_v43, %v10884_v56  ;;  %v3014_v33 = vmul.f32 %v7509_v13, %v10885_v22  ;;  %v3018_v0 = vmul.f32 %v7512_v30, %v10886_v53 }
 0x593   :  { %v2894_v8 = vadd.f32 %v2890_v6, %v2858_v4  ;;  %v2902_v29 = vadd.f32 %v2898_v59, %v2866_v23  ;;  %v3050_v55 = vmul.f32 %v7509_v13, %v10887_v57  ;;  %v3054_v60 = vmul.f32 %v7512_v30, %v10888_v35  ;;  %v10889_v6 = vld [vmem:[#allocation89_spill] sm:$0xff]  ;;  %v10890_v4 = vld [vmem:[#allocation91_spill] sm:$0xff]  ;;  %v10891_v57 = vld [vmem:[#allocation96_spill] sm:$0xff] }
 0x594   :  { %v2958_v15 = vmax.f32 %v2954_v27, 0.0  ;;  %v2994_v31 = vmax.f32 %v2990_v63, 0.0  ;;  %v3022_v61 = vadd.f32 %v3018_v0, %v3014_v33  ;;  %v3086_v43 = vmul.f32 %v7509_v13, %v7861_v54  ;;  %v10893_v63 = vld [vmem:[#allocation102_spill] sm:$0xff]  ;;  %v10894_v0 = vld [vmem:[#allocation107_spill] sm:$0xff] }
 0x595   :  { %v2930_v2 = vadd.f32 %v2926_v34, %v2894_v8  ;;  %v2938_v38 = vadd.f32 %v2934_v24, %v2902_v29  ;;  %v3058_v32 = vadd.f32 %v3054_v60, %v3050_v55  ;;  %v3090_v56 = vmul.f32 %v7512_v30, %v7869_v11  ;;  %v10895_v34 = vld [vmem:[#allocation90_spill] sm:$0xff]  ;;  %v10896_v11 = vld [vmem:[#allocation92_spill] sm:$0xff] }
 0x596   :  { %v2962_v59 = vmul.f32 %v2958_v15, %v10889_v6  ;;  %v2970_v23 = vmul.f32 %v2958_v15, %v10890_v4  ;;  %v2998_v45 = vmul.f32 %v2994_v31, %v10891_v57  ;;  %v3006_v35 = vmul.f32 %v2994_v31, %v10892_v3  ;;  %v10898_v57 = vld [vmem:[#allocation104_spill] sm:$0xff] }
 0x597   :  { %v3026_v33 = vadd.f32 %v3022_v61, %v10893_v63  ;;  %v3062_v28 = vadd.f32 %v3058_v32, %v10894_v0  ;;  %v3094_v54 = vadd.f32 %v3090_v56, %v3086_v43  ;;  %v2547_v55 = vmul.f32 %v10895_v34, %v7490_v39  ;;  %v10897_v0 = vld [vmem:[#allocation103_spill] sm:$0xff]  ;;  %v10899_v4 = vld [vmem:[#allocation108_spill] sm:$0xff] }
 0x598   :  { %v5547_v27 = vpop.eup %5546  ;;  %vm2016_vm1 = vweird.f32 %v8017_v18  ;;  %v2966_v8 = vadd.f32 %v2962_v59, %v2930_v2  ;;  %v2974_v29 = vadd.f32 %v2970_v23, %v2938_v38  ;;  %v2551_v61 = vmul.f32 %v10896_v11, %v7495_v9  ;;  %v10900_v38 = vld [vmem:[#allocation109_spill] sm:$0xff] }
 0x599   :  { %v2011_v24 = vmul.f32 %v5547_v27, %v8017_v18  ;;  %vm2017_vm3 = vweird.f32 %v5547_v27  ;;  %v3030_v60 = vmax.f32 %v3026_v33, 0.0  ;;  %v3066_v15 = vmax.f32 %v3062_v28, 0.0 }
 0x59a   :  { %v3098_v31 = vadd.f32 %v3094_v54, %v7882_v16  ;;  %v3002_v32 = vadd.f32 %v2998_v45, %v2966_v8  ;;  %v3010_v56 = vadd.f32 %v3006_v35, %v2974_v29  ;;  %v2583_v43 = vmul.f32 %v10895_v34, %v7498_v62  ;;  %vm2018_vm4 = vmor %vm2016_vm1, %vm2017_vm3 }
 0x59b   :  { %v2012_v3 = vmul.f32 %v5547_v27, %v2011_v24  ;;  %v3034_v39 = vmul.f32 %v3030_v60, %v10897_v0  ;;  %v3042_v63 = vmul.f32 %v3030_v60, %v10898_v57  ;;  %v3070_v2 = vmul.f32 %v3066_v15, %v10899_v4 }
 0x59c   :  { %v3078_v59 = vmul.f32 %v3066_v15, %v10900_v38  ;;  %v3102_v54 = vmax.f32 %v3098_v31, 0.0  ;;  %v2555_v23 = vadd.f32 %v2551_v61, %v2547_v55  ;;  %v2587_v45 = vmul.f32 %v10896_v11, %v7501_v46  ;;  %v10902_v15 = vld [vmem:[#allocation47_spill] sm:$0xff] }
 0x59d   :  { %v2013_v28 = vmul.f32 0.5, %v2012_v3  ;;  %v3038_v35 = vadd.f32 %v3034_v39, %v3002_v32  ;;  %v3046_v33 = vadd.f32 %v3042_v63, %v3010_v56  ;;  %v2619_v24 = vmul.f32 %v10895_v34, %v7504_v12  ;;  %v10901_v3 = vld [vmem:[#allocation113_spill] sm:$0xff] }
 0x59e   :  { %v2623_v8 = vmul.f32 %v10896_v11, %v7515_v25  ;;  %v3106_v60 = vmul.f32 %v3102_v54, %v10901_v3  ;;  %v3114_v55 = vmul.f32 %v3102_v54, %v7936_v14  ;;  %v2559_v31 = vadd.f32 %v2555_v23, %v10902_v15 }
 0x59f   :  { %v2014_v29 = vsub.f32 1.5, %v2013_v28  ;;  %v3074_v61 = vadd.f32 %v3070_v2, %v3038_v35  ;;  %v3082_v38 = vadd.f32 %v3078_v59, %v3046_v33  ;;  %v2591_v4 = vadd.f32 %v2587_v45, %v2583_v43  ;;  %v10903_v2 = vld [vmem:[#allocation49_spill] sm:$0xff]  ;;  %v10905_v33 = vld [vmem:[#allocation42_spill] sm:$0xff] }
 0x5a0   :  { %v2627_v39 = vadd.f32 %v2623_v8, %v2619_v24  ;;  %v2563_v32 = vmax.f32 %v2559_v31, 0.0  ;;  %v2655_v56 = vmul.f32 %v10895_v34, %v7529_v20  ;;  %v2659_v28 = vmul.f32 %v10896_v11, %v7534_v42 }
 0x5a1   :  { %v2015_v63 = vmul.f32 %v5547_v27, %v2014_v29  ;;  %v3110_v54 = vadd.f32 %v3106_v60, %v3074_v61  ;;  %v3118_v23 = vadd.f32 %v3114_v55, %v3082_v38  ;;  %v2595_v43 = vadd.f32 %v2591_v4, %v10903_v2  ;;  %v10908_v60 = vld [vmem:[#allocation48_spill] sm:$0xff] }
 0x5a2   :  { %v2631_v59 = vadd.f32 %v2627_v39, %v7526_v26  ;;  %v8088_v45 = vmul.f32 %v7993_v40, %v7457_v44  ;;  %v2567_v24 = vmul.f32 %v2563_v32, %v10905_v33  ;;  %v2663_v18 = vadd.f32 %v2659_v28, %v2655_v56  ;;  %v10952_v26 = vld [vmem:[#allocation105_spill] sm:$0xff] }
 0x5a3   :  { %v2019_v35 = vsel %vm2018_vm4, %v5547_v27, %v2015_v63  ;;  %v3122_v4 = vadd.f32 %v3110_v54, %v7509_v13  ;;  %v3130_v29 = vadd.f32 %v3118_v23, %v7512_v30  ;;  %v2575_v40 = vmul.f32 %v2563_v32, %v10908_v60  ;;  %v10912_v63 = vld [vmem:[#allocation51_spill] sm:$0xff]  ;;  %v10913_v32 = vld [vmem:[#allocation32_spill] sm:$0xff] }
 0x5a4   :  { %10904 = vst [vmem:[#allocation100_spill] sm:$0xff] %v8088_v45  ;;  %v8092_v8 = vmul.f32 %v2019_v35, %v7982_v1  ;;  %v8095_v38 = vmul.f32 %v2019_v35, %v7984_v7  ;;  %v2599_v55 = vmax.f32 %v2595_v43, 0.0  ;;  %v2635_v27 = vmax.f32 %v2631_v59, 0.0 }
 0x5a5   :  { %v2667_v31 = vadd.f32 %v2663_v18, %v7537_v52  ;;  %v8104_v61 = vstv %s8060_s3  ;;  %v8107_v39 = vstv %s8064_s19  ;;  %v3126_v7 = vadd.f32 %v3122_v4, %v7987_v5  ;;  %v10914_v4 = vld [vmem:[#allocation35_spill] sm:$0xff]  ;;  %s9358_s3 = sld [smem:[#allocation2 + $0x91]] }
 0x5a6   :  { %10906 = vst [vmem:[#allocation90_spill] sm:$0xff] %v8092_v8  ;;  %v3134_v1 = vadd.f32 %v3130_v29, %v7990_v37  ;;  %v8112_v13 = vstv %s8070_s21  ;;  %v2603_v30 = vmul.f32 %v2599_v55, %v7551_v41  ;;  %v2611_v56 = vmul.f32 %v2599_v55, %v10912_v63  ;;  %s9362_s19 = sld [smem:[#allocation2 + $0x92]] }
 0x5a7   :  { %10907 = vst [vmem:[#allocation92_spill] sm:$0xff] %v8095_v38  ;;  %v2691_v28 = vmul.f32 %v10895_v34, %v10913_v32  ;;  %v2639_v23 = vmul.f32 %v2635_v27, %v7568_v58  ;;  %v2647_v43 = vmul.f32 %v2635_v27, %v7576_v48  ;;  %v2671_v59 = vmax.f32 %v2667_v31, 0.0  ;;  %v10915_v38 = vld [vmem:[#allocation34_spill] sm:$0xff]  ;;  %s9365_s21 = sld [smem:[#allocation2 + $0xa2]] }
 0x5a8   :  { %10909 = vst [vmem:[#allocation117_spill] sm:$0xff] %v8104_v61  ;;  %v3138_v54 = vadd.f32 %v3134_v1, %v3126_v7  ;;  %v2607_v35 = vadd.f32 %v2603_v30, %v2567_v24  ;;  %v2615_v18 = vadd.f32 %v2611_v56, %v2575_v40  ;;  %v2695_v29 = vmul.f32 %v10896_v11, %v10914_v4  ;;  %v10917_v58 = vld [vmem:[#allocation46_spill] sm:$0xff] }
 0x5a9   :  { %10910 = vst [vmem:[#allocation118_spill] sm:$0xff] %v8107_v39  ;;  %v2727_v44 = vmul.f32 %v10895_v34, %v10915_v38  ;;  %v8127_v55 = vstv %s8082_s22  ;;  %v2675_v45 = vmul.f32 %v2671_v59, %v7579_v50  ;;  %v2731_v27 = vmul.f32 %v10896_v11, %v10917_v58  ;;  %s9368_s22 = sld [smem:[#allocation2 + $0xb2]] }
 0x5aa   :  { %10911 = vst [vmem:[#allocation119_spill] sm:$0xff] %v8112_v13  ;;  %v3142_v8 = vmul.f32 0.5, %v3138_v54  ;;  %v2643_v24 = vadd.f32 %v2639_v23, %v2607_v35  ;;  %v2651_v40 = vadd.f32 %v2647_v43, %v2615_v18  ;;  %v2699_v31 = vadd.f32 %v2695_v29, %v2691_v28  ;;  %v10919_v35 = vld [vmem:[#allocation11_spill] sm:$0xff]  ;;  %v10920_v18 = vld [vmem:[#allocation13_spill] sm:$0xff] }
 0x5ab   :  { %10916 = vst [vmem:[#allocation120_spill] sm:$0xff] %v8127_v55  ;;  %v2763_v30 = vmul.f32 %v10895_v34, %v10843_v17  ;;  %v2683_v54 = vmul.f32 %v2671_v59, %v7582_v36  ;;  %v2735_v50 = vadd.f32 %v2731_v27, %v2727_v44  ;;  %v8146_v38 = vstv %s8099_s16  ;;  %v10922_v36 = vld [vmem:[#allocation73_spill] sm:$0xff]  ;;  %v10926_v17 = vld [vmem:[#allocation8_spill] sm:$0xff]  ;;  %11198 = sst [smem:[#allocation56_spill]] %s9358_s3 }
 0x5ac   :  { %v8138_v56 = vsub.f32 %v3126_v7, %v3142_v8  ;;  %v8140_v48 = vsub.f32 %v3134_v1, %v3142_v8  ;;  %10918 = vst [vmem:[#allocation121_spill] sm:$0xff] %v8146_v38  ;;  %v2679_v58 = vadd.f32 %v2675_v45, %v2643_v24  ;;  %v2703_v23 = vadd.f32 %v2699_v31, %v7591_v49  ;;  %v10928_v49 = vld [vmem:[#allocation74_spill] sm:$0xff]  ;;  %11199 = sst [smem:[#allocation57_spill]] %s9362_s19 }
 0x5ad   :  { %v2767_v28 = vmul.f32 %v10896_v11, %v10845_v51  ;;  %v2687_v1 = vadd.f32 %v2683_v54, %v2651_v40  ;;  %v2739_v43 = vadd.f32 %v2735_v50, %v10839_v47  ;;  %v2799_v45 = vmul.f32 %v10895_v34, %v10919_v35  ;;  %v10923_v40 = vld [vmem:[#allocation37_spill] sm:$0xff]  ;;  %v10924_v54 = vld [vmem:[#allocation43_spill] sm:$0xff]  ;;  %11200 = sst [smem:[#allocation58_spill]] %s9365_s21 }
 0x5ae   :  { %v3154_v7 = vmul.f32 %v8138_v56, %v8138_v56  ;;  %v3158_v8 = vmul.f32 %v8140_v48, %v8140_v48  ;;  %v2707_v44 = vmax.f32 %v2703_v23, 0.0  ;;  %v2803_v29 = vmul.f32 %v10896_v11, %v10920_v18  ;;  %v10925_v23 = vld [vmem:[#allocation19_spill] sm:$0xff]  ;;  %s9370_s16 = sld [smem:[#allocation2 + $0xc2]] }
 0x5af   :  { %v2771_v59 = vadd.f32 %v2767_v28, %v2763_v30  ;;  %v8163_v24 = vstv %s8118_s10  ;;  %v2743_v31 = vmax.f32 %v2739_v43, 0.0  ;;  %v2835_v51 = vmul.f32 %v10895_v34, %v10922_v36  ;;  %11201 = sst [smem:[#allocation59_spill]] %s9368_s22 }
 0x5b0   :  { %v3162_v27 = vadd.f32 %v3158_v8, %v3154_v7  ;;  %10921 = vst [vmem:[#allocation122_spill] sm:$0xff] %v8163_v24  ;;  %v2711_v50 = vmul.f32 %v2707_v44, %v10923_v40  ;;  %v2719_v30 = vmul.f32 %v2707_v44, %v10924_v54  ;;  %v2807_v35 = vadd.f32 %v2803_v29, %v2799_v45  ;;  %v10927_v7 = vld [vmem:[#allocation9_spill] sm:$0xff]  ;;  %s9372_s10 = sld [smem:[#allocation2 + $0xd2]] }
 0x5b1   :  { %v2775_v28 = vadd.f32 %v2771_v59, %v10925_v23  ;;  %v2747_v18 = vmul.f32 %v2743_v31, %v10926_v17  ;;  %v2755_v8 = vmul.f32 %v2743_v31, %v10927_v7  ;;  %v2839_v43 = vmul.f32 %v10896_v11, %v10928_v49  ;;  %v10932_v17 = vld [vmem:[#allocation28_spill] sm:$0xff]  ;;  %v10933_v7 = vld [vmem:[#allocation10_spill] sm:$0xff]  ;;  %v10936_v49 = vld [vmem:[#allocation79_spill] sm:$0xff] }
 0x5b2   :  { %v3166_v47 = vmul.f32 0.5, %v3162_v27  ;;  %v2715_v52 = vadd.f32 %v2711_v50, %v2679_v58  ;;  %v2723_v63 = vadd.f32 %v2719_v30, %v2687_v1  ;;  %v2811_v41 = vadd.f32 %v2807_v35, %v10866_v10  ;;  %v10935_v30 = vld [vmem:[#allocation78_spill] sm:$0xff] }
 0x5b3   :  { %v2779_v36 = vmax.f32 %v2775_v28, 0.0  ;;  %v8178_v44 = vstv %s8129_s24  ;;  %v8181_v59 = vstv %s8134_s25  ;;  %v8184_v45 = vstv %s8142_s5  ;;  %s9374_s24 = sld [smem:[#allocation2 + $0x93]] }
 0x5b4   :  { %v8175_v40 = vadd.f32 1e-05, %v3166_v47  ;;  %10929 = vst [vmem:[#allocation123_spill] sm:$0xff] %v8178_v44  ;;  %v2751_v29 = vadd.f32 %v2747_v18, %v2715_v52  ;;  %v2759_v27 = vadd.f32 %v2755_v8, %v2723_v63  ;;  %v8190_v58 = vstv %s8155_s27  ;;  %v10937_v52 = vld [vmem:[#allocation15_spill] sm:$0xff]  ;;  %v10938_v18 = vld [vmem:[#allocation16_spill] sm:$0xff]  ;;  %11202 = sst [smem:[#allocation60_spill]] %s9370_s16 }
 0x5b5   :  { %10930 = vst [vmem:[#allocation124_spill] sm:$0xff] %v8181_v59  ;;  %v2783_v31 = vmul.f32 %v2779_v36, %v10932_v17  ;;  %v2791_v23 = vmul.f32 %v2779_v36, %v10933_v7  ;;  %v2815_v1 = vmax.f32 %v2811_v41, 0.0  ;;  %v2843_v35 = vadd.f32 %v2839_v43, %v2835_v51  ;;  %v10939_v17 = vld [vmem:[#allocation75_spill] sm:$0xff]  ;;  %v10941_v41 = vld [vmem:[#allocation84_spill] sm:$0xff]  ;;  %s9378_s25 = sld [smem:[#allocation2 + $0xa3]] }
 0x5b6   :  { %10931 = vst [vmem:[#allocation125_spill] sm:$0xff] %v8184_v45  ;;  %5548 = vrsqrt.f32 %v8175_v40  ;;  %v2871_v28 = vmul.f32 %v10895_v34, %v10935_v30  ;;  %v2875_v10 = vmul.f32 %v10896_v11, %v10936_v49  ;;  %v10940_v7 = vld [vmem:[#allocation83_spill] sm:$0xff]  ;;  %v2911_v51 = vmul.f32 %v10896_v11, %v10941_v41  ;;  %v10944_v30 = vld [vmem:[#allocation93_spill] sm:$0xff]  ;;  %11203 = sst [smem:[#allocation61_spill]] %s9372_s10 }
 0x5b7   :  { %10934 = vst [vmem:[#allocation126_spill] sm:$0xff] %v8190_v58  ;;  %v2787_v47 = vadd.f32 %v2783_v31, %v2751_v29  ;;  %v2795_v50 = vadd.f32 %v2791_v23, %v2759_v27  ;;  %v2819_v63 = vmul.f32 %v2815_v1, %v10937_v52  ;;  %v2827_v8 = vmul.f32 %v2815_v1, %v10938_v18  ;;  %v10942_v23 = vld [vmem:[#allocation17_spill] sm:$0xff]  ;;  %v10943_v29 = vld [vmem:[#allocation18_spill] sm:$0xff]  ;;  %s9380_s5 = sld [smem:[#allocation2 + $0xb3]] }
 0x5b8   :  { %v2847_v36 = vadd.f32 %v2843_v35, %v10939_v17  ;;  %v2907_v54 = vmul.f32 %v10895_v34, %v10940_v7  ;;  %v2879_v37 = vadd.f32 %v2875_v10, %v2871_v28  ;;  %v2943_v43 = vmul.f32 %v10895_v34, %v10942_v23  ;;  %v10945_v35 = vld [vmem:[#allocation80_spill] sm:$0xff]  ;;  %v10946_v10 = vld [vmem:[#allocation94_spill] sm:$0xff]  ;;  %s9383_s27 = sld [smem:[#allocation2 + $0xc3]] }
 0x5b9   :  { %v2947_v27 = vmul.f32 %v10896_v11, %v10943_v29  ;;  %v2823_v31 = vadd.f32 %v2819_v63, %v2787_v47  ;;  %v2831_v49 = vadd.f32 %v2827_v8, %v2795_v50  ;;  %v2979_v1 = vmul.f32 %v10895_v34, %v10944_v30  ;;  %v10951_v29 = vld [vmem:[#allocation95_spill] sm:$0xff]  ;;  %11204 = sst [smem:[#allocation62_spill]] %s9374_s24 }
 0x5ba   :  { %v2851_v52 = vmax.f32 %v2847_v36, 0.0  ;;  %v2883_v17 = vadd.f32 %v2879_v37, %v10945_v35  ;;  %v2915_v18 = vadd.f32 %v2911_v51, %v2907_v54  ;;  %v2983_v28 = vmul.f32 %v10896_v11, %v10946_v10  ;;  %v10947_v54 = vld [vmem:[#allocation85_spill] sm:$0xff] }
 0x5bb   :  { %v2951_v7 = vadd.f32 %v2947_v27, %v2943_v43  ;;  %v3015_v47 = vmul.f32 %v10895_v34, %v10885_v22  ;;  %v3019_v50 = vmul.f32 %v10896_v11, %v10886_v53  ;;  %vm3180_vm5 = vweird.f32 %v8175_v40  ;;  %v10948_v43 = vld [vmem:[#allocation88_spill] sm:$0xff]  ;;  %v10950_v22 = vld [vmem:[#allocation82_spill] sm:$0xff]  ;;  %11205 = sst [smem:[#allocation63_spill]] %s9378_s25 }
 0x5bc   :  { %v5549_v41 = vpop.eup %5548  ;;  %v2855_v5 = vmul.f32 %v2851_v52, %v10875_v21  ;;  %v2863_v23 = vmul.f32 %v2851_v52, %v10876_v19  ;;  %v2887_v37 = vmax.f32 %v2883_v17, 0.0  ;;  %v2919_v8 = vadd.f32 %v2915_v18, %v10947_v54  ;;  %v10949_v19 = vld [vmem:[#allocation81_spill] sm:$0xff] }
 0x5bd   :  { %v3175_v63 = vmul.f32 %v5549_v41, %v8175_v40  ;;  %vm3181_vm6 = vweird.f32 %v5549_v41  ;;  %v2955_v27 = vadd.f32 %v2951_v7, %v10948_v43  ;;  %v2987_v21 = vadd.f32 %v2983_v28, %v2979_v1  ;;  %v10954_v7 = vld [vmem:[#allocation87_spill] sm:$0xff]  ;;  %11206 = sst [smem:[#allocation64_spill]] %s9380_s5 }
 0x5be   :  { %v2859_v36 = vadd.f32 %v2855_v5, %v2823_v31  ;;  %v2867_v51 = vadd.f32 %v2863_v23, %v2831_v49  ;;  %v2891_v10 = vmul.f32 %v2887_v37, %v10949_v19  ;;  %v2899_v35 = vmul.f32 %v2887_v37, %v10950_v22  ;;  %v10953_v49 = vld [vmem:[#allocation86_spill] sm:$0xff]  ;;  %v10955_v28 = vld [vmem:[#allocation91_spill] sm:$0xff]  ;;  %vm3182_vm7 = vmor %vm3180_vm5, %vm3181_vm6  ;;  %11207 = sst [smem:[#allocation65_spill]] %s9383_s27 }
 0x5bf   :  { %v3176_v52 = vmul.f32 %v5549_v41, %v3175_v63  ;;  %v2923_v30 = vmax.f32 %v2919_v8, 0.0  ;;  %v2959_v53 = vmax.f32 %v2955_v27, 0.0  ;;  %v2991_v4 = vadd.f32 %v2987_v21, %v10951_v29  ;;  %v10956_v22 = vld [vmem:[#allocation102_spill] sm:$0xff] }
 0x5c0   :  { %v3023_v32 = vadd.f32 %v3019_v50, %v3015_v47  ;;  %v3051_v17 = vmul.f32 %v10895_v34, %v10952_v26  ;;  %v2895_v18 = vadd.f32 %v2891_v10, %v2859_v36  ;;  %v2903_v5 = vadd.f32 %v2899_v35, %v2867_v51  ;;  %v10957_v47 = vld [vmem:[#allocation106_spill] sm:$0xff]  ;;  %v10959_v35 = vld [vmem:[#allocation97_spill] sm:$0xff] }
 0x5c1   :  { %v3177_v42 = vmul.f32 0.5, %v3176_v52  ;;  %v2927_v23 = vmul.f32 %v2923_v30, %v10953_v49  ;;  %v2935_v31 = vmul.f32 %v2923_v30, %v10954_v7  ;;  %v2963_v1 = vmul.f32 %v2959_v53, %v10889_v6  ;;  %v10958_v52 = vld [vmem:[#allocation96_spill] sm:$0xff]  ;;  %v10960_v51 = vld [vmem:[#allocation110_spill] sm:$0xff] }
 0x5c2   :  { %v2971_v63 = vmul.f32 %v2959_v53, %v10955_v28  ;;  %v2995_v37 = vmax.f32 %v2991_v4, 0.0  ;;  %v3027_v21 = vadd.f32 %v3023_v32, %v10956_v22  ;;  %v3055_v50 = vmul.f32 %v10896_v11, %v10957_v47  ;;  %v10961_v32 = vld [vmem:[#allocation111_spill] sm:$0xff] }
 0x5c3   :  { %v3178_v8 = vsub.f32 1.5, %v3177_v42  ;;  %v2931_v27 = vadd.f32 %v2927_v23, %v2895_v18  ;;  %v2939_v26 = vadd.f32 %v2935_v31, %v2903_v5  ;;  %v3087_v30 = vmul.f32 %v10895_v34, %v10960_v51  ;;  %v10962_v18 = vld [vmem:[#allocation27_spill] sm:$0xff]  ;;  %v10963_v5 = vld [vmem:[#allocation115_spill] sm:$0xff] }
 0x5c4   :  { %v2999_v10 = vmul.f32 %v2995_v37, %v10958_v52  ;;  %v3007_v36 = vmul.f32 %v2995_v37, %v10959_v35  ;;  %v3031_v49 = vmax.f32 %v3027_v21, 0.0  ;;  %v3059_v53 = vadd.f32 %v3055_v50, %v3051_v17  ;;  %v10964_v31 = vld [vmem:[#allocation21_spill] sm:$0xff] }
 0x5c5   :  { %v3179_v7 = vmul.f32 %v5549_v41, %v3178_v8  ;;  %v2967_v6 = vadd.f32 %v2963_v1, %v2931_v27  ;;  %v2975_v42 = vadd.f32 %v2971_v63, %v2939_v26  ;;  %v3091_v4 = vmul.f32 %v10896_v11, %v10961_v32  ;;  %v10965_v63 = vld [vmem:[#allocation107_spill] sm:$0xff] }
 0x5c6   :  { %v2548_v23 = vmul.f32 %v10963_v5, %v10962_v18  ;;  %v2552_v37 = vmul.f32 %v10964_v31, %v7495_v9  ;;  %v3035_v1 = vmul.f32 %v3031_v49, %v10897_v0  ;;  %v3043_v17 = vmul.f32 %v3031_v49, %v10898_v57 }
 0x5c7   :  { %v3183_v22 = vsel %vm3182_vm7, %v5549_v41, %v3179_v7  ;;  %v3003_v35 = vadd.f32 %v2999_v10, %v2967_v6  ;;  %v3011_v26 = vadd.f32 %v3007_v36, %v2975_v42  ;;  %v3063_v27 = vadd.f32 %v3059_v53, %v10965_v63  ;;  %v10967_v42 = vld [vmem:[#allocation109_spill] sm:$0xff] }
 0x5c8   :  { %v3214_v8 = vmul.f32 %v3183_v22, %v8138_v56  ;;  %v3226_v40 = vmul.f32 %v3183_v22, %v8140_v48  ;;  %v3095_v50 = vadd.f32 %v3091_v4, %v3087_v30  ;;  %v2556_v32 = vadd.f32 %v2552_v37, %v2548_v23  ;;  %v10966_v30 = vld [vmem:[#allocation108_spill] sm:$0xff] }
 0x5c9   :  { %v3039_v21 = vadd.f32 %v3035_v1, %v3003_v35  ;;  %v2584_v18 = vmul.f32 %v10963_v5, %v7498_v62  ;;  %v3047_v7 = vadd.f32 %v3043_v17, %v3011_v26  ;;  %v3067_v10 = vmax.f32 %v3063_v27, 0.0 }
 0x5ca   :  { %v3218_v41 = vmul.f32 %v3214_v8, %v8104_v61  ;;  %v3230_v6 = vmul.f32 %v3226_v40, %v8112_v13  ;;  %v3099_v49 = vadd.f32 %v3095_v50, %v7882_v16  ;;  %v2560_v56 = vadd.f32 %v2556_v32, %v10902_v15 }
 0x5cb   :  { %v2588_v48 = vmul.f32 %v10964_v31, %v7501_v46  ;;  %v2620_v22 = vmul.f32 %v10963_v5, %v7504_v12  ;;  %v3071_v53 = vmul.f32 %v3067_v10, %v10966_v30  ;;  %v3079_v4 = vmul.f32 %v3067_v10, %v10967_v42 }
 0x5cc   :  { %v8263_v35 = vadd.f32 %v3218_v41, %v8107_v39  ;;  %v8266_v36 = vadd.f32 %v3230_v6, %v8127_v55  ;;  %v3103_v23 = vmax.f32 %v3099_v49, 0.0  ;;  %v2564_v37 = vmax.f32 %v2560_v56, 0.0 }
 0x5cd   :  { %v2592_v1 = vadd.f32 %v2588_v48, %v2584_v18  ;;  %v2624_v32 = vmul.f32 %v10964_v31, %v7515_v25  ;;  %v3075_v27 = vadd.f32 %v3071_v53, %v3039_v21  ;;  %v3083_v50 = vadd.f32 %v3079_v4, %v3047_v7  ;;  %v10968_v53 = vld [vmem:[#allocation39_spill] sm:$0xff] }
 0x5ce   :  { %v3290_v17 = vmul.f32 %v8146_v38, %v8263_v35  ;;  %v3295_v8 = vmul.f32 %v8163_v24, %v8266_v36  ;;  %v3271_v40 = vmul.f32 %v8181_v59, %v8263_v35  ;;  %v3276_v26 = vmul.f32 %v8184_v45, %v8266_v36 }
 0x5cf   :  { %v3107_v41 = vmul.f32 %v3103_v23, %v10901_v3  ;;  %v3115_v18 = vmul.f32 %v3103_v23, %v7936_v14  ;;  %v2568_v49 = vmul.f32 %v2564_v37, %v10905_v33  ;;  %v2576_v56 = vmul.f32 %v2564_v37, %v10908_v60  ;;  %v11026_v14 = vld [vmem:[#allocation75_spill] sm:$0xff] }
 0x5d0   :  { %v3299_v6 = vadd.f32 %v3295_v8, %v3290_v17  ;;  %v3280_v10 = vadd.f32 %v3276_v26, %v3271_v40  ;;  %v2596_v12 = vadd.f32 %v2592_v1, %v10903_v2  ;;  %v2628_v15 = vadd.f32 %v2624_v32, %v2620_v22  ;;  %v10969_v8 = vld [vmem:[#allocation26_spill] sm:$0xff]  ;;  %v10970_v32 = vld [vmem:[#allocation32_spill] sm:$0xff]  ;;  %v10971_v26 = vld [vmem:[#allocation35_spill] sm:$0xff] }
 0x5d1   :  { %v3111_v48 = vadd.f32 %v3107_v41, %v3075_v27  ;;  %v3119_v25 = vadd.f32 %v3115_v18, %v3083_v50  ;;  %v2656_v7 = vmul.f32 %v10963_v5, %v7529_v20  ;;  %v2660_v4 = vmul.f32 %v10964_v31, %v10968_v53  ;;  %v10972_v50 = vld [vmem:[#allocation22_spill] sm:$0xff]  ;;  %v10986_v20 = vld [vmem:[#allocation52_spill] sm:$0xff] }
 0x5d2   :  { %v8286_v46 = vadd.f32 %v8178_v44, %v3299_v6  ;;  %v8289_v21 = vadd.f32 %v8190_v58, %v3280_v10  ;;  %v2600_v17 = vmax.f32 %v2596_v12, 0.0  ;;  %v2632_v1 = vadd.f32 %v2628_v15, %v10969_v8  ;;  %v10973_v18 = vld [vmem:[#allocation116_spill] sm:$0xff]  ;;  %v10974_v12 = vld [vmem:[#allocation31_spill] sm:$0xff]  ;;  %v11024_v58 = vld [vmem:[#allocation16_spill] sm:$0xff] }
 0x5d3   :  { %v3123_v23 = vadd.f32 %v3111_v48, %v10895_v34  ;;  %v3131_v37 = vadd.f32 %v3119_v25, %v10896_v11  ;;  %v2664_v22 = vadd.f32 %v2660_v4, %v2656_v7  ;;  %v2692_v40 = vmul.f32 %v10963_v5, %v10970_v32  ;;  %v10975_v11 = vld [vmem:[#allocation51_spill] sm:$0xff]  ;;  %v10976_v10 = vld [vmem:[#allocation50_spill] sm:$0xff] }
 0x5d4   :  { %3373 = vperm.xlu1 %5330, %v8286_v46   ;;  %3348 = vperm.xlu2 %5329, %v8289_v21   ;;  %v2696_v27 = vmul.f32 %v10964_v31, %v10971_v26  ;;  %v2604_v25 = vmul.f32 %v2600_v17, %v10974_v12  ;;  %v2612_v15 = vmul.f32 %v2600_v17, %v10975_v11  ;;  %v2636_v6 = vmax.f32 %v2632_v1, 0.0  ;;  %v10977_v4 = vld [vmem:[#allocation34_spill] sm:$0xff]  ;;  %v10979_v17 = vld [vmem:[#allocation33_spill] sm:$0xff]  ;;  %v10983_v32 = vld [vmem:[#allocation23_spill] sm:$0xff] }
 0x5d5   :  { %v3127_v41 = vadd.f32 %v3123_v23, %v10972_v50  ;;  %v3135_v34 = vadd.f32 %v3131_v37, %v10973_v18  ;;  %v2668_v48 = vadd.f32 %v2664_v22, %v10976_v10  ;;  %v2728_v8 = vmul.f32 %v10963_v5, %v10977_v4  ;;  %v10978_v18 = vld [vmem:[#allocation46_spill] sm:$0xff]  ;;  %v10980_v12 = vld [vmem:[#allocation45_spill] sm:$0xff]  ;;  %v10981_v22 = vld [vmem:[#allocation36_spill] sm:$0xff] }
 0x5d6   :  { %v2700_v7 = vadd.f32 %v2696_v27, %v2692_v40  ;;  %v2608_v23 = vadd.f32 %v2604_v25, %v2568_v49  ;;  %v2616_v37 = vadd.f32 %v2612_v15, %v2576_v56  ;;  %v2732_v50 = vmul.f32 %v10964_v31, %v10978_v18  ;;  %v10982_v4 = vld [vmem:[#allocation12_spill] sm:$0xff]  ;;  %v10985_v25 = vld [vmem:[#allocation99_spill] sm:$0xff]  ;;  %v11007_v44 = vld [vmem:[#allocation30_spill] sm:$0xff] }
 0x5d7   :  { %v3139_v26 = vadd.f32 %v3135_v34, %v3127_v41  ;;  %v2640_v11 = vmul.f32 %v2636_v6, %v10979_v17  ;;  %v2648_v1 = vmul.f32 %v2636_v6, %v10980_v12  ;;  %v2672_v60 = vmax.f32 %v2668_v48, 0.0  ;;  %v10984_v56 = vld [vmem:[#allocation44_spill] sm:$0xff] }
 0x5d8   :  { %v2704_v40 = vadd.f32 %v2700_v7, %v10981_v22  ;;  %v2736_v10 = vadd.f32 %v2732_v50, %v2728_v8  ;;  %v2764_v33 = vmul.f32 %v10963_v5, %v10982_v4  ;;  %v2768_v49 = vmul.f32 %v10964_v31, %v10983_v32  ;;  %v10989_v32 = vld [vmem:[#allocation53_spill] sm:$0xff] }
 0x5d9   :  { %v3143_v27 = vmul.f32 0.5, %v3139_v26  ;;  %v2541_v15 = vmul.f32 %v10985_v25, %v10984_v56  ;;  %v2644_v18 = vadd.f32 %v2640_v11, %v2608_v23  ;;  %v2652_v53 = vadd.f32 %v2648_v1, %v2616_v37  ;;  %v10987_v26 = vld [vmem:[#allocation54_spill] sm:$0xff]  ;;  %v10992_v37 = vld [vmem:[#allocation19_spill] sm:$0xff]  ;;  %v10994_v25 = vld [vmem:[#allocation8_spill] sm:$0xff] }
 0x5da   :  { %v2676_v17 = vmul.f32 %v2672_v60, %v10986_v20  ;;  %v2708_v48 = vmax.f32 %v2704_v40, 0.0  ;;  %v2740_v8 = vadd.f32 %v2736_v10, %v10987_v26  ;;  %v10988_v50 = vmov 1   ;;  %v10991_v10 = vld [vmem:[#allocation43_spill] sm:$0xff]  ;;  %v11004_v56 = vld [vmem:[#allocation29_spill] sm:$0xff] }
 0x5db   :  { %v8331_v2 = vsub.f32 %v3127_v41, %v3143_v27  ;;  %v8333_v6 = vsub.f32 %v3135_v34, %v3143_v27  ;;  %v2684_v12 = vmul.f32 %v2672_v60, %v10989_v32  ;;  %v2772_v4 = vadd.f32 %v2768_v49, %v2764_v33  ;;  %v10993_v1 = vld [vmem:[#allocation11_spill] sm:$0xff]  ;;  %v10995_v32 = vld [vmem:[#allocation13_spill] sm:$0xff] }
 0x5dc   :  { %5332 = vset.pattern.permute.xlu1 %v10988_v50  ;;  %5331 = vset.pattern.permute.xlu2 %v10988_v50  ;;  %v2680_v7 = vadd.f32 %v2676_v17, %v2644_v18  ;;  %v10990_v18 = vld [vmem:[#allocation37_spill] sm:$0xff]  ;;  %v2744_v60 = vmax.f32 %v2740_v8, 0.0  ;;  %v2720_v23 = vmul.f32 %v2708_v48, %v10991_v10  ;;  %v2800_v40 = vmul.f32 %v10963_v5, %v10993_v1 }
 0x5dd   :  { %3539 = vperm.xlu1 %5332, %v8286_v46   ;;  %3518 = vperm.xlu2 %5331, %v8289_v21   ;;  %v3155_v41 = vmul.f32 %v8331_v2, %v8331_v2  ;;  %v3159_v34 = vmul.f32 %v8333_v6, %v8333_v6  ;;  %v2712_v11 = vmul.f32 %v2708_v48, %v10990_v18  ;;  %v8358_v22 = vstv %s8306_s15  ;;  %s9385_s15 = sld [smem:[#allocation2 + $0xd3]] }
 0x5de   :  { %v2688_v33 = vadd.f32 %v2684_v12, %v2652_v53  ;;  %v2776_v17 = vadd.f32 %v2772_v4, %v10992_v37  ;;  %v2748_v26 = vmul.f32 %v2744_v60, %v10994_v25  ;;  %v2804_v20 = vmul.f32 %v10964_v31, %v10995_v32  ;;  %10996 = vst [vmem:[#allocation115_spill] sm:$0xff] %v8358_v22  ;;  %v11001_v37 = vld [vmem:[#allocation25_spill] sm:$0xff]  ;;  %v11002_v25 = vld [vmem:[#allocation100_spill] sm:$0xff] }
 0x5df   :  { %v3163_v27 = vadd.f32 %v3159_v34, %v3155_v41  ;;  %v2716_v49 = vadd.f32 %v2712_v11, %v2680_v7  ;;  %v8361_v8 = vstv %s8310_s12  ;;  %v8364_v18 = vstv %s8315_s9  ;;  %v11000_v7 = vld [vmem:[#allocation9_spill] sm:$0xff]  ;;  %s9387_s12 = sld [smem:[#allocation2 + $0x94]] }
 0x5e0   :  { %10997 = vst [vmem:[#allocation21_spill] sm:$0xff] %v8361_v8  ;;  %v8367_v53 = vstv %s8319_s29  ;;  %v3328_v4 = vmul.f32 %v8358_v22, %v8263_v35  ;;  %v3333_v48 = vmul.f32 %v8361_v8, %v8266_v36  ;;  %v2756_v41 = vmul.f32 %v2744_v60, %v11000_v7  ;;  %v11006_v7 = vld [vmem:[#allocation90_spill] sm:$0xff]  ;;  %s9389_s9 = sld [smem:[#allocation2 + $0xa4]] }
 0x5e1   :  { %10998 = vst [vmem:[#allocation99_spill] sm:$0xff] %v8364_v18  ;;  %v3167_v12 = vmul.f32 0.5, %v3163_v27  ;;  %v3309_v34 = vmul.f32 %v8364_v18, %v8263_v35  ;;  %v3314_v11 = vmul.f32 %v8367_v53, %v8266_v36  ;;  %v2724_v32 = vadd.f32 %v2720_v23, %v2688_v33  ;;  %s9391_s29 = sld [smem:[#allocation2 + $0xb4]] }
 0x5e2   :  { %10999 = vst [vmem:[#allocation127_spill] sm:$0xff] %v8367_v53  ;;  %v2780_v1 = vmax.f32 %v2776_v17, 0.0  ;;  %v8380_v27 = vadd.f32 %v11002_v25, %v11001_v37  ;;  %v2752_v22 = vadd.f32 %v2748_v26, %v2716_v49  ;;  %v2808_v8 = vadd.f32 %v2804_v20, %v2800_v40  ;;  %v11011_v17 = vld [vmem:[#allocation28_spill] sm:$0xff]  ;;  %v11012_v20 = vld [vmem:[#allocation73_spill] sm:$0xff]  ;;  %v11015_v25 = vld [vmem:[#allocation14_spill] sm:$0xff] }
 0x5e3   :  { %v8382_v10 = vadd.f32 1e-05, %v3167_v12  ;;  %v8385_v60 = vadd.f32 %v2541_v15, %v11004_v56  ;;  %v8389_v35 = vmul.f32 %v11007_v44, %v11006_v7  ;;  %v3337_v18 = vadd.f32 %v3333_v48, %v3328_v4  ;;  %v11016_v48 = vld [vmem:[#allocation74_spill] sm:$0xff]  ;;  %v11018_v53 = vld [vmem:[#allocation79_spill] sm:$0xff]  ;;  %11208 = sst [smem:[#allocation66_spill]] %s9385_s15 }
 0x5e4   :  { %11003 = vst [vmem:[#allocation100_spill] sm:$0xff] %v8380_v27  ;;  %v2760_v36 = vadd.f32 %v2756_v41, %v2724_v32  ;;  %v11009_v33 = vmov 2   ;;  %v8395_v23 = vstv %s8345_s14  ;;  %v2784_v26 = vmul.f32 %v2780_v1, %v11011_v17  ;;  %v11014_v32 = vld [vmem:[#allocation10_spill] sm:$0xff]  ;;  %v11017_v41 = vld [vmem:[#allocation78_spill] sm:$0xff]  ;;  %v11019_v37 = vld [vmem:[#allocation83_spill] sm:$0xff]  ;;  %s9393_s14 = sld [smem:[#allocation2 + $0xc4]] }
 0x5e5   :  { %11005 = vst [vmem:[#allocation128_spill] sm:$0xff] %v8385_v60  ;;  %5334 = vset.pattern.permute.xlu1 %v11009_v33  ;;  %5333 = vset.pattern.permute.xlu2 %v11009_v33  ;;  %5550 = vrsqrt.f32 %v8382_v10  ;;  %v2836_v15 = vmul.f32 %v10963_v5, %v11012_v20  ;;  %v3318_v44 = vadd.f32 %v3314_v11, %v3309_v34  ;;  %v8403_v40 = vstv %s8348_s4  ;;  %v11020_v11 = vld [vmem:[#allocation84_spill] sm:$0xff]  ;;  %11209 = sst [smem:[#allocation67_spill]] %s9387_s12 }
 0x5e6   :  { %11008 = vst [vmem:[#allocation90_spill] sm:$0xff] %v8389_v35  ;;  %3694 = vperm.xlu1 %5334, %v8286_v46   ;;  %3673 = vperm.xlu2 %5333, %v8289_v21   ;;  %v2792_v49 = vmul.f32 %v2780_v1, %v11014_v32  ;;  %v2812_v12 = vadd.f32 %v2808_v8, %v11015_v25  ;;  %v11022_v25 = vld [vmem:[#allocation18_spill] sm:$0xff]  ;;  %vm3190_vm8 = vweird.f32 %v8382_v10  ;;  %11210 = sst [smem:[#allocation68_spill]] %s9389_s9 }
 0x5e7   :  { %11010 = vst [vmem:[#allocation30_spill] sm:$0xff] %v8395_v23  ;;  %v2788_v4 = vadd.f32 %v2784_v26, %v2752_v22  ;;  %v2840_v7 = vmul.f32 %v10964_v31, %v11016_v48  ;;  %v2872_v17 = vmul.f32 %v10963_v5, %v11017_v41  ;;  %v2876_v20 = vmul.f32 %v10964_v31, %v11018_v53  ;;  %v11021_v22 = vld [vmem:[#allocation17_spill] sm:$0xff]  ;;  %v11023_v41 = vld [vmem:[#allocation15_spill] sm:$0xff]  ;;  %11211 = sst [smem:[#allocation69_spill]] %s9391_s29 }
 0x5e8   :  { %11013 = vst [vmem:[#allocation129_spill] sm:$0xff] %v8403_v40  ;;  %v2796_v33 = vadd.f32 %v2792_v49, %v2760_v36  ;;  %v2816_v56 = vmax.f32 %v2812_v12, 0.0  ;;  %v2908_v34 = vmul.f32 %v10963_v5, %v11019_v37  ;;  %v2912_v1 = vmul.f32 %v10964_v31, %v11020_v11  ;;  %v11025_v49 = vld [vmem:[#allocation93_spill] sm:$0xff]  ;;  %v11027_v11 = vld [vmem:[#allocation80_spill] sm:$0xff]  ;;  %s9395_s4 = sld [smem:[#allocation2 + $0xd4]] }
 0x5e9   :  { %v2844_v32 = vadd.f32 %v2840_v7, %v2836_v15  ;;  %v2880_v8 = vadd.f32 %v2876_v20, %v2872_v17  ;;  %v2944_v26 = vmul.f32 %v10963_v5, %v11021_v22  ;;  %v2948_v48 = vmul.f32 %v10964_v31, %v11022_v25  ;;  %v11028_v20 = vld [vmem:[#allocation94_spill] sm:$0xff] }
 0x5ea   :  { %v2820_v35 = vmul.f32 %v2816_v56, %v11023_v41  ;;  %v2828_v53 = vmul.f32 %v2816_v56, %v11024_v58  ;;  %v2916_v36 = vadd.f32 %v2912_v1, %v2908_v34  ;;  %v2980_v12 = vmul.f32 %v10963_v5, %v11025_v49  ;;  %11212 = sst [smem:[#allocation70_spill]] %s9393_s14 }
 0x5eb   :  { %v5551_v37 = vpop.eup %5550  ;;  %v2848_v3 = vadd.f32 %v2844_v32, %v11026_v14  ;;  %v2884_v15 = vadd.f32 %v2880_v8, %v11027_v11  ;;  %v2952_v17 = vadd.f32 %v2948_v48, %v2944_v26  ;;  %v2984_v7 = vmul.f32 %v10964_v31, %v11028_v20 }
 0x5ec   :  { %v3185_v22 = vmul.f32 %v5551_v37, %v8382_v10  ;;  %v8432_v25 = vadd.f32 %v8395_v23, %v3337_v18  ;;  %v2824_v56 = vadd.f32 %v2820_v35, %v2788_v4  ;;  %v2832_v34 = vadd.f32 %v2828_v53, %v2796_v33  ;;  %v11033_v53 = vld [vmem:[#allocation77_spill] sm:$0xff]  ;;  %v11034_v4 = vld [vmem:[#allocation98_spill] sm:$0xff] }
 0x5ed   :  { %v2852_v1 = vmax.f32 %v2848_v3, 0.0  ;;  %v2888_v49 = vmax.f32 %v2884_v15, 0.0  ;;  %v2920_v58 = vadd.f32 %v2916_v36, %v10947_v54  ;;  %v2956_v32 = vadd.f32 %v2952_v17, %v10948_v43  ;;  %v11032_v3 = vld [vmem:[#allocation76_spill] sm:$0xff]  ;;  %v11036_v54 = vld [vmem:[#allocation86_spill] sm:$0xff] }
 0x5ee   :  { %11029 = vst [vmem:[#allocation130_spill] sm:$0xff] %v8432_v25  ;;  %v3186_v8 = vmul.f32 %v5551_v37, %v3185_v22  ;;  %vm3191_vm9 = vweird.f32 %v5551_v37  ;;  %v11030_v48 = vmov 3   ;;  %v8439_v26 = vadd.f32 %v8403_v40, %v3318_v44  ;;  %v11044_v10 = vld [vmem:[#allocation102_spill] sm:$0xff]  ;;  %11213 = sst [smem:[#allocation71_spill]] %s9395_s4 }
 0x5ef   :  { %5336 = vset.pattern.permute.xlu1 %v11030_v48  ;;  %5335 = vset.pattern.permute.xlu2 %v11030_v48  ;;  %v2988_v20 = vadd.f32 %v2984_v7, %v2980_v12  ;;  %v2856_v18 = vmul.f32 %v2852_v1, %v11032_v3  ;;  %v2864_v35 = vmul.f32 %v2852_v1, %v11033_v53  ;;  %v2924_v33 = vmax.f32 %v2920_v58, 0.0  ;;  %v11035_v7 = vld [vmem:[#allocation82_spill] sm:$0xff]  ;;  %v11037_v3 = vld [vmem:[#allocation87_spill] sm:$0xff]  ;;  %v11038_v1 = vld [vmem:[#allocation89_spill] sm:$0xff] }
 0x5f0   :  { %11031 = vst [vmem:[#allocation131_spill] sm:$0xff] %v8439_v26  ;;  %3849 = vperm.xlu1 %5336, %v8286_v46   ;;  %3828 = vperm.xlu2 %5335, %v8289_v21   ;;  %v3016_v22 = vmul.f32 %v10963_v5, %v11034_v4  ;;  %v3187_v36 = vmul.f32 0.5, %v3186_v8  ;;  %v2892_v15 = vmul.f32 %v2888_v49, %v10949_v19  ;;  %v2960_v17 = vmax.f32 %v2956_v32, 0.0  ;;  %v11039_v8 = vld [vmem:[#allocation101_spill] sm:$0xff]  ;;  %vm3192_vm10 = vmor %vm3190_vm8, %vm3191_vm9 }
 0x5f1   :  { %v2992_v44 = vadd.f32 %v2988_v20, %v10951_v29  ;;  %v2860_v43 = vadd.f32 %v2856_v18, %v2824_v56  ;;  %v2868_v12 = vadd.f32 %v2864_v35, %v2832_v34  ;;  %v2900_v46 = vmul.f32 %v2888_v49, %v11035_v7  ;;  %v11040_v32 = vld [vmem:[#allocation105_spill] sm:$0xff] }
 0x5f2   :  { %v2928_v21 = vmul.f32 %v2924_v33, %v11036_v54  ;;  %v3188_v11 = vsub.f32 1.5, %v3187_v36  ;;  %v2936_v41 = vmul.f32 %v2924_v33, %v11037_v3  ;;  %v2964_v58 = vmul.f32 %v2960_v17, %v11038_v1  ;;  %v11063_v3 = vld [vmem:[#allocation35_spill] sm:$0xff] }
 0x5f3   :  { %v2996_v53 = vmax.f32 %v2992_v44, 0.0  ;;  %v2896_v14 = vadd.f32 %v2892_v15, %v2860_v43  ;;  %v2904_v4 = vadd.f32 %v2900_v46, %v2868_v12  ;;  %v3020_v19 = vmul.f32 %v10964_v31, %v11039_v8  ;;  %v11041_v44 = vld [vmem:[#allocation97_spill] sm:$0xff] }
 0x5f4   :  { %v3052_v20 = vmul.f32 %v10963_v5, %v11040_v32  ;;  %v3189_v56 = vmul.f32 %v5551_v37, %v3188_v11  ;;  %v2972_v34 = vmul.f32 %v2960_v17, %v10955_v28  ;;  %v3056_v18 = vmul.f32 %v10964_v31, %v10957_v47  ;;  %v11042_v17 = vld [vmem:[#allocation111_spill] sm:$0xff]  ;;  %v11067_v47 = vld [vmem:[#allocation34_spill] sm:$0xff] }
 0x5f5   :  { %v3000_v49 = vmul.f32 %v2996_v53, %v10958_v52  ;;  %v2932_v43 = vadd.f32 %v2928_v21, %v2896_v14  ;;  %v2940_v35 = vadd.f32 %v2936_v41, %v2904_v4  ;;  %v3024_v33 = vadd.f32 %v3020_v19, %v3016_v22 }
 0x5f6   :  { %v3088_v36 = vmul.f32 %v10963_v5, %v10960_v51  ;;  %v3193_v15 = vsel %vm3192_vm10, %v5551_v37, %v3189_v56  ;;  %v3008_v11 = vmul.f32 %v2996_v53, %v11041_v44  ;;  %v3060_v12 = vadd.f32 %v3056_v18, %v3052_v20  ;;  %v11045_v56 = vld [vmem:[#allocation27_spill] sm:$0xff]  ;;  %v11062_v51 = vld [vmem:[#allocation26_spill] sm:$0xff] }
 0x5f7   :  { %v3092_v46 = vmul.f32 %v10964_v31, %v11042_v17  ;;  %v3215_v52 = vmul.f32 %v3193_v15, %v8331_v2  ;;  %v3227_v28 = vmul.f32 %v3193_v15, %v8333_v6  ;;  %v11043_v1 = vmov 0   ;;  %v11060_v17 = vld [vmem:[#allocation22_spill] sm:$0xff] }
 0x5f8   :  { %5338 = vset.pattern.permute.xlu1 %v11043_v1  ;;  %5337 = vset.pattern.permute.xlu2 %v11043_v1  ;;  %v2968_v14 = vadd.f32 %v2964_v58, %v2932_v43  ;;  %v2976_v19 = vadd.f32 %v2972_v34, %v2940_v35  ;;  %v3028_v37 = vadd.f32 %v3024_v33, %v11044_v10  ;;  %v11061_v10 = vld [vmem:[#allocation116_spill] sm:$0xff] }
 0x5f9   :  { %3482 = vperm.xlu1 %5338, %v8432_v25   ;;  %3445 = vperm.xlu2 %5337, %v8439_v26   ;;  %v3064_v41 = vadd.f32 %v3060_v12, %v10965_v63  ;;  %v3219_v53 = vmul.f32 %v3215_v52, %v8104_v61  ;;  %v3231_v2 = vmul.f32 %v3227_v28, %v8112_v13 }
 0x5fa   :  { %v3004_v4 = vadd.f32 %v3000_v49, %v2968_v14  ;;  %v3096_v6 = vadd.f32 %v3092_v46, %v3088_v36  ;;  %v3012_v22 = vadd.f32 %v3008_v11, %v2976_v19  ;;  %v3032_v21 = vmax.f32 %v3028_v37, 0.0 }
 0x5fb   :  { %v3068_v20 = vmax.f32 %v3064_v41, 0.0  ;;  %v2549_v58 = vmul.f32 %v8380_v27, %v11045_v56  ;;  %v8482_v18 = vadd.f32 %v3219_v53, %v8107_v39  ;;  %v8485_v34 = vadd.f32 %v3231_v2, %v8127_v55 }
 0x5fc   :  { %v3100_v43 = vadd.f32 %v3096_v6, %v7882_v16  ;;  %v2553_v52 = vmul.f32 %v8385_v60, %v7495_v9  ;;  %v3036_v28 = vmul.f32 %v3032_v21, %v10897_v0  ;;  %v3044_v49 = vmul.f32 %v3032_v21, %v10898_v57  ;;  %v11046_v6 = vld [vmem:[#allocation41_spill] sm:$0xff]  ;;  %v11047_v16 = vld [vmem:[#allocation113_spill] sm:$0xff]  ;;  %v11059_v0 = vld [vmem:[#allocation48_spill] sm:$0xff] }
 0x5fd   :  { %v3072_v35 = vmul.f32 %v3068_v20, %v10966_v30  ;;  %v3080_v33 = vmul.f32 %v3068_v20, %v10967_v42  ;;  %v3272_v36 = vmul.f32 %v8181_v59, %v8482_v18  ;;  %v3277_v15 = vmul.f32 %v8184_v45, %v8485_v34  ;;  %v11048_v30 = vld [vmem:[#allocation114_spill] sm:$0xff]  ;;  %v11079_v59 = vld [vmem:[#allocation23_spill] sm:$0xff] }
 0x5fe   :  { %v3291_v11 = vmul.f32 %v8146_v38, %v8482_v18  ;;  %v3296_v12 = vmul.f32 %v8163_v24, %v8485_v34  ;;  %v3040_v46 = vadd.f32 %v3036_v28, %v3004_v4  ;;  %v3048_v14 = vadd.f32 %v3044_v49, %v3012_v22  ;;  %v11049_v4 = vld [vmem:[#allocation126_spill] sm:$0xff] }
 0x5ff   :  { %v3104_v19 = vmax.f32 %v3100_v43, 0.0  ;;  %v2557_v37 = vadd.f32 %v2553_v52, %v2549_v58  ;;  %v3281_v41 = vadd.f32 %v3277_v15, %v3272_v36  ;;  %v2585_v2 = vmul.f32 %v8380_v27, %v7498_v62  ;;  %v11050_v58 = vld [vmem:[#allocation123_spill] sm:$0xff]  ;;  %v11051_v52 = vld [vmem:[#allocation47_spill] sm:$0xff]  ;;  %v11073_v38 = vld [vmem:[#allocation12_spill] sm:$0xff] }
 0x600   :  { %v3300_v53 = vadd.f32 %v3296_v12, %v3291_v11  ;;  %v2589_v21 = vmul.f32 %v8385_v60, %v11046_v6  ;;  %v3076_v20 = vadd.f32 %v3072_v35, %v3040_v46  ;;  %v3084_v25 = vadd.f32 %v3080_v33, %v3048_v14  ;;  %v11052_v11 = vld [vmem:[#allocation24_spill] sm:$0xff]  ;;  %v11053_v33 = vld [vmem:[#allocation38_spill] sm:$0xff]  ;;  %v11054_v14 = vld [vmem:[#allocation49_spill] sm:$0xff] }
 0x601   :  { %5339 = vset.pattern.permute.xlu1 %v10988_v50  ;;  %v3108_v42 = vmul.f32 %v3104_v19, %v11047_v16  ;;  %v3116_v57 = vmul.f32 %v3104_v19, %v11048_v30  ;;  %v8510_v22 = vadd.f32 %v11049_v4, %v3281_v41  ;;  %v2561_v28 = vadd.f32 %v2557_v37, %v11051_v52  ;;  %v11055_v41 = vld [vmem:[#allocation40_spill] sm:$0xff]  ;;  %v11056_v37 = vld [vmem:[#allocation39_spill] sm:$0xff]  ;;  %v11058_v30 = vld [vmem:[#allocation42_spill] sm:$0xff] }
 0x602   :  { %v8513_v43 = vadd.f32 %v11050_v58, %v3300_v53  ;;  %3607 = vperm.xlu1 %5339, %v8439_v26   ;;  %v2593_v49 = vadd.f32 %v2589_v21, %v2585_v2  ;;  %v2621_v35 = vmul.f32 %v8380_v27, %v11052_v11  ;;  %v2625_v12 = vmul.f32 %v8385_v60, %v11053_v33  ;;  %v11057_v21 = vld [vmem:[#allocation32_spill] sm:$0xff]  ;;  %v11071_v58 = vld [vmem:[#allocation33_spill] sm:$0xff] }
 0x603   :  { %v3112_v36 = vadd.f32 %v3108_v42, %v3076_v20  ;;  %v3120_v15 = vadd.f32 %v3116_v57, %v3084_v25  ;;  %3353 = vperm.xlu0 %5340, %v8510_v22   ;;  %v2565_v46 = vmax.f32 %v2561_v28, 0.0  ;;  %v2657_v53 = vmul.f32 %v8380_v27, %v11055_v41  ;;  %v11072_v4 = vld [vmem:[#allocation36_spill] sm:$0xff] }
 0x604   :  { %3378 = vperm.xlu2 %5337, %v8513_v43   ;;  %v2597_v19 = vadd.f32 %v2593_v49, %v11054_v14  ;;  %v2661_v42 = vmul.f32 %v8385_v60, %v11056_v37  ;;  %v2629_v2 = vadd.f32 %v2625_v12, %v2621_v35  ;;  %v2693_v20 = vmul.f32 %v8380_v27, %v11057_v21  ;;  %v11066_v12 = vld [vmem:[#allocation50_spill] sm:$0xff] }
 0x605   :  { %v3124_v57 = vadd.f32 %v3112_v36, %v10963_v5  ;;  %v3132_v25 = vadd.f32 %v3120_v15, %v10964_v31  ;;  %v2569_v16 = vmul.f32 %v2565_v46, %v11058_v30  ;;  %v2577_v28 = vmul.f32 %v2565_v46, %v11059_v0  ;;  %v11064_v31 = vld [vmem:[#allocation31_spill] sm:$0xff] }
 0x606   :  { %v2601_v44 = vmax.f32 %v2597_v19, 0.0  ;;  %v2665_v49 = vadd.f32 %v2661_v42, %v2657_v53  ;;  %v2633_v29 = vadd.f32 %v2629_v2, %v11062_v51  ;;  %v2697_v5 = vmul.f32 %v8385_v60, %v11063_v3  ;;  %v11065_v15 = vld [vmem:[#allocation51_spill] sm:$0xff]  ;;  %v11070_v2 = vld [vmem:[#allocation44_spill] sm:$0xff] }
 0x607   :  { %v3128_v63 = vadd.f32 %v3124_v57, %v11060_v17  ;;  %v3136_v26 = vadd.f32 %v3132_v25, %v11061_v10  ;;  %v2729_v46 = vmul.f32 %v8380_v27, %v11067_v47  ;;  %v11068_v57 = vld [vmem:[#allocation46_spill] sm:$0xff] }
 0x608   :  { %v2605_v36 = vmul.f32 %v2601_v44, %v11064_v31  ;;  %v2613_v35 = vmul.f32 %v2601_v44, %v11065_v15  ;;  %v2669_v54 = vadd.f32 %v2665_v49, %v11066_v12  ;;  %v2637_v53 = vmax.f32 %v2633_v29, 0.0  ;;  %v11069_v10 = vld [vmem:[#allocation92_spill] sm:$0xff] }
 0x609   :  { %v3140_v19 = vadd.f32 %v3136_v26, %v3128_v63  ;;  %v2701_v42 = vadd.f32 %v2697_v5, %v2693_v20  ;;  %v2733_v25 = vmul.f32 %v8385_v60, %v11068_v57  ;;  %v2030_v17 = vmul.f32 %v11070_v2, %v11069_v10  ;;  %v11074_v20 = vld [vmem:[#allocation45_spill] sm:$0xff]  ;;  %v11075_v10 = vld [vmem:[#allocation52_spill] sm:$0xff] }
 0x60a   :  { %5350 = vset.pattern.permute.xlu1 %v11043_v1  ;;  %v2609_v32 = vadd.f32 %v2605_v36, %v2569_v16  ;;  %v2617_v8 = vadd.f32 %v2613_v35, %v2577_v28  ;;  %v2673_v7 = vmax.f32 %v2669_v54, 0.0  ;;  %v2641_v49 = vmul.f32 %v2637_v53, %v11071_v58 }
 0x60b   :  { %v3144_v44 = vmul.f32 0.5, %v3140_v19  ;;  %v2705_v24 = vadd.f32 %v2701_v42, %v11072_v4  ;;  %v2765_v29 = vmul.f32 %v8380_v27, %v11073_v38  ;;  %5341 = vset.pattern.permute.xlu0 %v10988_v50  ;;  %v2649_v5 = vmul.f32 %v2637_v53, %v11074_v20  ;;  %v11077_v19 = vld [vmem:[#allocation53_spill] sm:$0xff]  ;;  %v11078_v27 = vld [vmem:[#allocation54_spill] sm:$0xff] }
 0x60c   :  { %5342 = vset.pattern.permute.xlu2 %v10988_v50  ;;  %v2677_v2 = vmul.f32 %v2673_v7, %v11075_v10  ;;  %v2737_v45 = vadd.f32 %v2733_v25, %v2729_v46  ;;  %3522 = vperm.xlu0 %5341, %v8510_v22   ;;  %v2645_v28 = vadd.f32 %v2641_v49, %v2609_v32  ;;  %v11080_v32 = vld [vmem:[#allocation90_spill] sm:$0xff]  ;;  %v11082_v49 = vld [vmem:[#allocation37_spill] sm:$0xff] }
 0x60d   :  { %3543 = vperm.xlu2 %5342, %v8513_v43   ;;  %v8559_v16 = vsub.f32 %v3128_v63, %v3144_v44  ;;  %v8561_v54 = vsub.f32 %v3136_v26, %v3144_v44  ;;  %v2709_v36 = vmax.f32 %v2705_v24, 0.0  ;;  %v2653_v35 = vadd.f32 %v2649_v5, %v2617_v8  ;;  %v11081_v24 = vld [vmem:[#allocation25_spill] sm:$0xff] }
 0x60e   :  { %v2685_v42 = vmul.f32 %v2673_v7, %v11077_v19  ;;  %v2741_v50 = vadd.f32 %v2737_v45, %v11078_v27  ;;  %v2769_v53 = vmul.f32 %v8385_v60, %v11079_v59  ;;  %v2681_v63 = vadd.f32 %v2677_v2, %v2645_v28  ;;  %v11083_v5 = vld [vmem:[#allocation29_spill] sm:$0xff]  ;;  %v11084_v60 = vld [vmem:[#allocation43_spill] sm:$0xff]  ;;  %v11085_v2 = vld [vmem:[#allocation8_spill] sm:$0xff] }
 0x60f   :  { %11076 = vst [vmem:[#allocation27_spill] sm:$0xff] %v8559_v16  ;;  %v3156_v46 = vmul.f32 %v8559_v16, %v8559_v16  ;;  %v3160_v25 = vmul.f32 %v8561_v54, %v8561_v54  ;;  %v8573_v8 = vadd.f32 %v11081_v24, %v11080_v32  ;;  %v2713_v45 = vmul.f32 %v2709_v36, %v11082_v49 }
 0x610   :  { %v2689_v55 = vadd.f32 %v2685_v42, %v2653_v35  ;;  %v2745_v26 = vmax.f32 %v2741_v50, 0.0  ;;  %v2773_v44 = vadd.f32 %v2769_v53, %v2765_v29  ;;  %v8577_v39 = vadd.f32 %v11083_v5, %v2030_v17  ;;  %v11086_v50 = vld [vmem:[#allocation9_spill] sm:$0xff]  ;;  %v11087_v35 = vld [vmem:[#allocation19_spill] sm:$0xff] }
 0x611   :  { %v3164_v7 = vadd.f32 %v3160_v25, %v3156_v46  ;;  %v2721_v13 = vmul.f32 %v2709_v36, %v11084_v60  ;;  %v2717_v16 = vadd.f32 %v2713_v45, %v2681_v63  ;;  %v11088_v53 = vmov 2   ;;  %v11089_v17 = vld [vmem:[#allocation99_spill] sm:$0xff] }
 0x612   :  { %v2749_v28 = vmul.f32 %v2745_v26, %v11085_v2  ;;  %v8584_v29 = vmul.f32 %v2745_v26, %v11086_v50  ;;  %v8587_v42 = vadd.f32 %v2773_v44, %v11087_v35  ;;  %v3310_v25 = vmul.f32 %v11089_v17, %v8482_v18  ;;  %v11090_v36 = vld [vmem:[#allocation127_spill] sm:$0xff] }
 0x613   :  { %v3168_v61 = vmul.f32 0.5, %v3164_v7  ;;  %v8580_v1 = vadd.f32 %v2721_v13, %v2689_v55  ;;  %v3315_v63 = vmul.f32 %v11090_v36, %v8485_v34  ;;  %v2036_v13 = vmul.f32 %v11045_v56, %v8573_v8 }
 0x614   :  { %5343 = vset.pattern.permute.xlu0 %v11088_v53  ;;  %v2039_v55 = vmul.f32 %v7495_v9, %v8577_v39  ;;  %v2058_v26 = vmul.f32 %v11046_v6, %v8577_v39  ;;  %v2074_v32 = vmul.f32 %v11052_v11, %v8573_v8  ;;  %v8610_v56 = vadd.f32 %v2749_v28, %v2717_v16 }
 0x615   :  { %v8590_v46 = vadd.f32 1e-05, %v3168_v61  ;;  %5344 = vset.pattern.permute.xlu2 %v11088_v53  ;;  %3677 = vperm.xlu0 %5343, %v8510_v22   ;;  %v2055_v61 = vmul.f32 %v7498_v62, %v8573_v8  ;;  %v3319_v44 = vadd.f32 %v3315_v63, %v3310_v25  ;;  %v2077_v45 = vmul.f32 %v11053_v33, %v8577_v39 }
 0x616   :  { %3698 = vperm.xlu2 %5344, %v8513_v43   ;;  %v2040_v24 = vadd.f32 %v2039_v55, %v2036_v13  ;;  %v2093_v9 = vmul.f32 %v11055_v41, %v8573_v8  ;;  %v2096_v6 = vmul.f32 %v11056_v37, %v8577_v39  ;;  %v2112_v5 = vmul.f32 %v11057_v21, %v8573_v8  ;;  %v11092_v21 = vld [vmem:[#allocation115_spill] sm:$0xff] }
 0x617   :  { %5552 = vrsqrt.f32 %v8590_v46  ;;  %v2059_v7 = vadd.f32 %v2058_v26, %v2055_v61  ;;  %v8617_v62 = vadd.f32 %v8403_v40, %v3319_v44  ;;  %v2115_v11 = vmul.f32 %v11063_v3, %v8577_v39  ;;  %v11093_v3 = vld [vmem:[#allocation21_spill] sm:$0xff] }
 0x618   :  { %v2043_v16 = vadd.f32 %v11051_v52, %v2040_v24  ;;  %v2078_v33 = vadd.f32 %v2077_v45, %v2074_v32  ;;  %v2131_v41 = vmul.f32 %v11067_v47, %v8573_v8  ;;  %v2097_v25 = vadd.f32 %v2096_v6, %v2093_v9 }
 0x619   :  { %11091 = vst [vmem:[#allocation41_spill] sm:$0xff] %v8617_v62  ;;  %v2062_v28 = vadd.f32 %v11054_v14, %v2059_v7  ;;  %v2116_v63 = vadd.f32 %v2115_v11, %v2112_v5  ;;  %v2134_v13 = vmul.f32 %v11068_v57, %v8577_v39  ;;  %v2150_v37 = vmul.f32 %v11073_v38, %v8573_v8 }
 0x61a   :  { %v3329_v55 = vmul.f32 %v11092_v21, %v8482_v18  ;;  %v3334_v52 = vmul.f32 %v11093_v3, %v8485_v34  ;;  %v2044_v61 = vmax.f32 %v2043_v16, 0.0  ;;  %v2081_v44 = vadd.f32 %v11062_v51, %v2078_v33  ;;  %v11138_v3 = vld [vmem:[#allocation106_spill] sm:$0xff] }
 0x61b   :  { %v2063_v14 = vmax.f32 %v2062_v28, 0.0  ;;  %v2100_v47 = vadd.f32 %v11066_v12, %v2097_v25  ;;  %v2119_v32 = vadd.f32 %v11072_v4, %v2116_v63  ;;  %v2135_v24 = vadd.f32 %v2134_v13, %v2131_v41  ;;  %v11096_v13 = vld [vmem:[#allocation13_spill] sm:$0xff] }
 0x61c   :  { %vm3200_vm14 = vweird.f32 %v8590_v46  ;;  %v3338_v18 = vadd.f32 %v3334_v52, %v3329_v55  ;;  %v2047_v34 = vmul.f32 %v11058_v30, %v2044_v61  ;;  %v2051_v51 = vmul.f32 %v11059_v0, %v2044_v61 }
 0x61d   :  { %v5553_v26 = vpop.eup %5552  ;;  %5345 = vset.pattern.permute.xlu0 %v11030_v48  ;;  %v2066_v4 = vmul.f32 %v11064_v31, %v2063_v14  ;;  %v2070_v12 = vmul.f32 %v11065_v15, %v2063_v14  ;;  %v2082_v57 = vmax.f32 %v2081_v44, 0.0  ;;  %v2101_v9 = vmax.f32 %v2100_v47, 0.0 }
 0x61e   :  { %v3195_v38 = vmul.f32 %v5553_v26, %v8590_v46  ;;  %vm3201_vm15 = vweird.f32 %v5553_v26  ;;  %5346 = vset.pattern.permute.xlu2 %v11030_v48  ;;  %3832 = vperm.xlu0 %5345, %v8510_v22   ;;  %v8651_v45 = vadd.f32 %v8395_v23, %v3338_v18  ;;  %v2120_v6 = vmax.f32 %v2119_v32, 0.0  ;;  %v11136_v23 = vld [vmem:[#allocation101_spill] sm:$0xff]  ;;  %v11142_v48 = vld [vmem:[#allocation95_spill] sm:$0xff] }
 0x61f   :  { %3853 = vperm.xlu2 %5346, %v8513_v43   ;;  %v2067_v5 = vadd.f32 %v2066_v4, %v2047_v34  ;;  %v2071_v11 = vadd.f32 %v2070_v12, %v2051_v51  ;;  %v2085_v30 = vmul.f32 %v11071_v58, %v2082_v57  ;;  %v2089_v22 = vmul.f32 %v11074_v20, %v2082_v57  ;;  %v11095_v58 = vld [vmem:[#allocation11_spill] sm:$0xff]  ;;  %vm3202_vm0 = vmor %vm3200_vm14, %vm3201_vm15  ;;  %v11101_v57 = vld [vmem:[#allocation14_spill] sm:$0xff] }
 0x620   :  { %v3196_v7 = vmul.f32 %v5553_v26, %v3195_v38  ;;  %11094 = vst [vmem:[#allocation47_spill] sm:$0xff] %v8651_v45  ;;  %v2104_v0 = vmul.f32 %v11075_v10, %v2101_v9  ;;  %v2108_v31 = vmul.f32 %v11077_v19, %v2101_v9  ;;  %v2123_v15 = vmul.f32 %v11082_v49, %v2120_v6  ;;  %v11097_v49 = vld [vmem:[#allocation73_spill] sm:$0xff] }
 0x621   :  { %v2086_v16 = vadd.f32 %v2085_v30, %v2067_v5  ;;  %v2090_v28 = vadd.f32 %v2089_v22, %v2071_v11  ;;  %v2127_v33 = vmul.f32 %v11084_v60, %v2120_v6  ;;  %v2138_v41 = vadd.f32 %v11078_v27, %v2135_v24  ;;  %v11098_v27 = vld [vmem:[#allocation74_spill] sm:$0xff]  ;;  %v11100_v51 = vld [vmem:[#allocation27_spill] sm:$0xff]  ;;  %v11104_v22 = vld [vmem:[#allocation119_spill] sm:$0xff] }
 0x622   :  { %v3197_v43 = vmul.f32 0.5, %v3196_v7  ;;  %v2153_v63 = vmul.f32 %v11079_v59, %v8577_v39  ;;  %v2169_v20 = vmul.f32 %v11095_v58, %v8573_v8  ;;  %v2172_v10 = vmul.f32 %v11096_v13, %v8577_v39  ;;  %v11103_v11 = vld [vmem:[#allocation117_spill] sm:$0xff] }
 0x623   :  { %v2105_v55 = vadd.f32 %v2104_v0, %v2086_v16  ;;  %v2109_v19 = vadd.f32 %v2108_v31, %v2090_v28  ;;  %v2139_v52 = vmax.f32 %v2138_v41, 0.0  ;;  %v2188_v61 = vmul.f32 %v11097_v49, %v8573_v8  ;;  %v11106_v31 = vld [vmem:[#allocation28_spill] sm:$0xff]  ;;  %v11108_v28 = vld [vmem:[#allocation75_spill] sm:$0xff] }
 0x624   :  { %v3198_v25 = vsub.f32 1.5, %v3197_v43  ;;  %v2154_v60 = vadd.f32 %v2153_v63, %v2150_v37  ;;  %v2173_v44 = vadd.f32 %v2172_v10, %v2169_v20  ;;  %v2191_v47 = vmul.f32 %v11098_v27, %v8577_v39  ;;  %v11109_v41 = vld [vmem:[#allocation83_spill] sm:$0xff]  ;;  %v11110_v63 = vld [vmem:[#allocation118_spill] sm:$0xff]  ;;  %v11112_v10 = vld [vmem:[#allocation120_spill] sm:$0xff] }
 0x625   :  { %v11099_v59 = vmov 0   ;;  %v2124_v32 = vadd.f32 %v2123_v15, %v2105_v55  ;;  %v2128_v24 = vadd.f32 %v2127_v33, %v2109_v19  ;;  %v2142_v38 = vmul.f32 %v11085_v2, %v2139_v52  ;;  %v11102_v2 = vld [vmem:[#allocation78_spill] sm:$0xff]  ;;  %v11114_v19 = vld [vmem:[#allocation15_spill] sm:$0xff] }
 0x626   :  { %v3199_v14 = vmul.f32 %v5553_v26, %v3198_v25  ;;  %5347 = vset.pattern.permute.xlu0 %v11099_v59  ;;  %v2146_v37 = vmul.f32 %v11086_v50, %v2139_v52  ;;  %v2157_v34 = vadd.f32 %v11087_v35, %v2154_v60  ;;  %v2176_v7 = vadd.f32 %v11101_v57, %v2173_v44  ;;  %v11105_v35 = vld [vmem:[#allocation79_spill] sm:$0xff] }
 0x627   :  { %5348 = vset.pattern.permute.xlu2 %v11099_v59  ;;  %3450 = vperm.xlu0 %5347, %v8617_v62   ;;  %v2143_v12 = vadd.f32 %v2142_v38, %v2124_v32  ;;  %v2192_v5 = vadd.f32 %v2191_v47, %v2188_v61  ;;  %v2210_v0 = vmul.f32 %v11105_v35, %v8577_v39  ;;  %v11115_v61 = vld [vmem:[#allocation16_spill] sm:$0xff]  ;;  %vm4445_vm14 = vcmask 523264  }
 0x628   :  { %v3203_v18 = vsel %vm3202_vm0, %v5553_v26, %v3199_v14  ;;  %3487 = vperm.xlu2 %5348, %v8651_v45   ;;  %v2147_v9 = vadd.f32 %v2146_v37, %v2128_v24  ;;  %v2158_v6 = vmax.f32 %v2157_v34, 0.0  ;;  %v2207_v26 = vmul.f32 %v11102_v2, %v8573_v8  ;;  %v11116_v24 = vld [vmem:[#allocation124_spill] sm:$0xff]  ;;  %v11118_v34 = vld [vmem:[#allocation121_spill] sm:$0xff] }
 0x629   :  { %v3216_v46 = vmul.f32 %v3203_v18, %v11100_v51  ;;  %v3228_v4 = vmul.f32 %v3203_v18, %v8561_v54  ;;  %v2177_v50 = vmax.f32 %v2176_v7, 0.0  ;;  %v11107_v54 = vld [vmem:[#allocation10_spill] sm:$0xff]  ;;  %v2195_v33 = vadd.f32 %v11108_v28, %v2192_v5  ;;  %v11117_v18 = vld [vmem:[#allocation125_spill] sm:$0xff] }
 0x62a   :  { %v2161_v15 = vmul.f32 %v11106_v31, %v2158_v6  ;;  %v2165_v16 = vmul.f32 %v11107_v54, %v2158_v6  ;;  %v2226_v25 = vmul.f32 %v11109_v41, %v8573_v8  ;;  %v2211_v32 = vadd.f32 %v2210_v0, %v2207_v26  ;;  %v11123_v0 = vld [vmem:[#allocation80_spill] sm:$0xff] }
 0x62b   :  { %v3220_v30 = vmul.f32 %v3216_v46, %v11103_v11  ;;  %v3232_v43 = vmul.f32 %v3228_v4, %v11104_v22  ;;  %v2180_v52 = vmul.f32 %v11114_v19, %v2177_v50  ;;  %v2184_v14 = vmul.f32 %v11115_v61, %v2177_v50  ;;  %v11119_v46 = vld [vmem:[#allocation122_spill] sm:$0xff] }
 0x62c   :  { %v2162_v60 = vadd.f32 %v2161_v15, %v2143_v12  ;;  %v2166_v44 = vadd.f32 %v2165_v16, %v2147_v9  ;;  %v2196_v47 = vmax.f32 %v2195_v33, 0.0  ;;  %v11120_v7 = vmov 1   ;;  %v11121_v12 = vld [vmem:[#allocation76_spill] sm:$0xff] }
 0x62d   :  { %v8695_v20 = vadd.f32 %v3220_v30, %v11110_v63  ;;  %v8698_v55 = vadd.f32 %v3232_v43, %v11112_v10  ;;  %v11122_v30 = vld [vmem:[#allocation77_spill] sm:$0xff]  ;;  %v2214_v15 = vadd.f32 %v11123_v0, %v2211_v32  ;;  %v11124_v16 = vld [vmem:[#allocation84_spill] sm:$0xff]  ;;  %v2286_v10 = vmul.f32 %v11136_v23, %v8577_v39 }
 0x62e   :  { %v2181_v6 = vadd.f32 %v2180_v52, %v2162_v60  ;;  %v2185_v5 = vadd.f32 %v2184_v14, %v2166_v44  ;;  %v2199_v9 = vmul.f32 %v11121_v12, %v2196_v47  ;;  %v2203_v26 = vmul.f32 %v11122_v30, %v2196_v47  ;;  %v11126_v52 = vld [vmem:[#allocation18_spill] sm:$0xff]  ;;  %v11127_v60 = vld [vmem:[#allocation126_spill] sm:$0xff]  ;;  %v11128_v47 = vld [vmem:[#allocation123_spill] sm:$0xff] }
 0x62f   :  { %11111 = vst [vmem:[#allocation24_spill] sm:$0xff] %v8695_v20  ;;  %v3273_v38 = vmul.f32 %v11116_v24, %v8695_v20  ;;  %v3278_v37 = vmul.f32 %v11117_v18, %v8698_v55  ;;  %v3292_v51 = vmul.f32 %v11118_v34, %v8695_v20  ;;  %v3297_v4 = vmul.f32 %v11119_v46, %v8698_v55  ;;  %v11125_v46 = vld [vmem:[#allocation17_spill] sm:$0xff]  ;;  %v11137_v63 = vld [vmem:[#allocation105_spill] sm:$0xff] }
 0x630   :  { %11113 = vst [vmem:[#allocation38_spill] sm:$0xff] %v8698_v55  ;;  %5349 = vset.pattern.permute.xlu2 %v11120_v7  ;;  %v2229_v33 = vmul.f32 %v11124_v16, %v8577_v39  ;;  %v2200_v18 = vadd.f32 %v2199_v9, %v2181_v6  ;;  %v2204_v24 = vadd.f32 %v2203_v26, %v2185_v5  ;;  %v11130_v6 = vld [vmem:[#allocation94_spill] sm:$0xff] }
 0x631   :  { %v3282_v43 = vadd.f32 %v3278_v37, %v3273_v38  ;;  %v3301_v50 = vadd.f32 %v3297_v4, %v3292_v51  ;;  %3611 = vperm.xlu2 %5349, %v8617_v62   ;;  %v2245_v34 = vmul.f32 %v11125_v46, %v8573_v8  ;;  %v2248_v14 = vmul.f32 %v11126_v52, %v8577_v39  ;;  %v11129_v4 = vld [vmem:[#allocation93_spill] sm:$0xff]  ;;  %v11131_v9 = vld [vmem:[#allocation98_spill] sm:$0xff]  ;;  %v11141_v62 = vld [vmem:[#allocation87_spill] sm:$0xff] }
 0x632   :  { %v2215_v37 = vmax.f32 %v2214_v15, 0.0  ;;  %v2230_v51 = vadd.f32 %v2229_v33, %v2226_v25  ;;  %v2264_v40 = vmul.f32 %v11129_v4, %v8573_v8  ;;  %v2267_v5 = vmul.f32 %v11130_v6, %v8577_v39  ;;  %v11134_v15 = vld [vmem:[#allocation85_spill] sm:$0xff] }
 0x633   :  { %v8722_v44 = vadd.f32 %v11127_v60, %v3282_v43  ;;  %v8725_v38 = vadd.f32 %v11128_v47, %v3301_v50  ;;  %v2249_v32 = vadd.f32 %v2248_v14, %v2245_v34  ;;  %v2283_v26 = vmul.f32 %v11131_v9, %v8573_v8  ;;  %v11132_v43 = vld [vmem:[#allocation81_spill] sm:$0xff]  ;;  %v11133_v50 = vld [vmem:[#allocation82_spill] sm:$0xff]  ;;  %v11135_v34 = vld [vmem:[#allocation88_spill] sm:$0xff] }
 0x634   :  { %v2218_v60 = vmul.f32 %v11132_v43, %v2215_v37  ;;  %v2222_v47 = vmul.f32 %v11133_v50, %v2215_v37  ;;  %v2233_v25 = vadd.f32 %v11134_v15, %v2230_v51  ;;  %v2268_v14 = vadd.f32 %v2267_v5, %v2264_v40  ;;  %v11139_v40 = vld [vmem:[#allocation100_spill] sm:$0xff]  ;;  %v11140_v5 = vld [vmem:[#allocation86_spill] sm:$0xff] }
 0x635   :  { %3358 = vperm.xlu1 %5350, %v8722_v44   ;;  %3383 = vperm.xlu0 %5347, %v8725_v38   ;;  %v2252_v33 = vadd.f32 %v11135_v34, %v2249_v32  ;;  %v2302_v36 = vmul.f32 %v11137_v63, %v8573_v8  ;;  %v2305_v55 = vmul.f32 %v11138_v3, %v8577_v39  ;;  %v2781_v51 = vmax.f32 %v8587_v42, 0.0  ;;  %v11146_v42 = vld [vmem:[#allocation131_spill] sm:$0xff]  ;;  %v11147_v34 = vld [vmem:[#allocation102_spill] sm:$0xff] }
 0x636   :  { %v2219_v22 = vadd.f32 %v2218_v60, %v2200_v18  ;;  %v2223_v11 = vadd.f32 %v2222_v47, %v2204_v24  ;;  %v2234_v17 = vmax.f32 %v2233_v25, 0.0  ;;  %v2761_v37 = vadd.f32 %v8584_v29, %v8580_v1  ;;  %v11143_v60 = vld [vmem:[#allocation89_spill] sm:$0xff]  ;;  %v11144_v25 = vld [vmem:[#allocation91_spill] sm:$0xff]  ;;  %v11145_v1 = vld [vmem:[#allocation110_spill] sm:$0xff] }
 0x637   :  { %v2253_v21 = vmax.f32 %v2252_v33, 0.0  ;;  %v2801_v32 = vmul.f32 %v11139_v40, %v11095_v58  ;;  %v2271_v18 = vadd.f32 %v11142_v48, %v2268_v14  ;;  %v2287_v24 = vadd.f32 %v2286_v10, %v2283_v26  ;;  %v11149_v10 = vld [vmem:[#allocation111_spill] sm:$0xff] }
 0x638   :  { %v2237_v20 = vmul.f32 %v11140_v5, %v2234_v17  ;;  %v2241_v45 = vmul.f32 %v11141_v62, %v2234_v17  ;;  %v2306_v3 = vadd.f32 %v2305_v55, %v2302_v36  ;;  %v2321_v29 = vmul.f32 %v11145_v1, %v8573_v8  ;;  %v11148_v62 = vld [vmem:[#allocation107_spill] sm:$0xff] }
 0x639   :  { %5359 = vset.pattern.permute.xlu2 %v11088_v53  ;;  %v2256_v47 = vmul.f32 %v11143_v60, %v2253_v21  ;;  %v2260_v33 = vmul.f32 %v11144_v25, %v2253_v21  ;;  %v2272_v5 = vmax.f32 %v2271_v18, 0.0  ;;  %v2290_v17 = vadd.f32 %v11147_v34, %v2287_v24 }
 0x63a   :  { %3762 = vperm.xlu2 %5359, %v11146_v42   ;;  %v2238_v58 = vadd.f32 %v2237_v20, %v2219_v22  ;;  %v2242_v63 = vadd.f32 %v2241_v45, %v2223_v11  ;;  %v2309_v14 = vadd.f32 %v11148_v62, %v2306_v3  ;;  %v2324_v26 = vmul.f32 %v11149_v10, %v8577_v39  ;;  %v11150_v22 = vld [vmem:[#allocation96_spill] sm:$0xff]  ;;  %v11151_v3 = vld [vmem:[#allocation97_spill] sm:$0xff] }
 0x63b   :  { %v2785_v48 = vmul.f32 %v2781_v51, %v11106_v31  ;;  %v2793_v21 = vmul.f32 %v2781_v51, %v11107_v54  ;;  %v2275_v45 = vmul.f32 %v11150_v22, %v2272_v5  ;;  %v2291_v11 = vmax.f32 %v2290_v17, 0.0  ;;  %v11152_v51 = vld [vmem:[#allocation103_spill] sm:$0xff]  ;;  %v11153_v62 = vld [vmem:[#allocation104_spill] sm:$0xff]  ;;  %v11155_v17 = vld [vmem:[#allocation109_spill] sm:$0xff] }
 0x63c   :  { %v2257_v36 = vadd.f32 %v2256_v47, %v2238_v58  ;;  %v2261_v55 = vadd.f32 %v2260_v33, %v2242_v63  ;;  %v2279_v20 = vmul.f32 %v11151_v3, %v2272_v5  ;;  %v2310_v18 = vmax.f32 %v2309_v14, 0.0  ;;  %v11154_v33 = vld [vmem:[#allocation108_spill] sm:$0xff] }
 0x63d   :  { %5351 = vset.pattern.permute.xlu1 %v11120_v7  ;;  %5352 = vset.pattern.permute.xlu0 %v11120_v7  ;;  %v2325_v24 = vadd.f32 %v2324_v26, %v2321_v29  ;;  %v2789_v31 = vadd.f32 %v2785_v48, %v8610_v56  ;;  %v2294_v42 = vmul.f32 %v11152_v51, %v2291_v11  ;;  %v11156_v10 = vld [vmem:[#allocation112_spill] sm:$0xff] }
 0x63e   :  { %3526 = vperm.xlu1 %5351, %v8722_v44   ;;  %3547 = vperm.xlu0 %5352, %v8725_v38   ;;  %v2276_v54 = vadd.f32 %v2275_v45, %v2257_v36  ;;  %v2298_v7 = vmul.f32 %v11153_v62, %v2291_v11  ;;  %v2797_v47 = vadd.f32 %v2793_v21, %v2761_v37  ;;  %v11157_v5 = vld [vmem:[#allocation128_spill] sm:$0xff]  ;;  %v11158_v37 = vld [vmem:[#allocation130_spill] sm:$0xff]  ;;  %v11159_v11 = vld [vmem:[#allocation113_spill] sm:$0xff] }
 0x63f   :  { %v2280_v63 = vadd.f32 %v2279_v20, %v2261_v55  ;;  %v2313_v58 = vmul.f32 %v11154_v33, %v2310_v18  ;;  %v2317_v22 = vmul.f32 %v11155_v17, %v2310_v18  ;;  %v2328_v1 = vadd.f32 %v11156_v10, %v2325_v24 }
 0x640   :  { %v2295_v34 = vadd.f32 %v2294_v42, %v2276_v54  ;;  %v2805_v14 = vmul.f32 %v11157_v5, %v11096_v13  ;;  %v2837_v48 = vmul.f32 %v11139_v40, %v11097_v49  ;;  %v2841_v56 = vmul.f32 %v11157_v5, %v11098_v27  ;;  %v11160_v27 = vld [vmem:[#allocation114_spill] sm:$0xff] }
 0x641   :  { %v2299_v29 = vadd.f32 %v2298_v7, %v2280_v63  ;;  %v2329_v26 = vmax.f32 %v2328_v1, 0.0  ;;  %v2873_v21 = vmul.f32 %v11139_v40, %v11102_v2  ;;  %v2877_v36 = vmul.f32 %v11157_v5, %v11105_v35 }
 0x642   :  { %3795 = vperm.xlu2 %5359, %v11158_v37   ;;  %v2314_v42 = vadd.f32 %v2313_v58, %v2295_v34  ;;  %v2809_v55 = vadd.f32 %v2805_v14, %v2801_v32  ;;  %v2845_v45 = vadd.f32 %v2841_v56, %v2837_v48  ;;  %v2909_v13 = vmul.f32 %v11139_v40, %v11109_v41 }
 0x643   :  { %v2318_v49 = vadd.f32 %v2317_v22, %v2299_v29  ;;  %v2332_v20 = vmul.f32 %v11159_v11, %v2329_v26  ;;  %v2336_v7 = vmul.f32 %v11160_v27, %v2329_v26  ;;  %v2881_v1 = vadd.f32 %v2877_v36, %v2873_v21  ;;  %v11161_v29 = vld [vmem:[#allocation22_spill] sm:$0xff] }
 0x644   :  { %v2813_v18 = vadd.f32 %v2809_v55, %v11101_v57  ;;  %v2849_v24 = vadd.f32 %v2845_v45, %v11108_v28  ;;  %v2913_v2 = vmul.f32 %v11157_v5, %v11124_v16  ;;  %v2945_v35 = vmul.f32 %v11139_v40, %v11125_v46  ;;  %v11162_v21 = vld [vmem:[#allocation116_spill] sm:$0xff] }
 0x645   :  { %v2333_v41 = vadd.f32 %v2332_v20, %v2314_v42  ;;  %v2337_v34 = vadd.f32 %v2336_v7, %v2318_v49  ;;  %v2885_v32 = vadd.f32 %v2881_v1, %v11123_v0  ;;  %v2949_v16 = vmul.f32 %v11157_v5, %v11126_v52 }
 0x646   :  { %5353 = vset.pattern.permute.xlu1 %v11088_v53  ;;  %5354 = vset.pattern.permute.xlu0 %v11088_v53  ;;  %v2817_v57 = vmax.f32 %v2813_v18, 0.0  ;;  %v2853_v28 = vmax.f32 %v2849_v24, 0.0  ;;  %v2917_v22 = vadd.f32 %v2913_v2, %v2909_v13  ;;  %v2981_v58 = vmul.f32 %v11139_v40, %v11129_v4  ;;  %v11163_v13 = vld [vmem:[#allocation88_spill] sm:$0xff]  ;;  %v11166_v18 = vld [vmem:[#allocation86_spill] sm:$0xff] }
 0x647   :  { %3681 = vperm.xlu1 %5353, %v8722_v44   ;;  %3702 = vperm.xlu0 %5354, %v8725_v38   ;;  %v2338_v46 = vadd.f32 %v2333_v41, %v8573_v8  ;;  %v2342_v54 = vadd.f32 %v2337_v34, %v8577_v39  ;;  %v2889_v63 = vmax.f32 %v2885_v32, 0.0  ;;  %v2953_v42 = vadd.f32 %v2949_v16, %v2945_v35  ;;  %v11167_v41 = vld [vmem:[#allocation87_spill] sm:$0xff] }
 0x648   :  { %v2821_v0 = vmul.f32 %v2817_v57, %v11114_v19  ;;  %v2829_v14 = vmul.f32 %v2817_v57, %v11115_v61  ;;  %v2857_v48 = vmul.f32 %v2853_v28, %v11121_v12  ;;  %v2865_v56 = vmul.f32 %v2853_v28, %v11122_v30 }
 0x649   :  { %v2341_v26 = vadd.f32 %v11161_v29, %v2338_v46  ;;  %v2345_v52 = vadd.f32 %v11162_v21, %v2342_v54  ;;  %v2893_v8 = vmul.f32 %v2889_v63, %v11132_v43  ;;  %v2901_v39 = vmul.f32 %v2889_v63, %v11133_v50  ;;  %v11169_v63 = vld [vmem:[#allocation102_spill] sm:$0xff] }
 0x64a   :  { %5362 = vset.pattern.permute.xlu2 %v11099_v59  ;;  %v2825_v36 = vadd.f32 %v2821_v0, %v2789_v31  ;;  %v2833_v4 = vadd.f32 %v2829_v14, %v2797_v47  ;;  %v2921_v19 = vadd.f32 %v2917_v22, %v11134_v15  ;;  %v2985_v12 = vmul.f32 %v11157_v5, %v11130_v6  ;;  %v11164_v15 = vld [vmem:[#allocation105_spill] sm:$0xff]  ;;  %v11168_v22 = vld [vmem:[#allocation95_spill] sm:$0xff]  ;;  %v11170_v14 = vld [vmem:[#allocation106_spill] sm:$0xff] }
 0x64b   :  { %v2346_v61 = vadd.f32 %v2345_v52, %v2341_v26  ;;  %v3017_v30 = vmul.f32 %v11139_v40, %v11131_v9  ;;  %v3021_v55 = vmul.f32 %v11157_v5, %v11136_v23  ;;  %v2957_v49 = vadd.f32 %v2953_v42, %v11163_v13 }
 0x64c   :  { %v2861_v43 = vadd.f32 %v2857_v48, %v2825_v36  ;;  %v2869_v45 = vadd.f32 %v2865_v56, %v2833_v4  ;;  %v2925_v50 = vmax.f32 %v2921_v19, 0.0  ;;  %v2989_v47 = vadd.f32 %v2985_v12, %v2981_v58  ;;  %v11171_v56 = vld [vmem:[#allocation110_spill] sm:$0xff]  ;;  %v11173_v36 = vld [vmem:[#allocation96_spill] sm:$0xff] }
 0x64d   :  { %v2347_v31 = vmul.f32 0.5, %v2346_v61  ;;  %v3025_v20 = vadd.f32 %v3021_v55, %v3017_v30  ;;  %v3053_v7 = vmul.f32 %v11139_v40, %v11164_v15  ;;  %v11165_v1 = vmov 3  }
 0x64e   :  { %v2897_v6 = vadd.f32 %v2893_v8, %v2861_v43  ;;  %v2905_v9 = vadd.f32 %v2901_v39, %v2869_v45  ;;  %v2929_v24 = vmul.f32 %v2925_v50, %v11166_v18  ;;  %v2961_v23 = vmax.f32 %v2957_v49, 0.0  ;;  %v11172_v8 = vld [vmem:[#allocation111_spill] sm:$0xff] }
 0x64f   :  { %5355 = vset.pattern.permute.xlu1 %v11165_v1  ;;  %5356 = vset.pattern.permute.xlu0 %v11165_v1  ;;  %v8832_v2 = vsub.f32 %v2341_v26, %v2347_v31  ;;  %v8834_v35 = vsub.f32 %v2345_v52, %v2347_v31  ;;  %v2937_v34 = vmul.f32 %v2925_v50, %v11167_v41  ;;  %v11174_v50 = vld [vmem:[#allocation107_spill] sm:$0xff]  ;;  %v11175_v49 = vmov 1  }
 0x650   :  { %3836 = vperm.xlu1 %5355, %v8722_v44   ;;  %3857 = vperm.xlu0 %5356, %v8725_v38   ;;  %v2933_v32 = vadd.f32 %v2929_v24, %v2897_v6  ;;  %v2965_v57 = vmul.f32 %v2961_v23, %v11143_v60  ;;  %v2973_v28 = vmul.f32 %v2961_v23, %v11144_v25  ;;  %v8862_v6 = vpop.permute.xlu2 %3348 }
 0x651   :  { %v2993_v16 = vadd.f32 %v2989_v47, %v11168_v22  ;;  %v2350_v46 = vmul.f32 %v8832_v2, %v8832_v2  ;;  %v2351_v44 = vmul.f32 %v8834_v35, %v8834_v35  ;;  %v2941_v54 = vadd.f32 %v2937_v34, %v2905_v9 }
 0x652   :  { %v3029_v58 = vadd.f32 %v3025_v20, %v11169_v63  ;;  %v2969_v0 = vadd.f32 %v2965_v57, %v2933_v32  ;;  %v3057_v48 = vmul.f32 %v11157_v5, %v11170_v14  ;;  %v3089_v60 = vmul.f32 %v11139_v40, %v11171_v56  ;;  %v11176_v20 = vld [vmem:[#allocation47_spill] sm:$0xff]  ;;  %v11178_v56 = vld [vmem:[#allocation24_spill] sm:$0xff] }
 0x653   :  { %v2997_v38 = vmax.f32 %v2993_v16, 0.0  ;;  %v2352_v25 = vadd.f32 %v2351_v44, %v2350_v46  ;;  %v2977_v26 = vadd.f32 %v2973_v28, %v2941_v54  ;;  %v3093_v39 = vmul.f32 %v11157_v5, %v11172_v8 }
 0x654   :  { %v3033_v52 = vmax.f32 %v3029_v58, 0.0  ;;  %v3061_v42 = vadd.f32 %v3057_v48, %v3053_v7 }
 0x655   :  { %v3001_v4 = vmul.f32 %v2997_v38, %v11173_v36  ;;  %v3009_v19 = vmul.f32 %v2997_v38, %v11151_v3  ;;  %v2353_v61 = vmul.f32 0.5, %v2352_v25  ;;  %v3097_v30 = vadd.f32 %v3093_v39, %v3089_v60  ;;  %v11179_v60 = vld [vmem:[#allocation115_spill] sm:$0xff] }
 0x656   :  { %v3037_v12 = vmul.f32 %v3033_v52, %v11152_v51  ;;  %v3045_v45 = vmul.f32 %v3033_v52, %v11153_v62  ;;  %v3065_v13 = vadd.f32 %v3061_v42, %v11174_v50  ;;  %v3330_v25 = vmul.f32 %v11179_v60, %v11178_v56  ;;  %v11181_v52 = vld [vmem:[#allocation21_spill] sm:$0xff]  ;;  %v11186_v50 = vld [vmem:[#allocation118_spill] sm:$0xff] }
 0x657   :  { %v3005_v55 = vadd.f32 %v3001_v4, %v2969_v0  ;;  %v3013_v43 = vadd.f32 %v3009_v19, %v2977_v26  ;;  %v2354_v31 = vadd.f32 1e-05, %v2353_v61  ;;  %v3101_v47 = vadd.f32 %v3097_v30, %v11156_v10  ;;  %v11180_v26 = vld [vmem:[#allocation38_spill] sm:$0xff]  ;;  %v11182_v39 = vld [vmem:[#allocation99_spill] sm:$0xff]  ;;  %v11183_v4 = vld [vmem:[#allocation117_spill] sm:$0xff] }
 0x658   :  { %5358 = vset.pattern.permute.xlu1 %v11175_v49  ;;  %5357 = vset.pattern.permute.xlu0 %v11175_v49  ;;  %v3069_v15 = vmax.f32 %v3065_v13, 0.0  ;;  %v8876_v46 = vpop.permute.xlu2 %3518  ;;  %v3335_v8 = vmul.f32 %v11181_v52, %v11180_v26  ;;  %v3311_v36 = vmul.f32 %v11182_v39, %v11178_v56  ;;  %v11184_v42 = vld [vmem:[#allocation119_spill] sm:$0xff]  ;;  %v3242_v30 = vstv %s8880_s13  ;;  %s9401_s13 = sld [smem:[#allocation2 + $0xa5]] }
 0x659   :  { %3644 = vperm.xlu1 %5358, %v11176_v20   ;;  %3640 = vperm.xlu0 %5357, %v11158_v37   ;;  %v3041_v3 = vadd.f32 %v3037_v12, %v3005_v55  ;;  %v3049_v51 = vadd.f32 %v3045_v45, %v3013_v43  ;;  %5554 = vrsqrt.f32 %v2354_v31  ;;  %v3105_v7 = vmax.f32 %v3101_v47, 0.0 }
 0x65a   :  { %v3073_v62 = vmul.f32 %v3069_v15, %v11154_v33  ;;  %v3081_v9 = vmul.f32 %v3069_v15, %v11155_v17  ;;  %v11177_v33 = vld [vmem:[#allocation41_spill] sm:$0xff]  ;;  %vm2361_vm3 = vweird.f32 %v2354_v31  ;;  %v3339_v45 = vadd.f32 %v3335_v8, %v3330_v25 }
 0x65b   :  { %v3109_v23 = vmul.f32 %v3105_v7, %v11159_v11  ;;  %v3117_v10 = vmul.f32 %v3105_v7, %v11160_v27  ;;  %v3249_v15 = vstv %s8882_s7  ;;  %v3252_v7 = vstv %s8888_s6  ;;  %s9404_s7 = sld [smem:[#allocation2 + $0xb5]] }
 0x65c   :  { %v3077_v18 = vadd.f32 %v3073_v62, %v3041_v3  ;;  %v3085_v24 = vadd.f32 %v3081_v9, %v3049_v51  ;;  %v3374_v62 = vpop.permute.xlu1 %3373  ;;  %s9406_s6 = sld [smem:[#allocation2 + $0xc5]] }
 0x65e   :  { %v3113_v41 = vadd.f32 %v3109_v23, %v3077_v18  ;;  %v3121_v34 = vadd.f32 %v3117_v10, %v3085_v24  ;;  %v3246_v10 = vstv %s8890_s30  ;;  %11215 = sst [smem:[#allocation132_spill]] %s9401_s13 }
 0x65f   :  { %v5555_v32 = vpop.eup %5554  ;;  %s9408_s30 = sld [smem:[#allocation2 + $0xd5]] }
 0x660   :  { %v2356_v57 = vmul.f32 %v5555_v32, %v2354_v31  ;;  %v3125_v28 = vadd.f32 %v3113_v41, %v11139_v40  ;;  %v3133_v22 = vadd.f32 %v3121_v34, %v11157_v5  ;;  %vm2362_vm1 = vweird.f32 %v5555_v32  ;;  %v3674_v55 = vpop.permute.xlu2 %3673  ;;  %v11187_v31 = vld [vmem:[#allocation120_spill] sm:$0xff]  ;;  %s9418_s13 = sld [smem:[#allocation2 + $0xb6]] }
 0x661   :  { %5360 = vset.pattern.permute.xlu1 %v11088_v53  ;;  %5361 = vset.pattern.permute.xlu0 %v11088_v53  ;;  %vm2363_vm4 = vmor %vm2361_vm3, %vm2362_vm1  ;;  %v3256_v41 = vstv %s8897_s2  ;;  %v11188_v34 = vld [vmem:[#allocation30_spill] sm:$0xff]  ;;  %11216 = sst [smem:[#allocation133_spill]] %s9404_s7 }
 0x662   :  { %3766 = vperm.xlu1 %5360, %v11177_v33   ;;  %3799 = vperm.xlu0 %5361, %v11176_v20   ;;  %v2357_v17 = vmul.f32 %v5555_v32, %v2356_v57  ;;  %v3129_v11 = vadd.f32 %v3125_v28, %v11161_v29  ;;  %v3137_v27 = vadd.f32 %v3133_v22, %v11162_v21  ;;  %11217 = sst [smem:[#allocation134_spill]] %s9406_s6 }
 0x663   :  { %s9410_s2 = sld [smem:[#allocation2 + $0x96]] }
 0x664   :  { %v2358_v16 = vmul.f32 0.5, %v2357_v17  ;;  %v3141_v44 = vadd.f32 %v3137_v27, %v3129_v11  ;;  %s9422_s6 = sld [smem:[#allocation2 + $0xc6]] }
 0x665   :  { %11218 = sst [smem:[#allocation135_spill]] %s9408_s30 }
 0x666   :  { %v2359_v40 = vsub.f32 1.5, %v2358_v16  ;;  %v3145_v5 = vmul.f32 0.5, %v3141_v44  ;;  %11221 = sst [smem:[#allocation138_spill]] %s9418_s13 }
 0x668   :  { %v2360_v54 = vmul.f32 %v5555_v32, %v2359_v40  ;;  %v8884_v63 = vsub.f32 %v3129_v11, %v3145_v5  ;;  %v8886_v29 = vsub.f32 %v3137_v27, %v3145_v5  ;;  %v3829_v40 = vpop.permute.xlu2 %3828 }
 0x669   :  { %11219 = sst [smem:[#allocation136_spill]] %s9410_s2 }
 0x66a   :  { %5363 = vset.pattern.permute.xlu1 %v11099_v59  ;;  %v2364_v21 = vsel %vm2363_vm4, %v5555_v32, %v2360_v54  ;;  %v3157_v58 = vmul.f32 %v8884_v63, %v8884_v63  ;;  %v3161_v0 = vmul.f32 %v8886_v29, %v8886_v29  ;;  %v8928_v32 = vadd.f32 %v11188_v34, %v3339_v45  ;;  %v3540_v54 = vpop.permute.xlu1 %3539  ;;  %11222 = sst [smem:[#allocation139_spill]] %s9422_s6 }
 0x66b   :  { %v2365_v38 = vmul.f32 %v2364_v21, %v8832_v2  ;;  %v2372_v14 = vmul.f32 %v2364_v21, %v8834_v35  ;;  %v11185_v2 = vld [vmem:[#allocation127_spill] sm:$0xff]  ;;  %v3239_v35 = vstv %s8878_s11  ;;  %s9398_s11 = sld [smem:[#allocation2 + $0x95]] }
 0x66c   :  { %v3165_v48 = vadd.f32 %v3161_v0, %v3157_v58  ;;  %v3316_v12 = vmul.f32 %v11185_v2, %v11180_v26  ;;  %3803 = vperm.xlu0 %5361, %v8928_v32   ;;  %v11189_v26 = vld [vmem:[#allocation131_spill] sm:$0xff]  ;;  %s9425_s2 = sld [smem:[#allocation2 + $0xd6]] }
 0x66d   :  { %v2368_v19 = vmul.f32 %v11183_v4, %v2365_v38  ;;  %v2375_v61 = vmul.f32 %v11184_v42, %v2372_v14  ;;  %s9437_s6 = sld [smem:[#allocation2 + $0xd7]] }
 0x66e   :  { %v3169_v43 = vmul.f32 0.5, %v3165_v48  ;;  %v3320_v3 = vadd.f32 %v3316_v12, %v3311_v36 }
 0x66f   :  { %v8914_v13 = vadd.f32 %v11186_v50, %v2368_v19  ;;  %v8917_v47 = vadd.f32 %v11187_v31, %v2375_v61 }
 0x670   :  { %v3173_v51 = vadd.f32 1e-05, %v3169_v43  ;;  %v8951_v19 = vpop.permute.xlu2 %3445 }
 0x671   :  { %v3240_v9 = vmul.f32 %v3239_v35, %v8914_v13  ;;  %v3243_v18 = vmul.f32 %v3242_v30, %v8917_v47  ;;  %v3250_v24 = vmul.f32 %v3249_v15, %v8914_v13  ;;  %v3253_v23 = vmul.f32 %v3252_v7, %v8917_v47  ;;  %v11190_v30 = vld [vmem:[#allocation129_spill] sm:$0xff]  ;;  %11214 = sst [smem:[#allocation72_spill]] %s9398_s11 }
 0x672   :  { %5556 = vrsqrt.f32 %v3173_v51  ;;  %vm3210_vm6 = vweird.f32 %v3173_v51  ;;  %v8958_v43 = vadd.f32 %v11190_v30, %v3320_v3  ;;  %s9413_s11 = sld [smem:[#allocation2 + $0xa6]] }
 0x673   :  { %v3244_v57 = vadd.f32 %v3243_v18, %v3240_v9  ;;  %v3254_v28 = vadd.f32 %v3253_v23, %v3250_v24  ;;  %11223 = sst [smem:[#allocation140_spill]] %s9425_s2 }
 0x674   :  { %5377 = vset.pattern.permute.xlu0 %v11165_v1  ;;  %11228 = sst [smem:[#allocation145_spill]] %s9437_s6 }
 0x675   :  { %v3247_v22 = vadd.f32 %v3246_v10, %v3244_v57  ;;  %v3257_v17 = vadd.f32 %v3256_v41, %v3254_v28  ;;  %3917 = vperm.xlu0 %5377, %v11189_v26   ;;  %v11193_v57 = vld [vmem:[#allocation124_spill] sm:$0xff]  ;;  %s9439_s2 = sld [smem:[#allocation2 + $0x98]] }
 0x676   :  { %s9461_s6 = sld [smem:[#allocation2 + $0xc9]] }
 0x677   :  { %v8931_v11 = vperm.slane %v3247_v22, 0  ;;  %v8933_v16 = vperm.slane %v3247_v22, 1  ;;  %v8935_v44 = vperm.slane %v3257_v17, 0  ;;  %v8940_v0 = vperm.slane %v3257_v17, 1 }
 0x678   :  { %v5557_v27 = vpop.eup %5556  ;;  %v8953_v61 = vperm.slane %v3247_v22, 2  ;;  %v8955_v12 = vperm.slane %v3257_v17, 2  ;;  %v8971_v23 = vperm.slane %v3247_v22, 3  ;;  %11220 = sst [smem:[#allocation137_spill]] %s9413_s11 }
 0x679   :  { %v3205_v5 = vmul.f32 %v5557_v27, %v3173_v51  ;;  %v3367_v21 = vmul.f32 %v8931_v11, %v8862_v6  ;;  %v3392_v58 = vmul.f32 %v8935_v44, %v3374_v62  ;;  %v3534_v14 = vmul.f32 %v8933_v16, %v8876_v46  ;;  %v3695_v46 = vpop.permute.xlu1 %3694 }
 0x67a   :  { %v3555_v56 = vmul.f32 %v8940_v0, %v3540_v54  ;;  %vm3211_vm5 = vweird.f32 %v5557_v27  ;;  %v3689_v45 = vmul.f32 %v8953_v61, %v3674_v55  ;;  %v3710_v51 = vmul.f32 %v8955_v12, %v3695_v46  ;;  %v3379_v55 = vpop.permute.xlu2 %3378  ;;  %v11196_v46 = vld [vmem:[#allocation126_spill] sm:$0xff] }
 0x67b   :  { %v3206_v38 = vmul.f32 %v5557_v27, %v3205_v5  ;;  %v8944_v48 = vadd.f32 %v3392_v58, %v3367_v21  ;;  %vm3212_vm7 = vmor %vm3210_vm6, %vm3211_vm5  ;;  %v8978_v21 = vperm.slane %v3257_v17, 3  ;;  %11229 = sst [smem:[#allocation146_spill]] %s9439_s2 }
 0x67c   :  { %v8949_v8 = vadd.f32 %v3555_v56, %v3534_v14  ;;  %v8967_v18 = vadd.f32 %v3710_v51, %v3689_v45  ;;  %v3844_v56 = vmul.f32 %v8971_v23, %v3829_v40  ;;  %s9459_s2 = sld [smem:[#allocation2 + $0xb9]] }
 0x67d   :  { %v3207_v25 = vmul.f32 0.5, %v3206_v38  ;;  %3925 = vperm.xlu0 %5377, %v8958_v43   ;;  %11236 = sst [smem:[#allocation153_spill]] %s9461_s6 }
 0x67e   :  { %s9475_s6 = sld [smem:[#allocation2 + $0xca]] }
 0x67f   :  { %v3208_v6 = vsub.f32 1.5, %v3207_v25 }
 0x681   :  { %v3209_v36 = vmul.f32 %v5557_v27, %v3208_v6  ;;  %v3850_v54 = vpop.permute.xlu1 %3849 }
 0x682   :  { %v3865_v25 = vmul.f32 %v8978_v21, %v3850_v54  ;;  %11235 = sst [smem:[#allocation152_spill]] %s9459_s2 }
 0x683   :  { %v3213_v35 = vsel %vm3212_vm7, %v5557_v27, %v3209_v36  ;;  %v11194_v27 = vld [vmem:[#allocation125_spill] sm:$0xff]  ;;  %v11195_v36 = vld [vmem:[#allocation123_spill] sm:$0xff]  ;;  %s9473_s2 = sld [smem:[#allocation2 + $0xba]] }
 0x684   :  { %v3217_v15 = vmul.f32 %v3213_v35, %v8884_v63  ;;  %v3229_v7 = vmul.f32 %v3213_v35, %v8886_v29  ;;  %v11191_v63 = vld [vmem:[#allocation121_spill] sm:$0xff]  ;;  %v11192_v29 = vld [vmem:[#allocation122_spill] sm:$0xff]  ;;  %11241 = sst [smem:[#allocation158_spill]] %s9475_s6 }
 0x685   :  { %s9490_s6 = sld [smem:[#allocation2 + $0xdb]] }
 0x686   :  { %v3221_v62 = vmul.f32 %v3217_v15, %v11183_v4  ;;  %v3233_v9 = vmul.f32 %v3229_v7, %v11184_v42  ;;  %v3393_v4 = vmul.f32 %v8935_v44, %v3379_v55  ;;  %v3354_v42 = vpop.permute.xlu0 %3353  ;;  %v3544_v7 = vpop.permute.xlu2 %3543 }
 0x687   :  { %v3368_v38 = vmul.f32 %v8931_v11, %v3354_v42  ;;  %v3556_v51 = vmul.f32 %v8940_v0, %v3544_v7 }
 0x688   :  { %v3225_v24 = vadd.f32 %v3221_v62, %v11186_v50  ;;  %v3237_v3 = vadd.f32 %v3233_v9, %v11187_v31 }
 0x689   :  { %11240 = sst [smem:[#allocation157_spill]] %s9473_s2 }
 0x68a   :  { %v3293_v10 = vmul.f32 %v11191_v63, %v3225_v24  ;;  %v3298_v41 = vmul.f32 %v11192_v29, %v3237_v3  ;;  %v3274_v28 = vmul.f32 %v11193_v57, %v3225_v24  ;;  %v3279_v5 = vmul.f32 %v11194_v27, %v3237_v3  ;;  %s9488_s2 = sld [smem:[#allocation2 + $0xcb]] }
 0x68b   :  { %v3331_v50 = vmul.f32 %v11179_v60, %v3225_v24  ;;  %v3336_v31 = vmul.f32 %v11181_v52, %v3237_v3  ;;  %v3312_v14 = vmul.f32 %v11182_v39, %v3225_v24  ;;  %v3317_v6 = vmul.f32 %v11185_v2, %v3237_v3  ;;  %11247 = sst [smem:[#allocation164_spill]] %s9490_s6 }
 0x68c   :  { %v3302_v22 = vadd.f32 %v3298_v41, %v3293_v10  ;;  %v3283_v58 = vadd.f32 %v3279_v5, %v3274_v28  ;;  %v8989_v60 = vadd.f32 %v3393_v4, %v3368_v38  ;;  %v8991_v52 = vadd.f32 %v3865_v25, %v3844_v56  ;;  %s9504_s6 = sld [smem:[#allocation2 + $0xbc]] }
 0x68d   :  { %v3340_v26 = vadd.f32 %v3336_v31, %v3331_v50  ;;  %v8996_v15 = vadd.f32 %v3317_v6, %v3312_v14  ;;  %v9000_v39 = vsel %vm131_vm2, %v8944_v48, -inf  ;;  %v9017_v24 = vsel %vm131_vm2, %v8949_v8, -inf  ;;  %v9057_v14 = vpop.permute.xlu1 %3482 }
 0x68e   :  { %v3307_v17 = vadd.f32 %v11195_v36, %v3302_v22  ;;  %v3288_v35 = vadd.f32 %v11196_v46, %v3283_v58  ;;  %v9004_v2 = vsel %vm131_vm2, %v8989_v60, -inf  ;;  %v3699_v63 = vpop.permute.xlu2 %3698  ;;  %v9033_v28 = vsel %vm131_vm2, %v8967_v18, -inf }
 0x68f   :  { %v8994_v45 = vadd.f32 %v11188_v34, %v3340_v26  ;;  %v3404_v40 = vmax.f32 %v9000_v39, %v9004_v2  ;;  %v3523_v34 = vpop.permute.xlu0 %3522  ;;  %v3711_v29 = vmul.f32 %v8955_v12, %v3699_v63  ;;  %v9049_v22 = vsel %vm131_vm2, %v8991_v52, -inf }
 0x690   :  { %3388 = vperm.xlu1 %5363, %v3307_v17   ;;  %3363 = vperm.xlu2 %5362, %v3288_v35   ;;  %v3535_v62 = vmul.f32 %v8933_v16, %v3523_v34  ;;  %11246 = sst [smem:[#allocation163_spill]] %s9488_s2 }
 0x691   :  { %3962 = vperm.xlu0 %5377, %v8994_v45   ;;  %s9688_s2 = sld [smem:[#allocation2 + $0xce]] }
 0x692   :  { %v9011_v9 = vadd.f32 %v3556_v51, %v3535_v62 }
 0x694   :  { %v9021_v3 = vsel %vm131_vm2, %v9011_v9, -inf }
 0x695   :  { %v3567_v55 = vmax.f32 %v9017_v24, %v9021_v3  ;;  %v9065_v56 = vpop.permute.xlu1 %3607 }
 0x696   :  { %v3854_v4 = vpop.permute.xlu2 %3853 }
 0x697   :  { %v3678_v10 = vpop.permute.xlu0 %3677  ;;  %v3866_v54 = vmul.f32 %v8978_v21, %v3854_v4 }
 0x698   :  { %5365 = vset.pattern.permute.xlu1 %v11175_v49  ;;  %5364 = vset.pattern.permute.xlu2 %v11175_v49  ;;  %v3690_v41 = vmul.f32 %v8953_v61, %v3678_v10 }
 0x699   :  { %3551 = vperm.xlu1 %5365, %v3307_v17   ;;  %3530 = vperm.xlu2 %5364, %v3288_v35  }
 0x69a   :  { %v9027_v57 = vadd.f32 %v3711_v29, %v3690_v41 }
 0x69c   :  { %v9037_v27 = vsel %vm131_vm2, %v9027_v57, -inf }
 0x69d   :  { %v3722_v5 = vmax.f32 %v9033_v28, %v9037_v27 }
 0x69e   :  { %v9077_v6 = vpop.permute.xlu2 %3487 }
 0x69f   :  { %v3833_v42 = vpop.permute.xlu0 %3832 }
 0x6a0   :  { %v3845_v50 = vmul.f32 %v8971_v23, %v3833_v42 }
 0x6a1   :  { %5367 = vset.pattern.permute.xlu1 %v11088_v53  ;;  %5366 = vset.pattern.permute.xlu2 %v11088_v53 }
 0x6a2   :  { %3706 = vperm.xlu1 %5367, %v3307_v17   ;;  %3685 = vperm.xlu2 %5366, %v3288_v35   ;;  %v9043_v31 = vadd.f32 %v3866_v54, %v3845_v50 }
 0x6a4   :  { %v9053_v58 = vsel %vm131_vm2, %v9043_v31, -inf }
 0x6a5   :  { %v3877_v38 = vmax.f32 %v9049_v22, %v9053_v58 }
 0x6a7   :  { %v3359_v25 = vpop.permute.xlu1 %3358 }
 0x6aa   :  { %5369 = vset.pattern.permute.xlu1 %v11165_v1  ;;  %5368 = vset.pattern.permute.xlu2 %v11165_v1 }
 0x6ab   :  { %3861 = vperm.xlu1 %5369, %v3307_v17   ;;  %3840 = vperm.xlu2 %5368, %v3288_v35  }
 0x6b0   :  { %v3527_v26 = vpop.permute.xlu1 %3526 }
 0x6b1   :  { %v3536_v4 = vmul.f32 %v8933_v16, %v3527_v26 }
 0x6b3   :  { %5370 = vset.pattern.permute.xlu1 %v11099_v59  ;;  %5371 = vset.pattern.permute.xlu2 %v11099_v59 }
 0x6b4   :  { %3455 = vperm.xlu1 %5370, %v8958_v43   ;;  %3492 = vperm.xlu2 %5371, %v8928_v32  }
 0x6b9   :  { %v9081_v36 = vpop.permute.xlu1 %3681 }
 0x6bc   :  { %5372 = vset.pattern.permute.xlu1 %v11175_v49  ;;  %5373 = vset.pattern.permute.xlu2 %v11175_v49 }
 0x6bd   :  { %3615 = vperm.xlu1 %5372, %v8958_v43   ;;  %3648 = vperm.xlu2 %5373, %v8928_v32  }
 0x6c5   :  { %5374 = vset.pattern.permute.xlu1 %v11165_v1  ;;  %5375 = vset.pattern.permute.xlu2 %v11165_v1 }
 0x6c6   :  { %3921 = vperm.xlu1 %5374, %v11177_v33   ;;  %3950 = vperm.xlu2 %5375, %v11158_v37   ;;  %v3326_v37 = vadd.f32 %v11190_v30, %v8996_v15  ;;  %v9090_v33 = vpop.permute.xlu1 %3836  ;;  %v3369_v15 = vmul.f32 %v8931_v11, %v3359_v25 }
 0x6ce   :  { %3954 = vperm.xlu1 %5374, %v11176_v20   ;;  %5376 = vset.pattern.permute.xlu2 %v11088_v53  ;;  %v9087_v20 = vpop.permute.xlu2 %3611  ;;  %v9096_v30 = vpop.permute.xlu1 %3644 }
 0x6cf   :  { %3770 = vperm.xlu2 %5376, %v8958_v43  }
 0x6d6   :  { %3958 = vperm.xlu1 %5374, %v8928_v32   ;;  %v9094_v32 = vpop.permute.xlu2 %3762 }
 0x6d7   :  { %5379 = vset.pattern.permute.xlu2 %v11099_v59 }
 0x6d8   :  { %3497 = vperm.xlu2 %5379, %v8994_v45  }
 0x6de   :  { %5378 = vset.pattern.permute.xlu1 %v11099_v59  ;;  %v9099_v59 = vpop.permute.xlu0 %3450  ;;  %v9103_v43 = vpop.permute.xlu2 %3795 }
 0x6df   :  { %3460 = vperm.xlu1 %5378, %v3326_v37  }
 0x6e0   :  { %5381 = vset.pattern.permute.xlu2 %v11175_v49 }
 0x6e1   :  { %3652 = vperm.xlu2 %5381, %v8994_v45  }
 0x6e6   :  { %v3384_v17 = vpop.permute.xlu0 %3383 }
 0x6e7   :  { %5380 = vset.pattern.permute.xlu1 %v11175_v49  ;;  %v9105_v49 = vpop.permute.xlu1 %3766  ;;  %v3394_v46 = vmul.f32 %v8935_v44, %v3384_v17 }
 0x6e8   :  { %3619 = vperm.xlu1 %5380, %v3326_v37  }
 0x6e9   :  { %5382 = vset.pattern.permute.xlu2 %v11088_v53  ;;  %v3398_v34 = vadd.f32 %v3394_v46, %v3369_v15 }
 0x6ea   :  { %3774 = vperm.xlu2 %5382, %v3326_v37   ;;  %v3364_v35 = vpop.permute.xlu2 %3363 }
 0x6f0   :  { %5383 = vset.pattern.permute.xlu1 %v11088_v53  ;;  %v3370_v53 = vmul.f32 %v8931_v11, %v3364_v35 }
 0x6f1   :  { %3807 = vperm.xlu1 %5383, %v8994_v45   ;;  %v3548_v45 = vpop.permute.xlu0 %3547 }
 0x6f2   :  { %5384 = vset.pattern.permute.xlu2 %v11165_v1  ;;  %v3402_v1 = vsel %vm131_vm2, %v3398_v34, -inf  ;;  %v3557_v10 = vmul.f32 %v8940_v0, %v3548_v45 }
 0x6f3   :  { %3929 = vperm.xlu2 %5384, %v3326_v37   ;;  %v3531_v41 = vpop.permute.xlu2 %3530 }
 0x6f4   :  { %v9118_v11 = vadd.f32 %v3557_v10, %v3536_v4 }
 0x6f6   :  { %v3565_v46 = vsel %vm131_vm2, %v9118_v11, -inf }
 0x702   :  { %v3389_v7 = vpop.permute.xlu1 %3388 }
 0x703   :  { %v3395_v51 = vmul.f32 %v8935_v44, %v3389_v7  ;;  %v3537_v44 = vmul.f32 %v8933_v16, %v3531_v41  ;;  %v3703_v7 = vpop.permute.xlu0 %3702 }
 0x704   :  { %v3712_v3 = vmul.f32 %v8955_v12, %v3703_v7 }
 0x705   :  { %v3399_v62 = vadd.f32 %v3395_v51, %v3370_v53 }
 0x707   :  { %v3403_v63 = vsel %vm131_vm2, %v3399_v62, -inf }
 0x708   :  { %v3405_v29 = vmax.f32 %v3402_v1, %v3403_v63  ;;  %v3686_v1 = vpop.permute.xlu2 %3685 }
 0x70a   :  { %v3406_v42 = vmax.f32 %v3404_v40, %v3405_v29 }
 0x70b   :  { %v3552_v54 = vpop.permute.xlu1 %3551 }
 0x70c   :  { %v3407_v50 = vrot.slane %v3406_v42, 4  ;;  %v3558_v25 = vmul.f32 %v8940_v0, %v3552_v54 }
 0x70e   :  { %v3408_v37 = vmax.f32 %v3406_v42, %v3407_v50  ;;  %v9122_v17 = vadd.f32 %v3558_v25, %v3537_v44 }
 0x710   :  { %v3409_v35 = vrot.slane %v3408_v37, 2  ;;  %v3566_v26 = vsel %vm131_vm2, %v9122_v17, -inf }
 0x711   :  { %v3568_v39 = vmax.f32 %v3565_v46, %v3566_v26 }
 0x712   :  { %v3410_v2 = vmax.f32 %v3408_v37, %v3409_v35 }
 0x713   :  { %v3569_v40 = vmax.f32 %v3567_v55, %v3568_v39  ;;  %v3692_v55 = vmul.f32 %v8953_v61, %v3686_v1  ;;  %v3841_v39 = vpop.permute.xlu2 %3840 }
 0x714   :  { %v3411_v16 = vrot.slane %v3410_v2, 1  ;;  %v3707_v53 = vpop.permute.xlu1 %3706 }
 0x715   :  { %v3570_v15 = vrot.slane %v3569_v40, 4  ;;  %v3713_v4 = vmul.f32 %v8955_v12, %v3707_v53 }
 0x716   :  { %v3412_v0 = vmax.f32 %v3410_v2, %v3411_v16 }
 0x717   :  { %v3571_v51 = vmax.f32 %v3569_v40, %v3570_v15  ;;  %v3846_v15 = vmul.f32 %v8971_v23, %v9090_v33 }
 0x718   :  { %v3416_v45 = vsub.f32 %v3399_v62, %v3412_v0  ;;  %v3413_v63 = vsub.f32 %v8944_v48, %v3412_v0  ;;  %v3414_v10 = vsub.f32 %v8989_v60, %v3412_v0  ;;  %v3415_v29 = vsub.f32 %v3398_v34, %v3412_v0  ;;  %v3858_v34 = vpop.permute.xlu0 %3857 }
 0x719   :  { %v3572_v41 = vrot.slane %v3571_v51, 2  ;;  %v3691_v62 = vmul.f32 %v8953_v61, %v9081_v36  ;;  %v9138_v48 = vadd.f32 %v3713_v4, %v3692_v55  ;;  %v3867_v61 = vmul.f32 %v8978_v21, %v3858_v34 }
 0x71a   :  { %v3423_v42 = vmul.f32 1.442695, %v3416_v45  ;;  %v3417_v54 = vmul.f32 1.442695, %v3413_v63  ;;  %v3419_v24 = vmul.f32 1.442695, %v3414_v10  ;;  %v3847_v45 = vmul.f32 %v8971_v23, %v3841_v39 }
 0x71b   :  { %v3421_v44 = vmul.f32 1.442695, %v3415_v29  ;;  %v3573_v50 = vmax.f32 %v3571_v51, %v3572_v41  ;;  %v9140_v60 = vadd.f32 %v3712_v3, %v3691_v62  ;;  %v3721_v12 = vsel %vm131_vm2, %v9138_v48, -inf }
 0x71c   :  { %5558 = vpow2.f32 %v3423_v42  ;;  %v9161_v51 = vadd.f32 %v3867_v61, %v3846_v15 }
 0x71d   :  { %5560 = vpow2.f32 %v3417_v54  ;;  %v3574_v25 = vrot.slane %v3573_v50, 1  ;;  %v3720_v35 = vsel %vm131_vm2, %v9140_v60, -inf  ;;  %v3862_v53 = vpop.permute.xlu1 %3861 }
 0x71e   :  { %5562 = vpow2.f32 %v3419_v24  ;;  %v3723_v2 = vmax.f32 %v3720_v35, %v3721_v12  ;;  %v3868_v63 = vmul.f32 %v8978_v21, %v3862_v53  ;;  %v3875_v21 = vsel %vm131_vm2, %v9161_v51, -inf }
 0x71f   :  { %5564 = vpow2.f32 %v3421_v44  ;;  %v3575_v26 = vmax.f32 %v3573_v50, %v3574_v25  ;;  %v3493_v25 = vpop.permute.xlu2 %3492 }
 0x720   :  { %v3724_v33 = vmax.f32 %v3722_v5, %v3723_v2  ;;  %v3872_v4 = vadd.f32 %v3868_v63, %v3847_v45 }
 0x721   :  { %v3579_v29 = vsub.f32 %v9122_v17, %v3575_v26  ;;  %v3576_v42 = vsub.f32 %v8949_v8, %v3575_v26  ;;  %v3577_v23 = vsub.f32 %v9011_v9, %v3575_v26  ;;  %v3578_v54 = vsub.f32 %v9118_v11, %v3575_v26 }
 0x722   :  { %v9144_v37 = vpop.eup %5558  ;;  %v3876_v3 = vsel %vm131_vm2, %v3872_v4, -inf  ;;  %v3725_v27 = vrot.slane %v3724_v33, 4 }
 0x723   :  { %v9146_v46 = vpop.eup %5560  ;;  %v3430_v10 = vsel %vm131_vm2, %v9144_v37, 0.0  ;;  %v3580_v55 = vmul.f32 1.442695, %v3576_v42  ;;  %v3582_v17 = vmul.f32 1.442695, %v3577_v23  ;;  %v3878_v50 = vmax.f32 %v3875_v21, %v3876_v3 }
 0x724   :  { %v9151_v36 = vpop.eup %5562  ;;  %v3425_v40 = vsel %vm131_vm2, %v9146_v46, 0.0  ;;  %v3586_v28 = vmul.f32 1.442695, %v3579_v29  ;;  %v3584_v5 = vmul.f32 1.442695, %v3578_v54  ;;  %v3726_v34 = vmax.f32 %v3724_v33, %v3725_v27 }
 0x725   :  { %v9155_v16 = vpop.eup %5564  ;;  %v3426_v7 = vsel %vm131_vm2, %v9151_v36, 0.0  ;;  %5566 = vpow2.f32 %v3580_v55  ;;  %v3879_v8 = vmax.f32 %v3877_v38, %v3878_v50  ;;  %v9190_v38 = vpop.permute.xlu0 %3640 }
 0x726   :  { %v3427_v0 = vadd.f32 %v3426_v7, %v3425_v40  ;;  %v3428_v1 = vsel %vm131_vm2, %v9155_v16, 0.0  ;;  %5568 = vpow2.f32 %v3582_v17  ;;  %v3727_v22 = vrot.slane %v3726_v34, 2 }
 0x727   :  { %v3880_v11 = vrot.slane %v3879_v8, 4  ;;  %5570 = vpow2.f32 %v3584_v5  ;;  %v9202_v21 = vpop.permute.xlu2 %3648 }
 0x728   :  { %v3429_v41 = vadd.f32 %v3428_v1, %v3427_v0  ;;  %5572 = vpow2.f32 %v3586_v28 }
 0x729   :  { %v3881_v35 = vmax.f32 %v3879_v8, %v3880_v11 }
 0x72a   :  { %v3431_v24 = vadd.f32 %v3430_v10, %v3429_v41  ;;  %v3728_v10 = vmax.f32 %v3726_v34, %v3727_v22 }
 0x72b   :  { %v9182_v61 = vpop.eup %5566  ;;  %v3882_v39 = vrot.slane %v3881_v35, 2 }
 0x72c   :  { %v3432_v44 = vrot.slane %v3431_v24, 4  ;;  %v3588_v2 = vsel %vm131_vm2, %v9182_v61, 0.0  ;;  %v9186_v40 = vpop.eup %5568  ;;  %v3729_v55 = vrot.slane %v3728_v10, 1 }
 0x72d   :  { %v9188_v58 = vpop.eup %5570  ;;  %v3883_v7 = vmax.f32 %v3881_v35, %v3882_v39  ;;  %v3589_v0 = vsel %vm131_vm2, %v9186_v40, 0.0 }
 0x72e   :  { %v3433_v62 = vadd.f32 %v3432_v44, %v3431_v24  ;;  %v9194_v53 = vpop.eup %5572  ;;  %v3590_v45 = vadd.f32 %v3589_v0, %v3588_v2  ;;  %v3591_v63 = vsel %vm131_vm2, %v9188_v58, 0.0 }
 0x72f   :  { %v3884_v1 = vrot.slane %v3883_v7, 1  ;;  %v3593_v33 = vsel %vm131_vm2, %v9194_v53, 0.0 }
 0x730   :  { %v3434_v9 = vrot.slane %v3433_v62, 2  ;;  %v3592_v29 = vadd.f32 %v3591_v63, %v3590_v45 }
 0x731   :  { %v3885_v41 = vmax.f32 %v3883_v7, %v3884_v1 }
 0x732   :  { %v3435_v12 = vadd.f32 %v3434_v9, %v3433_v62  ;;  %v3594_v42 = vadd.f32 %v3593_v33, %v3592_v29  ;;  %v9213_v62 = vpop.permute.xlu0 %3799 }
 0x733   :  { %v3886_v23 = vsub.f32 %v8991_v52, %v3885_v41  ;;  %v3887_v54 = vsub.f32 %v9043_v31, %v3885_v41  ;;  %v3889_v24 = vsub.f32 %v3872_v4, %v3885_v41  ;;  %v3888_v3 = vsub.f32 %v9161_v51, %v3885_v41 }
 0x734   :  { %v3436_v26 = vrot.slane %v3435_v12, 1  ;;  %v3595_v17 = vrot.slane %v3594_v42, 4 }
 0x735   :  { %v3890_v50 = vmul.f32 1.442695, %v3886_v23  ;;  %v3892_v28 = vmul.f32 1.442695, %v3887_v54  ;;  %v3896_v27 = vmul.f32 1.442695, %v3889_v24 }
 0x736   :  { %v3437_v15 = vadd.f32 %v3436_v26, %v3435_v12  ;;  %v3596_v4 = vadd.f32 %v3595_v17, %v3594_v42  ;;  %v3894_v51 = vmul.f32 1.442695, %v3888_v3 }
 0x738   :  { %5574 = vrcp.f32 %v3437_v15  ;;  %v3597_v34 = vrot.slane %v3596_v4, 2  ;;  %v9226_v15 = vpop.permute.xlu2 %3950 }
 0x739   :  { %5576 = vpow2.f32 %v3890_v50 }
 0x73a   :  { %5578 = vpow2.f32 %v3892_v28  ;;  %v3598_v35 = vadd.f32 %v3597_v34, %v3596_v4  ;;  %v9244_v24 = vpop.permute.xlu0 %3803 }
 0x73b   :  { %5580 = vpow2.f32 %v3896_v27 }
 0x73c   :  { %5582 = vpow2.f32 %v3894_v51 }
 0x73e   :  { %v9205_v44 = vpop.eup %5574 }
 0x73f   :  { %v3439_v5 = vmul.f32 %v9205_v44, %v9146_v46  ;;  %v3440_v52 = vmul.f32 %v9205_v44, %v9151_v36  ;;  %v3441_v31 = vmul.f32 %v9205_v44, %v9155_v16  ;;  %v3730_v46 = vmax.f32 %v3728_v10, %v3729_v55  ;;  %v9220_v39 = vpop.eup %5576 }
 0x740   :  { %v9228_v7 = vpop.eup %5578  ;;  %v3898_v0 = vsel %vm131_vm2, %v9220_v39, 0.0  ;;  %v9253_v51 = vpop.permute.xlu2 %3770 }
 0x741   :  { %v3500_v8 = vmul.f32 %v9057_v14, %v3439_v5  ;;  %v3501_v9 = vmul.f32 %v9077_v6, %v3440_v52  ;;  %v3502_v11 = vmul.f32 %v3493_v25, %v3441_v31  ;;  %v3599_v14 = vrot.slane %v3598_v35, 1  ;;  %v3456_v6 = vpop.permute.xlu1 %3455  ;;  %v9234_v10 = vpop.eup %5580 }
 0x742   :  { %v3463_v25 = vmul.f32 %v8951_v19, %v3439_v5  ;;  %v3464_v22 = vmul.f32 %v9099_v59, %v3440_v52  ;;  %v3465_v45 = vmul.f32 %v3456_v6, %v3441_v31  ;;  %v3731_v1 = vsub.f32 %v8967_v18, %v3730_v46  ;;  %v9240_v41 = vpop.eup %5582 }
 0x743   :  { %v3504_v12 = vsel %vm131_vm2, %v3500_v8, 0.0  ;;  %v3505_v36 = vsel %vm131_vm2, %v3501_v9, 0.0  ;;  %v3507_v26 = vsel %vm131_vm2, %v3502_v11, 0.0  ;;  %v3732_v63 = vsub.f32 %v9027_v57, %v3730_v46 }
 0x744   :  { %v3506_v16 = vadd.f32 %v3505_v36, %v3504_v12  ;;  %v3600_v29 = vadd.f32 %v3599_v14, %v3598_v35  ;;  %v3899_v19 = vsel %vm131_vm2, %v9228_v7, 0.0  ;;  %v3467_v59 = vsel %vm131_vm2, %v3463_v25, 0.0  ;;  %v3918_v14 = vpop.permute.xlu0 %3917 }
 0x745   :  { %v3468_v33 = vsel %vm131_vm2, %v3464_v22, 0.0  ;;  %v3734_v42 = vsub.f32 %v9138_v48, %v3730_v46  ;;  %v3900_v23 = vadd.f32 %v3899_v19, %v3898_v0  ;;  %v3470_v18 = vsel %vm131_vm2, %v3465_v45, 0.0 }
 0x746   :  { %v9222_v2 = vadd.f32 %v3507_v26, %v3506_v16  ;;  %v3469_v54 = vadd.f32 %v3468_v33, %v3467_v59  ;;  %5584 = vrcp.f32 %v3600_v29  ;;  %v3901_v57 = vsel %vm131_vm2, %v9240_v41, 0.0 }
 0x747   :  { %v3733_v3 = vsub.f32 %v9140_v60, %v3730_v46  ;;  %v3735_v55 = vmul.f32 1.442695, %v3731_v1  ;;  %v3902_v17 = vadd.f32 %v3901_v57, %v3900_v23  ;;  %v3737_v28 = vmul.f32 1.442695, %v3732_v63 }
 0x748   :  { %v9249_v50 = vadd.f32 %v3470_v18, %v3469_v54  ;;  %v3903_v48 = vsel %vm131_vm2, %v9234_v10, 0.0  ;;  %v3741_v52 = vmul.f32 1.442695, %v3734_v42  ;;  %v3498_v57 = vpop.permute.xlu2 %3497 }
 0x749   :  { %5586 = vpow2.f32 %v3735_v55  ;;  %v3739_v27 = vmul.f32 1.442695, %v3733_v3  ;;  %v3904_v5 = vadd.f32 %v3903_v48, %v3902_v17  ;;  %v3616_v4 = vpop.permute.xlu1 %3615  ;;  %v9287_v3 = vmul.f32 %v9205_v44, %v9144_v37 }
 0x74a   :  { %5588 = vpow2.f32 %v3737_v28 }
 0x74b   :  { %v3905_v31 = vrot.slane %v3904_v5, 4  ;;  %5590 = vpow2.f32 %v3739_v27  ;;  %v3503_v48 = vmul.f32 %v3498_v57, %v9287_v3 }
 0x74c   :  { %v5585_v8 = vpop.eup %5584  ;;  %5592 = vpow2.f32 %v3741_v52  ;;  %v3926_v52 = vpop.permute.xlu0 %3925 }
 0x74d   :  { %v3602_v60 = vmul.f32 %v5585_v8, %v9182_v61  ;;  %v3603_v9 = vmul.f32 %v5585_v8, %v9186_v40  ;;  %v3604_v11 = vmul.f32 %v5585_v8, %v9188_v58  ;;  %v3906_v34 = vadd.f32 %v3905_v31, %v3904_v5 }
 0x74e   :  { %v9290_v55 = vmul.f32 %v5585_v8, %v9194_v53  ;;  %v3509_v5 = vsel %vm131_vm2, %v3503_v48, 0.0 }
 0x74f   :  { %v9258_v46 = vpop.eup %5586  ;;  %v3655_v12 = vmul.f32 %v9190_v38, %v3602_v60  ;;  %v3656_v36 = vmul.f32 %v9096_v30, %v3603_v9  ;;  %v3657_v16 = vmul.f32 %v9202_v21, %v3604_v11  ;;  %v3907_v35 = vrot.slane %v3906_v34, 2 }
 0x750   :  { %v9263_v26 = vpop.eup %5588  ;;  %v3622_v61 = vmul.f32 %v9065_v56, %v3602_v60  ;;  %v3623_v40 = vmul.f32 %v9087_v20, %v3603_v9  ;;  %v3624_v6 = vmul.f32 %v3616_v4, %v3604_v11  ;;  %v3743_v30 = vsel %vm131_vm2, %v9258_v46, 0.0  ;;  %v3653_v53 = vpop.permute.xlu2 %3652 }
 0x751   :  { %v9267_v58 = vpop.eup %5590  ;;  %v3659_v25 = vsel %vm131_vm2, %v3655_v12, 0.0  ;;  %v3660_v22 = vsel %vm131_vm2, %v3656_v36, 0.0  ;;  %v3908_v38 = vadd.f32 %v3907_v35, %v3906_v34  ;;  %v3662_v56 = vsel %vm131_vm2, %v3657_v16, 0.0  ;;  %v3922_v18 = vpop.permute.xlu1 %3921 }
 0x752   :  { %v3661_v21 = vadd.f32 %v3660_v22, %v3659_v25  ;;  %v3626_v0 = vsel %vm131_vm2, %v3622_v61, 0.0  ;;  %v3627_v45 = vsel %vm131_vm2, %v3623_v40, 0.0  ;;  %v3744_v63 = vsel %vm131_vm2, %v9263_v26, 0.0  ;;  %v9278_v29 = vpop.eup %5592 }
 0x753   :  { %v3909_v1 = vrot.slane %v3908_v38, 1  ;;  %v3628_v20 = vadd.f32 %v3627_v45, %v3626_v0  ;;  %v3629_v59 = vsel %vm131_vm2, %v3624_v6, 0.0  ;;  %v3745_v33 = vadd.f32 %v3744_v63, %v3743_v30 }
 0x754   :  { %v3663_v19 = vadd.f32 %v3662_v56, %v3661_v21  ;;  %v3746_v42 = vsel %vm131_vm2, %v9267_v58, 0.0  ;;  %v3748_v28 = vsel %vm131_vm2, %v9278_v29, 0.0  ;;  %v3510_v4 = vadd.f32 %v3509_v5, %v9222_v2 }
 0x755   :  { %v3910_v23 = vadd.f32 %v3909_v1, %v3908_v38  ;;  %v9283_v54 = vadd.f32 %v3629_v59, %v3628_v20  ;;  %v3747_v17 = vadd.f32 %v3746_v42, %v3745_v33  ;;  %v3658_v2 = vmul.f32 %v3653_v53, %v9290_v55 }
 0x756   :  { %v3511_v37 = vrot.slane %v3510_v4, 4 }
 0x757   :  { %5594 = vrcp.f32 %v3910_v23  ;;  %v3749_v27 = vadd.f32 %v3748_v28, %v3747_v17 }
 0x758   :  { %v3512_v61 = vadd.f32 %v3511_v37, %v3510_v4  ;;  %v3775_v63 = vpop.permute.xlu2 %3774 }
 0x759   :  { %v3750_v31 = vrot.slane %v3749_v27, 4  ;;  %v3955_v9 = vpop.permute.xlu1 %3954 }
 0x75a   :  { %v3513_v56 = vrot.slane %v3512_v61, 2 }
 0x75b   :  { %v3751_v60 = vadd.f32 %v3750_v31, %v3749_v27 }
 0x75c   :  { %v3514_v57 = vadd.f32 %v3513_v56, %v3512_v61 }
 0x75d   :  { %v5595_v44 = vpop.eup %5594  ;;  %v3752_v12 = vrot.slane %v3751_v60, 2 }
 0x75e   :  { %v3914_v8 = vmul.f32 %v5595_v44, %v9240_v41  ;;  %v3912_v11 = vmul.f32 %v5595_v44, %v9220_v39  ;;  %v3915_v34 = vmul.f32 %v5595_v44, %v9234_v10  ;;  %v3913_v36 = vmul.f32 %v5595_v44, %v9228_v7  ;;  %v3963_v7 = vpop.permute.xlu0 %3962 }
 0x75f   :  { %v3753_v6 = vadd.f32 %v3752_v12, %v3751_v60  ;;  %v3515_v31 = vrot.slane %v3514_v57, 1 }
 0x760   :  { %v3932_v16 = vmul.f32 %v3918_v14, %v3912_v11  ;;  %v3965_v35 = vmul.f32 %v9226_v15, %v3912_v11  ;;  %v3934_v40 = vmul.f32 %v3926_v52, %v3914_v8  ;;  %v3933_v25 = vmul.f32 %v3922_v18, %v3913_v36  ;;  %v3930_v11 = vpop.permute.xlu2 %3929 }
 0x761   :  { %v3966_v22 = vmul.f32 %v3955_v9, %v3913_v36  ;;  %v3754_v39 = vrot.slane %v3753_v6, 1  ;;  %v3664_v15 = vsel %vm131_vm2, %v3658_v2, 0.0  ;;  %v3959_v20 = vpop.permute.xlu1 %3958  ;;  %v3968_v59 = vmul.f32 %v3963_v7, %v3915_v34 }
 0x762   :  { %v3969_v38 = vsel %vm131_vm2, %v3965_v35, 0.0  ;;  %v3936_v41 = vsel %vm131_vm2, %v3932_v16, 0.0  ;;  %v3937_v10 = vsel %vm131_vm2, %v3933_v25, 0.0  ;;  %v3939_v0 = vsel %vm131_vm2, %v3934_v40, 0.0 }
 0x763   :  { %v3970_v30 = vsel %vm131_vm2, %v3966_v22, 0.0  ;;  %v3938_v14 = vadd.f32 %v3937_v10, %v3936_v41  ;;  %v3755_v45 = vadd.f32 %v3754_v39, %v3753_v6  ;;  %v3665_v1 = vadd.f32 %v3664_v15, %v3663_v19 }
 0x764   :  { %v3971_v21 = vadd.f32 %v3970_v30, %v3969_v38  ;;  %v3967_v33 = vmul.f32 %v3959_v20, %v3914_v8  ;;  %v3974_v48 = vsel %vm131_vm2, %v3968_v59, 0.0 }
 0x765   :  { %v3940_v42 = vadd.f32 %v3939_v0, %v3938_v14  ;;  %5596 = vrcp.f32 %v3755_v45  ;;  %v3666_v23 = vrot.slane %v3665_v1, 4 }
 0x766   :  { %v3972_v18 = vsel %vm131_vm2, %v3967_v33, 0.0 }
 0x767   :  { %v3667_v17 = vadd.f32 %v3666_v23, %v3665_v1  ;;  %v3973_v28 = vadd.f32 %v3972_v18, %v3971_v21 }
 0x769   :  { %v3668_v27 = vrot.slane %v3667_v17, 2  ;;  %v9311_v5 = vadd.f32 %v3974_v48, %v3973_v28  ;;  %v3461_v4 = vpop.permute.xlu1 %3460 }
 0x76a   :  { %v3466_v8 = vmul.f32 %v3461_v4, %v9287_v3 }
 0x76b   :  { %v5597_v52 = vpop.eup %5596  ;;  %v3669_v19 = vadd.f32 %v3668_v27, %v3667_v17  ;;  %v3976_v20 = vrot.slane %v9311_v5, 4 }
 0x76c   :  { %v3757_v60 = vmul.f32 %v5597_v52, %v9258_v46  ;;  %v3758_v37 = vmul.f32 %v5597_v52, %v9263_v26  ;;  %v3759_v44 = vmul.f32 %v5597_v52, %v9267_v58  ;;  %v9317_v9 = vmul.f32 %v5597_v52, %v9278_v29 }
 0x76d   :  { %v3670_v53 = vrot.slane %v3669_v19, 1  ;;  %v3935_v26 = vmul.f32 %v3930_v11, %v3915_v34  ;;  %v3516_v58 = vadd.f32 %v3515_v31, %v3514_v57  ;;  %v3472_v35 = vsel %vm131_vm2, %v3466_v8, 0.0 }
 0x76e   :  { %v3777_v12 = vmul.f32 %v9094_v32, %v3757_v60  ;;  %v3778_v36 = vmul.f32 %v9105_v49, %v3758_v37  ;;  %v3779_v46 = vmul.f32 %v9253_v51, %v3759_v44  ;;  %v3780_v16 = vmul.f32 %v3775_v63, %v9317_v9 }
 0x76f   :  { %v3671_v29 = vadd.f32 %v3670_v53, %v3669_v19  ;;  %v3473_v32 = vadd.f32 %v3472_v35, %v9249_v50  ;;  %v3812_v34 = vmul.f32 %v9244_v24, %v3759_v44  ;;  %v3941_v6 = vsel %vm131_vm2, %v3935_v26, 0.0 }
 0x770   :  { %v3781_v3 = vsel %vm131_vm2, %v3777_v12, 0.0  ;;  %v3782_v61 = vsel %vm131_vm2, %v3778_v36, 0.0  ;;  %v3784_v51 = vsel %vm131_vm2, %v3779_v46, 0.0  ;;  %v3810_v25 = vmul.f32 %v9103_v43, %v3757_v60 }
 0x771   :  { %v3783_v49 = vadd.f32 %v3782_v61, %v3781_v3  ;;  %v9341_v2 = vsel %vm1970_vm12, %v3516_v58, %v3671_v29  ;;  %v3474_v40 = vrot.slane %v3473_v32, 4  ;;  %v3811_v50 = vmul.f32 %v9213_v62, %v3758_v37  ;;  %v3620_v39 = vpop.permute.xlu1 %3619 }
 0x772   :  { %v3786_v38 = vsel %vm131_vm2, %v3780_v16, 0.0  ;;  %v3942_v41 = vadd.f32 %v3941_v6, %v3940_v42  ;;  %v3625_v10 = vmul.f32 %v3620_v39, %v9290_v55  ;;  %v3814_v30 = vsel %vm131_vm2, %v3810_v25, 0.0 }
 0x773   :  { %v3785_v22 = vadd.f32 %v3784_v51, %v3783_v49  ;;  %v3475_v24 = vadd.f32 %v3474_v40, %v3473_v32  ;;  %v3815_v7 = vsel %vm131_vm2, %v3811_v50, 0.0  ;;  %v3817_v0 = vsel %vm131_vm2, %v3812_v34, 0.0 }
 0x774   :  { %v3943_v43 = vrot.slane %v3942_v41, 4  ;;  %v3816_v62 = vadd.f32 %v3815_v7, %v3814_v30  ;;  %v3631_v15 = vsel %vm131_vm2, %v3625_v10, 0.0  ;;  %v3989_v32 = vstv %s9319_s0  ;;  %s9427_s0 = sld [smem:[#allocation2 + $0x97]] }
 0x775   :  { %v3787_v14 = vadd.f32 %v3786_v38, %v3785_v22  ;;  %v3476_v21 = vrot.slane %v3475_v24, 2  ;;  %v3632_v56 = vadd.f32 %v3631_v15, %v9283_v54  ;;  %v3977_v54 = vadd.f32 %v3976_v20, %v9311_v5 }
 0x776   :  { %v3944_v55 = vadd.f32 %v3943_v43, %v3942_v41  ;;  %v3818_v1 = vadd.f32 %v3817_v0, %v3816_v62  ;;  %v3999_v34 = vstv %s9322_s1  ;;  %v3992_v40 = vstv %s9327_s17  ;;  %s9431_s1 = sld [smem:[#allocation2 + $0xa7]] }
 0x777   :  { %v3788_v45 = vrot.slane %v3787_v14, 4  ;;  %v3633_v33 = vrot.slane %v3632_v56, 4  ;;  %v3477_v23 = vadd.f32 %v3476_v21, %v3475_v24  ;;  %v3978_v37 = vrot.slane %v3977_v54, 2  ;;  %s9433_s17 = sld [smem:[#allocation2 + $0xb7]] }
 0x778   :  { %v3945_v59 = vrot.slane %v3944_v55, 2  ;;  %v4002_v6 = vstv %s9336_s20  ;;  %v3996_v24 = vstv %s9331_s18  ;;  %v4006_v10 = vstv %s9343_s23  ;;  %s9435_s20 = sld [smem:[#allocation2 + $0xc7]] }
 0x779   :  { %v3789_v63 = vadd.f32 %v3788_v45, %v3787_v14  ;;  %v3634_v57 = vadd.f32 %v3633_v33, %v3632_v56  ;;  %v3808_v17 = vpop.permute.xlu1 %3807  ;;  %v3478_v31 = vrot.slane %v3477_v23, 1  ;;  %v3979_v36 = vadd.f32 %v3978_v37, %v3977_v54  ;;  %s9443_s18 = sld [smem:[#allocation2 + $0xa8]] }
 0x77a   :  { %v3946_v18 = vadd.f32 %v3945_v59, %v3944_v55  ;;  %v3813_v28 = vmul.f32 %v3808_v17, %v9317_v9  ;;  %11224 = sst [smem:[#allocation141_spill]] %s9427_s0  ;;  %v4031_v20 = vstv %s9346_s26  ;;  %v4038_v59 = vstv %s9354_s8 }
 0x77b   :  { %v3790_v42 = vrot.slane %v3789_v63, 2  ;;  %v3635_v27 = vrot.slane %v3634_v57, 2  ;;  %v3479_v53 = vadd.f32 %v3478_v31, %v3477_v23  ;;  %v3980_v3 = vrot.slane %v3979_v36, 1  ;;  %s9445_s23 = sld [smem:[#allocation2 + $0xb8]] }
 0x77c   :  { %v3819_v52 = vsel %vm131_vm2, %v3813_v28, 0.0  ;;  %v3947_v19 = vrot.slane %v3946_v18, 1  ;;  %11225 = sst [smem:[#allocation142_spill]] %s9431_s1  ;;  %v4041_v33 = vstv %s9358_s3  ;;  %v4047_v23 = vstv %s9365_s21 }
 0x77d   :  { %v3791_v48 = vadd.f32 %v3790_v42, %v3789_v63  ;;  %v3636_v4 = vadd.f32 %v3635_v27, %v3634_v57  ;;  %v3820_v60 = vadd.f32 %v3819_v52, %v3818_v1  ;;  %v3981_v51 = vadd.f32 %v3980_v3, %v3979_v36  ;;  %11226 = sst [smem:[#allocation143_spill]] %s9433_s17 }
 0x77e   :  { %v3948_v8 = vadd.f32 %v3947_v19, %v3946_v18  ;;  %11227 = sst [smem:[#allocation144_spill]] %s9435_s20  ;;  %v4034_v63 = vstv %s9351_s28  ;;  %v4044_v42 = vstv %s9362_s19  ;;  %v4051_v18 = vstv %s9368_s22 }
 0x77f   :  { %v3792_v5 = vrot.slane %v3791_v48, 1  ;;  %v3637_v44 = vrot.slane %v3636_v4, 1  ;;  %v3821_v9 = vrot.slane %v3820_v60, 4  ;;  %s9447_s1 = sld [smem:[#allocation2 + $0xc8]]  ;;  %v4055_v57 = vstv %s9370_s16 }
 0x780   :  { %s9449_s17 = sld [smem:[#allocation2 + $0xd8]]  ;;  %v4059_v54 = vstv %s9372_s10  ;;  %v4063_v28 = vstv %s9374_s24  ;;  %v4070_v27 = vstv %s9380_s5  ;;  %v4074_v31 = vstv %s9383_s27 }
 0x781   :  { %v3638_v11 = vadd.f32 %v3637_v44, %v3636_v4  ;;  %v3822_v12 = vadd.f32 %v3821_v9, %v3820_v60  ;;  %v3793_v46 = vadd.f32 %v3792_v5, %v3791_v48  ;;  %11230 = sst [smem:[#allocation147_spill]] %s9445_s23  ;;  %v4066_v48 = vstv %s9378_s25 }
 0x782   :  { %s9451_s20 = sld [smem:[#allocation2 + $0x99]]  ;;  %v4078_v19 = vstv %s9385_s15  ;;  %v4082_v4 = vstv %s9387_s12  ;;  %v4085_v60 = vstv %s9389_s9  ;;  %v4089_v37 = vstv %s9391_s29 }
 0x783   :  { %v3982_v26 = vsel %vm1970_vm12, %v3479_v53, %v3638_v11  ;;  %v3823_v58 = vrot.slane %v3822_v12, 2  ;;  %s9453_s0 = sld [smem:[#allocation2 + $0xa9]]  ;;  %v4093_v5 = vstv %s9393_s14  ;;  %v4097_v44 = vstv %s9395_s4 }
 0x784   :  { %v3983_v29 = vsel %vm1972_vm13, %v3982_v26, %v3793_v46  ;;  %s11249_s28 = sld [smem:[#allocation72_spill]]  ;;  %v4108_v11 = vstv %s9404_s7  ;;  %v4116_v36 = vstv %s9408_s30  ;;  %v4123_v26 = vstv %s9413_s11 }
 0x785   :  { %v3984_v16 = vsel %vm1974_vm11, %v3983_v29, %v3948_v8  ;;  %v3824_v35 = vadd.f32 %v3823_v58, %v3822_v12  ;;  %11231 = sst [smem:[#allocation148_spill]] %s9447_s1  ;;  %v4127_v29 = vstv %s9418_s13 }
 0x786   :  { %v3990_v22 = vmul.f32 %v3989_v32, %v3984_v16  ;;  %v4000_v38 = vmul.f32 %v3999_v34, %v3984_v16  ;;  %11232 = sst [smem:[#allocation149_spill]] %s9449_s17 }
 0x787   :  { %v3825_v61 = vrot.slane %v3824_v35, 1  ;;  %s9467_s17 = sld [smem:[#allocation2 + $0xd9]] }
 0x788   :  { %11233 = sst [smem:[#allocation150_spill]] %s9451_s20 }
 0x789   :  { %v3826_v49 = vadd.f32 %v3825_v61, %v3824_v35  ;;  %11234 = sst [smem:[#allocation151_spill]] %s9453_s0 }
 0x78a   :  { %s9469_s20 = sld [smem:[#allocation2 + $0x9a]]  ;;  %v4101_v53 = vstv %s11249_s28 }
 0x78b   :  { %v3986_v25 = vsel %vm1972_vm13, %v9341_v2, %v3826_v49  ;;  %s9471_s0 = sld [smem:[#allocation2 + $0xaa]] }
 0x78c   :  { %v3987_v50 = vsel %vm1974_vm11, %v3986_v25, %v3981_v51  ;;  %s9477_s1 = sld [smem:[#allocation2 + $0xda]]  ;;  %v4165_v25 = vstv %s9445_s23 }
 0x78d   :  { %v3993_v41 = vmul.f32 %v3992_v40, %v3987_v50  ;;  %v4003_v39 = vmul.f32 %v4002_v6, %v3987_v50  ;;  %11237 = sst [smem:[#allocation154_spill]] %s9467_s17  ;;  %v4161_v6 = vstv %s9443_s18 }
 0x78e   :  { %s9483_s17 = sld [smem:[#allocation2 + $0xab]] }
 0x78f   :  { %v3994_v30 = vadd.f32 %v3993_v41, %v3990_v22  ;;  %v4004_v7 = vadd.f32 %v4003_v39, %v4000_v38  ;;  %s11250_s3 = sld [smem:[#allocation132_spill]] }
 0x790   :  { %11238 = sst [smem:[#allocation155_spill]] %s9469_s20 }
 0x791   :  { %v3997_v2 = vadd.f32 %v3996_v24, %v3994_v30  ;;  %v4007_v14 = vadd.f32 %v4006_v10, %v4004_v7  ;;  %11239 = sst [smem:[#allocation156_spill]] %s9471_s0 }
 0x792   :  { %11242 = sst [smem:[#allocation159_spill]] %s9477_s1 }
 0x793   :  { %v4008_v43 = vadd.f32 %v3997_v2, %v8914_v13  ;;  %v4009_v62 = vadd.f32 %v4007_v14, %v8917_v47  ;;  %s9481_s20 = sld [smem:[#allocation2 + $0x9b]] }
 0x794   :  { %11244 = sst [smem:[#allocation161_spill]] %s9483_s17 }
 0x795   :  { %v4010_v21 = vadd.f32 %v4009_v62, %v4008_v43  ;;  %s9486_s0 = sld [smem:[#allocation2 + $0xbb]]  ;;  %v4104_v8 = vstv %s11250_s3 }
 0x796   :  { %s9492_s1 = sld [smem:[#allocation2 + $0x9c]] }
 0x797   :  { %v4011_v15 = vmul.f32 0.5, %v4010_v21  ;;  %s9498_s17 = sld [smem:[#allocation2 + $0xac]] }
 0x798   :  { %s11252_s22 = sld [smem:[#allocation134_spill]] }
 0x799   :  { %v9455_v0 = vsub.f32 %v4008_v43, %v4011_v15  ;;  %v9457_v45 = vsub.f32 %v4009_v62, %v4011_v15  ;;  %11243 = sst [smem:[#allocation160_spill]] %s9481_s20 }
 0x79a   :  { %s11253_s16 = sld [smem:[#allocation136_spill]] }
 0x79b   :  { %v4014_v13 = vmul.f32 %v9455_v0, %v9455_v0  ;;  %v4015_v47 = vmul.f32 %v9457_v45, %v9457_v45  ;;  %11245 = sst [smem:[#allocation162_spill]] %s9486_s0 }
 0x79c   :  { %s9517_s10 = sld [smem:[#allocation2 + $0xdc]] }
 0x79d   :  { %v4016_v55 = vadd.f32 %v4015_v47, %v4014_v13  ;;  %11248 = sst [smem:[#allocation165_spill]] %s9498_s17  ;;  %v4215_v47 = vstv %s9481_s20 }
 0x79e   :  { %s9510_s17 = sld [smem:[#allocation2 + $0xcc]]  ;;  %v4112_v12 = vstv %s11252_s22 }
 0x79f   :  { %v4017_v56 = vmul.f32 0.5, %v4016_v55  ;;  %s11255_s5 = sld [smem:[#allocation139_spill]] }
 0x7a0   :  { %s9523_s25 = sld [smem:[#allocation2 + $0x9d]]  ;;  %v4120_v46 = vstv %s11253_s16 }
 0x7a1   :  { %v9479_v1 = vadd.f32 1e-05, %v4017_v56  ;;  %s11256_s24 = sld [smem:[#allocation140_spill]]  ;;  %v4222_v56 = vstv %s9486_s0 }
 0x7a2   :  { %11254 = sst [smem:[#allocation167_spill]] %s9517_s10 }
 0x7a3   :  { %5598 = vrsqrt.f32 %v9479_v1  ;;  %vm4025_vm12 = vweird.f32 %v9479_v1  ;;  %s11257_s21 = sld [smem:[#allocation141_spill]] }
 0x7a4   :  { %11251 = sst [smem:[#allocation166_spill]] %s9510_s17 }
 0x7a5   :  { %s11258_s19 = sld [smem:[#allocation142_spill]]  ;;  %v4131_v16 = vstv %s11255_s5 }
 0x7a6   :  { %s11259_s27 = sld [smem:[#allocation143_spill]] }
 0x7a7   :  { %s9528_s15 = sld [smem:[#allocation2 + $0xad]]  ;;  %v4135_v35 = vstv %s11256_s24 }
 0x7a8   :  { %s11261_s12 = sld [smem:[#allocation144_spill]] }
 0x7a9   :  { %v5599_v17 = vpop.eup %5598  ;;  %s11262_s29 = sld [smem:[#allocation145_spill]]  ;;  %v4139_v3 = vstv %s11257_s21 }
 0x7aa   :  { %v4020_v52 = vmul.f32 %v5599_v17, %v9479_v1  ;;  %s11263_s14 = sld [smem:[#allocation146_spill]]  ;;  %vm4026_vm13 = vweird.f32 %v5599_v17 }
 0x7ab   :  { %s9534_s4 = sld [smem:[#allocation2 + $0xbd]]  ;;  %v4142_v61 = vstv %s11258_s19  ;;  %vm4027_vm11 = vmor %vm4025_vm12, %vm4026_vm13  ;;  %vm4825_vm13 = vcmask 64512  }
 0x7ac   :  { %v4021_v9 = vmul.f32 %v5599_v17, %v4020_v52  ;;  %s11265_s28 = sld [smem:[#allocation148_spill]]  ;;  %v4146_v32 = vstv %s11259_s27  ;;  %v4234_v52 = vstv %s9492_s1 }
 0x7ad   :  { %11260 = sst [smem:[#allocation168_spill]] %s9528_s15 }
 0x7ae   :  { %v4022_v58 = vmul.f32 0.5, %v4021_v9  ;;  %s11266_s3 = sld [smem:[#allocation149_spill]]  ;;  %v4150_v51 = vstv %s11261_s12 }
 0x7af   :  { %s9538_s7 = sld [smem:[#allocation2 + $0xcd]]  ;;  %v4154_v34 = vstv %s11262_s29 }
 0x7b0   :  { %s11267_s22 = sld [smem:[#allocation150_spill]]  ;;  %v4023_v49 = vsub.f32 1.5, %v4022_v58  ;;  %v4158_v40 = vstv %s11263_s14 }
 0x7b1   :  { %11264 = sst [smem:[#allocation146_spill]] %s9534_s4 }
 0x7b2   :  { %s11268_s30 = sld [smem:[#allocation151_spill]]  ;;  %v4169_v50 = vstv %s11265_s28  ;;  %v4024_v38 = vmul.f32 %v5599_v17, %v4023_v49 }
 0x7b3   :  { %s11269_s16 = sld [smem:[#allocation152_spill]] }
 0x7b4   :  { %s9544_s11 = sld [smem:[#allocation2 + $0xdd]]  ;;  %v4173_v22 = vstv %s11266_s3  ;;  %v4028_v14 = vsel %vm4027_vm11, %v5599_v17, %v4024_v38  ;;  %vm4944_vm11 = vcmask 322560  }
 0x7b5   :  { %s11270_s9 = sld [smem:[#allocation153_spill]]  ;;  %v4029_v15 = vmul.f32 %v4028_v14, %v9455_v0  ;;  %v4036_v13 = vmul.f32 %v4028_v14, %v9457_v45  ;;  %v4253_v14 = vstv %s9523_s25 }
 0x7b6   :  { %s11271_s4 = sld [smem:[#allocation154_spill]]  ;;  %v4177_v41 = vstv %s11267_s22 }
 0x7b7   :  { %s11272_s15 = sld [smem:[#allocation155_spill]]  ;;  %v4032_v9 = vmul.f32 %v4031_v20, %v4029_v15  ;;  %v4039_v0 = vmul.f32 %v4038_v59, %v4036_v13 }
 0x7b8   :  { %s11273_s13 = sld [smem:[#allocation156_spill]]  ;;  %v4180_v39 = vstv %s11268_s30 }
 0x7b9   :  { %s9549_s5 = sld [smem:[#allocation2 + $0x9e]]  ;;  %v4184_v24 = vstv %s11269_s16  ;;  %v9592_v1 = vadd.f32 %v4034_v63, %v4032_v9  ;;  %v9596_v20 = vadd.f32 %v4041_v33, %v4039_v0 }
 0x7ba   :  { %s11274_s24 = sld [smem:[#allocation157_spill]] }
 0x7bb   :  { %s11275_s21 = sld [smem:[#allocation158_spill]]  ;;  %v4188_v10 = vstv %s11270_s9  ;;  %v4045_v58 = vmul.f32 %v4044_v42, %v9592_v1  ;;  %v4048_v63 = vmul.f32 %v4047_v23, %v9596_v20  ;;  %v4064_v33 = vmul.f32 %v4063_v28, %v9592_v1 }
 0x7bc   :  { %s9555_s27 = sld [smem:[#allocation2 + $0xae]]  ;;  %v4192_v30 = vstv %s11271_s4  ;;  %v4067_v9 = vmul.f32 %v4066_v48, %v9596_v20  ;;  %v4083_v0 = vmul.f32 %v4082_v4, %v9592_v1  ;;  %v4086_v13 = vmul.f32 %v4085_v60, %v9596_v20 }
 0x7bd   :  { %s11277_s12 = sld [smem:[#allocation161_spill]]  ;;  %v4196_v7 = vstv %s11272_s15  ;;  %v4102_v42 = vmul.f32 %v4101_v53, %v9592_v1  ;;  %v4105_v23 = vmul.f32 %v4104_v8, %v9596_v20  ;;  %v4049_v28 = vadd.f32 %v4048_v63, %v4045_v58 }
 0x7be   :  { %s9560_s29 = sld [smem:[#allocation2 + $0xbe]]  ;;  %v4199_v2 = vstv %s11273_s13  ;;  %v4068_v15 = vadd.f32 %v4067_v9, %v4064_v33  ;;  %v4121_v48 = vmul.f32 %v4120_v46, %v9592_v1  ;;  %v4124_v4 = vmul.f32 %v4123_v26, %v9596_v20 }
 0x7bf   :  { %s11279_s3 = sld [smem:[#allocation165_spill]]  ;;  %v4272_v21 = vstv %s9549_s5  ;;  %v4087_v38 = vadd.f32 %v4086_v13, %v4083_v0  ;;  %v4106_v60 = vadd.f32 %v4105_v23, %v4102_v42  ;;  %v4140_v59 = vmul.f32 %v4139_v3, %v9592_v1 }
 0x7c0   :  { %v4203_v43 = vstv %s11274_s24  ;;  %s11280_s16 = sld [smem:[#allocation168_spill]]  ;;  %v4143_v53 = vmul.f32 %v4142_v61, %v9596_v20  ;;  %v4052_v8 = vadd.f32 %v4051_v18, %v4049_v28  ;;  %v4071_v58 = vadd.f32 %v4070_v27, %v4068_v15 }
 0x7c1   :  { %v4207_v62 = vstv %s11275_s21  ;;  %s11283_s4 = sld [smem:[#allocation146_spill]]  ;;  %v4125_v46 = vadd.f32 %v4124_v4, %v4121_v48  ;;  %v4159_v26 = vmul.f32 %v4158_v40, %v9592_v1  ;;  %v4090_v13 = vadd.f32 %v4089_v37, %v4087_v38 }
 0x7c2   :  { %v4275_v49 = vstv %s9555_s27  ;;  %v4109_v3 = vadd.f32 %v4108_v11, %v4106_v60  ;;  %v4144_v63 = vadd.f32 %v4143_v53, %v4140_v59  ;;  %v4162_v18 = vmul.f32 %v4161_v6, %v9596_v20  ;;  %s9710_s15 = sld [smem:[#allocation2 + $0xde]] }
 0x7c3   :  { %v4218_v55 = vstv %s11277_s12  ;;  %v4053_v27 = vmax.f32 %v4052_v8, 0.0  ;;  %v4072_v61 = vmax.f32 %v4071_v58, 0.0  ;;  %v4128_v15 = vadd.f32 %v4127_v29, %v4125_v46  ;;  %s9717_s23 = sld [smem:[#allocation2 + $0x9f]] }
 0x7c4   :  { %v4178_v40 = vmul.f32 %v4177_v41, %v9592_v1  ;;  %v4091_v33 = vmax.f32 %v4090_v13, 0.0  ;;  %v4110_v37 = vmax.f32 %v4109_v3, 0.0  ;;  %v4147_v11 = vadd.f32 %v4146_v32, %v4144_v63  ;;  %s9725_s26 = sld [smem:[#allocation2 + $0xaf]] }
 0x7c5   :  { %v4237_v45 = vstv %s11279_s3  ;;  %v4163_v38 = vadd.f32 %v4162_v18, %v4159_v26  ;;  %v4056_v59 = vmul.f32 %v4055_v57, %v4053_v27  ;;  %v4060_v6 = vmul.f32 %v4059_v54, %v4053_v27  ;;  %s9730_s1 = sld [smem:[#allocation2 + $0xbf]] }
 0x7c6   :  { %v4256_v17 = vstv %s11280_s16  ;;  %v4075_v9 = vmul.f32 %v4074_v31, %v4072_v61  ;;  %v4079_v29 = vmul.f32 %v4078_v19, %v4072_v61  ;;  %v4094_v41 = vmul.f32 %v4093_v5, %v4091_v33  ;;  %s11325_s3 = sld [smem:[#allocation159_spill]] }
 0x7c7   :  { %v4098_v0 = vmul.f32 %v4097_v44, %v4091_v33  ;;  %v4113_v32 = vmul.f32 %v4112_v12, %v4110_v37  ;;  %v4117_v42 = vmul.f32 %v4116_v36, %v4110_v37  ;;  %v4129_v28 = vmax.f32 %v4128_v15, 0.0  ;;  %s9737_s25 = sld [smem:[#allocation2 + $0xcf]] }
 0x7c8   :  { %v4076_v23 = vadd.f32 %v4075_v9, %v4056_v59  ;;  %v4080_v57 = vadd.f32 %v4079_v29, %v4060_v6  ;;  %v4148_v54 = vmax.f32 %v4147_v11, 0.0  ;;  %v4166_v31 = vadd.f32 %v4165_v25, %v4163_v38  ;;  %s11326_s8 = sld [smem:[#allocation163_spill]] }
 0x7c9   :  { %v4181_v19 = vmul.f32 %v4180_v39, %v9596_v20  ;;  %v4197_v5 = vmul.f32 %v4196_v7, %v9592_v1  ;;  %v4200_v44 = vmul.f32 %v4199_v2, %v9596_v20  ;;  %v4132_v25 = vmul.f32 %v4131_v16, %v4129_v28  ;;  %s11327_s14 = sld [smem:[#allocation164_spill]] }
 0x7ca   :  { %v4095_v12 = vadd.f32 %v4094_v41, %v4076_v23  ;;  %v4099_v36 = vadd.f32 %v4098_v0, %v4080_v57  ;;  %v4136_v48 = vmul.f32 %v4135_v35, %v4129_v28  ;;  %v4151_v39 = vmul.f32 %v4150_v51, %v4148_v54  ;;  %s9743_s16 = sld [smem:[#allocation2 + $0xa0]] }
 0x7cb   :  { %v4155_v7 = vmul.f32 %v4154_v34, %v4148_v54  ;;  %v4167_v4 = vmax.f32 %v4166_v31, 0.0  ;;  %v4182_v60 = vadd.f32 %v4181_v19, %v4178_v40  ;;  %v4201_v8 = vadd.f32 %v4200_v44, %v4197_v5  ;;  %s9750_s22 = sld [smem:[#allocation2 + $0xb0]] }
 0x7cc   :  { %v4114_v53 = vadd.f32 %v4113_v32, %v4095_v12  ;;  %v4118_v2 = vadd.f32 %v4117_v42, %v4099_v36  ;;  %v4216_v58 = vmul.f32 %v4215_v47, %v9592_v1  ;;  %v4219_v51 = vmul.f32 %v4218_v55, %v9596_v20  ;;  %s11329_s18 = sld [smem:[#allocation166_spill]] }
 0x7cd   :  { %v4170_v16 = vmul.f32 %v4169_v50, %v4167_v4  ;;  %v4174_v35 = vmul.f32 %v4173_v22, %v4167_v4  ;;  %v4185_v46 = vadd.f32 %v4184_v24, %v4182_v60  ;;  %v4204_v13 = vadd.f32 %v4203_v43, %v4201_v8  ;;  %s11330_s28 = sld [smem:[#allocation167_spill]] }
 0x7ce   :  { %v4133_v34 = vadd.f32 %v4132_v25, %v4114_v53  ;;  %v4137_v26 = vadd.f32 %v4136_v48, %v4118_v2  ;;  %v4235_v50 = vmul.f32 %v4234_v52, %v9592_v1  ;;  %v4220_v24 = vadd.f32 %v4219_v51, %v4216_v58  ;;  %s9757_s9 = sld [smem:[#allocation2 + $0xdf]] }
 0x7cf   :  { %v4186_v22 = vmax.f32 %v4185_v46, 0.0  ;;  %v4238_v47 = vmul.f32 %v4237_v45, %v9596_v20  ;;  %v4254_v55 = vmul.f32 %v4253_v14, %v9592_v1  ;;  %v4205_v63 = vmax.f32 %v4204_v13, 0.0  ;;  %s9765_s5 = sld [smem:[#allocation2 + $0xc0]] }
 0x7d0   :  { %v4152_v3 = vadd.f32 %v4151_v39, %v4133_v34  ;;  %v4156_v43 = vadd.f32 %v4155_v7, %v4137_v26  ;;  %v4257_v52 = vmul.f32 %v4256_v17, %v9596_v20  ;;  %v4223_v45 = vadd.f32 %v4222_v56, %v4220_v24  ;;  %s9768_s27 = sld [smem:[#allocation2 + $0xa1]] }
 0x7d1   :  { %v4189_v18 = vmul.f32 %v4188_v10, %v4186_v22  ;;  %v4239_v27 = vadd.f32 %v4238_v47, %v4235_v50  ;;  %v4283_v14 = vstv %s9688_s2  ;;  %v4193_v40 = vmul.f32 %v4192_v30, %v4186_v22  ;;  %s9788_s19 = sld [smem:[#allocation2 + $0xc1]] }
 0x7d2   :  { %v4171_v61 = vadd.f32 %v4170_v16, %v4152_v3  ;;  %v4175_v15 = vadd.f32 %v4174_v35, %v4156_v43  ;;  %v4208_v17 = vmul.f32 %v4207_v62, %v4205_v63  ;;  %v4224_v10 = vmax.f32 %v4223_v45, 0.0  ;;  %s5213_s21 = sld [smem:[#allocation2 + $0xe2]] }
 0x7d3   :  { %v11328_v33 = vstv %s9504_s6  ;;  %v4258_v37 = vadd.f32 %v4257_v52, %v4254_v55  ;;  %v4273_v11 = vmul.f32 %v4272_v21, %v9592_v1  ;;  %v11331_v30 = vstv %s11325_s3  ;;  %s9780_s6 = sld [smem:[#allocation2 + $0xd0]] }
 0x7d4   :  { %v4242_v56 = vadd.f32 %v11328_v33, %v4239_v27  ;;  %v4190_v38 = vadd.f32 %v4189_v18, %v4171_v61  ;;  %v4194_v59 = vadd.f32 %v4193_v40, %v4175_v15  ;;  %v4212_v6 = vmul.f32 %v11331_v30, %v4205_v63  ;;  %s5214_s24 = sld [smem:[#allocation2 + $0xe3]] }
 0x7d5   :  { %v4276_v62 = vmul.f32 %v4275_v49, %v9596_v20  ;;  %v11332_v9 = vstv %s11326_s8  ;;  %v11333_v41 = vstv %s11327_s14  ;;  %v11334_v21 = vstv %s11283_s4  ;;  %s9775_s4 = sld [smem:[#allocation2 + $0xb1]] }
 0x7d6   :  { %v4227_v29 = vmul.f32 %v11332_v9, %v4224_v10  ;;  %v4231_v0 = vmul.f32 %v11333_v41, %v4224_v10  ;;  %v4243_v32 = vmax.f32 %v4242_v56, 0.0  ;;  %v4261_v42 = vadd.f32 %v11334_v21, %v4258_v37  ;;  %s11340_s0 = sld [smem:[#allocation170_spill]] }
 0x7d7   :  { %v4209_v23 = vadd.f32 %v4208_v17, %v4190_v38  ;;  %v4213_v57 = vadd.f32 %v4212_v6, %v4194_v59  ;;  %v4277_v28 = vadd.f32 %v4276_v62, %v4273_v11  ;;  %v4291_v49 = vstv %s9717_s23  ;;  %s5217_s30 = sld [smem:[#allocation2 + $0xe5]]  ;;  %s5660_s23 = smov 32  }
 0x7d8   :  { %v11335_v54 = vstv %s11329_s18  ;;  %v11336_v19 = vstv %s11330_s28  ;;  %v4262_v44 = vmax.f32 %v4261_v42, 0.0  ;;  %v4292_v12 = vmul.f32 %v4291_v49, %v9592_v1  ;;  %s5218_s20 = sld [smem:[#allocation2 + $0xe7]] }
 0x7d9   :  { %v4246_v31 = vmul.f32 %v11335_v54, %v4243_v32  ;;  %v4250_v5 = vmul.f32 %v11336_v19, %v4243_v32  ;;  %v4228_v36 = vadd.f32 %v4227_v29, %v4209_v23  ;;  %v4232_v25 = vadd.f32 %v4231_v0, %v4213_v57  ;;  %s5216_s28 = sld [smem:[#allocation2 + $0xe6]] }
 0x7da   :  { %v11337_v48 = vstv %s9560_s29  ;;  %v4294_v7 = vstv %s9725_s26  ;;  %v11338_v4 = vstv %s9538_s7  ;;  %v11339_v53 = vstv %s9544_s11  ;;  %s9791_s29 = sld [smem:[#allocation2 + $0xe0]] }
 0x7db   :  { %v4280_v39 = vadd.f32 %v11337_v48, %v4277_v28  ;;  %v4265_v60 = vmul.f32 %v11338_v4, %v4262_v44  ;;  %v4269_v2 = vmul.f32 %v11339_v53, %v4262_v44  ;;  %v4287_v8 = vstv %s9710_s15  ;;  %s9795_s11 = sld [smem:[#allocation2 + $0xd1]] }
 0x7dc   :  { %v4295_v58 = vmul.f32 %v4294_v7, %v9596_v20  ;;  %v4247_v16 = vadd.f32 %v4246_v31, %v4228_v36  ;;  %v4251_v35 = vadd.f32 %v4250_v5, %v4232_v25  ;;  %v4298_v51 = vstv %s9730_s1  ;;  %s9800_s7 = sld [smem:[#allocation2 + $0xe1]] }
 0x7dd   :  { %v4281_v46 = vmax.f32 %v4280_v39, 0.0  ;;  %v4310_v26 = vstv %s9743_s16  ;;  %v4313_v13 = vstv %s9750_s22  ;;  %v4302_v3 = vstv %s9737_s25 }
 0x7de   :  { %v4296_v34 = vadd.f32 %v4295_v58, %v4292_v12  ;;  %v4266_v50 = vadd.f32 %v4265_v60, %v4247_v16  ;;  %v4270_v22 = vadd.f32 %v4269_v2, %v4251_v35  ;;  %v4311_v43 = vmul.f32 %v4310_v26, %v9592_v1  ;;  %v4429_v2 = vld [vmem:[%s11340_s0 + $0x120] sm:$0xff]  ;;  %v4418_v16 = vld [vmem:[%s11340_s0 + $0xc8] sm:$0xff]  ;;  %v4431_v35 = vld [vmem:[%s11340_s0 + $0x130] sm:$0xff] }
 0x7df   :  { %v4284_v24 = vmul.f32 %v4283_v14, %v4281_v46  ;;  %v4288_v47 = vmul.f32 %v4287_v8, %v4281_v46  ;;  %v4314_v63 = vmul.f32 %v4313_v13, %v9596_v20  ;;  %v4306_v45 = vstv %s9757_s9  ;;  %4477 = vmatpush.msrb.mxu3 %v4429_v2  ;;  %v4424_v8 = vld [vmem:[%s11340_s0 + $0xf8] sm:$0xff]  ;;  %v4413_v13 = vld [vmem:[%s11340_s0 + $0xa0] sm:$0xff]  ;;  %4517 = vmatpush.msra.mxu0 %v4431_v35  ;;  %s11341_s9 = sld [smem:[#allocation172_spill]] }
 0x7e0   :  { %v4299_v55 = vadd.f32 %v4298_v51, %v4296_v34  ;;  %v4317_v27 = vstv %s9765_s5  ;;  %v4329_v15 = vstv %s9768_s27  ;;  %v4332_v40 = vstv %s9775_s4  ;;  %v4432_v46 = vld [vmem:[%s11340_s0 + $0x138] sm:$0xff] }
 0x7e1   :  { %v4285_v52 = vadd.f32 %v4284_v24, %v4266_v50  ;;  %v4289_v18 = vadd.f32 %v4288_v47, %v4270_v22  ;;  %v4315_v14 = vadd.f32 %v4314_v63, %v4311_v43  ;;  %v4330_v17 = vmul.f32 %v4329_v15, %v9592_v1  ;;  %4478 = vmatpush.msrb.mxu3 %v4424_v8  ;;  %v4426_v51 = vld [vmem:[%s11340_s0 + $0x108] sm:$0xff]  ;;  %v4427_v34 = vld [vmem:[%s11340_s0 + $0x110] sm:$0xff]  ;;  %v4421_v22 = vld [vmem:[%s11340_s0 + $0xe0] sm:$0xff] }
 0x7e2   :  { %v4300_v61 = vmax.f32 %v4299_v55, 0.0  ;;  %v4333_v10 = vmul.f32 %v4332_v40, %v9596_v20  ;;  %v4336_v11 = vstv %s9788_s19  ;;  %v4321_v38 = vstv %s9780_s6  ;;  %4537 = vmatpush.msra.mxu1 %v4432_v46  ;;  %v4419_v50 = vld [vmem:[%s11340_s0 + $0xd0] sm:$0xff]  ;;  %v4422_v24 = vld [vmem:[%s11340_s0 + $0xe8] sm:$0xff]  ;;  %4518 = vmatpush.msra.mxu0 %v4426_v51  ;;  %s11349_s6 = sld [smem:[#allocation174_spill]] }
 0x7e3   :  { %v4318_v37 = vadd.f32 %v4317_v27, %v4315_v14  ;;  %v4325_v59 = vstv %s9791_s29  ;;  %v4340_v32 = vstv %s9795_s11  ;;  %v4344_v21 = vstv %s9800_s7  ;;  %4479 = vmatpush.msrb.mxu3 %v4419_v50  ;;  %v4414_v47 = vld [vmem:[%s11340_s0 + $0xa8] sm:$0xff]  ;;  %s11342_s11 = sld [smem:[#allocation173_spill]] }
 0x7e4   :  { %v4303_v33 = vmul.f32 %v4302_v3, %v4300_v61  ;;  %v4307_v56 = vmul.f32 %v4306_v45, %v4300_v61  ;;  %v4334_v30 = vadd.f32 %v4333_v10, %v4330_v17  ;;  %v4349_v19 = vstv %s5213_s21  ;;  %v4408_v3 = vld [vmem:[%s11340_s0 + $0x78] sm:$0xff]  ;;  %4538 = vmatpush.msra.mxu1 %v4427_v34  ;;  %v4409_v43 = vld [vmem:[%s11340_s0 + $0x80] sm:$0xff]  ;;  %4519 = vmatpush.msra.mxu0 %v4421_v22  ;;  %v4411_v27 = vld [vmem:[%s11340_s0 + $0x90] sm:$0xff]  ;;  %s11344_s7 = sld [smem:[#allocation171_spill]] }
 0x7e5   :  { %v4319_v9 = vmax.f32 %v4318_v37, 0.0  ;;  %v4353_v5 = vstv %s5214_s24  ;;  %4480 = vmatpush.msrb.mxu3 %v4414_v47  ;;  %v4416_v63 = vld [vmem:[%s11340_s0 + $0xb8] sm:$0xff]  ;;  %v4398_v14 = vld [vmem:[%s11340_s0 + $0x28] sm:$0xff]  ;;  %v4399_v15 = vld [vmem:[%s11340_s0 + $0x30] sm:$0xff] }
 0x7e6   :  { %v4304_v6 = vadd.f32 %v4303_v33, %v4285_v52  ;;  %v4308_v62 = vadd.f32 %v4307_v56, %v4289_v18  ;;  %v4337_v29 = vadd.f32 %v4336_v11, %v4334_v30  ;;  %v4417_v52 = vld [vmem:[%s11340_s0 + $0xc0] sm:$0xff]  ;;  %v4403_v18 = vld [vmem:[%s11340_s0 + $0x50] sm:$0xff]  ;;  %4539 = vmatpush.msra.mxu1 %v4422_v24  ;;  %v4404_v45 = vld [vmem:[%s11340_s0 + $0x58] sm:$0xff]  ;;  %4520 = vmatpush.msra.mxu0 %v4416_v63  ;;  %v4379_v35 = vstv %s5216_s28 }
 0x7e7   :  { %v4322_v41 = vmul.f32 %v4321_v38, %v4319_v9  ;;  %v4326_v0 = vmul.f32 %v4325_v59, %v4319_v9  ;;  %4481 = vmatpush.msrb.mxu3 %v4409_v43  ;;  %v4412_v61 = vld [vmem:[%s11340_s0 + $0x98] sm:$0xff]  ;;  %v4406_v40 = vld [vmem:[%s11340_s0 + $0x68] sm:$0xff]  ;;  %v4407_v17 = vld [vmem:[%s11340_s0 + $0x70] sm:$0xff] }
 0x7e8   :  { %v4338_v42 = vmax.f32 %v4337_v29, 0.0  ;;  %4540 = vmatpush.msra.mxu1 %v4417_v52  ;;  %v4393_v10 = vld [vmem:[%s11340_s0] sm:$0xff]  ;;  %4521 = vmatpush.msra.mxu0 %v4411_v27  ;;  %v4430_v33 = vld [vmem:[%s11340_s0 + $0x128] sm:$0xff]  ;;  %v4634_v2 = vld [vmem:[%s11341_s9 + $0x10] sm:$0xff] }
 0x7e9   :  { %v4323_v23 = vadd.f32 %v4322_v41, %v4304_v6  ;;  %v4327_v57 = vadd.f32 %v4326_v0, %v4308_v62  ;;  %4482 = vmatpush.msrb.mxu3 %v4404_v45  ;;  %v4401_v56 = vld [vmem:[%s11340_s0 + $0x40] sm:$0xff]  ;;  %v4402_v11 = vld [vmem:[%s11340_s0 + $0x48] sm:$0xff]  ;;  %v4420_v6 = vld [vmem:[%s11340_s0 + $0xd8] sm:$0xff]  ;;  %v4383_v0 = vstv %s5217_s30  ;;  %s5661_s30 = smov [#allocation5]  }
 0x7ea   :  { %v4341_v28 = vmul.f32 %v4340_v32, %v4338_v42  ;;  %v4345_v49 = vmul.f32 %v4344_v21, %v4338_v42  ;;  %4541 = vmatpush.msra.mxu1 %v4412_v61  ;;  %4522 = vmatpush.msra.mxu0 %v4406_v40  ;;  %v4425_v59 = vld [vmem:[%s11340_s0 + $0x100] sm:$0xff]  ;;  %v4386_v21 = vstv %s5218_s20  ;;  %v4823_v50 = vld [vmem:[%s11342_s11 + $0x1f8] sm:$0xff]  ;;  %v4645_v24 = vld [vmem:[%s11341_s9 + $0x68] sm:$0xff]  ;;  %s4951_s15 = sshll.u32 %s5661_s30, 4  ;;  %s4952_s15 = int_to_ptr.vmem [resolvable:$true] %s4951_s15 }
 0x7eb   :  { %4483 = vmatpush.msrb.mxu3 %v4399_v15  ;;  %v4636_v8 = vld [vmem:[%s11341_s9 + $0x20] sm:$0xff]  ;;  %v4643_v22 = vld [vmem:[%s11341_s9 + $0x58] sm:$0xff]  ;;  %v4638_v47 = vld [vmem:[%s11341_s9 + $0x30] sm:$0xff] }
 0x7ec   :  { %v4342_v54 = vadd.f32 %v4341_v28, %v4323_v23  ;;  %v4346_v31 = vadd.f32 %v4345_v49, %v4327_v57  ;;  %4542 = vmatpush.msra.mxu1 %v4407_v17  ;;  %4523 = vmatpush.msra.mxu0 %v4401_v56  ;;  %v4394_v28 = vld [vmem:[%s11340_s0 + $0x8] sm:$0xff]  ;;  %v4415_v49 = vld [vmem:[%s11340_s0 + $0xb0] sm:$0xff]  ;;  %v4635_v43 = vld [vmem:[%s11341_s9 + $0x18] sm:$0xff] }
 0x7ed   :  { %4484 = vmatpush.msrb.mxu3 %v4394_v28  ;;  %v11343_v63 = vld [vmem:[#allocation20_spill] sm:$0xff]  ;;  %v4822_v52 = vld [vmem:[%s11342_s11 + $0x1f0] sm:$0xff]  ;;  %v4775_v45 = vld [vmem:[%s11342_s11 + $0x78] sm:$0xff] }
 0x7ee   :  { %v4347_v44 = vadd.f32 %v4342_v54, %v9592_v1  ;;  %v4351_v12 = vadd.f32 %v4346_v31, %v9596_v20  ;;  %v4428_v1 = vld [vmem:[%s11340_s0 + $0x118] sm:$0xff]  ;;  %v4423_v20 = vld [vmem:[%s11340_s0 + $0xf0] sm:$0xff]  ;;  %4543 = vmatpush.msra.mxu1 %v4402_v11  ;;  %v4397_v31 = vld [vmem:[%s11340_s0 + $0x20] sm:$0xff] }
 0x7ef   :  { %4457 = vmatpush.msrb.mxu2 %v4428_v1  ;;  %v4396_v54 = vld [vmem:[%s11340_s0 + $0x18] sm:$0xff]  ;;  %v4395_v1 = vld [vmem:[%s11340_s0 + $0x10] sm:$0xff]  ;;  %v4820_v61 = vld [vmem:[%s11342_s11 + $0x1e0] sm:$0xff] }
 0x7f0   :  { %v4350_v36 = vadd.f32 %v4349_v19, %v4347_v44  ;;  %v4354_v25 = vadd.f32 %v4353_v5, %v4351_v12  ;;  %4524 = vmatpush.msra.mxu0 %v4396_v54  ;;  %4544 = vmatpush.msra.mxu1 %v4397_v31  ;;  %v4410_v19 = vld [vmem:[%s11340_s0 + $0x88] sm:$0xff]  ;;  %v4647_v5 = vld [vmem:[%s11341_s9 + $0x78] sm:$0xff]  ;;  %v4790_v15 = vld [vmem:[%s11342_s11 + $0xf0] sm:$0xff] }
 0x7f1   :  { %4458 = vmatpush.msrb.mxu2 %v4423_v20  ;;  %v4649_v44 = vld [vmem:[%s11341_s9 + $0x88] sm:$0xff]  ;;  %4667 = vmatpush.msra.mxu3 %v4647_v5  ;;  %v4651_v12 = vld [vmem:[%s11341_s9 + $0x98] sm:$0xff]  ;;  %v4632_v20 = vld [vmem:[%s11341_s9] sm:$0xff] }
 0x7f2   :  { %v4355_v48 = vadd.f32 %v4354_v25, %v4350_v36  ;;  %4707 = vmatpush.msrb.mxu0 %v4649_v44  ;;  %4747 = vmatpush.msrb.mxu1 %v4651_v12  ;;  %v4791_v27 = vld [vmem:[%s11342_s11 + $0xf8] sm:$0xff]  ;;  %v10051_v17 = vld [vmem:[%s11344_s7] ss:$2 sm:$0x1f]  ;;  %v4818_v56 = vld [vmem:[%s11342_s11 + $0x1d0] sm:$0xff] }
 0x7f3   :  { %4459 = vmatpush.msrb.mxu2 %v4418_v16  ;;  %v4819_v40 = vld [vmem:[%s11342_s11 + $0x1d8] sm:$0xff]  ;;  %v4439_v11 = vperm.slane %v10051_v17, 4  ;;  %v4770_v31 = vld [vmem:[%s11342_s11 + $0x50] sm:$0xff]  ;;  %v4769_v12 = vld [vmem:[%s11342_s11 + $0x48] sm:$0xff] }
 0x7f4   :  { %v4356_v39 = vmul.f32 0.5, %v4355_v48  ;;  %v4644_v48 = vld [vmem:[%s11341_s9 + $0x60] sm:$0xff]  ;;  %v4806_v5 = vld [vmem:[%s11342_s11 + $0x170] sm:$0xff]  ;;  %v4815_v44 = vld [vmem:[%s11342_s11 + $0x1b8] sm:$0xff] }
 0x7f5   :  { %4460 = vmatpush.msrb.mxu2 %v4413_v13  ;;  %4708 = vmatpush.msrb.mxu0 %v4644_v48  ;;  %v4650_v13 = vld [vmem:[%s11341_s9 + $0x90] sm:$0xff] }
 0x7f6   :  { %v9815_v7 = vsub.f32 %v4350_v36, %v4356_v39  ;;  %v9817_v4 = vsub.f32 %v4354_v25, %v4356_v39  ;;  %v4405_v36 = vld [vmem:[%s11340_s0 + $0x60] sm:$0xff]  ;;  %v4642_v25 = vld [vmem:[%s11341_s9 + $0x50] sm:$0xff] }
 0x7f7   :  { %4461 = vmatpush.msrb.mxu2 %v4408_v3  ;;  %v4646_v39 = vld [vmem:[%s11341_s9 + $0x70] sm:$0xff]  ;;  %4668 = vmatpush.msra.mxu3 %v4642_v25  ;;  %v4633_v3 = vld [vmem:[%s11341_s9 + $0x8] sm:$0xff] }
 0x7f8   :  { %v4359_v60 = vmul.f32 %v9815_v7, %v9815_v7  ;;  %v4360_v53 = vmul.f32 %v9817_v4, %v9817_v4  ;;  %4748 = vmatpush.msrb.mxu1 %v4646_v39  ;;  %v4805_v25 = vld [vmem:[%s11342_s11 + $0x168] sm:$0xff]  ;;  %v4814_v48 = vld [vmem:[%s11342_s11 + $0x1b0] sm:$0xff]  ;;  %v4768_v39 = vld [vmem:[%s11342_s11 + $0x40] sm:$0xff] }
 0x7f9   :  { %4462 = vmatpush.msrb.mxu2 %v4403_v18  ;;  %v4821_v18 = vld [vmem:[%s11342_s11 + $0x1e8] sm:$0xff] }
 0x7fa   :  { %v4361_v58 = vadd.f32 %v4360_v53, %v4359_v60  ;;  %v4639_v60 = vld [vmem:[%s11341_s9 + $0x38] sm:$0xff]  ;;  %v4641_v53 = vld [vmem:[%s11341_s9 + $0x48] sm:$0xff] }
 0x7fb   :  { %4463 = vmatpush.msrb.mxu2 %v4398_v14  ;;  %4709 = vmatpush.msrb.mxu0 %v4639_v60  ;;  %v4774_v14 = vld [vmem:[%s11342_s11 + $0x70] sm:$0xff]  ;;  %v4804_v60 = vld [vmem:[%s11342_s11 + $0x160] sm:$0xff] }
 0x7fc   :  { %v4362_v26 = vmul.f32 0.5, %v4361_v58  ;;  %4749 = vmatpush.msrb.mxu1 %v4641_v53  ;;  %v4813_v53 = vld [vmem:[%s11342_s11 + $0x1a8] sm:$0xff] }
 0x7fd   :  { %4464 = vmatpush.msrb.mxu2 %v4393_v10  ;;  %4710 = vmatpush.msrb.mxu0 %v4634_v2  ;;  %v4773_v10 = vld [vmem:[%s11342_s11 + $0x68] sm:$0xff]  ;;  %v4437_v2 = vperm.slane %v10051_v17, 2 }
 0x7fe   :  { %v4363_v55 = vadd.f32 1e-05, %v4362_v26  ;;  %4750 = vmatpush.msrb.mxu1 %v4636_v8  ;;  %v4648_v26 = vld [vmem:[%s11341_s9 + $0x80] sm:$0xff]  ;;  %v4767_v8 = vld [vmem:[%s11342_s11 + $0x38] sm:$0xff] }
 0x7ff   :  { %4497 = vmatpush.msra.mxu2 %v4430_v33  ;;  %v4789_v33 = vld [vmem:[%s11342_s11 + $0xe8] sm:$0xff] }
 0x800   :  { %5600 = vrsqrt.f32 %v4363_v55  ;;  %vm4370_vm9 = vweird.f32 %v4363_v55 }
 0x801   :  { %4498 = vmatpush.msra.mxu2 %v4425_v59  ;;  %v4788_v59 = vld [vmem:[%s11342_s11 + $0xe0] sm:$0xff] }
 0x803   :  { %4499 = vmatpush.msra.mxu2 %v4420_v6  ;;  %v4771_v6 = vld [vmem:[%s11342_s11 + $0x58] sm:$0xff] }
 0x805   :  { %4500 = vmatpush.msra.mxu2 %v4415_v49 }
 0x806   :  { %v5601_v37 = vpop.eup %5600 }
 0x807   :  { %v4365_v38 = vmul.f32 %v5601_v37, %v4363_v55  ;;  %vm4371_vm8 = vweird.f32 %v5601_v37  ;;  %4501 = vmatpush.msra.mxu2 %v4410_v19  ;;  %v4640_v55 = vld [vmem:[%s11341_s9 + $0x40] sm:$0xff]  ;;  %v4786_v19 = vld [vmem:[%s11342_s11 + $0xd0] sm:$0xff] }
 0x808   :  { %vm4372_vm10 = vmor %vm4370_vm9, %vm4371_vm8 }
 0x809   :  { %v4366_v30 = vmul.f32 %v5601_v37, %v4365_v38  ;;  %4502 = vmatpush.msra.mxu2 %v4405_v36  ;;  %v4772_v38 = vld [vmem:[%s11342_s11 + $0x60] sm:$0xff]  ;;  %v4785_v36 = vld [vmem:[%s11342_s11 + $0xc8] sm:$0xff] }
 0x80b   :  { %v4367_v62 = vmul.f32 0.5, %v4366_v30  ;;  %v4817_v30 = vld [vmem:[%s11342_s11 + $0x1c8] sm:$0xff] }
 0x80d   :  { %v4368_v9 = vsub.f32 1.5, %v4367_v62  ;;  %v4787_v62 = vld [vmem:[%s11342_s11 + $0xd8] sm:$0xff] }
 0x80f   :  { %v4369_v29 = vmul.f32 %v5601_v37, %v4368_v9  ;;  %v4807_v9 = vld [vmem:[%s11342_s11 + $0x178] sm:$0xff] }
 0x811   :  { %v4373_v41 = vsel %vm4372_vm10, %v5601_v37, %v4369_v29  ;;  %v4438_v37 = vperm.slane %v10051_v17, 3  ;;  %v4816_v29 = vld [vmem:[%s11342_s11 + $0x1c0] sm:$0xff] }
 0x812   :  { %v4381_v32 = vmul.f32 %v4373_v41, %v9817_v4  ;;  %v4374_v23 = vmul.f32 %v4373_v41, %v9815_v7  ;;  %v4400_v7 = vld [vmem:[%s11340_s0 + $0x38] sm:$0xff]  ;;  %v4637_v4 = vld [vmem:[%s11341_s9 + $0x28] sm:$0xff]  ;;  %s5215_s0 = sld [smem:[#allocation2 + $0xe4]] }
 0x813   :  { %4503 = vmatpush.msra.mxu2 %v4400_v7  ;;  %4669 = vmatpush.msra.mxu3 %v4637_v4  ;;  %v4784_v4 = vld [vmem:[%s11342_s11 + $0xc0] sm:$0xff] }
 0x814   :  { %v4384_v42 = vmul.f32 %v4383_v0, %v4381_v32 }
 0x815   :  { %4504 = vmatpush.msra.mxu2 %v4395_v1  ;;  %4670 = vmatpush.msra.mxu3 %v4632_v20 }
 0x816   :  { %v4387_v57 = vadd.f32 %v4386_v21, %v4384_v42  ;;  %v4435_v42 = vperm.slane %v10051_v17, 0 }
 0x818   :  { %4389 = vrot.lane.b32.xlu1 %v4387_v57, %s5660_s23  ;;  %v4376_v58 = vstv %s5215_s0  ;;  %s11350_s23 = sld [smem:[#allocation175_spill]] }
 0x819   :  { %v4377_v16 = vmul.f32 %v4376_v58, %v4374_v23  ;;  %v4436_v23 = vperm.slane %v10051_v17, 1  ;;  %v4783_v58 = vld [vmem:[%s11342_s11 + $0xb8] sm:$0xff]  ;;  %v4764_v17 = vld [vmem:[%s11342_s11 + $0x20] sm:$0xff] }
 0x81b   :  { %v4380_v46 = vadd.f32 %v4379_v35, %v4377_v16  ;;  %v4803_v35 = vld [vmem:[%s11342_s11 + $0x158] sm:$0xff] }
 0x81e   :  { %s4953_s17 = sshll.u32 %s11350_s23, 4  ;;  %s4954_s17 = int_to_ptr.hbm [resolvable:$true] %s4953_s17 }
 0x88a   :  { %v4390_v51 = vpop.permute.xlu1 %4389 }
 0x88b   :  { %v4392_v34 = vsel %vm131_vm2, %v4380_v46, %v4390_v51  ;;  %v4812_v46 = vld [vmem:[%s11342_s11 + $0x1a0] sm:$0xff] }
 0x88c   :  { %5219 = vmatmul.msk.f32.vlgmr.msrb.gmra.mxu2 %vm4445_vm14, %v4392_v34  ;;  %5220 = vmatmul.msk.f32.vlgmr.msrb.gmra.mxu3 %vm4445_vm14, %v4392_v34 }
 0x88d   :  { %5222 = vmatmul.msk.f32.vlgmr.msra.gmra.mxu0 %vm4445_vm14, %v4392_v34  ;;  %5223 = vmatmul.msk.f32.vlgmr.msra.gmra.mxu1 %vm4445_vm14, %v4392_v34 }
 0x88e   :  { %4687 = vmatpush.msrb.mxu2 %v4648_v26  ;;  %4727 = vmatpush.msrb.mxu3 %v4650_v13  ;;  %v4782_v26 = vld [vmem:[%s11342_s11 + $0xb0] sm:$0xff] }
 0x88f   :  { %4889 = vmatpush.msra.mxu1 %v4823_v50  ;;  %4849 = vmatpush.msra.mxu0 %v4791_v27 }
 0x890   :  { %4688 = vmatpush.msrb.mxu2 %v4643_v22  ;;  %4728 = vmatpush.msrb.mxu3 %v4645_v24  ;;  %v4802_v22 = vld [vmem:[%s11342_s11 + $0x150] sm:$0xff]  ;;  %v4811_v24 = vld [vmem:[%s11342_s11 + $0x198] sm:$0xff] }
 0x891   :  { %4890 = vmatpush.msra.mxu1 %v4822_v52  ;;  %4850 = vmatpush.msra.mxu0 %v4790_v15  ;;  %v4781_v52 = vld [vmem:[%s11342_s11 + $0xa8] sm:$0xff] }
 0x892   :  { %4689 = vmatpush.msrb.mxu2 %v4638_v47  ;;  %4729 = vmatpush.msrb.mxu3 %v4640_v55 }
 0x893   :  { %4891 = vmatpush.msra.mxu1 %v4821_v18  ;;  %4851 = vmatpush.msra.mxu0 %v4789_v33 }
 0x894   :  { %5221 = vmatmul.msk.f32.vlgmr.msra.gmra.mxu2 %vm4445_vm14, %v4392_v34  ;;  %5225 = vmatmul.msk.f32.vlgmr.msra.gmra.mxu3 %vm131_vm2, %v11343_v63  ;;  %v4766_v34 = vld [vmem:[%s11342_s11 + $0x30] sm:$0xff] }
 0x895   :  { %5227 = vmatmul.msk.f32.vlgmr.msrb.gmra.mxu0 %vm131_vm2, %v11343_v63  ;;  %5229 = vmatmul.msk.f32.vlgmr.msrb.gmra.mxu1 %vm131_vm2, %v11343_v63 }
 0x896   :  { %4690 = vmatpush.msrb.mxu2 %v4633_v3  ;;  %4730 = vmatpush.msrb.mxu3 %v4635_v43  ;;  %v10151_v3 = vld [vmem:[%s11344_s7 + $0x1] ss:$2 sm:$0x1f] }
 0x897   :  { %4892 = vmatpush.msra.mxu1 %v4820_v61  ;;  %4852 = vmatpush.msra.mxu0 %v4788_v59  ;;  %v4801_v61 = vld [vmem:[%s11342_s11 + $0x148] sm:$0xff] }
 0x898   :  { %4829 = vmatpush.msra.mxu2 %v4775_v45  ;;  %4869 = vmatpush.msra.mxu3 %v4807_v9 }
 0x899   :  { %4893 = vmatpush.msra.mxu1 %v4819_v40  ;;  %4853 = vmatpush.msra.mxu0 %v4787_v62 }
 0x89a   :  { %4830 = vmatpush.msra.mxu2 %v4774_v14  ;;  %4870 = vmatpush.msra.mxu3 %v4806_v5  ;;  %v4810_v14 = vld [vmem:[%s11342_s11 + $0x190] sm:$0xff] }
 0x89b   :  { %4894 = vmatpush.msra.mxu1 %v4818_v56  ;;  %4854 = vmatpush.msra.mxu0 %v4786_v19  ;;  %v4798_v19 = vld [vmem:[%s11342_s11 + $0x130] sm:$0xff] }
 0x89c   :  { %5226 = vmatmul.msk.f32.vlgmr.msrb.gmra.mxu2 %vm131_vm2, %v11343_v63  ;;  %5228 = vmatmul.msk.f32.vlgmr.msrb.gmra.mxu3 %vm131_vm2, %v11343_v63  ;;  %v4765_v63 = vld [vmem:[%s11342_s11 + $0x28] sm:$0xff] }
 0x89d   :  { %4831 = vmatpush.msra.mxu2 %v4773_v10  ;;  %4895 = vmatpush.msra.mxu1 %v4817_v30  ;;  %v4780_v10 = vld [vmem:[%s11342_s11 + $0xa0] sm:$0xff]  ;;  %v4763_v30 = vld [vmem:[%s11342_s11 + $0x18] sm:$0xff] }
 0x89e   :  { %4855 = vmatpush.msra.mxu0 %v4785_v36  ;;  %4871 = vmatpush.msra.mxu3 %v4805_v25  ;;  %v5390_v25 = vld [vmem:[%s11349_s6 + $0x3] ss:$0 sm:$0xff] }
 0x89f   :  { %4832 = vmatpush.msra.mxu2 %v4772_v38  ;;  %4896 = vmatpush.msra.mxu1 %v4816_v29 }
 0x8a0   :  { %4856 = vmatpush.msra.mxu0 %v4784_v4  ;;  %4872 = vmatpush.msra.mxu3 %v4804_v60  ;;  %v4587_v60 = vperm.slane %v10151_v3, 0 }
 0x8a1   :  { %4833 = vmatpush.msra.mxu2 %v4771_v6  ;;  %4897 = vmatpush.msra.mxu1 %v4815_v44  ;;  %v4779_v6 = vld [vmem:[%s11342_s11 + $0x98] sm:$0xff] }
 0x8a2   :  { %4857 = vmatpush.msra.mxu0 %v4783_v58  ;;  %4873 = vmatpush.msra.mxu3 %v4803_v35  ;;  %v4760_v58 = vld [vmem:[%s11342_s11] sm:$0xff] }
 0x8a3   :  { %4834 = vmatpush.msra.mxu2 %v4770_v31  ;;  %4898 = vmatpush.msra.mxu1 %v4814_v48  ;;  %v4591_v31 = vperm.slane %v10151_v3, 4  ;;  %v4761_v48 = vld [vmem:[%s11342_s11 + $0x8] sm:$0xff] }
 0x8a4   :  { %4858 = vmatpush.msra.mxu0 %v4782_v26  ;;  %4874 = vmatpush.msra.mxu3 %v4802_v22 }
 0x8a5   :  { %4835 = vmatpush.msra.mxu2 %v4769_v12  ;;  %4899 = vmatpush.msra.mxu1 %v4813_v53  ;;  %v4797_v53 = vld [vmem:[%s11342_s11 + $0x128] sm:$0xff] }
 0x8a6   :  { %4859 = vmatpush.msra.mxu0 %v4781_v52  ;;  %4875 = vmatpush.msra.mxu3 %v4801_v61 }
 0x8a7   :  { %4836 = vmatpush.msra.mxu2 %v4768_v39  ;;  %4900 = vmatpush.msra.mxu1 %v4812_v46  ;;  %v4777_v39 = vld [vmem:[%s11342_s11 + $0x88] sm:$0xff] }
 0x8a8   :  { %4860 = vmatpush.msra.mxu0 %v4780_v10 }
 0x8a9   :  { %4837 = vmatpush.msra.mxu2 %v4767_v8  ;;  %4901 = vmatpush.msra.mxu1 %v4811_v24 }
 0x8aa   :  { %4861 = vmatpush.msra.mxu0 %v4779_v6 }
 0x8ab   :  { %4838 = vmatpush.msra.mxu2 %v4766_v34  ;;  %4902 = vmatpush.msra.mxu1 %v4810_v14  ;;  %v4824_v34 = vld [vmem:[%s11342_s11 + $0x200] sm:$0xff]  ;;  %v4794_v14 = vld [vmem:[%s11342_s11 + $0x110] sm:$0xff] }
 0x8ad   :  { %4839 = vmatpush.msra.mxu2 %v4765_v63  ;;  %v4795_v63 = vld [vmem:[%s11342_s11 + $0x118] sm:$0xff] }
 0x8af   :  { %4840 = vmatpush.msra.mxu2 %v4764_v17 }
 0x8b1   :  { %4841 = vmatpush.msra.mxu2 %v4763_v30 }
 0x90a   :  { %v4526_v41 = vpop.f32.mrf.mxu0  ;;  %v4546_v0 = vpop.f32.mrf.mxu1 }
 0x90b   :  { %v4527_v32 = vadd.f32 %v4526_v41, %v4438_v37  ;;  %v4547_v21 = vadd.f32 %v4546_v0, %v4439_v11  ;;  %v4800_v37 = vld [vmem:[%s11342_s11 + $0x140] sm:$0xff]  ;;  %v4809_v11 = vld [vmem:[%s11342_s11 + $0x188] sm:$0xff]  ;;  %v4590_v41 = vperm.slane %v10151_v3, 3  ;;  %v4799_v0 = vld [vmem:[%s11342_s11 + $0x138] sm:$0xff] }
 0x90c   :  { %4876 = vmatpush.msra.mxu3 %v4800_v37  ;;  %4903 = vmatpush.msra.mxu1 %v4809_v11  ;;  %v4793_v37 = vld [vmem:[%s11342_s11 + $0x108] sm:$0xff] }
 0x90d   :  { %5602 = vtanh.f32 %v4527_v32  ;;  %v4808_v32 = vld [vmem:[%s11342_s11 + $0x180] sm:$0xff] }
 0x90e   :  { %5604 = vtanh.f32 %v4547_v21  ;;  %4877 = vmatpush.msra.mxu3 %v4799_v0  ;;  %4904 = vmatpush.msra.mxu1 %v4808_v32  ;;  %v4792_v32 = vld [vmem:[%s11342_s11 + $0x100] sm:$0xff] }
 0x90f   :  { %v4466_v57 = vpop.f32.mrf.mxu2  ;;  %v4486_v28 = vpop.f32.mrf.mxu3 }
 0x910   :  { %v4467_v49 = vadd.f32 %v4466_v57, %v4435_v42  ;;  %v4487_v54 = vadd.f32 %v4486_v28, %v4436_v23  ;;  %v4762_v57 = vld [vmem:[%s11342_s11 + $0x10] sm:$0xff]  ;;  %4878 = vmatpush.msra.mxu3 %v4798_v19 }
 0x911   :  { %v4778_v28 = vld [vmem:[%s11342_s11 + $0x90] sm:$0xff]  ;;  %4842 = vmatpush.msra.mxu2 %v4762_v57 }
 0x912   :  { %5606 = vtanh.f32 %v4467_v49  ;;  %4862 = vmatpush.msra.mxu0 %v4778_v28  ;;  %4879 = vmatpush.msra.mxu3 %v4797_v53  ;;  %v4752_v57 = vpop.f32.mrf.mxu1  ;;  %v5392_v53 = vld [vmem:[%s11349_s6 + $0x1] ss:$0 sm:$0xff] }
 0x913   :  { %v5603_v7 = vpop.eup %5602  ;;  %5608 = vtanh.f32 %v4487_v54  ;;  %4843 = vmatpush.msra.mxu2 %v4761_v48 }
 0x914   :  { %v5605_v1 = vpop.eup %5604  ;;  %v4557_v20 = vmul.f32 6.5, %v5603_v7  ;;  %4863 = vmatpush.msra.mxu0 %v4777_v39 }
 0x915   :  { %v4558_v16 = vmul.f32 6.5, %v5605_v1  ;;  %4844 = vmatpush.msra.mxu2 %v4760_v58 }
 0x916   :  { %v4562_v51 = vadd.f32 6.5, %v4557_v20  ;;  %v4588_v20 = vperm.slane %v10151_v3, 1 }
 0x917   :  { %v4563_v13 = vadd.f32 6.5, %v4558_v16  ;;  %v4506_v50 = vpop.f32.mrf.mxu2  ;;  %v10185_v29 = vpop.f32.mrf.mxu3  ;;  %v4776_v16 = vld [vmem:[%s11342_s11 + $0x80] sm:$0xff]  ;;  %4924 = vmatpush.msrb.mxu2 %v4824_v34 }
 0x918   :  { %v5607_v47 = vpop.eup %5606  ;;  %v4567_v55 = vmax.f32 %v4562_v51, 0.0  ;;  %v4507_v43 = vadd.f32 %v4506_v50, %v4437_v2  ;;  %v4796_v51 = vld [vmem:[%s11342_s11 + $0x120] sm:$0xff]  ;;  %4864 = vmatpush.msra.mxu0 %v4776_v16 }
 0x919   :  { %v5609_v18 = vpop.eup %5608  ;;  %v4568_v45 = vmax.f32 %v4563_v13, 0.0  ;;  %v4554_v27 = vmul.f32 6.5, %v5607_v47  ;;  %4880 = vmatpush.msra.mxu3 %v4796_v51 }
 0x91a   :  { %v4572_v15 = vmin.f32 %v4567_v55, 11.999999  ;;  %v4555_v40 = vmul.f32 6.5, %v5609_v18  ;;  %5610 = vtanh.f32 %v4507_v43 }
 0x91b   :  { %v4573_v33 = vmin.f32 %v4568_v45, 11.999999  ;;  %v4559_v56 = vadd.f32 6.5, %v4554_v27  ;;  %4881 = vmatpush.msra.mxu3 %v4795_v63 }
 0x91c   :  { %v4577_v38 = vfloor.f32 %v4572_v15  ;;  %v4560_v59 = vadd.f32 6.5, %v4555_v40 }
 0x91d   :  { %v10183_v62 = vfloor.f32 %v4573_v33  ;;  %v4564_v9 = vmax.f32 %v4559_v56, 0.0  ;;  %4882 = vmatpush.msra.mxu3 %v4794_v14 }
 0x91e   :  { %v4565_v21 = vmax.f32 %v4560_v59, 0.0  ;;  %v4582_v42 = vsub.f32 %v4572_v15, %v4577_v38  ;;  %v4615_v23 = vadd.f32 1.0, %v4577_v38  ;;  %vm4600_vm15 = vcmp.eq.f32.partialorder %v4577_v38, %v4590_v41 }
 0x91f   :  { %v4569_v49 = vmin.f32 %v4564_v9, 11.999999  ;;  %v10201_v54 = vsub.f32 %v4573_v33, %v10183_v62  ;;  %v4616_v12 = vadd.f32 1.0, %v10183_v62  ;;  %v4732_v61 = vpop.f32.mrf.mxu3  ;;  %vm4601_vm6 = vcmp.eq.f32.partialorder %v10183_v62, %v4591_v31  ;;  %v4692_v30 = vpop.f32.mrf.mxu2  ;;  %4883 = vmatpush.msra.mxu3 %v4793_v37 }
 0x920   :  { %v5611_v5 = vpop.eup %5610  ;;  %v4570_v44 = vmin.f32 %v4565_v21, 11.999999  ;;  %v4605_v36 = vsub.f32 1.0, %v4582_v42  ;;  %vm10208_vm2 = vcmp.eq.f32.partialorder %v4615_v23, %v4590_v41  ;;  %v4589_v38 = vperm.slane %v10151_v3, 2  ;;  %v4712_v23 = vpop.f32.mrf.mxu0 }
 0x921   :  { %v4574_v7 = vfloor.f32 %v4569_v49  ;;  %v4556_v4 = vmul.f32 6.5, %v5611_v5  ;;  %v4625_v8 = vsel %vm10208_vm2, %v4582_v42, 0.0  ;;  %v4606_v26 = vsub.f32 1.0, %v10201_v54  ;;  %4884 = vmatpush.msra.mxu3 %v4792_v32 }
 0x922   :  { %v4575_v1 = vfloor.f32 %v4570_v44  ;;  %v4610_v2 = vsel %vm4600_vm15, %v4605_v36, 0.0  ;;  %vm10240_vm0 = vcmp.eq.f32.partialorder %v4616_v12, %v4591_v31 }
 0x923   :  { %v4561_v35 = vadd.f32 6.5, %v4556_v4  ;;  %v4579_v46 = vsub.f32 %v4569_v49, %v4574_v7  ;;  %v4612_v50 = vadd.f32 1.0, %v4574_v7  ;;  %v4630_v43 = vadd.f32 %v4625_v8, %v4610_v2  ;;  %v5393_v2 = vld [vmem:[%s11349_s6] ss:$0 sm:$0xff] }
 0x924   :  { %v4580_v22 = vsub.f32 %v4570_v44, %v4575_v1  ;;  %v4613_v55 = vadd.f32 1.0, %v4575_v1  ;;  %vm4597_vm1 = vcmp.eq.f32.partialorder %v4574_v7, %v4587_v60  ;;  %vm4598_vm4 = vcmp.eq.f32.partialorder %v4575_v1, %v4588_v20  ;;  %v5391_v7 = vld [vmem:[%s11349_s6 + $0x2] ss:$0 sm:$0xff] }
 0x925   :  { %v4566_v24 = vmax.f32 %v4561_v35, 0.0  ;;  %v4602_v47 = vsub.f32 1.0, %v4579_v46  ;;  %vm4617_vm3 = vcmp.eq.f32.partialorder %v4612_v50, %v4587_v60  ;;  %v4758_v10 = vmul.f32 %v4732_v61, %v4630_v43 }
 0x926   :  { %v4603_v52 = vsub.f32 1.0, %v4580_v22  ;;  %v4622_v27 = vsel %vm4617_vm3, %v4579_v46, 0.0  ;;  %vm4618_vm5 = vcmp.eq.f32.partialorder %v4613_v55, %v4588_v20  ;;  %v4626_v11 = vsel %vm10240_vm0, %v10201_v54, 0.0 }
 0x927   :  { %v4571_v18 = vmin.f32 %v4566_v24, 11.999999  ;;  %v4607_v45 = vsel %vm4597_vm1, %v4602_v47, 0.0  ;;  %v4623_v17 = vsel %vm4618_vm5, %v4580_v22, 0.0  ;;  %4905 = vmatmul.f32.vlgmr.msra.gmra.mxu1 %v4758_v10  ;;  %v4611_v6 = vsel %vm4601_vm6, %v4606_v26, 0.0 }
 0x928   :  { %v4627_v15 = vadd.f32 %v4622_v27, %v4607_v45  ;;  %v4608_v40 = vsel %vm4598_vm4, %v4603_v52, 0.0  ;;  %v4631_v21 = vadd.f32 %v4626_v11, %v4611_v6 }
 0x929   :  { %v4576_v33 = vfloor.f32 %v4571_v18  ;;  %v4628_v56 = vadd.f32 %v4623_v17, %v4608_v40 }
 0x92a   :  { %v4755_v59 = vmul.f32 %v10185_v29, %v4627_v15  ;;  %v4759_v28 = vmul.f32 %v4752_v57, %v4631_v21 }
 0x92b   :  { %v4581_v9 = vsub.f32 %v4571_v18, %v4576_v33  ;;  %v4614_v41 = vadd.f32 1.0, %v4576_v33  ;;  %v4756_v0 = vmul.f32 %v4692_v30, %v4628_v56  ;;  %vm4599_vm12 = vcmp.eq.f32.partialorder %v4576_v33, %v4589_v38 }
 0x92c   :  { %4845 = vmatmul.f32.vlgmr.msra.gmra.mxu2 %v4755_v59 }
 0x92d   :  { %v4604_v62 = vsub.f32 1.0, %v4581_v9  ;;  %vm4619_vm7 = vcmp.eq.f32.partialorder %v4614_v41, %v4589_v38  ;;  %4865 = vmatmul.f32.vlgmr.msra.gmra.mxu0 %v4756_v0 }
 0x92e   :  { %v4624_v3 = vsel %vm4619_vm7, %v4581_v9, 0.0 }
 0x92f   :  { %v4609_v29 = vsel %vm4599_vm12, %v4604_v62, 0.0 }
 0x930   :  { %v4629_v42 = vadd.f32 %v4624_v3, %v4609_v29 }
 0x932   :  { %v4757_v49 = vmul.f32 %v4712_v23, %v4629_v42 }
 0x934   :  { %4885 = vmatmul.f32.vlgmr.msra.gmra.mxu3 %v4757_v49  ;;  %5230 = vmatmul.msk.f32.vlgmr.msrb.gmra.mxu2 %vm4825_vm13, %v4759_v28 }
 0x9a4   :  { %v4906_v12 = vpop.f32.mrf.mxu1 }
 0x9aa   :  { %v4866_v31 = vpop.f32.mrf.mxu0 }
 0x9af   :  { %v4846_v54 = vpop.f32.mrf.mxu2 }
 0x9b0   :  { %v4867_v19 = vadd.f32 %v4866_v31, %v4846_v54 }
 0x9b7   :  { %v4886_v5 = vpop.f32.mrf.mxu3  ;;  %v4926_v48 = vpop.f32.mrf.mxu2 }
 0x9b8   :  { %v4887_v44 = vadd.f32 %v4886_v5, %v4867_v19 }
 0x9ba   :  { %v4907_v36 = vadd.f32 %v4906_v12, %v4887_v44 }
 0x9bc   :  { %v4927_v39 = vadd.f32 %v4926_v48, %v4907_v36 }
 0x9be   :  { %v4931_v4 = vmul.f32 %v5390_v25, %v4927_v39 }
 0x9c0   :  { %v4934_v60 = vadd.f32 %v5391_v7, %v4931_v4 }
 0x9c2   :  { %v4935_v1 = vmul.f32 %v4934_v60, %v4927_v39 }
 0x9c4   :  { %v4938_v20 = vadd.f32 %v5392_v53, %v4935_v1 }
 0x9c6   :  { %v4939_v8 = vmul.f32 %v4938_v20, %v4927_v39 }
 0x9c8   :  { %v4942_v58 = vadd.f32 %v5393_v2, %v4939_v8 }
 0x9ca   :  { %v4943_v16 = vadd.f32 %v4942_v58, %v4927_v39 }
 0x9cc   :  { %4945 = vst.msk [vmem:[#allocation5] sm:$0xf] %vm4944_vm11, %v4943_v16 }
 0x9cd   :  { %4956 = dma.vmem_to_hbm [thread:$0]  %s4952_s15, 64, %s4954_s17, [#allocation3]  }
 0x9ce   :  { %5650 = dma.done.wait [#allocation3], 64  }
 0x9cf   :  { %5651 = vsyncadd [#allocation3], 4294967232 }
 0x9d0   :  { %4961 = vsyncpa [#allocation3], 1 }
 0x9d1   :  { %4962 = vsyncpa [#allocation4], 1 }

</bundles_post_ra>
